<compile_context>
chip_gen: v6e
topology: v6e:2x2x1
jax: 0.10.0
libtpu: 0.0.40
codegen_flags: <defaults>
</compile_context>

<pallas_src>
import functools
import math

import jax
import jax.numpy as jnp
from jax import lax
from jax.experimental import pallas as pl
from jax.experimental.pallas import tpu as pltpu


_TILE_M = 512                     # lane tile (multiple of 128)
_VMEM_LIMIT = 32 * 1024 * 1024    # explicit scoped-VMEM cap; safe on v7x (64 MiB)
_EPS = 1e-5


def _round_up(x, m):
    return ((x + m - 1) // m) * m


# ---------------------------------------------------------------------------
# Fused (Cout, K) @ (K, M) matmul + BatchNorm2d + ReLU Pallas kernels.
#   w_ref : (Cout, Kp)  bf16 flattened conv kernel (K padded to 16)
#   p_ref : (Kp, Mt)    bf16 im2col patch tile, M on the lane axis (128-padded)
#   c_ref : (Cout, 2)   f32 per-channel pair:
#                         eval  -> [scale, shift] (BN prefolded in the wrapper)
#                         train -> [gamma, beta]
#   o_ref : (Cout, Mt)  f32 channels-first flattened output (lane-dense stores)
# ---------------------------------------------------------------------------
def _mm_affine_relu_kernel(w_ref, p_ref, c_ref, o_ref):
    """Eval mode: dot -> fma -> relu (scale/shift precomputed in the wrapper)."""
    acc = jnp.dot(w_ref[...], p_ref[...], preferred_element_type=jnp.float32)
    o_ref[...] = jnp.maximum(acc * c_ref[:, 0:1] + c_ref[:, 1:2], 0.0)


def _mm_bn_relu_train_single_kernel(w_ref, p_ref, c_ref, o_ref, *, eps, inv_m):
    """Training, whole (padded) M in one tile.  Zero-padded columns contribute 0
    to both the sum and the sum-of-squares, so dividing by the TRUE M gives the
    exact (biased) batch statistics."""
    acc = jnp.dot(w_ref[...], p_ref[...], preferred_element_type=jnp.float32)
    mean = jnp.sum(acc, axis=1, keepdims=True) * inv_m
    var = jnp.sum(acc * acc, axis=1, keepdims=True) * inv_m - mean * mean
    scale = lax.rsqrt(var + eps) * c_ref[:, 0:1]
    shift = c_ref[:, 1:2] - mean * scale
    o_ref[...] = jnp.maximum(acc * scale + shift, 0.0)


def _mm_bn_relu_train_tiled_kernel(w_ref, p_ref, c_ref, o_ref, sum_sc, ssq_sc,
                                   *, eps, inv_m):
    """Training with M tiled.  grid = (2, n_mt): pass 0 accumulates per-channel
    sum / sum-of-squares in VMEM scratch across all M tiles; pass 1 recomputes
    the tile matmul and writes the normalized + ReLU'd output."""
    pss = pl.program_id(0)
    mt = pl.program_id(1)

    @pl.when(jnp.logical_and(pss == 0, mt == 0))
    def _():
        sum_sc[...] = jnp.zeros_like(sum_sc)
        ssq_sc[...] = jnp.zeros_like(ssq_sc)

    acc = jnp.dot(w_ref[...], p_ref[...], preferred_element_type=jnp.float32)

    @pl.when(pss == 0)
    def _():
        sum_sc[...] += jnp.sum(acc, axis=1, keepdims=True)
        ssq_sc[...] += jnp.sum(acc * acc, axis=1, keepdims=True)
        o_ref[...] = acc                      # placeholder; overwritten in pass 1

    @pl.when(pss == 1)
    def _():
        mean = sum_sc[...] * inv_m
        var = ssq_sc[...] * inv_m - mean * mean
        scale = lax.rsqrt(var + eps) * c_ref[:, 0:1]
        shift = c_ref[:, 1:2] - mean * scale
        o_ref[...] = jnp.maximum(acc * scale + shift, 0.0)


def _fused_matmul_bn_relu(w_flat, patches, bn4, *, training, eps=_EPS):
    """w_flat: (Cout, K) f32; patches: (K, M) bf16/f32; bn4: (Cout, 4) f32
    columns [gamma, beta, running_mean, running_var].  Returns (Cout, M) f32."""
    cout, k = w_flat.shape
    m = patches.shape[1]

    kp = _round_up(k, 16)                       # bf16 sublane packing of K
    mp = _round_up(m, 128)                      # lane-dense output stores
    n_mt = (mp + _TILE_M - 1) // _TILE_M
    tile_m = _TILE_M if n_mt > 1 else mp
    mp = n_mt * tile_m

    w_b = jnp.pad(w_flat.astype(jnp.bfloat16), ((0, 0), (0, kp - k)))
    p_b = jnp.pad(patches.astype(jnp.bfloat16), ((0, kp - k), (0, mp - m)))

    gamma, beta = bn4[:, 0:1], bn4[:, 1:2]
    if training:
        chan = jnp.concatenate([gamma, beta], axis=1).astype(jnp.float32)
    else:
        # Fold BN running stats into one per-channel (scale, shift) pair.
        rmean, rvar = bn4[:, 2:3], bn4[:, 3:4]
        scale = gamma * lax.rsqrt(rvar.astype(jnp.float32) + eps)
        shift = beta - rmean * scale
        chan = jnp.concatenate([scale, shift], axis=1).astype(jnp.float32)

    two_pass = training and n_mt > 1
    cost = pl.CostEstimate(
        flops=2 * cout * kp * mp * (2 if two_pass else 1),
        transcendentals=0,
        bytes_accessed=(cout * kp + kp * mp) * 2 + (cout * 2 + cout * mp) * 4)

    if not training:
        out = pl.pallas_call(
            _mm_affine_relu_kernel,
            out_shape=jax.ShapeDtypeStruct((cout, mp), jnp.float32),
            grid=(n_mt,),
            in_specs=[pl.BlockSpec((cout, kp), lambda i: (0, 0)),
                      pl.BlockSpec((kp, tile_m), lambda i: (0, i)),
                      pl.BlockSpec((cout, 2), lambda i: (0, 0))],
            out_specs=pl.BlockSpec((cout, tile_m), lambda i: (0, i)),
            compiler_params=pltpu.CompilerParams(
                dimension_semantics=("parallel",),
                vmem_limit_bytes=_VMEM_LIMIT),
            cost_estimate=cost,
        )(w_b, p_b, chan)
    elif n_mt == 1:
        out = pl.pallas_call(
            functools.partial(_mm_bn_relu_train_single_kernel,
                              eps=eps, inv_m=1.0 / m),
            out_shape=jax.ShapeDtypeStruct((cout, mp), jnp.float32),
            grid=(1,),
            in_specs=[pl.BlockSpec((cout, kp), lambda i: (0, 0)),
                      pl.BlockSpec((kp, tile_m), lambda i: (0, 0)),
                      pl.BlockSpec((cout, 2), lambda i: (0, 0))],
            out_specs=pl.BlockSpec((cout, tile_m), lambda i: (0, 0)),
            compiler_params=pltpu.CompilerParams(
                dimension_semantics=("arbitrary",),
                vmem_limit_bytes=_VMEM_LIMIT),
            cost_estimate=cost,
        )(w_b, p_b, chan)
    else:
        out = pl.pallas_call(
            functools.partial(_mm_bn_relu_train_tiled_kernel,
                              eps=eps, inv_m=1.0 / m),
            out_shape=jax.ShapeDtypeStruct((cout, mp), jnp.float32),
            grid=(2, n_mt),
            in_specs=[pl.BlockSpec((cout, kp), lambda p, i: (0, 0)),
                      pl.BlockSpec((kp, tile_m), lambda p, i: (0, i)),
                      pl.BlockSpec((cout, 2), lambda p, i: (0, 0))],
            out_specs=pl.BlockSpec((cout, tile_m), lambda p, i: (0, i)),
            scratch_shapes=[pltpu.VMEM((cout, 1), jnp.float32),
                            pltpu.VMEM((cout, 1), jnp.float32)],
            compiler_params=pltpu.CompilerParams(
                dimension_semantics=("arbitrary", "arbitrary"),
                vmem_limit_bytes=_VMEM_LIMIT),
            cost_estimate=cost,
        )(w_b, p_b, chan)

    return out[:, :m]


# ---------------------------------------------------------------------------
# Wrapper-side im2col (lane-dense bf16 2D operand for the kernel; fused by XLA).
# ---------------------------------------------------------------------------
def _im2col(xpad, kh, kw, hout, wout):
    """xpad: (C, N, Hp, Wp) -> (kh*kw*C, N*hout*wout) bf16, tap-major rows."""
    c, n = xpad.shape[0], xpad.shape[1]
    xpad = xpad.astype(jnp.bfloat16)
    cols = [xpad[:, :, dy:dy + hout, dx:dx + wout].reshape(c, n * hout * wout)
            for dy in range(kh) for dx in range(kw)]
    return jnp.concatenate(cols, axis=0)


def conv3x3_bn_relu(x, w_oihw, bn4, *, training):
    """x: (Cin, N, H, W); w: (Cout, Cin, 3, 3); stride=1, padding=1, no bias."""
    cin, n, h, w = x.shape
    cout = w_oihw.shape[0]
    xp = jnp.pad(x, ((0, 0), (0, 0), (1, 1), (1, 1)))
    patches = _im2col(xp, 3, 3, h, w)                                    # (9*Cin, NHW)
    w_flat = jnp.transpose(w_oihw, (0, 2, 3, 1)).reshape(cout, 9 * cin)  # tap-major
    out = _fused_matmul_bn_relu(w_flat, patches, bn4, training=training)
    return out.reshape(cout, n, h, w)


def convtranspose_bn_relu(x, w_iohw, bn4, *, training, stride=2):
    """x: (Cin, N, H, W); w: (Cin, Cout, kh, kw) (PyTorch conv_transpose layout);
    stride=2, padding=0, no bias.  Lowered to a regular conv on the zero-dilated
    input with the spatially flipped, in/out-swapped kernel -> same fused kernel.
    # TODO(synk): stride-phase decomposition would avoid the 4x zero-dilation
    # waste on this path."""
    cin, n, h, w = x.shape
    _, cout, kh, kw = w_iohw.shape
    hd, wd = (h - 1) * stride + 1, (w - 1) * stride + 1
    hout, wout = (h - 1) * stride + kh, (w - 1) * stride + kw
    xd = jnp.zeros((cin, n, hd, wd), x.dtype).at[:, :, ::stride, ::stride].set(x)
    xp = jnp.pad(xd, ((0, 0), (0, 0), (kh - 1, kh - 1), (kw - 1, kw - 1)))
    patches = _im2col(xp, kh, kw, hout, wout)                            # (kh*kw*Cin, NHW)
    w_flat = jnp.transpose(w_iohw[:, :, ::-1, ::-1], (1, 2, 3, 0)).reshape(cout, kh * kw * cin)
    out = _fused_matmul_bn_relu(w_flat, patches, bn4, training=training)
    return out.reshape(cout, n, hout, wout)


def maxpool2x2(x):
    """2x2 max pool, stride 2 (floor), on (C, N, H, W)."""
    c, n, h, w = x.shape
    h2, w2 = h // 2, w // 2
    v = x[:, :, :h2 * 2, :w2 * 2].reshape(c, n, h2, 2, w2, 2)
    return jnp.max(v, axis=(3, 5))


# ---------------------------------------------------------------------------
# SNN_C forward (matches the PyTorch reference forward numerics).
# ---------------------------------------------------------------------------
@functools.partial(jax.jit, static_argnums=(2,))
def _snn_c_apply(params, x_nchw, training):
    t = training
    x = jnp.transpose(x_nchw, (1, 0, 2, 3)).astype(jnp.float32)   # (C=1, N, H, W)

    l00 = conv3x3_bn_relu(x,   params["dw_weights0"], params["dw_bn0"], training=t)
    l01 = maxpool2x2(l00)
    l10 = conv3x3_bn_relu(l01, params["dw_weights1"], params["dw_bn1"], training=t)
    l11 = maxpool2x2(l10)
    l20 = conv3x3_bn_relu(l11, params["dw_weights2"], params["dw_bn2"], training=t)
    l21 = maxpool2x2(l20)
    l30 = conv3x3_bn_relu(l21, params["dw_weights3"], params["dw_bn3"], training=t)
    l31 = maxpool2x2(l30)
    l40 = conv3x3_bn_relu(l31, params["dw_weights4"], params["dw_bn4"], training=t)

    # TODO(synk): the tiny bottom-of-U layer chain (l21..l60) could be fused into
    # a single pallas_call to amortize per-call dispatch overhead.
    l60 = convtranspose_bn_relu(l40, params["up_sample0"], params["up_bn00"], training=t)
    l61 = jnp.concatenate([l30, l60], axis=0)                    # channel concat
    l62 = conv3x3_bn_relu(l61, params["up_weights0"], params["up_bn01"], training=t)

    l70 = convtranspose_bn_relu(l62, params["up_sample1"], params["up_bn10"], training=t)
    l71 = jnp.concatenate([l20, l70], axis=0)
    l72 = conv3x3_bn_relu(l71, params["up_weights1"], params["up_bn11"], training=t)

    l80 = convtranspose_bn_relu(l72, params["up_sample2"], params["up_bn20"], training=t)
    l81 = jnp.concatenate([l10, l80], axis=0)
    l82 = conv3x3_bn_relu(l81, params["up_weights2"], params["up_bn21"], training=t)

    l90 = convtranspose_bn_relu(l82, params["up_sample3"], params["up_bn30"], training=t)
    l91 = jnp.concatenate([l00, l90], axis=0)
    l92 = conv3x3_bn_relu(l91, params["up_weights3"], params["up_bn31"], training=t)

    lout = conv3x3_bn_relu(l92, params["gate_weights0"], params["gate_bn0"], training=t)
    # lout is (1, N, H, W); reference returns (N, 1, H, W).view(-1) -> identical
    # element order because the channel dim is 1.
    return lout.reshape(-1)


def snn_c_forward(params, x_nchw, epoch, training=True):
    # epoch only toggles requires_grad in the PyTorch reference (forward math is
    # identical for even/odd epochs >= 4); with training=True and epoch < 4 the
    # reference leaves `gate` undefined, so reject that combination.
    if training and epoch < 4:
        raise ValueError("SNN_C training forward requires epoch >= 4.")
    return _snn_c_apply(params, x_nchw, training)


# ---------------------------------------------------------------------------
# Parameter construction (mirrors reset_parameters / BatchNorm2d defaults).
# ---------------------------------------------------------------------------
def init_params(key):
    def kaiming(k, shape):
        # kaiming_normal_(mode='fan_out', relu): std = sqrt(2 / (dim0 * kh * kw))
        fan_out = shape[0] * shape[2] * shape[3]
        return jax.random.normal(k, shape, jnp.float32) * math.sqrt(2.0 / fan_out)

    def bn(c):
        # columns: [gamma, beta, running_mean, running_var] -> one (C, 4) block
        return jnp.stack([jnp.ones((c,), jnp.float32), jnp.zeros((c,), jnp.float32),
                          jnp.zeros((c,), jnp.float32), jnp.ones((c,), jnp.float32)],
                         axis=1)

    w_shapes = {
        "dw_weights0": (8, 1, 3, 3),    "dw_weights1": (16, 8, 3, 3),
        "dw_weights2": (32, 16, 3, 3),  "dw_weights3": (64, 32, 3, 3),
        "dw_weights4": (128, 64, 3, 3),
        "up_sample0": (128, 64, 3, 2),  "up_weights0": (64, 128, 3, 3),
        "up_sample1": (64, 32, 2, 2),   "up_weights1": (32, 64, 3, 3),
        "up_sample2": (32, 16, 3, 2),   "up_weights2": (16, 32, 3, 3),
        "up_sample3": (16, 8, 3, 2),    "up_weights3": (8, 16, 3, 3),
        "gate_weights0": (1, 8, 3, 3),
    }
    keys = jax.random.split(key, len(w_shapes))
    params = {name: kaiming(k, s) for (name, s), k in zip(w_shapes.items(), keys)}
    bn_channels = {
        "dw_bn0": 8, "dw_bn1": 16, "dw_bn2": 32, "dw_bn3": 64, "dw_bn4": 128,
        "up_bn00": 64, "up_bn01": 64, "up_bn10": 32, "up_bn11": 32,
        "up_bn20": 16, "up_bn21": 16, "up_bn30": 8, "up_bn31": 8, "gate_bn0": 1,
    }
    params.update({name: bn(c) for name, c in bn_channels.items()})
    return params


if __name__ == "__main__":
    key = jax.random.PRNGKey(0)
    k_params, k_x = jax.random.split(key)
    params = init_params(k_params)

    # Smallest spatial shape compatible with the U-Net skip/upsample arithmetic:
    # H must satisfy 2*(2*(2*(2*h4+1))+1)+1 with h4>=1 -> 27; W must be 16*w4 -> 16.
    N, H, W = 2, 27, 16
    x = jax.random.normal(k_x, (N, 1, H, W), jnp.float32)

    gate_train = snn_c_forward(params, x, epoch=5, training=True)   # batch-stats BN
    gate_eval = snn_c_forward(params, x, epoch=5, training=False)   # running-stats BN
    jax.block_until_ready((gate_train, gate_eval))

    assert gate_train.shape == (N * H * W,)
    assert gate_eval.shape == (N * H * W,)
    assert bool(jnp.all(jnp.isfinite(gate_train)))
    assert bool(jnp.all(jnp.isfinite(gate_eval)))
    print("KERNEL_OK")
</pallas_src>

<mosaic_0001>
module attributes {stable_mosaic.version = 11 : i64} {
  func.func @_mm_bn_relu_train_tiled_kernel(%arg0: i32, %arg1: i32, %arg2: memref<8x16xbf16, #tpu.memory_space<vmem>>, %arg3: memref<16x512xbf16, #tpu.memory_space<vmem>>, %arg4: memref<8x2xf32, #tpu.memory_space<vmem>>, %arg5: memref<8x512xf32, #tpu.memory_space<vmem>>, %arg6: memref<8x1xf32, #tpu.memory_space<vmem>>, %arg7: memref<8x1xf32, #tpu.memory_space<vmem>>) attributes {dimension_semantics = [#tpu.dimension_semantics<arbitrary>, #tpu.dimension_semantics<arbitrary>], iteration_bounds = array<i64: 2, 2>, scalar_prefetch = 0 : i64, scratch_operands = 2 : i64, tpu.core_type = #tpu.core_type<tc>, window_params = [{pipeline_mode = #tpu.pipeline_mode<synchronous>, transform_indices = @transform_0, window_bounds = array<i64: 8, 16>}, {transform_indices = @transform_1, window_bounds = array<i64: 16, 512>}, {pipeline_mode = #tpu.pipeline_mode<synchronous>, transform_indices = @transform_2, window_bounds = array<i64: 8, 2>}, {transform_indices = @transform_3, window_bounds = array<i64: 8, 512>}]} {
    %c0_i32 = arith.constant 0 : i32
    %0 = arith.cmpi eq, %arg0, %c0_i32 : i32
    %c0_i32_0 = arith.constant 0 : i32
    %1 = arith.cmpi eq, %arg1, %c0_i32_0 : i32
    %2 = arith.andi %0, %1 : i1
    %3 = arith.extui %2 : i1 to i32
    %c0_i32_1 = arith.constant 0 : i32
    %4 = arith.cmpi ne, %3, %c0_i32_1 : i32
    scf.if %4 {
      %cst_8 = arith.constant 0.000000e+00 : f32
      %14 = vector.broadcast %cst_8 : f32 to vector<8x1xf32>
      %c0_9 = arith.constant 0 : index
      %c0_10 = arith.constant 0 : index
      %15 = vector.load %arg6[%c0_9, %c0_10] : memref<8x1xf32, #tpu.memory_space<vmem>>, vector<8x1xf32>
      tpu.vector_store %arg6[%c0_9, %c0_10], %14 {strides = array<i32>} : memref<8x1xf32, #tpu.memory_space<vmem>>, vector<8x1xf32>,
      %cst_11 = arith.constant 0.000000e+00 : f32
      %16 = vector.broadcast %cst_11 : f32 to vector<8x1xf32>
      %c0_12 = arith.constant 0 : index
      %c0_13 = arith.constant 0 : index
      %17 = vector.load %arg7[%c0_12, %c0_13] : memref<8x1xf32, #tpu.memory_space<vmem>>, vector<8x1xf32>
      tpu.vector_store %arg7[%c0_12, %c0_13], %16 {strides = array<i32>} : memref<8x1xf32, #tpu.memory_space<vmem>>, vector<8x1xf32>,
    } else {
    }
    %c0 = arith.constant 0 : index
    %c0_2 = arith.constant 0 : index
    %5 = vector.load %arg2[%c0, %c0_2] : memref<8x16xbf16, #tpu.memory_space<vmem>>, vector<8x16xbf16>
    %c0_3 = arith.constant 0 : index
    %c0_4 = arith.constant 0 : index
    %6 = vector.load %arg3[%c0_3, %c0_4] : memref<16x512xbf16, #tpu.memory_space<vmem>>, vector<16x512xbf16>
    %cst = arith.constant dense<0.000000e+00> : vector<8x512xf32>
    %7 = tpu.matmul %5, %6, %cst {dimension_numbers = #tpu.dot_dimension_numbers<[1], [0], [0], [1], [0, 0, 1, 1], [], []>} : vector<8x16xbf16>, vector<16x512xbf16>, vector<8x512xf32> -> vector<8x512xf32>
    %c0_i32_5 = arith.constant 0 : i32
    %8 = arith.cmpi eq, %arg0, %c0_i32_5 : i32
    %9 = arith.extui %8 : i1 to i32
    %c0_i32_6 = arith.constant 0 : i32
    %10 = arith.cmpi ne, %9, %c0_i32_6 : i32
    scf.if %10 {
      %c0_8 = arith.constant 0 : index
      %c0_9 = arith.constant 0 : index
      %14 = vector.load %arg6[%c0_8, %c0_9] : memref<8x1xf32, #tpu.memory_space<vmem>>, vector<8x1xf32>
      %cst_10 = arith.constant dense<0.000000e+00> : vector<8xf32>
      %15 = vector.multi_reduction <add>, %7, %cst_10 [1] : vector<8x512xf32> to vector<8xf32>
      %16 = vector.shape_cast %15 : vector<8xf32> to vector<8x1xf32>
      %17 = arith.addf %14, %16 : vector<8x1xf32>
      %c0_11 = arith.constant 0 : index
      %c0_12 = arith.constant 0 : index
      %18 = vector.load %arg6[%c0_11, %c0_12] : memref<8x1xf32, #tpu.memory_space<vmem>>, vector<8x1xf32>
      tpu.vector_store %arg6[%c0_11, %c0_12], %17 {strides = array<i32>} : memref<8x1xf32, #tpu.memory_space<vmem>>, vector<8x1xf32>,
      %c0_13 = arith.constant 0 : index
      %c0_14 = arith.constant 0 : index
      %19 = vector.load %arg7[%c0_13, %c0_14] : memref<8x1xf32, #tpu.memory_space<vmem>>, vector<8x1xf32>
      %20 = arith.mulf %7, %7 : vector<8x512xf32>
      %cst_15 = arith.constant dense<0.000000e+00> : vector<8xf32>
      %21 = vector.multi_reduction <add>, %20, %cst_15 [1] : vector<8x512xf32> to vector<8xf32>
      %22 = vector.shape_cast %21 : vector<8xf32> to vector<8x1xf32>
      %23 = arith.addf %19, %22 : vector<8x1xf32>
      %c0_16 = arith.constant 0 : index
      %c0_17 = arith.constant 0 : index
      %24 = vector.load %arg7[%c0_16, %c0_17] : memref<8x1xf32, #tpu.memory_space<vmem>>, vector<8x1xf32>
      tpu.vector_store %arg7[%c0_16, %c0_17], %23 {strides = array<i32>} : memref<8x1xf32, #tpu.memory_space<vmem>>, vector<8x1xf32>,
      %c0_18 = arith.constant 0 : index
      %c0_19 = arith.constant 0 : index
      %25 = vector.load %arg5[%c0_18, %c0_19] : memref<8x512xf32, #tpu.memory_space<vmem>>, vector<8x512xf32>
      tpu.vector_store %arg5[%c0_18, %c0_19], %7 {strides = array<i32>} : memref<8x512xf32, #tpu.memory_space<vmem>>, vector<8x512xf32>,
    } else {
    }
    %c1_i32 = arith.constant 1 : i32
    %11 = arith.cmpi eq, %arg0, %c1_i32 : i32
    %12 = arith.extui %11 : i1 to i32
    %c0_i32_7 = arith.constant 0 : i32
    %13 = arith.cmpi ne, %12, %c0_i32_7 : i32
    scf.if %13 {
      %c0_8 = arith.constant 0 : index
      %c0_9 = arith.constant 0 : index
      %14 = vector.load %arg6[%c0_8, %c0_9] : memref<8x1xf32, #tpu.memory_space<vmem>>, vector<8x1xf32>
      %cst_10 = arith.constant 0.00115740742 : f32
      %15 = vector.broadcast %cst_10 : f32 to vector<8x1xf32>
      %16 = arith.mulf %14, %15 : vector<8x1xf32>
      %c0_11 = arith.constant 0 : index
      %c0_12 = arith.constant 0 : index
      %17 = vector.load %arg7[%c0_11, %c0_12] : memref<8x1xf32, #tpu.memory_space<vmem>>, vector<8x1xf32>
      %cst_13 = arith.constant 0.00115740742 : f32
      %18 = vector.broadcast %cst_13 : f32 to vector<8x1xf32>
      %19 = arith.mulf %17, %18 : vector<8x1xf32>
      %20 = arith.mulf %16, %16 : vector<8x1xf32>
      %21 = arith.subf %19, %20 : vector<8x1xf32>
      %cst_14 = arith.constant 9.99999974E-6 : f32
      %22 = vector.broadcast %cst_14 : f32 to vector<8x1xf32>
      %23 = arith.addf %21, %22 : vector<8x1xf32>
      %24 = math.rsqrt %23 : vector<8x1xf32>
      %c0_15 = arith.constant 0 : index
      %c0_16 = arith.constant 0 : index
      %25 = vector.load %arg4[%c0_15, %c0_16] : memref<8x2xf32, #tpu.memory_space<vmem>>, vector<8x1xf32>
      %26 = arith.mulf %24, %25 : vector<8x1xf32>
      %c0_17 = arith.constant 0 : index
      %c1 = arith.constant 1 : index
      %27 = vector.load %arg4[%c0_17, %c1] : memref<8x2xf32, #tpu.memory_space<vmem>>, vector<8x1xf32>
      %28 = arith.mulf %16, %26 : vector<8x1xf32>
      %29 = arith.subf %27, %28 : vector<8x1xf32>
      %30 = vector.broadcast %26 : vector<8x1xf32> to vector<8x512xf32>
      %31 = arith.mulf %7, %30 : vector<8x512xf32>
      %32 = vector.broadcast %29 : vector<8x1xf32> to vector<8x512xf32>
      %33 = arith.addf %31, %32 : vector<8x512xf32>
      %cst_18 = arith.constant 0.000000e+00 : f32
      %34 = vector.broadcast %cst_18 : f32 to vector<8x512xf32>
      %35 = arith.maximumf %33, %34 : vector<8x512xf32>
      %c0_19 = arith.constant 0 : index
      %c0_20 = arith.constant 0 : index
      %36 = vector.load %arg5[%c0_19, %c0_20] : memref<8x512xf32, #tpu.memory_space<vmem>>, vector<8x512xf32>
      tpu.vector_store %arg5[%c0_19, %c0_20], %35 {strides = array<i32>} : memref<8x512xf32, #tpu.memory_space<vmem>>, vector<8x512xf32>,
    } else {
    }
    return
  }
  func.func @transform_0(%arg0: i32, %arg1: i32) -> (i32, i32) {
    %c0_i32 = arith.constant 0 : i32
    %c0_i32_0 = arith.constant 0 : i32
    %c0_i32_1 = arith.constant 0 : i32
    return %c0_i32, %c0_i32_0 : i32, i32
  }
  func.func @transform_1(%arg0: i32, %arg1: i32) -> (i32, i32) {
    %c0_i32 = arith.constant 0 : i32
    %c0_i32_0 = arith.constant 0 : i32
    return %c0_i32, %arg1 : i32, i32
  }
  func.func @transform_2(%arg0: i32, %arg1: i32) -> (i32, i32) {
    %c0_i32 = arith.constant 0 : i32
    %c0_i32_0 = arith.constant 0 : i32
    %c0_i32_1 = arith.constant 0 : i32
    return %c0_i32, %c0_i32_0 : i32, i32
  }
  func.func @transform_3(%arg0: i32, %arg1: i32) -> (i32, i32) {
    %c0_i32 = arith.constant 0 : i32
    %c0_i32_0 = arith.constant 0 : i32
    return %c0_i32, %arg1 : i32, i32
  }
}

module attributes {stable_mosaic.version = 11 : i64} {
  func.func @_mm_bn_relu_train_single_kernel(%arg0: i32, %arg1: memref<16x80xbf16, #tpu.memory_space<vmem>>, %arg2: memref<80x256xbf16, #tpu.memory_space<vmem>>, %arg3: memref<16x2xf32, #tpu.memory_space<vmem>>, %arg4: memref<16x256xf32, #tpu.memory_space<vmem>>) attributes {dimension_semantics = [#tpu.dimension_semantics<arbitrary>], iteration_bounds = array<i64: 1>, scalar_prefetch = 0 : i64, scratch_operands = 0 : i64, tpu.core_type = #tpu.core_type<tc>, window_params = [{pipeline_mode = #tpu.pipeline_mode<synchronous>, transform_indices = @transform_0, window_bounds = array<i64: 16, 80>}, {pipeline_mode = #tpu.pipeline_mode<synchronous>, transform_indices = @transform_1, window_bounds = array<i64: 80, 256>}, {pipeline_mode = #tpu.pipeline_mode<synchronous>, transform_indices = @transform_2, window_bounds = array<i64: 16, 2>}, {pipeline_mode = #tpu.pipeline_mode<synchronous>, transform_indices = @transform_3, window_bounds = array<i64: 16, 256>}]} {
    %c0 = arith.constant 0 : index
    %c0_0 = arith.constant 0 : index
    %0 = vector.load %arg1[%c0, %c0_0] : memref<16x80xbf16, #tpu.memory_space<vmem>>, vector<16x80xbf16>
    %c0_1 = arith.constant 0 : index
    %c0_2 = arith.constant 0 : index
    %1 = vector.load %arg2[%c0_1, %c0_2] : memref<80x256xbf16, #tpu.memory_space<vmem>>, vector<80x256xbf16>
    %cst = arith.constant dense<0.000000e+00> : vector<16x256xf32>
    %2 = tpu.matmul %0, %1, %cst {dimension_numbers = #tpu.dot_dimension_numbers<[1], [0], [0], [1], [0, 0, 1, 1], [], []>} : vector<16x80xbf16>, vector<80x256xbf16>, vector<16x256xf32> -> vector<16x256xf32>
    %cst_3 = arith.constant dense<0.000000e+00> : vector<16xf32>
    %3 = vector.multi_reduction <add>, %2, %cst_3 [1] : vector<16x256xf32> to vector<16xf32>
    %4 = vector.shape_cast %3 : vector<16xf32> to vector<16x1xf32>
    %cst_4 = arith.constant 0.00480769249 : f32
    %5 = vector.broadcast %cst_4 : f32 to vector<16x1xf32>
    %6 = arith.mulf %4, %5 : vector<16x1xf32>
    %7 = arith.mulf %2, %2 : vector<16x256xf32>
    %cst_5 = arith.constant dense<0.000000e+00> : vector<16xf32>
    %8 = vector.multi_reduction <add>, %7, %cst_5 [1] : vector<16x256xf32> to vector<16xf32>
    %9 = vector.shape_cast %8 : vector<16xf32> to vector<16x1xf32>
    %cst_6 = arith.constant 0.00480769249 : f32
    %10 = vector.broadcast %cst_6 : f32 to vector<16x1xf32>
    %11 = arith.mulf %9, %10 : vector<16x1xf32>
    %12 = arith.mulf %6, %6 : vector<16x1xf32>
    %13 = arith.subf %11, %12 : vector<16x1xf32>
    %cst_7 = arith.constant 9.99999974E-6 : f32
    %14 = vector.broadcast %cst_7 : f32 to vector<16x1xf32>
    %15 = arith.addf %13, %14 : vector<16x1xf32>
    %16 = math.rsqrt %15 : vector<16x1xf32>
    %c0_8 = arith.constant 0 : index
    %c0_9 = arith.constant 0 : index
    %17 = vector.load %arg3[%c0_8, %c0_9] : memref<16x2xf32, #tpu.memory_space<vmem>>, vector<16x1xf32>
    %18 = arith.mulf %16, %17 : vector<16x1xf32>
    %c0_10 = arith.constant 0 : index
    %c1 = arith.constant 1 : index
    %19 = vector.load %arg3[%c0_10, %c1] : memref<16x2xf32, #tpu.memory_space<vmem>>, vector<16x1xf32>
    %20 = arith.mulf %6, %18 : vector<16x1xf32>
    %21 = arith.subf %19, %20 : vector<16x1xf32>
    %22 = vector.broadcast %18 : vector<16x1xf32> to vector<16x256xf32>
    %23 = arith.mulf %2, %22 : vector<16x256xf32>
    %24 = vector.broadcast %21 : vector<16x1xf32> to vector<16x256xf32>
    %25 = arith.addf %23, %24 : vector<16x256xf32>
    %cst_11 = arith.constant 0.000000e+00 : f32
    %26 = vector.broadcast %cst_11 : f32 to vector<16x256xf32>
    %27 = arith.maximumf %25, %26 : vector<16x256xf32>
    %c0_12 = arith.constant 0 : index
    %c0_13 = arith.constant 0 : index
    %28 = vector.load %arg4[%c0_12, %c0_13] : memref<16x256xf32, #tpu.memory_space<vmem>>, vector<16x256xf32>
    tpu.vector_store %arg4[%c0_12, %c0_13], %27 {strides = array<i32>} : memref<16x256xf32, #tpu.memory_space<vmem>>, vector<16x256xf32>,
    return
  }
  func.func @transform_0(%arg0: i32) -> (i32, i32) {
    %c0_i32 = arith.constant 0 : i32
    %c0_i32_0 = arith.constant 0 : i32
    %c0_i32_1 = arith.constant 0 : i32
    return %c0_i32, %c0_i32_0 : i32, i32
  }
  func.func @transform_1(%arg0: i32) -> (i32, i32) {
    %c0_i32 = arith.constant 0 : i32
    %c0_i32_0 = arith.constant 0 : i32
    %c0_i32_1 = arith.constant 0 : i32
    return %c0_i32, %c0_i32_0 : i32, i32
  }
  func.func @transform_2(%arg0: i32) -> (i32, i32) {
    %c0_i32 = arith.constant 0 : i32
    %c0_i32_0 = arith.constant 0 : i32
    %c0_i32_1 = arith.constant 0 : i32
    return %c0_i32, %c0_i32_0 : i32, i32
  }
  func.func @transform_3(%arg0: i32) -> (i32, i32) {
    %c0_i32 = arith.constant 0 : i32
    %c0_i32_0 = arith.constant 0 : i32
    %c0_i32_1 = arith.constant 0 : i32
    return %c0_i32, %c0_i32_0 : i32, i32
  }
}

module attributes {stable_mosaic.version = 11 : i64} {
  func.func @_mm_bn_relu_train_single_kernel(%arg0: i32, %arg1: memref<32x144xbf16, #tpu.memory_space<vmem>>, %arg2: memref<144x128xbf16, #tpu.memory_space<vmem>>, %arg3: memref<32x2xf32, #tpu.memory_space<vmem>>, %arg4: memref<32x128xf32, #tpu.memory_space<vmem>>) attributes {dimension_semantics = [#tpu.dimension_semantics<arbitrary>], iteration_bounds = array<i64: 1>, scalar_prefetch = 0 : i64, scratch_operands = 0 : i64, tpu.core_type = #tpu.core_type<tc>, window_params = [{pipeline_mode = #tpu.pipeline_mode<synchronous>, transform_indices = @transform_0, window_bounds = array<i64: 32, 144>}, {pipeline_mode = #tpu.pipeline_mode<synchronous>, transform_indices = @transform_1, window_bounds = array<i64: 144, 128>}, {pipeline_mode = #tpu.pipeline_mode<synchronous>, transform_indices = @transform_2, window_bounds = array<i64: 32, 2>}, {pipeline_mode = #tpu.pipeline_mode<synchronous>, transform_indices = @transform_3, window_bounds = array<i64: 32, 128>}]} {
    %c0 = arith.constant 0 : index
    %c0_0 = arith.constant 0 : index
    %0 = vector.load %arg1[%c0, %c0_0] : memref<32x144xbf16, #tpu.memory_space<vmem>>, vector<32x144xbf16>
    %c0_1 = arith.constant 0 : index
    %c0_2 = arith.constant 0 : index
    %1 = vector.load %arg2[%c0_1, %c0_2] : memref<144x128xbf16, #tpu.memory_space<vmem>>, vector<144x128xbf16>
    %cst = arith.constant dense<0.000000e+00> : vector<32x128xf32>
    %2 = tpu.matmul %0, %1, %cst {dimension_numbers = #tpu.dot_dimension_numbers<[1], [0], [0], [1], [0, 0, 1, 1], [], []>} : vector<32x144xbf16>, vector<144x128xbf16>, vector<32x128xf32> -> vector<32x128xf32>
    %cst_3 = arith.constant dense<0.000000e+00> : vector<32xf32>
    %3 = vector.multi_reduction <add>, %2, %cst_3 [1] : vector<32x128xf32> to vector<32xf32>
    %4 = vector.shape_cast %3 : vector<32xf32> to vector<32x1xf32>
    %cst_4 = arith.constant 0.020833334 : f32
    %5 = vector.broadcast %cst_4 : f32 to vector<32x1xf32>
    %6 = arith.mulf %4, %5 : vector<32x1xf32>
    %7 = arith.mulf %2, %2 : vector<32x128xf32>
    %cst_5 = arith.constant dense<0.000000e+00> : vector<32xf32>
    %8 = vector.multi_reduction <add>, %7, %cst_5 [1] : vector<32x128xf32> to vector<32xf32>
    %9 = vector.shape_cast %8 : vector<32xf32> to vector<32x1xf32>
    %cst_6 = arith.constant 0.020833334 : f32
    %10 = vector.broadcast %cst_6 : f32 to vector<32x1xf32>
    %11 = arith.mulf %9, %10 : vector<32x1xf32>
    %12 = arith.mulf %6, %6 : vector<32x1xf32>
    %13 = arith.subf %11, %12 : vector<32x1xf32>
    %cst_7 = arith.constant 9.99999974E-6 : f32
    %14 = vector.broadcast %cst_7 : f32 to vector<32x1xf32>
    %15 = arith.addf %13, %14 : vector<32x1xf32>
    %16 = math.rsqrt %15 : vector<32x1xf32>
    %c0_8 = arith.constant 0 : index
    %c0_9 = arith.constant 0 : index
    %17 = vector.load %arg3[%c0_8, %c0_9] : memref<32x2xf32, #tpu.memory_space<vmem>>, vector<32x1xf32>
    %18 = arith.mulf %16, %17 : vector<32x1xf32>
    %c0_10 = arith.constant 0 : index
    %c1 = arith.constant 1 : index
    %19 = vector.load %arg3[%c0_10, %c1] : memref<32x2xf32, #tpu.memory_space<vmem>>, vector<32x1xf32>
    %20 = arith.mulf %6, %18 : vector<32x1xf32>
    %21 = arith.subf %19, %20 : vector<32x1xf32>
    %22 = vector.broadcast %18 : vector<32x1xf32> to vector<32x128xf32>
    %23 = arith.mulf %2, %22 : vector<32x128xf32>
    %24 = vector.broadcast %21 : vector<32x1xf32> to vector<32x128xf32>
    %25 = arith.addf %23, %24 : vector<32x128xf32>
    %cst_11 = arith.constant 0.000000e+00 : f32
    %26 = vector.broadcast %cst_11 : f32 to vector<32x128xf32>
    %27 = arith.maximumf %25, %26 : vector<32x128xf32>
    %c0_12 = arith.constant 0 : index
    %c0_13 = arith.constant 0 : index
    %28 = vector.load %arg4[%c0_12, %c0_13] : memref<32x128xf32, #tpu.memory_space<vmem>>, vector<32x128xf32>
    tpu.vector_store %arg4[%c0_12, %c0_13], %27 {strides = array<i32>} : memref<32x128xf32, #tpu.memory_space<vmem>>, vector<32x128xf32>,
    return
  }
  func.func @transform_0(%arg0: i32) -> (i32, i32) {
    %c0_i32 = arith.constant 0 : i32
    %c0_i32_0 = arith.constant 0 : i32
    %c0_i32_1 = arith.constant 0 : i32
    return %c0_i32, %c0_i32_0 : i32, i32
  }
  func.func @transform_1(%arg0: i32) -> (i32, i32) {
    %c0_i32 = arith.constant 0 : i32
    %c0_i32_0 = arith.constant 0 : i32
    %c0_i32_1 = arith.constant 0 : i32
    return %c0_i32, %c0_i32_0 : i32, i32
  }
  func.func @transform_2(%arg0: i32) -> (i32, i32) {
    %c0_i32 = arith.constant 0 : i32
    %c0_i32_0 = arith.constant 0 : i32
    %c0_i32_1 = arith.constant 0 : i32
    return %c0_i32, %c0_i32_0 : i32, i32
  }
  func.func @transform_3(%arg0: i32) -> (i32, i32) {
    %c0_i32 = arith.constant 0 : i32
    %c0_i32_0 = arith.constant 0 : i32
    %c0_i32_1 = arith.constant 0 : i32
    return %c0_i32, %c0_i32_0 : i32, i32
  }
}

module attributes {stable_mosaic.version = 11 : i64} {
  func.func @_mm_bn_relu_train_single_kernel(%arg0: i32, %arg1: memref<64x288xbf16, #tpu.memory_space<vmem>>, %arg2: memref<288x128xbf16, #tpu.memory_space<vmem>>, %arg3: memref<64x2xf32, #tpu.memory_space<vmem>>, %arg4: memref<64x128xf32, #tpu.memory_space<vmem>>) attributes {dimension_semantics = [#tpu.dimension_semantics<arbitrary>], iteration_bounds = array<i64: 1>, scalar_prefetch = 0 : i64, scratch_operands = 0 : i64, tpu.core_type = #tpu.core_type<tc>, window_params = [{pipeline_mode = #tpu.pipeline_mode<synchronous>, transform_indices = @transform_0, window_bounds = array<i64: 64, 288>}, {pipeline_mode = #tpu.pipeline_mode<synchronous>, transform_indices = @transform_1, window_bounds = array<i64: 288, 128>}, {pipeline_mode = #tpu.pipeline_mode<synchronous>, transform_indices = @transform_2, window_bounds = array<i64: 64, 2>}, {pipeline_mode = #tpu.pipeline_mode<synchronous>, transform_indices = @transform_3, window_bounds = array<i64: 64, 128>}]} {
    %c0 = arith.constant 0 : index
    %c0_0 = arith.constant 0 : index
    %0 = vector.load %arg1[%c0, %c0_0] : memref<64x288xbf16, #tpu.memory_space<vmem>>, vector<64x288xbf16>
    %c0_1 = arith.constant 0 : index
    %c0_2 = arith.constant 0 : index
    %1 = vector.load %arg2[%c0_1, %c0_2] : memref<288x128xbf16, #tpu.memory_space<vmem>>, vector<288x128xbf16>
    %cst = arith.constant dense<0.000000e+00> : vector<64x128xf32>
    %2 = tpu.matmul %0, %1, %cst {dimension_numbers = #tpu.dot_dimension_numbers<[1], [0], [0], [1], [0, 0, 1, 1], [], []>} : vector<64x288xbf16>, vector<288x128xbf16>, vector<64x128xf32> -> vector<64x128xf32>
    %cst_3 = arith.constant dense<0.000000e+00> : vector<64xf32>
    %3 = vector.multi_reduction <add>, %2, %cst_3 [1] : vector<64x128xf32> to vector<64xf32>
    %4 = vector.shape_cast %3 : vector<64xf32> to vector<64x1xf32>
    %cst_4 = arith.constant 0.0833333358 : f32
    %5 = vector.broadcast %cst_4 : f32 to vector<64x1xf32>
    %6 = arith.mulf %4, %5 : vector<64x1xf32>
    %7 = arith.mulf %2, %2 : vector<64x128xf32>
    %cst_5 = arith.constant dense<0.000000e+00> : vector<64xf32>
    %8 = vector.multi_reduction <add>, %7, %cst_5 [1] : vector<64x128xf32> to vector<64xf32>
    %9 = vector.shape_cast %8 : vector<64xf32> to vector<64x1xf32>
    %cst_6 = arith.constant 0.0833333358 : f32
    %10 = vector.broadcast %cst_6 : f32 to vector<64x1xf32>
    %11 = arith.mulf %9, %10 : vector<64x1xf32>
    %12 = arith.mulf %6, %6 : vector<64x1xf32>
    %13 = arith.subf %11, %12 : vector<64x1xf32>
    %cst_7 = arith.constant 9.99999974E-6 : f32
    %14 = vector.broadcast %cst_7 : f32 to vector<64x1xf32>
    %15 = arith.addf %13, %14 : vector<64x1xf32>
    %16 = math.rsqrt %15 : vector<64x1xf32>
    %c0_8 = arith.constant 0 : index
    %c0_9 = arith.constant 0 : index
    %17 = vector.load %arg3[%c0_8, %c0_9] : memref<64x2xf32, #tpu.memory_space<vmem>>, vector<64x1xf32>
    %18 = arith.mulf %16, %17 : vector<64x1xf32>
    %c0_10 = arith.constant 0 : index
    %c1 = arith.constant 1 : index
    %19 = vector.load %arg3[%c0_10, %c1] : memref<64x2xf32, #tpu.memory_space<vmem>>, vector<64x1xf32>
    %20 = arith.mulf %6, %18 : vector<64x1xf32>
    %21 = arith.subf %19, %20 : vector<64x1xf32>
    %22 = vector.broadcast %18 : vector<64x1xf32> to vector<64x128xf32>
    %23 = arith.mulf %2, %22 : vector<64x128xf32>
    %24 = vector.broadcast %21 : vector<64x1xf32> to vector<64x128xf32>
    %25 = arith.addf %23, %24 : vector<64x128xf32>
    %cst_11 = arith.constant 0.000000e+00 : f32
    %26 = vector.broadcast %cst_11 : f32 to vector<64x128xf32>
    %27 = arith.maximumf %25, %26 : vector<64x128xf32>
    %c0_12 = arith.constant 0 : index
    %c0_13 = arith.constant 0 : index
    %28 = vector.load %arg4[%c0_12, %c0_13] : memref<64x128xf32, #tpu.memory_space<vmem>>, vector<64x128xf32>
    tpu.vector_store %arg4[%c0_12, %c0_13], %27 {strides = array<i32>} : memref<64x128xf32, #tpu.memory_space<vmem>>, vector<64x128xf32>,
    return
  }
  func.func @transform_0(%arg0: i32) -> (i32, i32) {
    %c0_i32 = arith.constant 0 : i32
    %c0_i32_0 = arith.constant 0 : i32
    %c0_i32_1 = arith.constant 0 : i32
    return %c0_i32, %c0_i32_0 : i32, i32
  }
  func.func @transform_1(%arg0: i32) -> (i32, i32) {
    %c0_i32 = arith.constant 0 : i32
    %c0_i32_0 = arith.constant 0 : i32
    %c0_i32_1 = arith.constant 0 : i32
    return %c0_i32, %c0_i32_0 : i32, i32
  }
  func.func @transform_2(%arg0: i32) -> (i32, i32) {
    %c0_i32 = arith.constant 0 : i32
    %c0_i32_0 = arith.constant 0 : i32
    %c0_i32_1 = arith.constant 0 : i32
    return %c0_i32, %c0_i32_0 : i32, i32
  }
  func.func @transform_3(%arg0: i32) -> (i32, i32) {
    %c0_i32 = arith.constant 0 : i32
    %c0_i32_0 = arith.constant 0 : i32
    %c0_i32_1 = arith.constant 0 : i32
    return %c0_i32, %c0_i32_0 : i32, i32
  }
}

module attributes {stable_mosaic.version = 11 : i64} {
  func.func @_mm_bn_relu_train_single_kernel(%arg0: i32, %arg1: memref<128x576xbf16, #tpu.memory_space<vmem>>, %arg2: memref<576x128xbf16, #tpu.memory_space<vmem>>, %arg3: memref<128x2xf32, #tpu.memory_space<vmem>>, %arg4: memref<128x128xf32, #tpu.memory_space<vmem>>) attributes {dimension_semantics = [#tpu.dimension_semantics<arbitrary>], iteration_bounds = array<i64: 1>, scalar_prefetch = 0 : i64, scratch_operands = 0 : i64, tpu.core_type = #tpu.core_type<tc>, window_params = [{pipeline_mode = #tpu.pipeline_mode<synchronous>, transform_indices = @transform_0, window_bounds = array<i64: 128, 576>}, {pipeline_mode = #tpu.pipeline_mode<synchronous>, transform_indices = @transform_1, window_bounds = array<i64: 576, 128>}, {pipeline_mode = #tpu.pipeline_mode<synchronous>, transform_indices = @transform_2, window_bounds = array<i64: 128, 2>}, {pipeline_mode = #tpu.pipeline_mode<synchronous>, transform_indices = @transform_3, window_bounds = array<i64: 128, 128>}]} {
    %c0 = arith.constant 0 : index
    %c0_0 = arith.constant 0 : index
    %0 = vector.load %arg1[%c0, %c0_0] : memref<128x576xbf16, #tpu.memory_space<vmem>>, vector<128x576xbf16>
    %c0_1 = arith.constant 0 : index
    %c0_2 = arith.constant 0 : index
    %1 = vector.load %arg2[%c0_1, %c0_2] : memref<576x128xbf16, #tpu.memory_space<vmem>>, vector<576x128xbf16>
    %cst = arith.constant dense<0.000000e+00> : vector<128x128xf32>
    %2 = tpu.matmul %0, %1, %cst {dimension_numbers = #tpu.dot_dimension_numbers<[1], [0], [0], [1], [0, 0, 1, 1], [], []>} : vector<128x576xbf16>, vector<576x128xbf16>, vector<128x128xf32> -> vector<128x128xf32>
    %cst_3 = arith.constant dense<0.000000e+00> : vector<128xf32>
    %3 = vector.multi_reduction <add>, %2, %cst_3 [1] : vector<128x128xf32> to vector<128xf32>
    %4 = vector.shape_cast %3 : vector<128xf32> to vector<128x1xf32>
    %cst_4 = arith.constant 5.000000e-01 : f32
    %5 = vector.broadcast %cst_4 : f32 to vector<128x1xf32>
    %6 = arith.mulf %4, %5 : vector<128x1xf32>
    %7 = arith.mulf %2, %2 : vector<128x128xf32>
    %cst_5 = arith.constant dense<0.000000e+00> : vector<128xf32>
    %8 = vector.multi_reduction <add>, %7, %cst_5 [1] : vector<128x128xf32> to vector<128xf32>
    %9 = vector.shape_cast %8 : vector<128xf32> to vector<128x1xf32>
    %cst_6 = arith.constant 5.000000e-01 : f32
    %10 = vector.broadcast %cst_6 : f32 to vector<128x1xf32>
    %11 = arith.mulf %9, %10 : vector<128x1xf32>
    %12 = arith.mulf %6, %6 : vector<128x1xf32>
    %13 = arith.subf %11, %12 : vector<128x1xf32>
    %cst_7 = arith.constant 9.99999974E-6 : f32
    %14 = vector.broadcast %cst_7 : f32 to vector<128x1xf32>
    %15 = arith.addf %13, %14 : vector<128x1xf32>
    %16 = math.rsqrt %15 : vector<128x1xf32>
    %c0_8 = arith.constant 0 : index
    %c0_9 = arith.constant 0 : index
    %17 = vector.load %arg3[%c0_8, %c0_9] : memref<128x2xf32, #tpu.memory_space<vmem>>, vector<128x1xf32>
    %18 = arith.mulf %16, %17 : vector<128x1xf32>
    %c0_10 = arith.constant 0 : index
    %c1 = arith.constant 1 : index
    %19 = vector.load %arg3[%c0_10, %c1] : memref<128x2xf32, #tpu.memory_space<vmem>>, vector<128x1xf32>
    %20 = arith.mulf %6, %18 : vector<128x1xf32>
    %21 = arith.subf %19, %20 : vector<128x1xf32>
    %22 = vector.broadcast %18 : vector<128x1xf32> to vector<128x128xf32>
    %23 = arith.mulf %2, %22 : vector<128x128xf32>
    %24 = vector.broadcast %21 : vector<128x1xf32> to vector<128x128xf32>
    %25 = arith.addf %23, %24 : vector<128x128xf32>
    %cst_11 = arith.constant 0.000000e+00 : f32
    %26 = vector.broadcast %cst_11 : f32 to vector<128x128xf32>
    %27 = arith.maximumf %25, %26 : vector<128x128xf32>
    %c0_12 = arith.constant 0 : index
    %c0_13 = arith.constant 0 : index
    %28 = vector.load %arg4[%c0_12, %c0_13] : memref<128x128xf32, #tpu.memory_space<vmem>>, vector<128x128xf32>
    tpu.vector_store %arg4[%c0_12, %c0_13], %27 {strides = array<i32>} : memref<128x128xf32, #tpu.memory_space<vmem>>, vector<128x128xf32>,
    return
  }
  func.func @transform_0(%arg0: i32) -> (i32, i32) {
    %c0_i32 = arith.constant 0 : i32
    %c0_i32_0 = arith.constant 0 : i32
    %c0_i32_1 = arith.constant 0 : i32
    return %c0_i32, %c0_i32_0 : i32, i32
  }
  func.func @transform_1(%arg0: i32) -> (i32, i32) {
    %c0_i32 = arith.constant 0 : i32
    %c0_i32_0 = arith.constant 0 : i32
    %c0_i32_1 = arith.constant 0 : i32
    return %c0_i32, %c0_i32_0 : i32, i32
  }
  func.func @transform_2(%arg0: i32) -> (i32, i32) {
    %c0_i32 = arith.constant 0 : i32
    %c0_i32_0 = arith.constant 0 : i32
    %c0_i32_1 = arith.constant 0 : i32
    return %c0_i32, %c0_i32_0 : i32, i32
  }
  func.func @transform_3(%arg0: i32) -> (i32, i32) {
    %c0_i32 = arith.constant 0 : i32
    %c0_i32_0 = arith.constant 0 : i32
    %c0_i32_1 = arith.constant 0 : i32
    return %c0_i32, %c0_i32_0 : i32, i32
  }
}

module attributes {stable_mosaic.version = 11 : i64} {
  func.func @_mm_bn_relu_train_single_kernel(%arg0: i32, %arg1: memref<64x768xbf16, #tpu.memory_space<vmem>>, %arg2: memref<768x128xbf16, #tpu.memory_space<vmem>>, %arg3: memref<64x2xf32, #tpu.memory_space<vmem>>, %arg4: memref<64x128xf32, #tpu.memory_space<vmem>>) attributes {dimension_semantics = [#tpu.dimension_semantics<arbitrary>], iteration_bounds = array<i64: 1>, scalar_prefetch = 0 : i64, scratch_operands = 0 : i64, tpu.core_type = #tpu.core_type<tc>, window_params = [{pipeline_mode = #tpu.pipeline_mode<synchronous>, transform_indices = @transform_0, window_bounds = array<i64: 64, 768>}, {pipeline_mode = #tpu.pipeline_mode<synchronous>, transform_indices = @transform_1, window_bounds = array<i64: 768, 128>}, {pipeline_mode = #tpu.pipeline_mode<synchronous>, transform_indices = @transform_2, window_bounds = array<i64: 64, 2>}, {pipeline_mode = #tpu.pipeline_mode<synchronous>, transform_indices = @transform_3, window_bounds = array<i64: 64, 128>}]} {
    %c0 = arith.constant 0 : index
    %c0_0 = arith.constant 0 : index
    %0 = vector.load %arg1[%c0, %c0_0] : memref<64x768xbf16, #tpu.memory_space<vmem>>, vector<64x768xbf16>
    %c0_1 = arith.constant 0 : index
    %c0_2 = arith.constant 0 : index
    %1 = vector.load %arg2[%c0_1, %c0_2] : memref<768x128xbf16, #tpu.memory_space<vmem>>, vector<768x128xbf16>
    %cst = arith.constant dense<0.000000e+00> : vector<64x128xf32>
    %2 = tpu.matmul %0, %1, %cst {dimension_numbers = #tpu.dot_dimension_numbers<[1], [0], [0], [1], [0, 0, 1, 1], [], []>} : vector<64x768xbf16>, vector<768x128xbf16>, vector<64x128xf32> -> vector<64x128xf32>
    %cst_3 = arith.constant dense<0.000000e+00> : vector<64xf32>
    %3 = vector.multi_reduction <add>, %2, %cst_3 [1] : vector<64x128xf32> to vector<64xf32>
    %4 = vector.shape_cast %3 : vector<64xf32> to vector<64x1xf32>
    %cst_4 = arith.constant 0.0833333358 : f32
    %5 = vector.broadcast %cst_4 : f32 to vector<64x1xf32>
    %6 = arith.mulf %4, %5 : vector<64x1xf32>
    %7 = arith.mulf %2, %2 : vector<64x128xf32>
    %cst_5 = arith.constant dense<0.000000e+00> : vector<64xf32>
    %8 = vector.multi_reduction <add>, %7, %cst_5 [1] : vector<64x128xf32> to vector<64xf32>
    %9 = vector.shape_cast %8 : vector<64xf32> to vector<64x1xf32>
    %cst_6 = arith.constant 0.0833333358 : f32
    %10 = vector.broadcast %cst_6 : f32 to vector<64x1xf32>
    %11 = arith.mulf %9, %10 : vector<64x1xf32>
    %12 = arith.mulf %6, %6 : vector<64x1xf32>
    %13 = arith.subf %11, %12 : vector<64x1xf32>
    %cst_7 = arith.constant 9.99999974E-6 : f32
    %14 = vector.broadcast %cst_7 : f32 to vector<64x1xf32>
    %15 = arith.addf %13, %14 : vector<64x1xf32>
    %16 = math.rsqrt %15 : vector<64x1xf32>
    %c0_8 = arith.constant 0 : index
    %c0_9 = arith.constant 0 : index
    %17 = vector.load %arg3[%c0_8, %c0_9] : memref<64x2xf32, #tpu.memory_space<vmem>>, vector<64x1xf32>
    %18 = arith.mulf %16, %17 : vector<64x1xf32>
    %c0_10 = arith.constant 0 : index
    %c1 = arith.constant 1 : index
    %19 = vector.load %arg3[%c0_10, %c1] : memref<64x2xf32, #tpu.memory_space<vmem>>, vector<64x1xf32>
    %20 = arith.mulf %6, %18 : vector<64x1xf32>
    %21 = arith.subf %19, %20 : vector<64x1xf32>
    %22 = vector.broadcast %18 : vector<64x1xf32> to vector<64x128xf32>
    %23 = arith.mulf %2, %22 : vector<64x128xf32>
    %24 = vector.broadcast %21 : vector<64x1xf32> to vector<64x128xf32>
    %25 = arith.addf %23, %24 : vector<64x128xf32>
    %cst_11 = arith.constant 0.000000e+00 : f32
    %26 = vector.broadcast %cst_11 : f32 to vector<64x128xf32>
    %27 = arith.maximumf %25, %26 : vector<64x128xf32>
    %c0_12 = arith.constant 0 : index
    %c0_13 = arith.constant 0 : index
    %28 = vector.load %arg4[%c0_12, %c0_13] : memref<64x128xf32, #tpu.memory_space<vmem>>, vector<64x128xf32>
    tpu.vector_store %arg4[%c0_12, %c0_13], %27 {strides = array<i32>} : memref<64x128xf32, #tpu.memory_space<vmem>>, vector<64x128xf32>,
    return
  }
  func.func @transform_0(%arg0: i32) -> (i32, i32) {
    %c0_i32 = arith.constant 0 : i32
    %c0_i32_0 = arith.constant 0 : i32
    %c0_i32_1 = arith.constant 0 : i32
    return %c0_i32, %c0_i32_0 : i32, i32
  }
  func.func @transform_1(%arg0: i32) -> (i32, i32) {
    %c0_i32 = arith.constant 0 : i32
    %c0_i32_0 = arith.constant 0 : i32
    %c0_i32_1 = arith.constant 0 : i32
    return %c0_i32, %c0_i32_0 : i32, i32
  }
  func.func @transform_2(%arg0: i32) -> (i32, i32) {
    %c0_i32 = arith.constant 0 : i32
    %c0_i32_0 = arith.constant 0 : i32
    %c0_i32_1 = arith.constant 0 : i32
    return %c0_i32, %c0_i32_0 : i32, i32
  }
  func.func @transform_3(%arg0: i32) -> (i32, i32) {
    %c0_i32 = arith.constant 0 : i32
    %c0_i32_0 = arith.constant 0 : i32
    %c0_i32_1 = arith.constant 0 : i32
    return %c0_i32, %c0_i32_0 : i32, i32
  }
}

module attributes {stable_mosaic.version = 11 : i64} {
  func.func @_mm_bn_relu_train_single_kernel(%arg0: i32, %arg1: memref<64x1152xbf16, #tpu.memory_space<vmem>>, %arg2: memref<1152x128xbf16, #tpu.memory_space<vmem>>, %arg3: memref<64x2xf32, #tpu.memory_space<vmem>>, %arg4: memref<64x128xf32, #tpu.memory_space<vmem>>) attributes {dimension_semantics = [#tpu.dimension_semantics<arbitrary>], iteration_bounds = array<i64: 1>, scalar_prefetch = 0 : i64, scratch_operands = 0 : i64, tpu.core_type = #tpu.core_type<tc>, window_params = [{pipeline_mode = #tpu.pipeline_mode<synchronous>, transform_indices = @transform_0, window_bounds = array<i64: 64, 1152>}, {pipeline_mode = #tpu.pipeline_mode<synchronous>, transform_indices = @transform_1, window_bounds = array<i64: 1152, 128>}, {pipeline_mode = #tpu.pipeline_mode<synchronous>, transform_indices = @transform_2, window_bounds = array<i64: 64, 2>}, {pipeline_mode = #tpu.pipeline_mode<synchronous>, transform_indices = @transform_3, window_bounds = array<i64: 64, 128>}]} {
    %c0 = arith.constant 0 : index
    %c0_0 = arith.constant 0 : index
    %0 = vector.load %arg1[%c0, %c0_0] : memref<64x1152xbf16, #tpu.memory_space<vmem>>, vector<64x1152xbf16>
    %c0_1 = arith.constant 0 : index
    %c0_2 = arith.constant 0 : index
    %1 = vector.load %arg2[%c0_1, %c0_2] : memref<1152x128xbf16, #tpu.memory_space<vmem>>, vector<1152x128xbf16>
    %cst = arith.constant dense<0.000000e+00> : vector<64x128xf32>
    %2 = tpu.matmul %0, %1, %cst {dimension_numbers = #tpu.dot_dimension_numbers<[1], [0], [0], [1], [0, 0, 1, 1], [], []>} : vector<64x1152xbf16>, vector<1152x128xbf16>, vector<64x128xf32> -> vector<64x128xf32>
    %cst_3 = arith.constant dense<0.000000e+00> : vector<64xf32>
    %3 = vector.multi_reduction <add>, %2, %cst_3 [1] : vector<64x128xf32> to vector<64xf32>
    %4 = vector.shape_cast %3 : vector<64xf32> to vector<64x1xf32>
    %cst_4 = arith.constant 0.0833333358 : f32
    %5 = vector.broadcast %cst_4 : f32 to vector<64x1xf32>
    %6 = arith.mulf %4, %5 : vector<64x1xf32>
    %7 = arith.mulf %2, %2 : vector<64x128xf32>
    %cst_5 = arith.constant dense<0.000000e+00> : vector<64xf32>
    %8 = vector.multi_reduction <add>, %7, %cst_5 [1] : vector<64x128xf32> to vector<64xf32>
    %9 = vector.shape_cast %8 : vector<64xf32> to vector<64x1xf32>
    %cst_6 = arith.constant 0.0833333358 : f32
    %10 = vector.broadcast %cst_6 : f32 to vector<64x1xf32>
    %11 = arith.mulf %9, %10 : vector<64x1xf32>
    %12 = arith.mulf %6, %6 : vector<64x1xf32>
    %13 = arith.subf %11, %12 : vector<64x1xf32>
    %cst_7 = arith.constant 9.99999974E-6 : f32
    %14 = vector.broadcast %cst_7 : f32 to vector<64x1xf32>
    %15 = arith.addf %13, %14 : vector<64x1xf32>
    %16 = math.rsqrt %15 : vector<64x1xf32>
    %c0_8 = arith.constant 0 : index
    %c0_9 = arith.constant 0 : index
    %17 = vector.load %arg3[%c0_8, %c0_9] : memref<64x2xf32, #tpu.memory_space<vmem>>, vector<64x1xf32>
    %18 = arith.mulf %16, %17 : vector<64x1xf32>
    %c0_10 = arith.constant 0 : index
    %c1 = arith.constant 1 : index
    %19 = vector.load %arg3[%c0_10, %c1] : memref<64x2xf32, #tpu.memory_space<vmem>>, vector<64x1xf32>
    %20 = arith.mulf %6, %18 : vector<64x1xf32>
    %21 = arith.subf %19, %20 : vector<64x1xf32>
    %22 = vector.broadcast %18 : vector<64x1xf32> to vector<64x128xf32>
    %23 = arith.mulf %2, %22 : vector<64x128xf32>
    %24 = vector.broadcast %21 : vector<64x1xf32> to vector<64x128xf32>
    %25 = arith.addf %23, %24 : vector<64x128xf32>
    %cst_11 = arith.constant 0.000000e+00 : f32
    %26 = vector.broadcast %cst_11 : f32 to vector<64x128xf32>
    %27 = arith.maximumf %25, %26 : vector<64x128xf32>
    %c0_12 = arith.constant 0 : index
    %c0_13 = arith.constant 0 : index
    %28 = vector.load %arg4[%c0_12, %c0_13] : memref<64x128xf32, #tpu.memory_space<vmem>>, vector<64x128xf32>
    tpu.vector_store %arg4[%c0_12, %c0_13], %27 {strides = array<i32>} : memref<64x128xf32, #tpu.memory_space<vmem>>, vector<64x128xf32>,
    return
  }
  func.func @transform_0(%arg0: i32) -> (i32, i32) {
    %c0_i32 = arith.constant 0 : i32
    %c0_i32_0 = arith.constant 0 : i32
    %c0_i32_1 = arith.constant 0 : i32
    return %c0_i32, %c0_i32_0 : i32, i32
  }
  func.func @transform_1(%arg0: i32) -> (i32, i32) {
    %c0_i32 = arith.constant 0 : i32
    %c0_i32_0 = arith.constant 0 : i32
    %c0_i32_1 = arith.constant 0 : i32
    return %c0_i32, %c0_i32_0 : i32, i32
  }
  func.func @transform_2(%arg0: i32) -> (i32, i32) {
    %c0_i32 = arith.constant 0 : i32
    %c0_i32_0 = arith.constant 0 : i32
    %c0_i32_1 = arith.constant 0 : i32
    return %c0_i32, %c0_i32_0 : i32, i32
  }
  func.func @transform_3(%arg0: i32) -> (i32, i32) {
    %c0_i32 = arith.constant 0 : i32
    %c0_i32_0 = arith.constant 0 : i32
    %c0_i32_1 = arith.constant 0 : i32
    return %c0_i32, %c0_i32_0 : i32, i32
  }
}

module attributes {stable_mosaic.version = 11 : i64} {
  func.func @_mm_bn_relu_train_single_kernel(%arg0: i32, %arg1: memref<32x256xbf16, #tpu.memory_space<vmem>>, %arg2: memref<256x128xbf16, #tpu.memory_space<vmem>>, %arg3: memref<32x2xf32, #tpu.memory_space<vmem>>, %arg4: memref<32x128xf32, #tpu.memory_space<vmem>>) attributes {dimension_semantics = [#tpu.dimension_semantics<arbitrary>], iteration_bounds = array<i64: 1>, scalar_prefetch = 0 : i64, scratch_operands = 0 : i64, tpu.core_type = #tpu.core_type<tc>, window_params = [{pipeline_mode = #tpu.pipeline_mode<synchronous>, transform_indices = @transform_0, window_bounds = array<i64: 32, 256>}, {pipeline_mode = #tpu.pipeline_mode<synchronous>, transform_indices = @transform_1, window_bounds = array<i64: 256, 128>}, {pipeline_mode = #tpu.pipeline_mode<synchronous>, transform_indices = @transform_2, window_bounds = array<i64: 32, 2>}, {pipeline_mode = #tpu.pipeline_mode<synchronous>, transform_indices = @transform_3, window_bounds = array<i64: 32, 128>}]} {
    %c0 = arith.constant 0 : index
    %c0_0 = arith.constant 0 : index
    %0 = vector.load %arg1[%c0, %c0_0] : memref<32x256xbf16, #tpu.memory_space<vmem>>, vector<32x256xbf16>
    %c0_1 = arith.constant 0 : index
    %c0_2 = arith.constant 0 : index
    %1 = vector.load %arg2[%c0_1, %c0_2] : memref<256x128xbf16, #tpu.memory_space<vmem>>, vector<256x128xbf16>
    %cst = arith.constant dense<0.000000e+00> : vector<32x128xf32>
    %2 = tpu.matmul %0, %1, %cst {dimension_numbers = #tpu.dot_dimension_numbers<[1], [0], [0], [1], [0, 0, 1, 1], [], []>} : vector<32x256xbf16>, vector<256x128xbf16>, vector<32x128xf32> -> vector<32x128xf32>
    %cst_3 = arith.constant dense<0.000000e+00> : vector<32xf32>
    %3 = vector.multi_reduction <add>, %2, %cst_3 [1] : vector<32x128xf32> to vector<32xf32>
    %4 = vector.shape_cast %3 : vector<32xf32> to vector<32x1xf32>
    %cst_4 = arith.constant 0.020833334 : f32
    %5 = vector.broadcast %cst_4 : f32 to vector<32x1xf32>
    %6 = arith.mulf %4, %5 : vector<32x1xf32>
    %7 = arith.mulf %2, %2 : vector<32x128xf32>
    %cst_5 = arith.constant dense<0.000000e+00> : vector<32xf32>
    %8 = vector.multi_reduction <add>, %7, %cst_5 [1] : vector<32x128xf32> to vector<32xf32>
    %9 = vector.shape_cast %8 : vector<32xf32> to vector<32x1xf32>
    %cst_6 = arith.constant 0.020833334 : f32
    %10 = vector.broadcast %cst_6 : f32 to vector<32x1xf32>
    %11 = arith.mulf %9, %10 : vector<32x1xf32>
    %12 = arith.mulf %6, %6 : vector<32x1xf32>
    %13 = arith.subf %11, %12 : vector<32x1xf32>
    %cst_7 = arith.constant 9.99999974E-6 : f32
    %14 = vector.broadcast %cst_7 : f32 to vector<32x1xf32>
    %15 = arith.addf %13, %14 : vector<32x1xf32>
    %16 = math.rsqrt %15 : vector<32x1xf32>
    %c0_8 = arith.constant 0 : index
    %c0_9 = arith.constant 0 : index
    %17 = vector.load %arg3[%c0_8, %c0_9] : memref<32x2xf32, #tpu.memory_space<vmem>>, vector<32x1xf32>
    %18 = arith.mulf %16, %17 : vector<32x1xf32>
    %c0_10 = arith.constant 0 : index
    %c1 = arith.constant 1 : index
    %19 = vector.load %arg3[%c0_10, %c1] : memref<32x2xf32, #tpu.memory_space<vmem>>, vector<32x1xf32>
    %20 = arith.mulf %6, %18 : vector<32x1xf32>
    %21 = arith.subf %19, %20 : vector<32x1xf32>
    %22 = vector.broadcast %18 : vector<32x1xf32> to vector<32x128xf32>
    %23 = arith.mulf %2, %22 : vector<32x128xf32>
    %24 = vector.broadcast %21 : vector<32x1xf32> to vector<32x128xf32>
    %25 = arith.addf %23, %24 : vector<32x128xf32>
    %cst_11 = arith.constant 0.000000e+00 : f32
    %26 = vector.broadcast %cst_11 : f32 to vector<32x128xf32>
    %27 = arith.maximumf %25, %26 : vector<32x128xf32>
    %c0_12 = arith.constant 0 : index
    %c0_13 = arith.constant 0 : index
    %28 = vector.load %arg4[%c0_12, %c0_13] : memref<32x128xf32, #tpu.memory_space<vmem>>, vector<32x128xf32>
    tpu.vector_store %arg4[%c0_12, %c0_13], %27 {strides = array<i32>} : memref<32x128xf32, #tpu.memory_space<vmem>>, vector<32x128xf32>,
    return
  }
  func.func @transform_0(%arg0: i32) -> (i32, i32) {
    %c0_i32 = arith.constant 0 : i32
    %c0_i32_0 = arith.constant 0 : i32
    %c0_i32_1 = arith.constant 0 : i32
    return %c0_i32, %c0_i32_0 : i32, i32
  }
  func.func @transform_1(%arg0: i32) -> (i32, i32) {
    %c0_i32 = arith.constant 0 : i32
    %c0_i32_0 = arith.constant 0 : i32
    %c0_i32_1 = arith.constant 0 : i32
    return %c0_i32, %c0_i32_0 : i32, i32
  }
  func.func @transform_2(%arg0: i32) -> (i32, i32) {
    %c0_i32 = arith.constant 0 : i32
    %c0_i32_0 = arith.constant 0 : i32
    %c0_i32_1 = arith.constant 0 : i32
    return %c0_i32, %c0_i32_0 : i32, i32
  }
  func.func @transform_3(%arg0: i32) -> (i32, i32) {
    %c0_i32 = arith.constant 0 : i32
    %c0_i32_0 = arith.constant 0 : i32
    %c0_i32_1 = arith.constant 0 : i32
    return %c0_i32, %c0_i32_0 : i32, i32
  }
}

module attributes {stable_mosaic.version = 11 : i64} {
  func.func @_mm_bn_relu_train_single_kernel(%arg0: i32, %arg1: memref<32x576xbf16, #tpu.memory_space<vmem>>, %arg2: memref<576x128xbf16, #tpu.memory_space<vmem>>, %arg3: memref<32x2xf32, #tpu.memory_space<vmem>>, %arg4: memref<32x128xf32, #tpu.memory_space<vmem>>) attributes {dimension_semantics = [#tpu.dimension_semantics<arbitrary>], iteration_bounds = array<i64: 1>, scalar_prefetch = 0 : i64, scratch_operands = 0 : i64, tpu.core_type = #tpu.core_type<tc>, window_params = [{pipeline_mode = #tpu.pipeline_mode<synchronous>, transform_indices = @transform_0, window_bounds = array<i64: 32, 576>}, {pipeline_mode = #tpu.pipeline_mode<synchronous>, transform_indices = @transform_1, window_bounds = array<i64: 576, 128>}, {pipeline_mode = #tpu.pipeline_mode<synchronous>, transform_indices = @transform_2, window_bounds = array<i64: 32, 2>}, {pipeline_mode = #tpu.pipeline_mode<synchronous>, transform_indices = @transform_3, window_bounds = array<i64: 32, 128>}]} {
    %c0 = arith.constant 0 : index
    %c0_0 = arith.constant 0 : index
    %0 = vector.load %arg1[%c0, %c0_0] : memref<32x576xbf16, #tpu.memory_space<vmem>>, vector<32x576xbf16>
    %c0_1 = arith.constant 0 : index
    %c0_2 = arith.constant 0 : index
    %1 = vector.load %arg2[%c0_1, %c0_2] : memref<576x128xbf16, #tpu.memory_space<vmem>>, vector<576x128xbf16>
    %cst = arith.constant dense<0.000000e+00> : vector<32x128xf32>
    %2 = tpu.matmul %0, %1, %cst {dimension_numbers = #tpu.dot_dimension_numbers<[1], [0], [0], [1], [0, 0, 1, 1], [], []>} : vector<32x576xbf16>, vector<576x128xbf16>, vector<32x128xf32> -> vector<32x128xf32>
    %cst_3 = arith.constant dense<0.000000e+00> : vector<32xf32>
    %3 = vector.multi_reduction <add>, %2, %cst_3 [1] : vector<32x128xf32> to vector<32xf32>
    %4 = vector.shape_cast %3 : vector<32xf32> to vector<32x1xf32>
    %cst_4 = arith.constant 0.020833334 : f32
    %5 = vector.broadcast %cst_4 : f32 to vector<32x1xf32>
    %6 = arith.mulf %4, %5 : vector<32x1xf32>
    %7 = arith.mulf %2, %2 : vector<32x128xf32>
    %cst_5 = arith.constant dense<0.000000e+00> : vector<32xf32>
    %8 = vector.multi_reduction <add>, %7, %cst_5 [1] : vector<32x128xf32> to vector<32xf32>
    %9 = vector.shape_cast %8 : vector<32xf32> to vector<32x1xf32>
    %cst_6 = arith.constant 0.020833334 : f32
    %10 = vector.broadcast %cst_6 : f32 to vector<32x1xf32>
    %11 = arith.mulf %9, %10 : vector<32x1xf32>
    %12 = arith.mulf %6, %6 : vector<32x1xf32>
    %13 = arith.subf %11, %12 : vector<32x1xf32>
    %cst_7 = arith.constant 9.99999974E-6 : f32
    %14 = vector.broadcast %cst_7 : f32 to vector<32x1xf32>
    %15 = arith.addf %13, %14 : vector<32x1xf32>
    %16 = math.rsqrt %15 : vector<32x1xf32>
    %c0_8 = arith.constant 0 : index
    %c0_9 = arith.constant 0 : index
    %17 = vector.load %arg3[%c0_8, %c0_9] : memref<32x2xf32, #tpu.memory_space<vmem>>, vector<32x1xf32>
    %18 = arith.mulf %16, %17 : vector<32x1xf32>
    %c0_10 = arith.constant 0 : index
    %c1 = arith.constant 1 : index
    %19 = vector.load %arg3[%c0_10, %c1] : memref<32x2xf32, #tpu.memory_space<vmem>>, vector<32x1xf32>
    %20 = arith.mulf %6, %18 : vector<32x1xf32>
    %21 = arith.subf %19, %20 : vector<32x1xf32>
    %22 = vector.broadcast %18 : vector<32x1xf32> to vector<32x128xf32>
    %23 = arith.mulf %2, %22 : vector<32x128xf32>
    %24 = vector.broadcast %21 : vector<32x1xf32> to vector<32x128xf32>
    %25 = arith.addf %23, %24 : vector<32x128xf32>
    %cst_11 = arith.constant 0.000000e+00 : f32
    %26 = vector.broadcast %cst_11 : f32 to vector<32x128xf32>
    %27 = arith.maximumf %25, %26 : vector<32x128xf32>
    %c0_12 = arith.constant 0 : index
    %c0_13 = arith.constant 0 : index
    %28 = vector.load %arg4[%c0_12, %c0_13] : memref<32x128xf32, #tpu.memory_space<vmem>>, vector<32x128xf32>
    tpu.vector_store %arg4[%c0_12, %c0_13], %27 {strides = array<i32>} : memref<32x128xf32, #tpu.memory_space<vmem>>, vector<32x128xf32>,
    return
  }
  func.func @transform_0(%arg0: i32) -> (i32, i32) {
    %c0_i32 = arith.constant 0 : i32
    %c0_i32_0 = arith.constant 0 : i32
    %c0_i32_1 = arith.constant 0 : i32
    return %c0_i32, %c0_i32_0 : i32, i32
  }
  func.func @transform_1(%arg0: i32) -> (i32, i32) {
    %c0_i32 = arith.constant 0 : i32
    %c0_i32_0 = arith.constant 0 : i32
    %c0_i32_1 = arith.constant 0 : i32
    return %c0_i32, %c0_i32_0 : i32, i32
  }
  func.func @transform_2(%arg0: i32) -> (i32, i32) {
    %c0_i32 = arith.constant 0 : i32
    %c0_i32_0 = arith.constant 0 : i32
    %c0_i32_1 = arith.constant 0 : i32
    return %c0_i32, %c0_i32_0 : i32, i32
  }
  func.func @transform_3(%arg0: i32) -> (i32, i32) {
    %c0_i32 = arith.constant 0 : i32
    %c0_i32_0 = arith.constant 0 : i32
    %c0_i32_1 = arith.constant 0 : i32
    return %c0_i32, %c0_i32_0 : i32, i32
  }
}

module attributes {stable_mosaic.version = 11 : i64} {
  func.func @_mm_bn_relu_train_single_kernel(%arg0: i32, %arg1: memref<16x192xbf16, #tpu.memory_space<vmem>>, %arg2: memref<192x256xbf16, #tpu.memory_space<vmem>>, %arg3: memref<16x2xf32, #tpu.memory_space<vmem>>, %arg4: memref<16x256xf32, #tpu.memory_space<vmem>>) attributes {dimension_semantics = [#tpu.dimension_semantics<arbitrary>], iteration_bounds = array<i64: 1>, scalar_prefetch = 0 : i64, scratch_operands = 0 : i64, tpu.core_type = #tpu.core_type<tc>, window_params = [{pipeline_mode = #tpu.pipeline_mode<synchronous>, transform_indices = @transform_0, window_bounds = array<i64: 16, 192>}, {pipeline_mode = #tpu.pipeline_mode<synchronous>, transform_indices = @transform_1, window_bounds = array<i64: 192, 256>}, {pipeline_mode = #tpu.pipeline_mode<synchronous>, transform_indices = @transform_2, window_bounds = array<i64: 16, 2>}, {pipeline_mode = #tpu.pipeline_mode<synchronous>, transform_indices = @transform_3, window_bounds = array<i64: 16, 256>}]} {
    %c0 = arith.constant 0 : index
    %c0_0 = arith.constant 0 : index
    %0 = vector.load %arg1[%c0, %c0_0] : memref<16x192xbf16, #tpu.memory_space<vmem>>, vector<16x192xbf16>
    %c0_1 = arith.constant 0 : index
    %c0_2 = arith.constant 0 : index
    %1 = vector.load %arg2[%c0_1, %c0_2] : memref<192x256xbf16, #tpu.memory_space<vmem>>, vector<192x256xbf16>
    %cst = arith.constant dense<0.000000e+00> : vector<16x256xf32>
    %2 = tpu.matmul %0, %1, %cst {dimension_numbers = #tpu.dot_dimension_numbers<[1], [0], [0], [1], [0, 0, 1, 1], [], []>} : vector<16x192xbf16>, vector<192x256xbf16>, vector<16x256xf32> -> vector<16x256xf32>
    %cst_3 = arith.constant dense<0.000000e+00> : vector<16xf32>
    %3 = vector.multi_reduction <add>, %2, %cst_3 [1] : vector<16x256xf32> to vector<16xf32>
    %4 = vector.shape_cast %3 : vector<16xf32> to vector<16x1xf32>
    %cst_4 = arith.constant 0.00480769249 : f32
    %5 = vector.broadcast %cst_4 : f32 to vector<16x1xf32>
    %6 = arith.mulf %4, %5 : vector<16x1xf32>
    %7 = arith.mulf %2, %2 : vector<16x256xf32>
    %cst_5 = arith.constant dense<0.000000e+00> : vector<16xf32>
    %8 = vector.multi_reduction <add>, %7, %cst_5 [1] : vector<16x256xf32> to vector<16xf32>
    %9 = vector.shape_cast %8 : vector<16xf32> to vector<16x1xf32>
    %cst_6 = arith.constant 0.00480769249 : f32
    %10 = vector.broadcast %cst_6 : f32 to vector<16x1xf32>
    %11 = arith.mulf %9, %10 : vector<16x1xf32>
    %12 = arith.mulf %6, %6 : vector<16x1xf32>
    %13 = arith.subf %11, %12 : vector<16x1xf32>
    %cst_7 = arith.constant 9.99999974E-6 : f32
    %14 = vector.broadcast %cst_7 : f32 to vector<16x1xf32>
    %15 = arith.addf %13, %14 : vector<16x1xf32>
    %16 = math.rsqrt %15 : vector<16x1xf32>
    %c0_8 = arith.constant 0 : index
    %c0_9 = arith.constant 0 : index
    %17 = vector.load %arg3[%c0_8, %c0_9] : memref<16x2xf32, #tpu.memory_space<vmem>>, vector<16x1xf32>
    %18 = arith.mulf %16, %17 : vector<16x1xf32>
    %c0_10 = arith.constant 0 : index
    %c1 = arith.constant 1 : index
    %19 = vector.load %arg3[%c0_10, %c1] : memref<16x2xf32, #tpu.memory_space<vmem>>, vector<16x1xf32>
    %20 = arith.mulf %6, %18 : vector<16x1xf32>
    %21 = arith.subf %19, %20 : vector<16x1xf32>
    %22 = vector.broadcast %18 : vector<16x1xf32> to vector<16x256xf32>
    %23 = arith.mulf %2, %22 : vector<16x256xf32>
    %24 = vector.broadcast %21 : vector<16x1xf32> to vector<16x256xf32>
    %25 = arith.addf %23, %24 : vector<16x256xf32>
    %cst_11 = arith.constant 0.000000e+00 : f32
    %26 = vector.broadcast %cst_11 : f32 to vector<16x256xf32>
    %27 = arith.maximumf %25, %26 : vector<16x256xf32>
    %c0_12 = arith.constant 0 : index
    %c0_13 = arith.constant 0 : index
    %28 = vector.load %arg4[%c0_12, %c0_13] : memref<16x256xf32, #tpu.memory_space<vmem>>, vector<16x256xf32>
    tpu.vector_store %arg4[%c0_12, %c0_13], %27 {strides = array<i32>} : memref<16x256xf32, #tpu.memory_space<vmem>>, vector<16x256xf32>,
    return
  }
  func.func @transform_0(%arg0: i32) -> (i32, i32) {
    %c0_i32 = arith.constant 0 : i32
    %c0_i32_0 = arith.constant 0 : i32
    %c0_i32_1 = arith.constant 0 : i32
    return %c0_i32, %c0_i32_0 : i32, i32
  }
  func.func @transform_1(%arg0: i32) -> (i32, i32) {
    %c0_i32 = arith.constant 0 : i32
    %c0_i32_0 = arith.constant 0 : i32
    %c0_i32_1 = arith.constant 0 : i32
    return %c0_i32, %c0_i32_0 : i32, i32
  }
  func.func @transform_2(%arg0: i32) -> (i32, i32) {
    %c0_i32 = arith.constant 0 : i32
    %c0_i32_0 = arith.constant 0 : i32
    %c0_i32_1 = arith.constant 0 : i32
    return %c0_i32, %c0_i32_0 : i32, i32
  }
  func.func @transform_3(%arg0: i32) -> (i32, i32) {
    %c0_i32 = arith.constant 0 : i32
    %c0_i32_0 = arith.constant 0 : i32
    %c0_i32_1 = arith.constant 0 : i32
    return %c0_i32, %c0_i32_0 : i32, i32
  }
}

module attributes {stable_mosaic.version = 11 : i64} {
  func.func @_mm_bn_relu_train_single_kernel(%arg0: i32, %arg1: memref<16x288xbf16, #tpu.memory_space<vmem>>, %arg2: memref<288x256xbf16, #tpu.memory_space<vmem>>, %arg3: memref<16x2xf32, #tpu.memory_space<vmem>>, %arg4: memref<16x256xf32, #tpu.memory_space<vmem>>) attributes {dimension_semantics = [#tpu.dimension_semantics<arbitrary>], iteration_bounds = array<i64: 1>, scalar_prefetch = 0 : i64, scratch_operands = 0 : i64, tpu.core_type = #tpu.core_type<tc>, window_params = [{pipeline_mode = #tpu.pipeline_mode<synchronous>, transform_indices = @transform_0, window_bounds = array<i64: 16, 288>}, {pipeline_mode = #tpu.pipeline_mode<synchronous>, transform_indices = @transform_1, window_bounds = array<i64: 288, 256>}, {pipeline_mode = #tpu.pipeline_mode<synchronous>, transform_indices = @transform_2, window_bounds = array<i64: 16, 2>}, {pipeline_mode = #tpu.pipeline_mode<synchronous>, transform_indices = @transform_3, window_bounds = array<i64: 16, 256>}]} {
    %c0 = arith.constant 0 : index
    %c0_0 = arith.constant 0 : index
    %0 = vector.load %arg1[%c0, %c0_0] : memref<16x288xbf16, #tpu.memory_space<vmem>>, vector<16x288xbf16>
    %c0_1 = arith.constant 0 : index
    %c0_2 = arith.constant 0 : index
    %1 = vector.load %arg2[%c0_1, %c0_2] : memref<288x256xbf16, #tpu.memory_space<vmem>>, vector<288x256xbf16>
    %cst = arith.constant dense<0.000000e+00> : vector<16x256xf32>
    %2 = tpu.matmul %0, %1, %cst {dimension_numbers = #tpu.dot_dimension_numbers<[1], [0], [0], [1], [0, 0, 1, 1], [], []>} : vector<16x288xbf16>, vector<288x256xbf16>, vector<16x256xf32> -> vector<16x256xf32>
    %cst_3 = arith.constant dense<0.000000e+00> : vector<16xf32>
    %3 = vector.multi_reduction <add>, %2, %cst_3 [1] : vector<16x256xf32> to vector<16xf32>
    %4 = vector.shape_cast %3 : vector<16xf32> to vector<16x1xf32>
    %cst_4 = arith.constant 0.00480769249 : f32
    %5 = vector.broadcast %cst_4 : f32 to vector<16x1xf32>
    %6 = arith.mulf %4, %5 : vector<16x1xf32>
    %7 = arith.mulf %2, %2 : vector<16x256xf32>
    %cst_5 = arith.constant dense<0.000000e+00> : vector<16xf32>
    %8 = vector.multi_reduction <add>, %7, %cst_5 [1] : vector<16x256xf32> to vector<16xf32>
    %9 = vector.shape_cast %8 : vector<16xf32> to vector<16x1xf32>
    %cst_6 = arith.constant 0.00480769249 : f32
    %10 = vector.broadcast %cst_6 : f32 to vector<16x1xf32>
    %11 = arith.mulf %9, %10 : vector<16x1xf32>
    %12 = arith.mulf %6, %6 : vector<16x1xf32>
    %13 = arith.subf %11, %12 : vector<16x1xf32>
    %cst_7 = arith.constant 9.99999974E-6 : f32
    %14 = vector.broadcast %cst_7 : f32 to vector<16x1xf32>
    %15 = arith.addf %13, %14 : vector<16x1xf32>
    %16 = math.rsqrt %15 : vector<16x1xf32>
    %c0_8 = arith.constant 0 : index
    %c0_9 = arith.constant 0 : index
    %17 = vector.load %arg3[%c0_8, %c0_9] : memref<16x2xf32, #tpu.memory_space<vmem>>, vector<16x1xf32>
    %18 = arith.mulf %16, %17 : vector<16x1xf32>
    %c0_10 = arith.constant 0 : index
    %c1 = arith.constant 1 : index
    %19 = vector.load %arg3[%c0_10, %c1] : memref<16x2xf32, #tpu.memory_space<vmem>>, vector<16x1xf32>
    %20 = arith.mulf %6, %18 : vector<16x1xf32>
    %21 = arith.subf %19, %20 : vector<16x1xf32>
    %22 = vector.broadcast %18 : vector<16x1xf32> to vector<16x256xf32>
    %23 = arith.mulf %2, %22 : vector<16x256xf32>
    %24 = vector.broadcast %21 : vector<16x1xf32> to vector<16x256xf32>
    %25 = arith.addf %23, %24 : vector<16x256xf32>
    %cst_11 = arith.constant 0.000000e+00 : f32
    %26 = vector.broadcast %cst_11 : f32 to vector<16x256xf32>
    %27 = arith.maximumf %25, %26 : vector<16x256xf32>
    %c0_12 = arith.constant 0 : index
    %c0_13 = arith.constant 0 : index
    %28 = vector.load %arg4[%c0_12, %c0_13] : memref<16x256xf32, #tpu.memory_space<vmem>>, vector<16x256xf32>
    tpu.vector_store %arg4[%c0_12, %c0_13], %27 {strides = array<i32>} : memref<16x256xf32, #tpu.memory_space<vmem>>, vector<16x256xf32>,
    return
  }
  func.func @transform_0(%arg0: i32) -> (i32, i32) {
    %c0_i32 = arith.constant 0 : i32
    %c0_i32_0 = arith.constant 0 : i32
    %c0_i32_1 = arith.constant 0 : i32
    return %c0_i32, %c0_i32_0 : i32, i32
  }
  func.func @transform_1(%arg0: i32) -> (i32, i32) {
    %c0_i32 = arith.constant 0 : i32
    %c0_i32_0 = arith.constant 0 : i32
    %c0_i32_1 = arith.constant 0 : i32
    return %c0_i32, %c0_i32_0 : i32, i32
  }
  func.func @transform_2(%arg0: i32) -> (i32, i32) {
    %c0_i32 = arith.constant 0 : i32
    %c0_i32_0 = arith.constant 0 : i32
    %c0_i32_1 = arith.constant 0 : i32
    return %c0_i32, %c0_i32_0 : i32, i32
  }
  func.func @transform_3(%arg0: i32) -> (i32, i32) {
    %c0_i32 = arith.constant 0 : i32
    %c0_i32_0 = arith.constant 0 : i32
    %c0_i32_1 = arith.constant 0 : i32
    return %c0_i32, %c0_i32_0 : i32, i32
  }
}

module attributes {stable_mosaic.version = 11 : i64} {
  func.func @_mm_bn_relu_train_tiled_kernel(%arg0: i32, %arg1: i32, %arg2: memref<8x96xbf16, #tpu.memory_space<vmem>>, %arg3: memref<96x512xbf16, #tpu.memory_space<vmem>>, %arg4: memref<8x2xf32, #tpu.memory_space<vmem>>, %arg5: memref<8x512xf32, #tpu.memory_space<vmem>>, %arg6: memref<8x1xf32, #tpu.memory_space<vmem>>, %arg7: memref<8x1xf32, #tpu.memory_space<vmem>>) attributes {dimension_semantics = [#tpu.dimension_semantics<arbitrary>, #tpu.dimension_semantics<arbitrary>], iteration_bounds = array<i64: 2, 2>, scalar_prefetch = 0 : i64, scratch_operands = 2 : i64, tpu.core_type = #tpu.core_type<tc>, window_params = [{pipeline_mode = #tpu.pipeline_mode<synchronous>, transform_indices = @transform_0, window_bounds = array<i64: 8, 96>}, {transform_indices = @transform_1, window_bounds = array<i64: 96, 512>}, {pipeline_mode = #tpu.pipeline_mode<synchronous>, transform_indices = @transform_2, window_bounds = array<i64: 8, 2>}, {transform_indices = @transform_3, window_bounds = array<i64: 8, 512>}]} {
    %c0_i32 = arith.constant 0 : i32
    %0 = arith.cmpi eq, %arg0, %c0_i32 : i32
    %c0_i32_0 = arith.constant 0 : i32
    %1 = arith.cmpi eq, %arg1, %c0_i32_0 : i32
    %2 = arith.andi %0, %1 : i1
    %3 = arith.extui %2 : i1 to i32
    %c0_i32_1 = arith.constant 0 : i32
    %4 = arith.cmpi ne, %3, %c0_i32_1 : i32
    scf.if %4 {
      %cst_8 = arith.constant 0.000000e+00 : f32
      %14 = vector.broadcast %cst_8 : f32 to vector<8x1xf32>
      %c0_9 = arith.constant 0 : index
      %c0_10 = arith.constant 0 : index
      %15 = vector.load %arg6[%c0_9, %c0_10] : memref<8x1xf32, #tpu.memory_space<vmem>>, vector<8x1xf32>
      tpu.vector_store %arg6[%c0_9, %c0_10], %14 {strides = array<i32>} : memref<8x1xf32, #tpu.memory_space<vmem>>, vector<8x1xf32>,
      %cst_11 = arith.constant 0.000000e+00 : f32
      %16 = vector.broadcast %cst_11 : f32 to vector<8x1xf32>
      %c0_12 = arith.constant 0 : index
      %c0_13 = arith.constant 0 : index
      %17 = vector.load %arg7[%c0_12, %c0_13] : memref<8x1xf32, #tpu.memory_space<vmem>>, vector<8x1xf32>
      tpu.vector_store %arg7[%c0_12, %c0_13], %16 {strides = array<i32>} : memref<8x1xf32, #tpu.memory_space<vmem>>, vector<8x1xf32>,
    } else {
    }
    %c0 = arith.constant 0 : index
    %c0_2 = arith.constant 0 : index
    %5 = vector.load %arg2[%c0, %c0_2] : memref<8x96xbf16, #tpu.memory_space<vmem>>, vector<8x96xbf16>
    %c0_3 = arith.constant 0 : index
    %c0_4 = arith.constant 0 : index
    %6 = vector.load %arg3[%c0_3, %c0_4] : memref<96x512xbf16, #tpu.memory_space<vmem>>, vector<96x512xbf16>
    %cst = arith.constant dense<0.000000e+00> : vector<8x512xf32>
    %7 = tpu.matmul %5, %6, %cst {dimension_numbers = #tpu.dot_dimension_numbers<[1], [0], [0], [1], [0, 0, 1, 1], [], []>} : vector<8x96xbf16>, vector<96x512xbf16>, vector<8x512xf32> -> vector<8x512xf32>
    %c0_i32_5 = arith.constant 0 : i32
    %8 = arith.cmpi eq, %arg0, %c0_i32_5 : i32
    %9 = arith.extui %8 : i1 to i32
    %c0_i32_6 = arith.constant 0 : i32
    %10 = arith.cmpi ne, %9, %c0_i32_6 : i32
    scf.if %10 {
      %c0_8 = arith.constant 0 : index
      %c0_9 = arith.constant 0 : index
      %14 = vector.load %arg6[%c0_8, %c0_9] : memref<8x1xf32, #tpu.memory_space<vmem>>, vector<8x1xf32>
      %cst_10 = arith.constant dense<0.000000e+00> : vector<8xf32>
      %15 = vector.multi_reduction <add>, %7, %cst_10 [1] : vector<8x512xf32> to vector<8xf32>
      %16 = vector.shape_cast %15 : vector<8xf32> to vector<8x1xf32>
      %17 = arith.addf %14, %16 : vector<8x1xf32>
      %c0_11 = arith.constant 0 : index
      %c0_12 = arith.constant 0 : index
      %18 = vector.load %arg6[%c0_11, %c0_12] : memref<8x1xf32, #tpu.memory_space<vmem>>, vector<8x1xf32>
      tpu.vector_store %arg6[%c0_11, %c0_12], %17 {strides = array<i32>} : memref<8x1xf32, #tpu.memory_space<vmem>>, vector<8x1xf32>,
      %c0_13 = arith.constant 0 : index
      %c0_14 = arith.constant 0 : index
      %19 = vector.load %arg7[%c0_13, %c0_14] : memref<8x1xf32, #tpu.memory_space<vmem>>, vector<8x1xf32>
      %20 = arith.mulf %7, %7 : vector<8x512xf32>
      %cst_15 = arith.constant dense<0.000000e+00> : vector<8xf32>
      %21 = vector.multi_reduction <add>, %20, %cst_15 [1] : vector<8x512xf32> to vector<8xf32>
      %22 = vector.shape_cast %21 : vector<8xf32> to vector<8x1xf32>
      %23 = arith.addf %19, %22 : vector<8x1xf32>
      %c0_16 = arith.constant 0 : index
      %c0_17 = arith.constant 0 : index
      %24 = vector.load %arg7[%c0_16, %c0_17] : memref<8x1xf32, #tpu.memory_space<vmem>>, vector<8x1xf32>
      tpu.vector_store %arg7[%c0_16, %c0_17], %23 {strides = array<i32>} : memref<8x1xf32, #tpu.memory_space<vmem>>, vector<8x1xf32>,
      %c0_18 = arith.constant 0 : index
      %c0_19 = arith.constant 0 : index
      %25 = vector.load %arg5[%c0_18, %c0_19] : memref<8x512xf32, #tpu.memory_space<vmem>>, vector<8x512xf32>
      tpu.vector_store %arg5[%c0_18, %c0_19], %7 {strides = array<i32>} : memref<8x512xf32, #tpu.memory_space<vmem>>, vector<8x512xf32>,
    } else {
    }
    %c1_i32 = arith.constant 1 : i32
    %11 = arith.cmpi eq, %arg0, %c1_i32 : i32
    %12 = arith.extui %11 : i1 to i32
    %c0_i32_7 = arith.constant 0 : i32
    %13 = arith.cmpi ne, %12, %c0_i32_7 : i32
    scf.if %13 {
      %c0_8 = arith.constant 0 : index
      %c0_9 = arith.constant 0 : index
      %14 = vector.load %arg6[%c0_8, %c0_9] : memref<8x1xf32, #tpu.memory_space<vmem>>, vector<8x1xf32>
      %cst_10 = arith.constant 0.00115740742 : f32
      %15 = vector.broadcast %cst_10 : f32 to vector<8x1xf32>
      %16 = arith.mulf %14, %15 : vector<8x1xf32>
      %c0_11 = arith.constant 0 : index
      %c0_12 = arith.constant 0 : index
      %17 = vector.load %arg7[%c0_11, %c0_12] : memref<8x1xf32, #tpu.memory_space<vmem>>, vector<8x1xf32>
      %cst_13 = arith.constant 0.00115740742 : f32
      %18 = vector.broadcast %cst_13 : f32 to vector<8x1xf32>
      %19 = arith.mulf %17, %18 : vector<8x1xf32>
      %20 = arith.mulf %16, %16 : vector<8x1xf32>
      %21 = arith.subf %19, %20 : vector<8x1xf32>
      %cst_14 = arith.constant 9.99999974E-6 : f32
      %22 = vector.broadcast %cst_14 : f32 to vector<8x1xf32>
      %23 = arith.addf %21, %22 : vector<8x1xf32>
      %24 = math.rsqrt %23 : vector<8x1xf32>
      %c0_15 = arith.constant 0 : index
      %c0_16 = arith.constant 0 : index
      %25 = vector.load %arg4[%c0_15, %c0_16] : memref<8x2xf32, #tpu.memory_space<vmem>>, vector<8x1xf32>
      %26 = arith.mulf %24, %25 : vector<8x1xf32>
      %c0_17 = arith.constant 0 : index
      %c1 = arith.constant 1 : index
      %27 = vector.load %arg4[%c0_17, %c1] : memref<8x2xf32, #tpu.memory_space<vmem>>, vector<8x1xf32>
      %28 = arith.mulf %16, %26 : vector<8x1xf32>
      %29 = arith.subf %27, %28 : vector<8x1xf32>
      %30 = vector.broadcast %26 : vector<8x1xf32> to vector<8x512xf32>
      %31 = arith.mulf %7, %30 : vector<8x512xf32>
      %32 = vector.broadcast %29 : vector<8x1xf32> to vector<8x512xf32>
      %33 = arith.addf %31, %32 : vector<8x512xf32>
      %cst_18 = arith.constant 0.000000e+00 : f32
      %34 = vector.broadcast %cst_18 : f32 to vector<8x512xf32>
      %35 = arith.maximumf %33, %34 : vector<8x512xf32>
      %c0_19 = arith.constant 0 : index
      %c0_20 = arith.constant 0 : index
      %36 = vector.load %arg5[%c0_19, %c0_20] : memref<8x512xf32, #tpu.memory_space<vmem>>, vector<8x512xf32>
      tpu.vector_store %arg5[%c0_19, %c0_20], %35 {strides = array<i32>} : memref<8x512xf32, #tpu.memory_space<vmem>>, vector<8x512xf32>,
    } else {
    }
    return
  }
  func.func @transform_0(%arg0: i32, %arg1: i32) -> (i32, i32) {
    %c0_i32 = arith.constant 0 : i32
    %c0_i32_0 = arith.constant 0 : i32
    %c0_i32_1 = arith.constant 0 : i32
    return %c0_i32, %c0_i32_0 : i32, i32
  }
  func.func @transform_1(%arg0: i32, %arg1: i32) -> (i32, i32) {
    %c0_i32 = arith.constant 0 : i32
    %c0_i32_0 = arith.constant 0 : i32
    return %c0_i32, %arg1 : i32, i32
  }
  func.func @transform_2(%arg0: i32, %arg1: i32) -> (i32, i32) {
    %c0_i32 = arith.constant 0 : i32
    %c0_i32_0 = arith.constant 0 : i32
    %c0_i32_1 = arith.constant 0 : i32
    return %c0_i32, %c0_i32_0 : i32, i32
  }
  func.func @transform_3(%arg0: i32, %arg1: i32) -> (i32, i32) {
    %c0_i32 = arith.constant 0 : i32
    %c0_i32_0 = arith.constant 0 : i32
    return %c0_i32, %arg1 : i32, i32
  }
}

module attributes {stable_mosaic.version = 11 : i64} {
  func.func @_mm_bn_relu_train_tiled_kernel(%arg0: i32, %arg1: i32, %arg2: memref<8x144xbf16, #tpu.memory_space<vmem>>, %arg3: memref<144x512xbf16, #tpu.memory_space<vmem>>, %arg4: memref<8x2xf32, #tpu.memory_space<vmem>>, %arg5: memref<8x512xf32, #tpu.memory_space<vmem>>, %arg6: memref<8x1xf32, #tpu.memory_space<vmem>>, %arg7: memref<8x1xf32, #tpu.memory_space<vmem>>) attributes {dimension_semantics = [#tpu.dimension_semantics<arbitrary>, #tpu.dimension_semantics<arbitrary>], iteration_bounds = array<i64: 2, 2>, scalar_prefetch = 0 : i64, scratch_operands = 2 : i64, tpu.core_type = #tpu.core_type<tc>, window_params = [{pipeline_mode = #tpu.pipeline_mode<synchronous>, transform_indices = @transform_0, window_bounds = array<i64: 8, 144>}, {transform_indices = @transform_1, window_bounds = array<i64: 144, 512>}, {pipeline_mode = #tpu.pipeline_mode<synchronous>, transform_indices = @transform_2, window_bounds = array<i64: 8, 2>}, {transform_indices = @transform_3, window_bounds = array<i64: 8, 512>}]} {
    %c0_i32 = arith.constant 0 : i32
    %0 = arith.cmpi eq, %arg0, %c0_i32 : i32
    %c0_i32_0 = arith.constant 0 : i32
    %1 = arith.cmpi eq, %arg1, %c0_i32_0 : i32
    %2 = arith.andi %0, %1 : i1
    %3 = arith.extui %2 : i1 to i32
    %c0_i32_1 = arith.constant 0 : i32
    %4 = arith.cmpi ne, %3, %c0_i32_1 : i32
    scf.if %4 {
      %cst_8 = arith.constant 0.000000e+00 : f32
      %14 = vector.broadcast %cst_8 : f32 to vector<8x1xf32>
      %c0_9 = arith.constant 0 : index
      %c0_10 = arith.constant 0 : index
      %15 = vector.load %arg6[%c0_9, %c0_10] : memref<8x1xf32, #tpu.memory_space<vmem>>, vector<8x1xf32>
      tpu.vector_store %arg6[%c0_9, %c0_10], %14 {strides = array<i32>} : memref<8x1xf32, #tpu.memory_space<vmem>>, vector<8x1xf32>,
      %cst_11 = arith.constant 0.000000e+00 : f32
      %16 = vector.broadcast %cst_11 : f32 to vector<8x1xf32>
      %c0_12 = arith.constant 0 : index
      %c0_13 = arith.constant 0 : index
      %17 = vector.load %arg7[%c0_12, %c0_13] : memref<8x1xf32, #tpu.memory_space<vmem>>, vector<8x1xf32>
      tpu.vector_store %arg7[%c0_12, %c0_13], %16 {strides = array<i32>} : memref<8x1xf32, #tpu.memory_space<vmem>>, vector<8x1xf32>,
    } else {
    }
    %c0 = arith.constant 0 : index
    %c0_2 = arith.constant 0 : index
    %5 = vector.load %arg2[%c0, %c0_2] : memref<8x144xbf16, #tpu.memory_space<vmem>>, vector<8x144xbf16>
    %c0_3 = arith.constant 0 : index
    %c0_4 = arith.constant 0 : index
    %6 = vector.load %arg3[%c0_3, %c0_4] : memref<144x512xbf16, #tpu.memory_space<vmem>>, vector<144x512xbf16>
    %cst = arith.constant dense<0.000000e+00> : vector<8x512xf32>
    %7 = tpu.matmul %5, %6, %cst {dimension_numbers = #tpu.dot_dimension_numbers<[1], [0], [0], [1], [0, 0, 1, 1], [], []>} : vector<8x144xbf16>, vector<144x512xbf16>, vector<8x512xf32> -> vector<8x512xf32>
    %c0_i32_5 = arith.constant 0 : i32
    %8 = arith.cmpi eq, %arg0, %c0_i32_5 : i32
    %9 = arith.extui %8 : i1 to i32
    %c0_i32_6 = arith.constant 0 : i32
    %10 = arith.cmpi ne, %9, %c0_i32_6 : i32
    scf.if %10 {
      %c0_8 = arith.constant 0 : index
      %c0_9 = arith.constant 0 : index
      %14 = vector.load %arg6[%c0_8, %c0_9] : memref<8x1xf32, #tpu.memory_space<vmem>>, vector<8x1xf32>
      %cst_10 = arith.constant dense<0.000000e+00> : vector<8xf32>
      %15 = vector.multi_reduction <add>, %7, %cst_10 [1] : vector<8x512xf32> to vector<8xf32>
      %16 = vector.shape_cast %15 : vector<8xf32> to vector<8x1xf32>
      %17 = arith.addf %14, %16 : vector<8x1xf32>
      %c0_11 = arith.constant 0 : index
      %c0_12 = arith.constant 0 : index
      %18 = vector.load %arg6[%c0_11, %c0_12] : memref<8x1xf32, #tpu.memory_space<vmem>>, vector<8x1xf32>
      tpu.vector_store %arg6[%c0_11, %c0_12], %17 {strides = array<i32>} : memref<8x1xf32, #tpu.memory_space<vmem>>, vector<8x1xf32>,
      %c0_13 = arith.constant 0 : index
      %c0_14 = arith.constant 0 : index
      %19 = vector.load %arg7[%c0_13, %c0_14] : memref<8x1xf32, #tpu.memory_space<vmem>>, vector<8x1xf32>
      %20 = arith.mulf %7, %7 : vector<8x512xf32>
      %cst_15 = arith.constant dense<0.000000e+00> : vector<8xf32>
      %21 = vector.multi_reduction <add>, %20, %cst_15 [1] : vector<8x512xf32> to vector<8xf32>
      %22 = vector.shape_cast %21 : vector<8xf32> to vector<8x1xf32>
      %23 = arith.addf %19, %22 : vector<8x1xf32>
      %c0_16 = arith.constant 0 : index
      %c0_17 = arith.constant 0 : index
      %24 = vector.load %arg7[%c0_16, %c0_17] : memref<8x1xf32, #tpu.memory_space<vmem>>, vector<8x1xf32>
      tpu.vector_store %arg7[%c0_16, %c0_17], %23 {strides = array<i32>} : memref<8x1xf32, #tpu.memory_space<vmem>>, vector<8x1xf32>,
      %c0_18 = arith.constant 0 : index
      %c0_19 = arith.constant 0 : index
      %25 = vector.load %arg5[%c0_18, %c0_19] : memref<8x512xf32, #tpu.memory_space<vmem>>, vector<8x512xf32>
      tpu.vector_store %arg5[%c0_18, %c0_19], %7 {strides = array<i32>} : memref<8x512xf32, #tpu.memory_space<vmem>>, vector<8x512xf32>,
    } else {
    }
    %c1_i32 = arith.constant 1 : i32
    %11 = arith.cmpi eq, %arg0, %c1_i32 : i32
    %12 = arith.extui %11 : i1 to i32
    %c0_i32_7 = arith.constant 0 : i32
    %13 = arith.cmpi ne, %12, %c0_i32_7 : i32
    scf.if %13 {
      %c0_8 = arith.constant 0 : index
      %c0_9 = arith.constant 0 : index
      %14 = vector.load %arg6[%c0_8, %c0_9] : memref<8x1xf32, #tpu.memory_space<vmem>>, vector<8x1xf32>
      %cst_10 = arith.constant 0.00115740742 : f32
      %15 = vector.broadcast %cst_10 : f32 to vector<8x1xf32>
      %16 = arith.mulf %14, %15 : vector<8x1xf32>
      %c0_11 = arith.constant 0 : index
      %c0_12 = arith.constant 0 : index
      %17 = vector.load %arg7[%c0_11, %c0_12] : memref<8x1xf32, #tpu.memory_space<vmem>>, vector<8x1xf32>
      %cst_13 = arith.constant 0.00115740742 : f32
      %18 = vector.broadcast %cst_13 : f32 to vector<8x1xf32>
      %19 = arith.mulf %17, %18 : vector<8x1xf32>
      %20 = arith.mulf %16, %16 : vector<8x1xf32>
      %21 = arith.subf %19, %20 : vector<8x1xf32>
      %cst_14 = arith.constant 9.99999974E-6 : f32
      %22 = vector.broadcast %cst_14 : f32 to vector<8x1xf32>
      %23 = arith.addf %21, %22 : vector<8x1xf32>
      %24 = math.rsqrt %23 : vector<8x1xf32>
      %c0_15 = arith.constant 0 : index
      %c0_16 = arith.constant 0 : index
      %25 = vector.load %arg4[%c0_15, %c0_16] : memref<8x2xf32, #tpu.memory_space<vmem>>, vector<8x1xf32>
      %26 = arith.mulf %24, %25 : vector<8x1xf32>
      %c0_17 = arith.constant 0 : index
      %c1 = arith.constant 1 : index
      %27 = vector.load %arg4[%c0_17, %c1] : memref<8x2xf32, #tpu.memory_space<vmem>>, vector<8x1xf32>
      %28 = arith.mulf %16, %26 : vector<8x1xf32>
      %29 = arith.subf %27, %28 : vector<8x1xf32>
      %30 = vector.broadcast %26 : vector<8x1xf32> to vector<8x512xf32>
      %31 = arith.mulf %7, %30 : vector<8x512xf32>
      %32 = vector.broadcast %29 : vector<8x1xf32> to vector<8x512xf32>
      %33 = arith.addf %31, %32 : vector<8x512xf32>
      %cst_18 = arith.constant 0.000000e+00 : f32
      %34 = vector.broadcast %cst_18 : f32 to vector<8x512xf32>
      %35 = arith.maximumf %33, %34 : vector<8x512xf32>
      %c0_19 = arith.constant 0 : index
      %c0_20 = arith.constant 0 : index
      %36 = vector.load %arg5[%c0_19, %c0_20] : memref<8x512xf32, #tpu.memory_space<vmem>>, vector<8x512xf32>
      tpu.vector_store %arg5[%c0_19, %c0_20], %35 {strides = array<i32>} : memref<8x512xf32, #tpu.memory_space<vmem>>, vector<8x512xf32>,
    } else {
    }
    return
  }
  func.func @transform_0(%arg0: i32, %arg1: i32) -> (i32, i32) {
    %c0_i32 = arith.constant 0 : i32
    %c0_i32_0 = arith.constant 0 : i32
    %c0_i32_1 = arith.constant 0 : i32
    return %c0_i32, %c0_i32_0 : i32, i32
  }
  func.func @transform_1(%arg0: i32, %arg1: i32) -> (i32, i32) {
    %c0_i32 = arith.constant 0 : i32
    %c0_i32_0 = arith.constant 0 : i32
    return %c0_i32, %arg1 : i32, i32
  }
  func.func @transform_2(%arg0: i32, %arg1: i32) -> (i32, i32) {
    %c0_i32 = arith.constant 0 : i32
    %c0_i32_0 = arith.constant 0 : i32
    %c0_i32_1 = arith.constant 0 : i32
    return %c0_i32, %c0_i32_0 : i32, i32
  }
  func.func @transform_3(%arg0: i32, %arg1: i32) -> (i32, i32) {
    %c0_i32 = arith.constant 0 : i32
    %c0_i32_0 = arith.constant 0 : i32
    return %c0_i32, %arg1 : i32, i32
  }
}

module attributes {stable_mosaic.version = 11 : i64} {
  func.func @_mm_bn_relu_train_tiled_kernel(%arg0: i32, %arg1: i32, %arg2: memref<1x80xbf16, #tpu.memory_space<vmem>>, %arg3: memref<80x512xbf16, #tpu.memory_space<vmem>>, %arg4: memref<1x2xf32, #tpu.memory_space<vmem>>, %arg5: memref<1x512xf32, #tpu.memory_space<vmem>>, %arg6: memref<1x1xf32, #tpu.memory_space<vmem>>, %arg7: memref<1x1xf32, #tpu.memory_space<vmem>>) attributes {dimension_semantics = [#tpu.dimension_semantics<arbitrary>, #tpu.dimension_semantics<arbitrary>], iteration_bounds = array<i64: 2, 2>, scalar_prefetch = 0 : i64, scratch_operands = 2 : i64, tpu.core_type = #tpu.core_type<tc>, window_params = [{pipeline_mode = #tpu.pipeline_mode<synchronous>, transform_indices = @transform_0, window_bounds = array<i64: 1, 80>}, {transform_indices = @transform_1, window_bounds = array<i64: 80, 512>}, {pipeline_mode = #tpu.pipeline_mode<synchronous>, transform_indices = @transform_2, window_bounds = array<i64: 1, 2>}, {transform_indices = @transform_3, window_bounds = array<i64: 1, 512>}]} {
    %c0_i32 = arith.constant 0 : i32
    %0 = arith.cmpi eq, %arg0, %c0_i32 : i32
    %c0_i32_0 = arith.constant 0 : i32
    %1 = arith.cmpi eq, %arg1, %c0_i32_0 : i32
    %2 = arith.andi %0, %1 : i1
    %3 = arith.extui %2 : i1 to i32
    %c0_i32_1 = arith.constant 0 : i32
    %4 = arith.cmpi ne, %3, %c0_i32_1 : i32
    scf.if %4 {
      %cst_8 = arith.constant 0.000000e+00 : f32
      %14 = vector.broadcast %cst_8 : f32 to vector<1x1xf32>
      %c0_9 = arith.constant 0 : index
      %c0_10 = arith.constant 0 : index
      %15 = vector.load %arg6[%c0_9, %c0_10] : memref<1x1xf32, #tpu.memory_space<vmem>>, vector<1x1xf32>
      tpu.vector_store %arg6[%c0_9, %c0_10], %14 {strides = array<i32>} : memref<1x1xf32, #tpu.memory_space<vmem>>, vector<1x1xf32>,
      %cst_11 = arith.constant 0.000000e+00 : f32
      %16 = vector.broadcast %cst_11 : f32 to vector<1x1xf32>
      %c0_12 = arith.constant 0 : index
      %c0_13 = arith.constant 0 : index
      %17 = vector.load %arg7[%c0_12, %c0_13] : memref<1x1xf32, #tpu.memory_space<vmem>>, vector<1x1xf32>
      tpu.vector_store %arg7[%c0_12, %c0_13], %16 {strides = array<i32>} : memref<1x1xf32, #tpu.memory_space<vmem>>, vector<1x1xf32>,
    } else {
    }
    %c0 = arith.constant 0 : index
    %c0_2 = arith.constant 0 : index
    %5 = vector.load %arg2[%c0, %c0_2] : memref<1x80xbf16, #tpu.memory_space<vmem>>, vector<1x80xbf16>
    %c0_3 = arith.constant 0 : index
    %c0_4 = arith.constant 0 : index
    %6 = vector.load %arg3[%c0_3, %c0_4] : memref<80x512xbf16, #tpu.memory_space<vmem>>, vector<80x512xbf16>
    %cst = arith.constant dense<0.000000e+00> : vector<1x512xf32>
    %7 = tpu.matmul %5, %6, %cst {dimension_numbers = #tpu.dot_dimension_numbers<[1], [0], [0], [1], [0, 0, 1, 1], [], []>} : vector<1x80xbf16>, vector<80x512xbf16>, vector<1x512xf32> -> vector<1x512xf32>
    %c0_i32_5 = arith.constant 0 : i32
    %8 = arith.cmpi eq, %arg0, %c0_i32_5 : i32
    %9 = arith.extui %8 : i1 to i32
    %c0_i32_6 = arith.constant 0 : i32
    %10 = arith.cmpi ne, %9, %c0_i32_6 : i32
    scf.if %10 {
      %c0_8 = arith.constant 0 : index
      %c0_9 = arith.constant 0 : index
      %14 = vector.load %arg6[%c0_8, %c0_9] : memref<1x1xf32, #tpu.memory_space<vmem>>, vector<1x1xf32>
      %cst_10 = arith.constant dense<0.000000e+00> : vector<1xf32>
      %15 = vector.multi_reduction <add>, %7, %cst_10 [1] : vector<1x512xf32> to vector<1xf32>
      %16 = vector.shape_cast %15 : vector<1xf32> to vector<1x1xf32>
      %17 = arith.addf %14, %16 : vector<1x1xf32>
      %c0_11 = arith.constant 0 : index
      %c0_12 = arith.constant 0 : index
      %18 = vector.load %arg6[%c0_11, %c0_12] : memref<1x1xf32, #tpu.memory_space<vmem>>, vector<1x1xf32>
      tpu.vector_store %arg6[%c0_11, %c0_12], %17 {strides = array<i32>} : memref<1x1xf32, #tpu.memory_space<vmem>>, vector<1x1xf32>,
      %c0_13 = arith.constant 0 : index
      %c0_14 = arith.constant 0 : index
      %19 = vector.load %arg7[%c0_13, %c0_14] : memref<1x1xf32, #tpu.memory_space<vmem>>, vector<1x1xf32>
      %20 = arith.mulf %7, %7 : vector<1x512xf32>
      %cst_15 = arith.constant dense<0.000000e+00> : vector<1xf32>
      %21 = vector.multi_reduction <add>, %20, %cst_15 [1] : vector<1x512xf32> to vector<1xf32>
      %22 = vector.shape_cast %21 : vector<1xf32> to vector<1x1xf32>
      %23 = arith.addf %19, %22 : vector<1x1xf32>
      %c0_16 = arith.constant 0 : index
      %c0_17 = arith.constant 0 : index
      %24 = vector.load %arg7[%c0_16, %c0_17] : memref<1x1xf32, #tpu.memory_space<vmem>>, vector<1x1xf32>
      tpu.vector_store %arg7[%c0_16, %c0_17], %23 {strides = array<i32>} : memref<1x1xf32, #tpu.memory_space<vmem>>, vector<1x1xf32>,
      %c0_18 = arith.constant 0 : index
      %c0_19 = arith.constant 0 : index
      %25 = vector.load %arg5[%c0_18, %c0_19] : memref<1x512xf32, #tpu.memory_space<vmem>>, vector<1x512xf32>
      tpu.vector_store %arg5[%c0_18, %c0_19], %7 {strides = array<i32>} : memref<1x512xf32, #tpu.memory_space<vmem>>, vector<1x512xf32>,
    } else {
    }
    %c1_i32 = arith.constant 1 : i32
    %11 = arith.cmpi eq, %arg0, %c1_i32 : i32
    %12 = arith.extui %11 : i1 to i32
    %c0_i32_7 = arith.constant 0 : i32
    %13 = arith.cmpi ne, %12, %c0_i32_7 : i32
    scf.if %13 {
      %c0_8 = arith.constant 0 : index
      %c0_9 = arith.constant 0 : index
      %14 = vector.load %arg6[%c0_8, %c0_9] : memref<1x1xf32, #tpu.memory_space<vmem>>, vector<1x1xf32>
      %cst_10 = arith.constant 0.00115740742 : f32
      %15 = vector.broadcast %cst_10 : f32 to vector<1x1xf32>
      %16 = arith.mulf %14, %15 : vector<1x1xf32>
      %c0_11 = arith.constant 0 : index
      %c0_12 = arith.constant 0 : index
      %17 = vector.load %arg7[%c0_11, %c0_12] : memref<1x1xf32, #tpu.memory_space<vmem>>, vector<1x1xf32>
      %cst_13 = arith.constant 0.00115740742 : f32
      %18 = vector.broadcast %cst_13 : f32 to vector<1x1xf32>
      %19 = arith.mulf %17, %18 : vector<1x1xf32>
      %20 = arith.mulf %16, %16 : vector<1x1xf32>
      %21 = arith.subf %19, %20 : vector<1x1xf32>
      %cst_14 = arith.constant 9.99999974E-6 : f32
      %22 = vector.broadcast %cst_14 : f32 to vector<1x1xf32>
      %23 = arith.addf %21, %22 : vector<1x1xf32>
      %24 = math.rsqrt %23 : vector<1x1xf32>
      %c0_15 = arith.constant 0 : index
      %c0_16 = arith.constant 0 : index
      %25 = vector.load %arg4[%c0_15, %c0_16] : memref<1x2xf32, #tpu.memory_space<vmem>>, vector<1x1xf32>
      %26 = arith.mulf %24, %25 : vector<1x1xf32>
      %c0_17 = arith.constant 0 : index
      %c1 = arith.constant 1 : index
      %27 = vector.load %arg4[%c0_17, %c1] : memref<1x2xf32, #tpu.memory_space<vmem>>, vector<1x1xf32>
      %28 = arith.mulf %16, %26 : vector<1x1xf32>
      %29 = arith.subf %27, %28 : vector<1x1xf32>
      %30 = vector.broadcast %26 : vector<1x1xf32> to vector<1x512xf32>
      %31 = arith.mulf %7, %30 : vector<1x512xf32>
      %32 = vector.broadcast %29 : vector<1x1xf32> to vector<1x512xf32>
      %33 = arith.addf %31, %32 : vector<1x512xf32>
      %cst_18 = arith.constant 0.000000e+00 : f32
      %34 = vector.broadcast %cst_18 : f32 to vector<1x512xf32>
      %35 = arith.maximumf %33, %34 : vector<1x512xf32>
      %c0_19 = arith.constant 0 : index
      %c0_20 = arith.constant 0 : index
      %36 = vector.load %arg5[%c0_19, %c0_20] : memref<1x512xf32, #tpu.memory_space<vmem>>, vector<1x512xf32>
      tpu.vector_store %arg5[%c0_19, %c0_20], %35 {strides = array<i32>} : memref<1x512xf32, #tpu.memory_space<vmem>>, vector<1x512xf32>,
    } else {
    }
    return
  }
  func.func @transform_0(%arg0: i32, %arg1: i32) -> (i32, i32) {
    %c0_i32 = arith.constant 0 : i32
    %c0_i32_0 = arith.constant 0 : i32
    %c0_i32_1 = arith.constant 0 : i32
    return %c0_i32, %c0_i32_0 : i32, i32
  }
  func.func @transform_1(%arg0: i32, %arg1: i32) -> (i32, i32) {
    %c0_i32 = arith.constant 0 : i32
    %c0_i32_0 = arith.constant 0 : i32
    return %c0_i32, %arg1 : i32, i32
  }
  func.func @transform_2(%arg0: i32, %arg1: i32) -> (i32, i32) {
    %c0_i32 = arith.constant 0 : i32
    %c0_i32_0 = arith.constant 0 : i32
    %c0_i32_1 = arith.constant 0 : i32
    return %c0_i32, %c0_i32_0 : i32, i32
  }
  func.func @transform_3(%arg0: i32, %arg1: i32) -> (i32, i32) {
    %c0_i32 = arith.constant 0 : i32
    %c0_i32_0 = arith.constant 0 : i32
    return %c0_i32, %arg1 : i32, i32
  }
}

</mosaic_0001>

<bundles_post_ra>
// kernel: _snn_c_apply.14
= control target key start
LH: loop header
LB: loop body
LE: loop exit
PB: predicated region body
PF: predicated region fallthrough
CT: control target
= control target key end

     0   :  { %s655_s12 = smov 0   ;;  %s657_s13 = smov 0   ;;  %s767_s0 = inlined_call_operand.vmem [shape: bf16[8,16], index: 0, kind: input, shape index: {}]   ;;  %s768_s1 = inlined_call_operand.vmem [shape: bf16[16,1024], index: 1, kind: input, shape index: {}]   ;;  %s769_s2 = inlined_call_operand.vmem [shape: f32[8,2], index: 2, kind: input, shape index: {}]   ;;  %s770_s3 = inlined_call_operand.vmem [shape: f32[8,1024], index: 3, kind: output, shape index: {}]  }
   0x1   :  { %s659_s14 = smov 0   ;;  %s661_s15 = smov 0  }
   0x2   :  { %s663_s16 = smov 0   ;;  %s665_s17 = smov 0  }
   0x3   :  { %s667_s18 = smov 0  }
   0x4 LB: > { %s22_s19 = sadd.s32 1, %s620_s16  ;;  %s25_s20 = sadd.s32 1, %s624_s17  ;;  %s628_s18 = sphi %s667_s18, %s13_s18   ;;  %s624_s17 = sphi %s665_s17, %s776_s17   ;;  %s620_s16 = sphi %s663_s16, %s775_s16   ;;  %s616_s15 = sphi %s661_s15, %s774_s15   ;;  %s612_s14 = sphi %s659_s14, %s773_s14   ;;  %s608_s13 = sphi %s657_s13, %s772_s13   ;;  %s604_s12 = sphi %s655_s12, %s771_s12  }
   0x5   : > { %p23_p0 = scmp.ge.s32.totalorder %s22_s19, 2  ;;  %s53_s21 = sadd.s32 1, %s608_s13 }
   0x6   : > { %p60_p1 = scmp.ne.s32.totalorder %s608_s13, %s604_s12  ;;  %p61_p2 = scmp.eq.s32.totalorder %s628_s18, 0 }
   0x7   : > { %s778_s19 = smov (%p23_p0, %s22_s19), 0  ;;  %s780_s20 = smov (!%p23_p0, %s25_s20), %s624_s17 }
   0x8   : > { %s50_s22 = ssub.s32 %s620_s16, %s778_s19  ;;  %p62_p3 = por %p61_p2, %p60_p1 }
   0x9   : > { %p27_p4 = scmp.ge.s32.totalorder %s780_s20, 2  ;;  %p51_p5 = scmp.eq.s32.totalorder %s50_s22, 0 }
   0xa   : > { %p483_p6 = scmp.ge.s32.totalorder %s628_s18, 4 }
   0xb   : > { %s782_s20 = smov (%p27_p4, %s780_s20), 0 }
   0xc   : > { %s704_s23 = scalar_select %p51_p5, %s608_s13, %s53_s21  }
   0xd   : > { %139 = sbr.rel (%p483_p6) target bundleno = 24 (0x18), region = 24 }
  0x12   : > { %142 = sbr.rel (!%p62_p3) target bundleno = 24 (0x18), region = 28  ;;  %s144_s24 = sand.u32 (%p62_p3), 1, %s608_s13  }
  0x13   : > { %s501_s25 = sshll.u32 (%p62_p3), %s620_s16, 4  ;;  %s484_s26 = sshll.u32 (%p62_p3), %s144_s24, 5 }
  0x14   : > { %s149_s29 = scalar_lea.vmem (%p62_p3), %s768_s1, %s501_s25  ;;  %s146_s30 = scalar_lea.vmem (%p62_p3), [#allocation4], %s484_s26 }
  0x15   : > { %v162_v0 = vld [vmem:[%s149_s29] sm:$0xff] (%p62_p3)  ;;  %v164_v1 = vld [vmem:[%s149_s29 + $0x8] sm:$0xff] (%p62_p3) }
  0x16   : > { %v166_v2 = vld [vmem:[%s149_s29 + $0x20] sm:$0xff] (%p62_p3)  ;;  %163 = vst [vmem:[%s146_s30] sm:$0xff] (%p62_p3), %v162_v0  ;;  %165 = vst [vmem:[%s146_s30 + $0x8] sm:$0xff] (%p62_p3), %v164_v1  ;;  %v168_v3 = vld [vmem:[%s149_s29 + $0x28] sm:$0xff] (%p62_p3) }
  0x17   : > { %167 = vst [vmem:[%s146_s30 + $0x10] sm:$0xff] %v166_v2  ;;  %169 = vst [vmem:[%s146_s30 + $0x18] sm:$0xff] %v168_v3 }
  0x18 PF: > { %p487_p7 = scmp.ge.s32.totalorder %s628_s18, 1  ;;  %p174_p8 = scmp.lt.s32.totalorder %s628_s18, 5 }
  0x1a   : > { %p175_p9 = pnand %p487_p7, %p174_p8 }
  0x1b   : > { %s181_s4 = sand.u32 (!%p175_p9), 1, %s604_s12   ;;  %s489_s5 = sshll.u32 (!%p175_p9), %s612_s14, 2 }
  0x1c   : > { %178 = sbr.rel (%p175_p9) target bundleno = 678 (0x2a6), region = 51  ;;  %s488_s6 = sshll.u32 (!%p175_p9), %s181_s4, 5 }
  0x1d   : > { %p206_p10 = scmp.lt.s32.totalorder (!%p175_p9), %s489_s5, 7  ;;  %p212_p11 = scmp.eq.s32.totalorder (!%p175_p9), %s616_s15, 0 }
  0x1e   : > { %p213_p12 = scmp.eq.s32.totalorder (!%p175_p9), %s612_s14, 0  ;;  %s183_s11 = scalar_lea.vmem (!%p175_p9), [#allocation4], %s488_s6 }
  0x20   : > { %p214_p13 = pnand (!%p175_p9), %p213_p12, %p212_p11 }
  0x21   : > { %s784_s5 = smov (!%p206_p10, %s489_s5), 7 }
  0x22   : > { %s490_s7 = sshll.u32 %s784_s5, 3  ;;  %217 = sbr.rel (%p214_p13) target bundleno = 41 (0x29), region = 59 }
  0x23   : > { %s721_s10 = scalar_lea.vmem %s770_s3, %s490_s7 }
  0x27   : > { %vm218_vm0 = vcmask 7168   ;;  %v630_v4 = vmov 0.0  }
  0x28   : > { %219 = vst.msk [vmem:[#allocation2] sm:$0xff] %vm218_vm0, %v630_v4  ;;  %220 = vst.msk [vmem:[#allocation3] sm:$0xff] %vm218_vm0, %v630_v4 }
  0x29 PF: > { %v563_v5 = vld [vmem:[%s183_s11 + $0x4] ss:$16 sps:$4 sm:$0xff]   ;;  %v565_v6 = vld [vmem:[%s183_s11 + $0xc] ss:$16 sps:$4 sm:$0xff]   ;;  %v631_v7 = vmov 0   ;;  %vm246_vm1 = vcmask 130048  }
  0x2a   : > { %282 = vmatprep.mubr.bf16.mxu0 %v631_v7  ;;  %323 = vmatprep.mubr.bf16.mxu1 %v631_v7  ;;  %v567_v8 = vld [vmem:[%s183_s11] ss:$16 sps:$4 sm:$0xff]   ;;  %v568_v9 = vld [vmem:[%s183_s11 + $0x8] ss:$16 sps:$4 sm:$0xff]   ;;  %p497_p0 = scmp.ne.s32.totalorder %s616_s15, 0 }
  0x2b   : > { %264 = vmatprep.subr.bf16.mxu0 %v563_v5  ;;  %305 = vmatprep.subr.bf16.mxu1 %v565_v6  ;;  %v221_v10 = vld [vmem:[%s767_s0] sm:$0xf] }
  0x2c   : > { %265 = vmatpush1.bf16.msra.mxu0 %v567_v8  ;;  %306 = vmatpush1.bf16.msra.mxu1 %v568_v9 }
  0x2f   : > { %495 = vmatmul.mubr.msk.bf16.vlgmr.msra.gmra.mxu0 %vm246_vm1, %v221_v10  ;;  %496 = vmatmul.mubr.msk.bf16.vlgmr.msra.gmra.mxu1 %vm246_vm1, %v221_v10 }
  0xef   : > { %v284_v11 = vpop.f32.mrf.mxu0  ;;  %v726_v12 = vpop.f32.mrf.mxu1 }
  0xf1   : > { %v286_v13 = vpop.f32.mrf.mxu0  ;;  %v327_v14 = vpop.f32.mrf.mxu1  ;;  %334 = sbr.rel (%p497_p0) target bundleno = 397 (0x18d), region = 63 }
  0xf3   : > { %v288_v15 = vpop.f32.mrf.mxu0  ;;  %v329_v16 = vpop.f32.mrf.mxu1 }
  0xf5   : > { %v289_v17 = vpop.f32.mrf.mxu0  ;;  %v330_v18 = vpop.f32.mrf.mxu1 }
  0xf6   : > { %v336_v19 = vadd.f32 %v286_v13, %v284_v11  ;;  %v345_v20 = vmul.f32 %v284_v11, %v284_v11  ;;  %v346_v21 = vmul.f32 %v286_v13, %v286_v13  ;;  %v347_v22 = vmul.f32 %v726_v12, %v726_v12  ;;  %356 = vst [vmem:[%s721_s10] sm:$0xff] %v284_v11  ;;  %v335_v29 = vld [vmem:[#allocation2] sm:$0xff]  ;;  %v344_v32 = vld [vmem:[#allocation3] sm:$0xff] }
  0xf7   : > { %357 = vst [vmem:[%s721_s10 + $0x8] sm:$0xff] %v286_v13  ;;  %v348_v24 = vmul.f32 %v327_v14, %v327_v14  ;;  %358 = vst [vmem:[%s721_s10 + $0x10] sm:$0xff] %v726_v12  ;;  %vm342_vm2 = vcmask 7168  }
  0xf8   : > { %v337_v23 = vadd.f32 %v336_v19, %v726_v12  ;;  %v349_v25 = vadd.f32 %v346_v21, %v345_v20  ;;  %359 = vst [vmem:[%s721_s10 + $0x18] sm:$0xff] %v327_v14 }
  0xfa   : > { %v338_v26 = vadd.f32 %v337_v23, %v327_v14  ;;  %v350_v27 = vadd.f32 %v349_v25, %v347_v22 }
  0xfc   : > { %339 = vadd.xlane.f32.xlu0 %v338_v26  ;;  %v351_v28 = vadd.f32 %v350_v27, %v348_v24 }
 0x100   : > { %352 = vadd.xlane.f32.xlu0 %v351_v28 }
 0x185   : > { %v340_v30 = vpop.xlane.xlu0 %339 }
 0x186   : > { %v341_v31 = vadd.f32 %v340_v30, %v335_v29 }
 0x188   : > { %343 = vst.msk [vmem:[#allocation2] sm:$0xff] %vm342_vm2, %v341_v31 }
 0x189   : > { %v353_v33 = vpop.xlane.xlu0 %352 }
 0x18a   : > { %v354_v34 = vadd.f32 %v353_v33, %v344_v32 }
 0x18c   : > { %355 = vst.msk [vmem:[#allocation3] sm:$0xff] %vm342_vm2, %v354_v34 }
 0x18d PF: > { %p498_p1 = scmp.ne.s32.totalorder %s616_s15, 1 }
 0x18e   : > { %s634_s15 = smov (!%p498_p1), 1  }
 0x18f   : > { %363 = sbr.rel (%p498_p1) target bundleno = 678 (0x2a6), region = 67 }
 0x194   : > { %v364_v35 = vld [vmem:[#allocation2] sm:$0xff]  ;;  %v366_v36 = vld [vmem:[#allocation3] sm:$0xff]  ;;  %v632_v39 = vmov 0   ;;  %v633_v43 = vmov 1  }
 0x195   : > { %v365_v37 = vmul.f32 0.0011574074, %v364_v35  ;;  %v367_v38 = vmul.f32 0.0011574074, %v366_v36  ;;  %569 = vset.pattern.permute.xlu0 %v632_v39  ;;  %570 = vset.pattern.permute.xlu1 %v633_v43  ;;  %v372_v44 = vld [vmem:[%s769_s2] sm:$0xff] }
 0x197   : > { %v368_v40 = vmul.f32 %v365_v37, %v365_v37 }
 0x199   : > { %v369_v41 = vsub.f32 %v367_v38, %v368_v40 }
 0x19b   : > { %v370_v42 = vadd.f32 1e-05, %v369_v41 }
 0x19d   : > { %572 = vrsqrt.f32 %v370_v42 }
 0x1aa   : > { %v573_v45 = vpop.eup %572 }
 0x1ab   : > { %v373_v46 = vmul.f32 %v573_v45, %v372_v44 }
 0x1ad   : > { %v374_v47 = vmul.f32 %v373_v46, %v365_v37 }
 0x1af   : > { %376 = vrot.lane.b32.xlu0 %v374_v47, %s634_s15 }
 0x1b3   : > { %382 = vperm.xlu0 %569, %v373_v46  }
 0x1b7   : > { %571 = vset.pattern.permute.xlu0 %v633_v43 }
 0x221   : > { %v377_v48 = vpop.permute.xlu0 %376 }
 0x222   : > { %v379_v49 = vsub.f32 %v372_v44, %v377_v48 }
 0x224   : > { %391 = vperm.xlu1 %570, %v379_v49  }
 0x22e   : > { %v383_v50 = vpop.permute.xlu0 %382 }
 0x22f   : > { %v385_v51 = vmul.f32 %v383_v50, %v284_v11  ;;  %v386_v52 = vmul.f32 %v383_v50, %v286_v13  ;;  %v387_v53 = vmul.f32 %v383_v50, %v726_v12  ;;  %v388_v54 = vmul.f32 %v383_v50, %v327_v14 }
 0x29f   : > { %v392_v55 = vpop.permute.xlu1 %391 }
 0x2a0   : > { %v394_v56 = vadd.f32 %v392_v55, %v385_v51  ;;  %v395_v57 = vadd.f32 %v392_v55, %v386_v52  ;;  %v396_v58 = vadd.f32 %v392_v55, %v387_v53  ;;  %v397_v59 = vadd.f32 %v392_v55, %v388_v54 }
 0x2a2   : > { %v398_v60 = vmax.f32 %v394_v56, 0.0  ;;  %v399_v61 = vmax.f32 %v395_v57, 0.0  ;;  %v400_v62 = vmax.f32 %v396_v58, 0.0  ;;  %v401_v63 = vmax.f32 %v397_v59, 0.0 }
 0x2a4   : > { %402 = vst [vmem:[%s721_s10] sm:$0xff] %v398_v60  ;;  %403 = vst [vmem:[%s721_s10 + $0x8] sm:$0xff] %v399_v61 }
 0x2a5   : > { %404 = vst [vmem:[%s721_s10 + $0x10] sm:$0xff] %v400_v62  ;;  %405 = vst [vmem:[%s721_s10 + $0x18] sm:$0xff] %v401_v63 }
 0x2a6 PF: > { %s13_s18 = sadd.s32 1, %s628_s18   ;;  %s771_s12 = smov %s608_s13 }
 0x2a7   : > { %p10_p2 = scmp.ge.s32.totalorder %s13_s18, 6   ;;  %s772_s13 = smov %s704_s23 }
 0x2a8   : > { %s773_s14 = smov %s620_s16  ;;  %s774_s15 = smov %s624_s17 }
 0x2a9   : > { %s775_s16 = smov %s778_s19  ;;  %s776_s17 = smov %s782_s20 }
 0x2aa   :  { %12 = sbr.rel (!%p10_p2) target bundleno = 4 (0x4), region = 102 }

// kernel: _snn_c_apply.15
= control target key start
LH: loop header
LB: loop body
LE: loop exit
PB: predicated region body
PF: predicated region fallthrough
CT: control target
= control target key end

     0   :  { %v251_v1 = vmov 0   ;;  %vm82_vm0 = vcmask 654336   ;;  %v252_v38 = vmov 1   ;;  %s253_s9 = smov 1   ;;  %s325_s1 = inlined_call_operand.vmem [shape: bf16[80,256], index: 1, kind: input, shape index: {}]   ;;  %s326_s0 = inlined_call_operand.vmem [shape: bf16[16,80], index: 0, kind: input, shape index: {}]   ;;  %s327_s2 = inlined_call_operand.vmem [shape: f32[16,2], index: 2, kind: input, shape index: {}]   ;;  %s328_s3 = inlined_call_operand.vmem [shape: f32[16,256], index: 3, kind: output, shape index: {}]  }
   0x1   :  { %v231_v0 = vld [vmem:[%s325_s1 + $0x44] ss:$8 sps:$4 sm:$0xff]   ;;  %118 = vmatprep.mubr.bf16.mxu0 %v251_v1  ;;  %228 = vset.pattern.permute.xlu1 %v251_v1  ;;  %v233_v2 = vld [vmem:[%s325_s1 + $0x40] ss:$8 sps:$4 sm:$0xff]   ;;  %v234_v3 = vld [vmem:[%s325_s1 + $0x34] ss:$8 sps:$4 sm:$0xff]  }
   0x2   :  { %92 = vmatprep.subr.bf16.mxu0 %v231_v0  ;;  %v236_v4 = vld [vmem:[%s325_s1 + $0x30] ss:$8 sps:$4 sm:$0xff]   ;;  %v237_v5 = vld [vmem:[%s325_s1 + $0x24] ss:$8 sps:$4 sm:$0xff]   ;;  %v239_v6 = vld [vmem:[%s325_s1 + $0x20] ss:$8 sps:$4 sm:$0xff]   ;;  %229 = vset.pattern.permute.xlu0 %v252_v38 }
   0x3   :  { %93 = vmatpush1.bf16.msra.mxu0 %v233_v2  ;;  %v240_v7 = vld [vmem:[%s325_s1 + $0x14] ss:$8 sps:$4 sm:$0xff]   ;;  %v242_v8 = vld [vmem:[%s325_s1 + $0x10] ss:$8 sps:$4 sm:$0xff]   ;;  %v243_v9 = vld [vmem:[%s325_s1 + $0x4] ss:$8 sps:$4 sm:$0xff]  }
   0x4   :  { %94 = vmatprep.subr.bf16.mxu0 %v234_v3  ;;  %v245_v10 = vld [vmem:[%s325_s1] ss:$8 sps:$4 sm:$0xff]  }
   0x5   :  { %v246_v11 = vld [vmem:[%s326_s0] sm:$0xff]   ;;  %v158_v42 = vld [vmem:[%s327_s2 + $0x8] sm:$0xff] }
   0x6   :  { %v157_v39 = vld [vmem:[%s327_s2] sm:$0xff] }
   0x7   :  { %95 = vmatpush1.bf16.msra.mxu0 %v236_v4 }
   0x8   :  { %96 = vmatprep.subr.bf16.mxu0 %v237_v5 }
   0xb   :  { %97 = vmatpush1.bf16.msra.mxu0 %v239_v6 }
   0xc   :  { %98 = vmatprep.subr.bf16.mxu0 %v240_v7 }
   0xf   :  { %99 = vmatpush1.bf16.msra.mxu0 %v242_v8 }
  0x10   :  { %100 = vmatprep.subr.bf16.mxu0 %v243_v9 }
  0x13   :  { %101 = vmatpush1.bf16.msra.mxu0 %v245_v10 }
  0x16   :  { %224 = vmatmul.mubr.msk.bf16.vlgmr.msra.gmra.mxu0 %vm82_vm0, %v246_v11 }
  0xd6   :  { %v120_v12 = vpop.f32.mrf.mxu0 }
  0xd7   :  { %v137_v15 = vmul.f32 %v120_v12, %v120_v12 }
  0xd8   :  { %v122_v13 = vpop.f32.mrf.mxu0 }
  0xd9   :  { %v129_v14 = vadd.f32 %v122_v13, %v120_v12  ;;  %v138_v16 = vmul.f32 %v122_v13, %v122_v13 }
  0xda   :  { %v124_v17 = vpop.f32.mrf.mxu0 }
  0xdb   :  { %130 = vadd.xlane.f32.xlu0 %v129_v14  ;;  %v141_v18 = vadd.f32 %v138_v16, %v137_v15  ;;  %v139_v22 = vmul.f32 %v124_v17, %v124_v17 }
  0xdc   :  { %v126_v19 = vpop.f32.mrf.mxu0 }
  0xdd   :  { %v140_v20 = vmul.f32 %v126_v19, %v126_v19  ;;  %142 = vadd.xlane.f32.xlu1 %v141_v18  ;;  %v132_v21 = vadd.f32 %v126_v19, %v124_v17 }
  0xdf   :  { %133 = vadd.xlane.f32.xlu0 %v132_v21  ;;  %v144_v23 = vadd.f32 %v140_v20, %v139_v22 }
  0xe1   :  { %145 = vadd.xlane.f32.xlu1 %v144_v23 }
 0x164   :  { %v131_v24 = vpop.xlane.xlu0 %130 }
 0x165   :  { %v135_v25 = vmul.f32 0.0048076925, %v131_v24 }
 0x166   :  { %v143_v26 = vpop.xlane.xlu1 %142 }
 0x167   :  { %v149_v27 = vmul.f32 %v135_v25, %v135_v25  ;;  %v147_v28 = vmul.f32 0.0048076925, %v143_v26 }
 0x168   :  { %v134_v29 = vpop.xlane.xlu0 %133 }
 0x169   :  { %v151_v30 = vsub.f32 %v147_v28, %v149_v27  ;;  %v136_v31 = vmul.f32 0.0048076925, %v134_v29 }
 0x16a   :  { %v146_v32 = vpop.xlane.xlu1 %145 }
 0x16b   :  { %v153_v33 = vadd.f32 1e-05, %v151_v30  ;;  %v150_v34 = vmul.f32 %v136_v31, %v136_v31  ;;  %v148_v35 = vmul.f32 0.0048076925, %v146_v32 }
 0x16d   :  { %247 = vrsqrt.f32 %v153_v33  ;;  %v152_v36 = vsub.f32 %v148_v35, %v150_v34 }
 0x16f   :  { %v154_v37 = vadd.f32 1e-05, %v152_v36 }
 0x171   :  { %249 = vrsqrt.f32 %v154_v37 }
 0x17a   :  { %v248_v40 = vpop.eup %247 }
 0x17b   :  { %v159_v41 = vmul.f32 %v248_v40, %v157_v39 }
 0x17d   :  { %v161_v43 = vmul.f32 %v159_v41, %v135_v25 }
 0x17e   :  { %v250_v44 = vpop.eup %249 }
 0x17f   :  { %165 = vrot.lane.b32.xlu0 %v161_v43, %s253_s9  ;;  %v160_v45 = vmul.f32 %v250_v44, %v158_v42 }
 0x181   :  { %v162_v46 = vmul.f32 %v160_v45, %v136_v31 }
 0x183   :  { %167 = vrot.lane.b32.xlu1 %v162_v46, %s253_s9 }
 0x187   :  { %175 = vperm.xlu1 %228, %v159_v41  }
 0x18b   :  { %180 = vperm.xlu1 %228, %v160_v45  }
 0x18f   :  { %230 = vset.pattern.permute.xlu1 %v252_v38 }
 0x1f1   :  { %v166_v47 = vpop.permute.xlu0 %165 }
 0x1f2   :  { %v171_v48 = vsub.f32 %v157_v39, %v166_v47 }
 0x1f4   :  { %189 = vperm.xlu0 %229, %v171_v48  }
 0x1f5   :  { %v168_v49 = vpop.permute.xlu1 %167 }
 0x1f6   :  { %v172_v50 = vsub.f32 %v158_v42, %v168_v49 }
 0x1f8   :  { %194 = vperm.xlu1 %230, %v172_v50  }
 0x202   :  { %v176_v51 = vpop.permute.xlu1 %175 }
 0x203   :  { %v183_v52 = vmul.f32 %v176_v51, %v120_v12  ;;  %v184_v53 = vmul.f32 %v176_v51, %v122_v13 }
 0x206   :  { %v181_v54 = vpop.permute.xlu1 %180 }
 0x207   :  { %v185_v58 = vmul.f32 %v181_v54, %v124_v17  ;;  %v186_v59 = vmul.f32 %v181_v54, %v126_v19 }
 0x26f   :  { %v190_v55 = vpop.permute.xlu0 %189 }
 0x270   :  { %v197_v56 = vadd.f32 %v190_v55, %v183_v52  ;;  %v198_v57 = vadd.f32 %v190_v55, %v184_v53 }
 0x272   :  { %v201_v60 = vmax.f32 %v197_v56, 0.0  ;;  %v202_v61 = vmax.f32 %v198_v57, 0.0 }
 0x273   :  { %v195_v62 = vpop.permute.xlu1 %194 }
 0x274   :  { %205 = vst [vmem:[%s328_s3] sm:$0xff] %v201_v60  ;;  %206 = vst [vmem:[%s328_s3 + $0x8] sm:$0xff] %v202_v61  ;;  %v199_v63 = vadd.f32 %v195_v62, %v185_v58  ;;  %v200_v0 = vadd.f32 %v195_v62, %v186_v59 }
 0x276   :  { %v203_v1 = vmax.f32 %v199_v63, 0.0  ;;  %v204_v2 = vmax.f32 %v200_v0, 0.0 }
 0x278   :  { %207 = vst [vmem:[%s328_s3 + $0x10] sm:$0xff] %v203_v1  ;;  %208 = vst [vmem:[%s328_s3 + $0x18] sm:$0xff] %v204_v2 }

// kernel: _snn_c_apply.16
= control target key start
LH: loop header
LB: loop body
LE: loop exit
PB: predicated region body
PF: predicated region fallthrough
CT: control target
= control target key end

     0   :  { %v364_v0 = vmov 0   ;;  %vm109_vm0 = vcmask 130048   ;;  %s365_s11 = smov 1   ;;  %s474_s1 = inlined_call_operand.vmem [shape: bf16[144,128], index: 1, kind: input, shape index: {}]   ;;  %s475_s0 = inlined_call_operand.vmem [shape: bf16[32,144], index: 0, kind: input, shape index: {}]   ;;  %s476_s2 = inlined_call_operand.vmem [shape: f32[32,2], index: 2, kind: input, shape index: {}]   ;;  %s477_s3 = inlined_call_operand.vmem [shape: f32[32,128], index: 3, kind: output, shape index: {}]  }
   0x1   :  { %116 = vmatprep.subr.bf16.mxu0 %v364_v0  ;;  %316 = vmatprep.subr.bf16.mxu1 %v364_v0  ;;  %v341_v1 = vld [vmem:[%s474_s1 + $0x38] sm:$0xff]   ;;  %v342_v2 = vld [vmem:[%s474_s1 + $0x30] sm:$0xff]   ;;  %v343_v3 = vld [vmem:[%s474_s1 + $0x28] sm:$0xff]  }
   0x2   :  { %337 = vset.pattern.permute.xlu0 %v364_v0  ;;  %338 = vset.pattern.permute.xlu1 %v364_v0  ;;  %v344_v4 = vld [vmem:[%s474_s1 + $0x20] sm:$0xff]   ;;  %v355_v6 = vld [vmem:[%s475_s0 + $0x14] ss:$8 sps:$4 sm:$0xff]   ;;  %v347_v9 = vld [vmem:[%s474_s1 + $0x8] sm:$0xff]  }
   0x3   :  { %117 = vmatpush1.bf16.msra.mxu0 %v341_v1  ;;  %325 = vmatpush1.bf16.msra.mxu1 %v341_v1  ;;  %v352_v5 = vld [vmem:[%s475_s0 + $0x4] ss:$8 sps:$4 sm:$0xff]   ;;  %v345_v7 = vld [vmem:[%s474_s1 + $0x18] sm:$0xff]   ;;  %v346_v8 = vld [vmem:[%s474_s1 + $0x10] sm:$0xff]  }
   0x4   :  { %118 = vmatprep.subr.bf16.mxu0 %v364_v0  ;;  %317 = vmatprep.subr.bf16.mxu1 %v364_v0  ;;  %v348_v10 = vld [vmem:[%s474_s1] sm:$0xff]   ;;  %v353_v13 = vld [vmem:[%s475_s0 + $0x10] ss:$8 sps:$4 sm:$0xff]   ;;  %v210_v62 = vld [vmem:[%s476_s2 + $0x8] sm:$0xff] }
   0x5   :  { %314 = vmatprep.mubr.msk.bf16.mxu0 %vm109_vm0, %v352_v5  ;;  %315 = vmatprep.mubr.msk.bf16.mxu1 %vm109_vm0, %v355_v6  ;;  %v349_v11 = vld [vmem:[%s474_s1 + $0x40] sm:$0xff]   ;;  %v211_v58 = vld [vmem:[%s476_s2 + $0x10] sm:$0xff]  ;;  %v212_v61 = vld [vmem:[%s476_s2 + $0x18] sm:$0xff]  ;;  %v366_v5 = vmov 1  }
   0x6   :  { %v350_v12 = vld [vmem:[%s475_s0] ss:$8 sps:$4 sm:$0xff]  }
   0x7   :  { %119 = vmatpush1.bf16.msra.mxu0 %v342_v2  ;;  %326 = vmatpush1.bf16.msra.mxu1 %v342_v2  ;;  %v209_v54 = vld [vmem:[%s476_s2] sm:$0xff] }
   0x8   :  { %120 = vmatprep.subr.bf16.mxu0 %v364_v0  ;;  %318 = vmatprep.subr.bf16.mxu1 %v364_v0 }
   0xb   :  { %121 = vmatpush1.bf16.msra.mxu0 %v343_v3  ;;  %327 = vmatpush1.bf16.msra.mxu1 %v343_v3 }
   0xc   :  { %122 = vmatprep.subr.bf16.mxu0 %v364_v0  ;;  %319 = vmatprep.subr.bf16.mxu1 %v364_v0 }
   0xf   :  { %123 = vmatpush1.bf16.msra.mxu0 %v344_v4  ;;  %328 = vmatpush1.bf16.msra.mxu1 %v344_v4 }
  0x10   :  { %124 = vmatprep.subr.bf16.mxu0 %v364_v0  ;;  %320 = vmatprep.subr.bf16.mxu1 %v364_v0 }
  0x13   :  { %125 = vmatpush1.bf16.msra.mxu0 %v345_v7  ;;  %329 = vmatpush1.bf16.msra.mxu1 %v345_v7 }
  0x14   :  { %126 = vmatprep.subr.bf16.mxu0 %v364_v0  ;;  %321 = vmatprep.subr.bf16.mxu1 %v364_v0 }
  0x17   :  { %127 = vmatpush1.bf16.msra.mxu0 %v346_v8  ;;  %330 = vmatpush1.bf16.msra.mxu1 %v346_v8 }
  0x18   :  { %128 = vmatprep.subr.bf16.mxu0 %v364_v0  ;;  %322 = vmatprep.subr.bf16.mxu1 %v364_v0 }
  0x1b   :  { %129 = vmatpush1.bf16.msra.mxu0 %v347_v9  ;;  %331 = vmatpush1.bf16.msra.mxu1 %v347_v9 }
  0x1c   :  { %130 = vmatprep.subr.bf16.mxu0 %v364_v0  ;;  %323 = vmatprep.subr.bf16.mxu1 %v364_v0 }
  0x1f   :  { %131 = vmatpush1.bf16.msra.mxu0 %v348_v10  ;;  %332 = vmatpush1.bf16.msra.mxu1 %v348_v10 }
  0x20   :  { %146 = vmatprep.subr.bf16.mxu0 %v364_v0  ;;  %324 = vmatprep.subr.bf16.mxu1 %v364_v0 }
  0x23   :  { %147 = vmatpush2.bf16.msra.mxu0 %v349_v11  ;;  %333 = vmatpush2.bf16.msra.mxu1 %v349_v11 }
  0x26   :  { %149 = vmatmul.mubr.bf16.vlgmr.msra.gmra.mxu0 %v350_v12  ;;  %157 = vmatmul.mubr.bf16.vlgmr.msra.gmra.mxu1 %v353_v13 }
  0xe6   :  { %v426_v14 = vpop.f32.mrf.mxu0  ;;  %v428_v15 = vpop.f32.mrf.mxu1 }
  0xe7   :  { %169 = vadd.xlane.f32.xlu1 %v428_v15  ;;  %165 = vadd.xlane.f32.xlu0 %v426_v14  ;;  %v177_v18 = vmul.f32 %v426_v14, %v426_v14  ;;  %v179_v24 = vmul.f32 %v428_v15, %v428_v15 }
  0xe8   :  { %v152_v16 = vpop.f32.mrf.mxu0  ;;  %v160_v17 = vpop.f32.mrf.mxu1 }
  0xea   :  { %v434_v19 = vpop.f32.mrf.mxu0  ;;  %v436_v20 = vpop.f32.mrf.mxu1 }
  0xeb   :  { %171 = vadd.xlane.f32.xlu1 %v436_v20  ;;  %181 = vadd.xlane.f32.xlu0 %v177_v18  ;;  %v178_v23 = vmul.f32 %v434_v19, %v434_v19  ;;  %v180_v25 = vmul.f32 %v436_v20, %v436_v20 }
  0xec   :  { %v155_v21 = vpop.f32.mrf.mxu0  ;;  %v163_v22 = vpop.f32.mrf.mxu1 }
  0xef   :  { %167 = vadd.xlane.f32.xlu0 %v434_v19  ;;  %183 = vadd.xlane.f32.xlu1 %v178_v23 }
  0xf3   :  { %185 = vadd.xlane.f32.xlu0 %v179_v24  ;;  %187 = vadd.xlane.f32.xlu1 %v180_v25 }
 0x170   :  { %v170_v26 = vpop.xlane.xlu1 %169  ;;  %v166_v27 = vpop.xlane.xlu0 %165 }
 0x171   :  { %v173_v28 = vmul.f32 0.020833334, %v166_v27  ;;  %v175_v34 = vmul.f32 0.020833334, %v170_v26 }
 0x173   :  { %v193_v31 = vmul.f32 %v173_v28, %v173_v28  ;;  %v195_v42 = vmul.f32 %v175_v34, %v175_v34 }
 0x174   :  { %v172_v29 = vpop.xlane.xlu1 %171  ;;  %v182_v30 = vpop.xlane.xlu0 %181 }
 0x175   :  { %v189_v32 = vmul.f32 0.020833334, %v182_v30  ;;  %v176_v37 = vmul.f32 0.020833334, %v172_v29 }
 0x177   :  { %v197_v33 = vsub.f32 %v189_v32, %v193_v31  ;;  %v196_v45 = vmul.f32 %v176_v37, %v176_v37 }
 0x178   :  { %v168_v35 = vpop.xlane.xlu0 %167  ;;  %v184_v36 = vpop.xlane.xlu1 %183 }
 0x179   :  { %v201_v38 = vadd.f32 1e-05, %v197_v33  ;;  %v174_v39 = vmul.f32 0.020833334, %v168_v35  ;;  %v190_v41 = vmul.f32 0.020833334, %v184_v36 }
 0x17b   :  { %356 = vrsqrt.f32 %v201_v38  ;;  %v194_v40 = vmul.f32 %v174_v39, %v174_v39 }
 0x17c   :  { %v186_v43 = vpop.xlane.xlu0 %185  ;;  %v188_v44 = vpop.xlane.xlu1 %187 }
 0x17d   :  { %v198_v46 = vsub.f32 %v190_v41, %v194_v40  ;;  %v191_v47 = vmul.f32 0.020833334, %v186_v43  ;;  %v192_v48 = vmul.f32 0.020833334, %v188_v44 }
 0x17f   :  { %v202_v49 = vadd.f32 1e-05, %v198_v46  ;;  %v199_v50 = vsub.f32 %v191_v47, %v195_v42  ;;  %v200_v51 = vsub.f32 %v192_v48, %v196_v45 }
 0x181   :  { %v203_v52 = vadd.f32 1e-05, %v199_v50  ;;  %v204_v53 = vadd.f32 1e-05, %v200_v51  ;;  %358 = vrsqrt.f32 %v202_v49 }
 0x183   :  { %360 = vrsqrt.f32 %v203_v52 }
 0x184   :  { %362 = vrsqrt.f32 %v204_v53 }
 0x188   :  { %v357_v55 = vpop.eup %356 }
 0x189   :  { %v213_v56 = vmul.f32 %v357_v55, %v209_v54 }
 0x18b   :  { %v217_v57 = vmul.f32 %v213_v56, %v173_v28 }
 0x18d   :  { %225 = vrot.lane.b32.xlu0 %v217_v57, %s365_s11 }
 0x18e   :  { %v359_v59 = vpop.eup %358 }
 0x18f   :  { %v214_v3 = vmul.f32 %v359_v59, %v210_v62 }
 0x190   :  { %v361_v60 = vpop.eup %360 }
 0x191   :  { %v363_v63 = vpop.eup %362  ;;  %243 = vperm.xlu0 %337, %v213_v56   ;;  %v215_v0 = vmul.f32 %v361_v60, %v211_v58  ;;  %v218_v4 = vmul.f32 %v214_v3, %v174_v39 }
 0x192   :  { %v216_v2 = vmul.f32 %v363_v63, %v212_v61 }
 0x193   :  { %v219_v1 = vmul.f32 %v215_v0, %v175_v34 }
 0x194   :  { %v220_v6 = vmul.f32 %v216_v2, %v176_v37 }
 0x195   :  { %229 = vrot.lane.b32.xlu1 %v219_v1, %s365_s11  ;;  %258 = vperm.xlu0 %337, %v216_v2  }
 0x199   :  { %227 = vrot.lane.b32.xlu1 %v218_v4, %s365_s11  ;;  %340 = vset.pattern.permute.xlu0 %v366_v5 }
 0x19d   :  { %231 = vrot.lane.b32.xlu1 %v220_v6, %s365_s11 }
 0x1a1   :  { %248 = vperm.xlu1 %338, %v214_v3  }
 0x1a5   :  { %253 = vperm.xlu1 %338, %v215_v0  }
 0x1a9   :  { %339 = vset.pattern.permute.xlu1 %v366_v5 }
 0x1ff   :  { %v226_v7 = vpop.permute.xlu0 %225 }
 0x200   :  { %v237_v8 = vsub.f32 %v209_v54, %v226_v7 }
 0x202   :  { %267 = vperm.xlu1 %339, %v237_v8  }
 0x207   :  { %v230_v9 = vpop.permute.xlu1 %229 }
 0x208   :  { %v239_v10 = vsub.f32 %v211_v58, %v230_v9 }
 0x20a   :  { %277 = vperm.xlu1 %339, %v239_v10  }
 0x20b   :  { %v228_v11 = vpop.permute.xlu1 %227 }
 0x20c   :  { %v238_v12 = vsub.f32 %v210_v62, %v228_v11  ;;  %v244_v18 = vpop.permute.xlu0 %243 }
 0x20d   :  { %v261_v22 = vmul.f32 %v244_v18, %v426_v14 }
 0x20e   :  { %272 = vperm.xlu0 %340, %v238_v12  }
 0x20f   :  { %v232_v13 = vpop.permute.xlu1 %231 }
 0x210   :  { %v240_v16 = vsub.f32 %v212_v61, %v232_v13  ;;  %v259_v27 = vpop.permute.xlu0 %258 }
 0x211   :  { %v264_v33 = vmul.f32 %v259_v27, %v436_v20 }
 0x212   :  { %282 = vperm.xlu1 %339, %v240_v16  }
 0x21c   :  { %v249_v17 = vpop.permute.xlu1 %248 }
 0x21d   :  { %v262_v30 = vmul.f32 %v249_v17, %v434_v19 }
 0x220   :  { %v254_v21 = vpop.permute.xlu1 %253 }
 0x221   :  { %v263_v26 = vmul.f32 %v254_v21, %v428_v15 }
 0x27d   :  { %v268_v23 = vpop.permute.xlu1 %267 }
 0x27e   :  { %v285_v24 = vadd.f32 %v268_v23, %v261_v22 }
 0x280   :  { %v289_v25 = vmax.f32 %v285_v24, 0.0 }
 0x282   :  { %293 = vst [vmem:[%s477_s3] sm:$0xff] %v289_v25 }
 0x285   :  { %v278_v28 = vpop.permute.xlu1 %277 }
 0x286   :  { %v287_v29 = vadd.f32 %v278_v28, %v263_v26 }
 0x288   :  { %v291_v31 = vmax.f32 %v287_v29, 0.0 }
 0x289   :  { %v273_v32 = vpop.permute.xlu0 %272 }
 0x28a   :  { %295 = vst [vmem:[%s477_s3 + $0x10] sm:$0xff] %v291_v31  ;;  %v286_v14 = vadd.f32 %v273_v32, %v262_v30 }
 0x28c   :  { %v290_v34 = vmax.f32 %v286_v14, 0.0 }
 0x28d   :  { %v283_v35 = vpop.permute.xlu1 %282 }
 0x28e   :  { %294 = vst [vmem:[%s477_s3 + $0x8] sm:$0xff] %v290_v34  ;;  %v288_v15 = vadd.f32 %v283_v35, %v264_v33 }
 0x290   :  { %v292_v36 = vmax.f32 %v288_v15, 0.0 }
 0x292   :  { %296 = vst [vmem:[%s477_s3 + $0x18] sm:$0xff] %v292_v36 }

// kernel: _snn_c_apply.17
= control target key start
LH: loop header
LB: loop body
LE: loop exit
PB: predicated region body
PF: predicated region fallthrough
CT: control target
= control target key end

     0   :  { %vm235_vm0 = vcmask 261120   ;;  %s812_s18 = smov 1   ;;  %s1051_s1 = inlined_call_operand.vmem [shape: bf16[288,128], index: 1, kind: input, shape index: {}]   ;;  %s1052_s0 = inlined_call_operand.vmem [shape: bf16[64,288], index: 0, kind: input, shape index: {}]   ;;  %s1053_s2 = inlined_call_operand.vmem [shape: f32[64,2], index: 2, kind: input, shape index: {}]   ;;  %s1054_s3 = inlined_call_operand.vmem [shape: f32[64,128], index: 3, kind: output, shape index: {}]  }
   0x1   :  { %v761_v0 = vld [vmem:[%s1051_s1 + $0x78] sm:$0xff]   ;;  %v763_v2 = vld [vmem:[%s1051_s1 + $0x70] sm:$0xff]   ;;  %v765_v4 = vld [vmem:[%s1051_s1 + $0x68] sm:$0xff]  }
   0x2   :  { %v762_v1 = vld [vmem:[%s1051_s1 + $0x38] sm:$0xff]   ;;  %680 = vmatprep.subr.bf16.mxu0 %v761_v0  ;;  %738 = vmatprep.subr.bf16.mxu1 %v761_v0  ;;  %v764_v3 = vld [vmem:[%s1051_s1 + $0x30] sm:$0xff]   ;;  %v766_v5 = vld [vmem:[%s1051_s1 + $0x28] sm:$0xff]  }
   0x3   :  { %681 = vmatpush3.bf16.msra.mxu0 %v762_v1  ;;  %746 = vmatpush3.bf16.msra.mxu1 %v762_v1  ;;  %v767_v6 = vld [vmem:[%s1051_s1 + $0x60] sm:$0xff]   ;;  %v769_v8 = vld [vmem:[%s1051_s1 + $0x58] sm:$0xff]   ;;  %v771_v10 = vld [vmem:[%s1051_s1 + $0x50] sm:$0xff]  }
   0x4   :  { %682 = vmatprep.subr.bf16.mxu0 %v763_v2  ;;  %739 = vmatprep.subr.bf16.mxu1 %v763_v2  ;;  %v768_v7 = vld [vmem:[%s1051_s1 + $0x20] sm:$0xff]   ;;  %v770_v9 = vld [vmem:[%s1051_s1 + $0x18] sm:$0xff]   ;;  %v772_v13 = vld [vmem:[%s1051_s1 + $0x10] sm:$0xff]  }
   0x5   :  { %v779_v11 = vld [vmem:[%s1052_s0 + $0x4] ss:$12 sps:$4 sm:$0xff]   ;;  %v782_v12 = vld [vmem:[%s1052_s0 + $0x4c] ss:$12 sps:$4 sm:$0xff]   ;;  %v780_v20 = vld [vmem:[%s1052_s0 + $0x48] ss:$12 sps:$4 sm:$0xff]  }
   0x6   :  { %v773_v14 = vld [vmem:[%s1051_s1 + $0x48] sm:$0xff]   ;;  %280 = vmatprep.mubr.bf16.mxu0 %v779_v11  ;;  %304 = vmatprep.mubr.bf16.mxu1 %v782_v12  ;;  %v775_v16 = vld [vmem:[%s1051_s1 + $0x40] sm:$0xff]   ;;  %v793_v28 = vld [vmem:[%s1052_s0 + $0x30] ss:$12 sps:$4 sm:$0xff]  }
   0x7   :  { %683 = vmatpush3.bf16.msra.mxu0 %v764_v3  ;;  %747 = vmatpush3.bf16.msra.mxu1 %v764_v3  ;;  %v774_v15 = vld [vmem:[%s1051_s1 + $0x8] sm:$0xff]   ;;  %v776_v17 = vld [vmem:[%s1051_s1] sm:$0xff]   ;;  %v794_v29 = vld [vmem:[%s1052_s0 + $0x50] ss:$12 sps:$4 sm:$0xff]  }
   0x8   :  { %684 = vmatprep.subr.bf16.mxu0 %v765_v4  ;;  %740 = vmatprep.subr.bf16.mxu1 %v765_v4  ;;  %v783_v18 = vld [vmem:[%s1051_s1 + $0x88] sm:$0xff]   ;;  %v784_v22 = vld [vmem:[%s1051_s1 + $0x80] sm:$0xff]  }
   0x9   :  { %v777_v19 = vld [vmem:[%s1052_s0] ss:$12 sps:$4 sm:$0xff]   ;;  %v785_v21 = vld [vmem:[%s1052_s0 + $0x1c] ss:$12 sps:$4 sm:$0xff]   ;;  %v788_v24 = vld [vmem:[%s1052_s0 + $0x18] ss:$12 sps:$4 sm:$0xff]  }
   0xa   :  { %v787_v23 = vld [vmem:[%s1052_s0 + $0x8] ss:$12 sps:$4 sm:$0xff]   ;;  %v789_v25 = vld [vmem:[%s1052_s0 + $0x20] ss:$12 sps:$4 sm:$0xff]   ;;  %v792_v27 = vld [vmem:[%s1052_s0 + $0x38] ss:$12 sps:$4 sm:$0xff]  }
   0xb   :  { %685 = vmatpush3.bf16.msra.mxu0 %v766_v5  ;;  %748 = vmatpush3.bf16.msra.mxu1 %v766_v5  ;;  %v790_v26 = vld [vmem:[%s1052_s0 + $0x34] ss:$12 sps:$4 sm:$0xff]  }
   0xc   :  { %686 = vmatprep.subr.bf16.mxu0 %v767_v6  ;;  %741 = vmatprep.subr.bf16.mxu1 %v767_v6 }
   0xf   :  { %687 = vmatpush3.bf16.msra.mxu0 %v768_v7  ;;  %749 = vmatpush3.bf16.msra.mxu1 %v768_v7 }
  0x10   :  { %688 = vmatprep.subr.bf16.mxu0 %v769_v8  ;;  %742 = vmatprep.subr.bf16.mxu1 %v769_v8 }
  0x13   :  { %689 = vmatpush3.bf16.msra.mxu0 %v770_v9  ;;  %750 = vmatpush3.bf16.msra.mxu1 %v770_v9 }
  0x14   :  { %690 = vmatprep.subr.bf16.mxu0 %v771_v10  ;;  %743 = vmatprep.subr.bf16.mxu1 %v771_v10 }
  0x17   :  { %691 = vmatpush3.bf16.msra.mxu0 %v772_v13  ;;  %751 = vmatpush3.bf16.msra.mxu1 %v772_v13 }
  0x18   :  { %692 = vmatprep.subr.bf16.mxu0 %v773_v14  ;;  %744 = vmatprep.subr.bf16.mxu1 %v773_v14  ;;  %v811_v14 = vmov 0  }
  0x19   :  { %757 = vset.pattern.permute.xlu0 %v811_v14  ;;  %758 = vset.pattern.permute.xlu1 %v811_v14 }
  0x1b   :  { %693 = vmatpush3.bf16.msra.mxu0 %v774_v15  ;;  %752 = vmatpush3.bf16.msra.mxu1 %v774_v15 }
  0x1c   :  { %694 = vmatprep.subr.bf16.mxu0 %v775_v16  ;;  %745 = vmatprep.subr.bf16.mxu1 %v775_v16 }
  0x1f   :  { %695 = vmatpush3.bf16.msra.mxu0 %v776_v17  ;;  %753 = vmatpush3.bf16.msra.mxu1 %v776_v17 }
  0x20   :  { %726 = vmatprep.subr.bf16.mxu1 %v783_v18 }
  0x22   :  { %281 = vmatmul.mubr.bf16.vlgmr.msra.gmra.mxu0 %v777_v19  ;;  %305 = vmatmul.mubr.bf16.vlgmr.msra.gmra.mxu1 %v780_v20 }
  0x23   :  { %727 = vmatpush3.bf16.msra.mxu1 %v783_v18  ;;  %288 = vmatprep.mubr.bf16.mxu0 %v785_v21 }
  0x24   :  { %728 = vmatprep.subr.bf16.mxu1 %v784_v22  ;;  %730 = vmatprep.mubr.msk.bf16.mxu1 %vm235_vm0, %v787_v23 }
  0x27   :  { %729 = vmatpush3.bf16.msra.mxu1 %v784_v22 }
  0x2a   :  { %289 = vmatmul.mubr.bf16.gmra.mxu0 %v788_v24  ;;  %731 = vmatmul.mubr.msk.bf16.vlgmr.msra.gmra.mxu1 %vm235_vm0, %v789_v25 }
  0x2b   :  { %296 = vmatprep.mubr.bf16.mxu0 %v790_v26  ;;  %734 = vmatprep.mubr.msk.bf16.mxu1 %vm235_vm0, %v792_v27 }
  0x32   :  { %297 = vmatmul.mubr.bf16.gmra.mxu0 %v793_v28  ;;  %735 = vmatmul.mubr.msk.bf16.gmra.mxu1 %vm235_vm0, %v794_v29 }
  0xe2   :  { %v696_v30 = vpop.f32.mrf.mxu0  ;;  %v714_v31 = vpop.f32.mrf.mxu1 }
  0xe4   :  { %v697_v32 = vpop.f32.mrf.mxu0  ;;  %v715_v33 = vpop.f32.mrf.mxu1 }
  0xe5   :  { %v698_v40 = vadd.f32 %v697_v32, %v696_v30  ;;  %v716_v62 = vadd.f32 %v715_v33, %v714_v31 }
  0xe6   :  { %v699_v34 = vpop.f32.mrf.mxu0  ;;  %v717_v35 = vpop.f32.mrf.mxu1 }
  0xe8   :  { %v700_v36 = vpop.f32.mrf.mxu0  ;;  %v718_v37 = vpop.f32.mrf.mxu1 }
  0xe9   :  { %v701_v50 = vadd.f32 %v700_v36, %v699_v34  ;;  %v719_v2 = vadd.f32 %v718_v37, %v717_v35 }
  0xea   :  { %v702_v38 = vpop.f32.mrf.mxu0  ;;  %v732_v39 = vpop.f32.mrf.mxu1 }
  0xec   :  { %v703_v41 = vpop.f32.mrf.mxu0  ;;  %v347_v42 = vpop.f32.mrf.mxu1 }
  0xed   :  { %v704_v43 = vadd.f32 %v703_v41, %v702_v38  ;;  %v928_v44 = vadd.f32 %v698_v40, %v347_v42 }
  0xee   :  { %v705_v45 = vpop.f32.mrf.mxu0  ;;  %v733_v46 = vpop.f32.mrf.mxu1 }
  0xef   :  { %v930_v47 = vadd.f32 %v732_v39, %v704_v43  ;;  %378 = vadd.xlane.f32.xlu0 %v928_v44  ;;  %v402_v52 = vmul.f32 %v928_v44, %v928_v44 }
  0xf0   :  { %v706_v48 = vpop.f32.mrf.mxu0  ;;  %v350_v49 = vpop.f32.mrf.mxu1 }
  0xf1   :  { %v707_v51 = vadd.f32 %v706_v48, %v705_v45  ;;  %382 = vadd.xlane.f32.xlu1 %v930_v47  ;;  %v938_v55 = vadd.f32 %v701_v50, %v350_v49  ;;  %v404_v61 = vmul.f32 %v930_v47, %v930_v47  ;;  %v983_v50 = vld [vmem:[%s1053_s2] sm:$0xff] }
  0xf2   :  { %v708_v53 = vpop.f32.mrf.mxu0  ;;  %v736_v56 = vpop.f32.mrf.mxu1 }
  0xf3   :  { %v936_v54 = vadd.f32 %v733_v46, %v707_v51  ;;  %410 = vadd.xlane.f32.xlu0 %v402_v52  ;;  %v403_v58 = vmul.f32 %v938_v55, %v938_v55  ;;  %v948_v3 = vadd.f32 %v736_v56, %v716_v62 }
  0xf4   :  { %v709_v57 = vpop.f32.mrf.mxu0  ;;  %v363_v59 = vpop.f32.mrf.mxu1 }
  0xf5   :  { %384 = vadd.xlane.f32.xlu1 %v936_v54  ;;  %v405_v63 = vmul.f32 %v936_v54, %v936_v54  ;;  %v710_v4 = vadd.f32 %v709_v57, %v708_v53  ;;  %v408_v12 = vmul.f32 %v948_v3, %v948_v3 }
  0xf6   :  { %v711_v60 = vpop.f32.mrf.mxu0  ;;  %v737_v0 = vpop.f32.mrf.mxu1 }
  0xf7   :  { %380 = vadd.xlane.f32.xlu0 %v938_v55  ;;  %v950_v5 = vadd.f32 %v737_v0, %v719_v2  ;;  %v953_v8 = vadd.f32 %v710_v4, %v363_v59 }
  0xf8   :  { %v712_v1 = vpop.f32.mrf.mxu0  ;;  %v366_v7 = vpop.f32.mrf.mxu1 }
  0xf9   :  { %412 = vadd.xlane.f32.xlu1 %v403_v58  ;;  %v713_v6 = vadd.f32 %v712_v1, %v711_v60  ;;  %v406_v10 = vmul.f32 %v953_v8, %v953_v8  ;;  %v409_v13 = vmul.f32 %v950_v5, %v950_v5 }
  0xfb   :  { %414 = vadd.xlane.f32.xlu0 %v404_v61  ;;  %v956_v9 = vadd.f32 %v713_v6, %v366_v7 }
  0xfd   :  { %416 = vadd.xlane.f32.xlu1 %v405_v63  ;;  %v407_v11 = vmul.f32 %v956_v9, %v956_v9 }
  0xff   :  { %390 = vadd.xlane.f32.xlu0 %v948_v3 }
 0x101   :  { %392 = vadd.xlane.f32.xlu1 %v950_v5 }
 0x103   :  { %386 = vadd.xlane.f32.xlu0 %v953_v8 }
 0x105   :  { %388 = vadd.xlane.f32.xlu1 %v956_v9 }
 0x107   :  { %418 = vadd.xlane.f32.xlu0 %v406_v10 }
 0x109   :  { %420 = vadd.xlane.f32.xlu1 %v407_v11 }
 0x10b   :  { %422 = vadd.xlane.f32.xlu0 %v408_v12 }
 0x10d   :  { %424 = vadd.xlane.f32.xlu1 %v409_v13  ;;  %v468_v13 = vld [vmem:[%s1053_s2 + $0x10] sm:$0xff] }
 0x178   :  { %v379_v15 = vpop.xlane.xlu0 %378 }
 0x179   :  { %v394_v16 = vmul.f32 0.083333336, %v379_v15 }
 0x17a   :  { %v383_v17 = vpop.xlane.xlu1 %382 }
 0x17b   :  { %v434_v19 = vmul.f32 %v394_v16, %v394_v16  ;;  %v968_v24 = vmul.f32 0.083333336, %v383_v17 }
 0x17c   :  { %v411_v18 = vpop.xlane.xlu0 %410 }
 0x17d   :  { %v426_v20 = vmul.f32 0.083333336, %v411_v18  ;;  %v436_v32 = vmul.f32 %v968_v24, %v968_v24 }
 0x17e   :  { %v385_v21 = vpop.xlane.xlu1 %384 }
 0x17f   :  { %v442_v22 = vsub.f32 %v426_v20, %v434_v19  ;;  %v972_v28 = vmul.f32 0.083333336, %v385_v21  ;;  %v467_v19 = vld [vmem:[%s1053_s2 + $0x8] sm:$0xff] }
 0x180   :  { %v381_v23 = vpop.xlane.xlu0 %380 }
 0x181   :  { %v450_v25 = vadd.f32 1e-05, %v442_v22  ;;  %v970_v26 = vmul.f32 0.083333336, %v381_v23  ;;  %v437_v36 = vmul.f32 %v972_v28, %v972_v28 }
 0x182   :  { %v413_v27 = vpop.xlane.xlu1 %412 }
 0x183   :  { %795 = vrsqrt.f32 %v450_v25  ;;  %v435_v29 = vmul.f32 %v970_v26, %v970_v26  ;;  %v427_v30 = vmul.f32 0.083333336, %v413_v27 }
 0x184   :  { %v415_v31 = vpop.xlane.xlu0 %414 }
 0x185   :  { %v443_v33 = vsub.f32 %v427_v30, %v435_v29  ;;  %v428_v34 = vmul.f32 0.083333336, %v415_v31  ;;  %v469_v30 = vld [vmem:[%s1053_s2 + $0x18] sm:$0xff] }
 0x186   :  { %v417_v35 = vpop.xlane.xlu1 %416 }
 0x187   :  { %v451_v37 = vadd.f32 1e-05, %v443_v33  ;;  %v444_v38 = vsub.f32 %v428_v34, %v436_v32  ;;  %v429_v39 = vmul.f32 0.083333336, %v417_v35  ;;  %v470_v33 = vld [vmem:[%s1053_s2 + $0x20] sm:$0xff]  ;;  %v471_v35 = vld [vmem:[%s1053_s2 + $0x28] sm:$0xff] }
 0x188   :  { %v391_v40 = vpop.xlane.xlu0 %390 }
 0x189   :  { %v452_v41 = vadd.f32 1e-05, %v444_v38  ;;  %v445_v42 = vsub.f32 %v429_v39, %v437_v36  ;;  %797 = vrsqrt.f32 %v451_v37  ;;  %v400_v56 = vmul.f32 0.083333336, %v391_v40 }
 0x18a   :  { %v393_v43 = vpop.xlane.xlu1 %392 }
 0x18b   :  { %799 = vrsqrt.f32 %v452_v41  ;;  %v453_v45 = vadd.f32 1e-05, %v445_v42  ;;  %v401_v60 = vmul.f32 0.083333336, %v393_v43  ;;  %v440_v4 = vmul.f32 %v400_v56, %v400_v56 }
 0x18c   :  { %v387_v46 = vpop.xlane.xlu0 %386 }
 0x18d   :  { %v398_v48 = vmul.f32 0.083333336, %v387_v46  ;;  %801 = vrsqrt.f32 %v453_v45  ;;  %v441_v11 = vmul.f32 %v401_v60, %v401_v60 }
 0x18e   :  { %v389_v49 = vpop.xlane.xlu1 %388 }
 0x18f   :  { %v399_v51 = vmul.f32 0.083333336, %v389_v49  ;;  %v438_v57 = vmul.f32 %v398_v48, %v398_v48 }
 0x190   :  { %v796_v52 = vpop.eup %795  ;;  %v419_v53 = vpop.xlane.xlu0 %418 }
 0x191   :  { %v430_v58 = vmul.f32 0.083333336, %v419_v53  ;;  %v474_v59 = vmul.f32 %v796_v52, %v983_v50  ;;  %v439_v62 = vmul.f32 %v399_v51, %v399_v51 }
 0x192   :  { %v421_v61 = vpop.xlane.xlu1 %420 }
 0x193   :  { %v446_v63 = vsub.f32 %v430_v58, %v438_v57  ;;  %v431_v0 = vmul.f32 0.083333336, %v421_v61  ;;  %v482_v1 = vmul.f32 %v474_v59, %v394_v16 }
 0x194   :  { %v423_v2 = vpop.xlane.xlu0 %422 }
 0x195   :  { %v454_v6 = vadd.f32 1e-05, %v446_v63  ;;  %v447_v7 = vsub.f32 %v431_v0, %v439_v62  ;;  %v432_v10 = vmul.f32 0.083333336, %v423_v2  ;;  %498 = vrot.lane.b32.xlu0 %v482_v1, %s812_s18 }
 0x196   :  { %v425_v12 = vpop.xlane.xlu1 %424  ;;  %v798_v14 = vpop.eup %797 }
 0x197   :  { %803 = vrsqrt.f32 %v454_v6  ;;  %v455_v15 = vadd.f32 1e-05, %v447_v7  ;;  %v448_v17 = vsub.f32 %v432_v10, %v440_v4  ;;  %v433_v18 = vmul.f32 0.083333336, %v425_v12 }
 0x198   :  { %v800_v16 = vpop.eup %799  ;;  %v475_v27 = vmul.f32 %v798_v14, %v467_v19 }
 0x199   :  { %805 = vrsqrt.f32 %v455_v15  ;;  %v456_v20 = vadd.f32 1e-05, %v448_v17  ;;  %v449_v21 = vsub.f32 %v433_v18, %v441_v11  ;;  %v476_v22 = vmul.f32 %v800_v16, %v468_v13 }
 0x19a   :  { %v802_v29 = vpop.eup %801  ;;  %v483_v31 = vmul.f32 %v475_v27, %v970_v26  ;;  %v472_v26 = vld [vmem:[%s1053_s2 + $0x30] sm:$0xff] }
 0x19b   :  { %807 = vrsqrt.f32 %v456_v20  ;;  %v457_v23 = vadd.f32 1e-05, %v449_v21  ;;  %v484_v25 = vmul.f32 %v476_v22, %v968_v24  ;;  %v477_v32 = vmul.f32 %v802_v29, %v469_v30 }
 0x19d   :  { %809 = vrsqrt.f32 %v457_v23  ;;  %502 = vrot.lane.b32.xlu1 %v484_v25, %s812_s18  ;;  %v485_v24 = vmul.f32 %v477_v32, %v972_v28  ;;  %v473_v28 = vld [vmem:[%s1053_s2 + $0x38] sm:$0xff] }
 0x1a1   :  { %500 = vrot.lane.b32.xlu1 %v483_v31, %s812_s18 }
 0x1a4   :  { %v804_v34 = vpop.eup %803 }
 0x1a5   :  { %504 = vrot.lane.b32.xlu1 %v485_v24, %s812_s18  ;;  %v478_v36 = vmul.f32 %v804_v34, %v470_v33 }
 0x1a6   :  { %v806_v37 = vpop.eup %805 }
 0x1a7   :  { %v486_v38 = vmul.f32 %v478_v36, %v398_v48  ;;  %v479_v39 = vmul.f32 %v806_v37, %v471_v35  ;;  %v813_v48 = vmov 1  }
 0x1a8   :  { %v808_v40 = vpop.eup %807 }
 0x1a9   :  { %506 = vrot.lane.b32.xlu0 %v486_v38, %s812_s18  ;;  %v487_v41 = vmul.f32 %v479_v39, %v399_v51  ;;  %v480_v42 = vmul.f32 %v808_v40, %v472_v26 }
 0x1aa   :  { %v810_v43 = vpop.eup %809 }
 0x1ab   :  { %508 = vrot.lane.b32.xlu1 %v487_v41, %s812_s18  ;;  %v488_v45 = vmul.f32 %v480_v42, %v400_v56  ;;  %v481_v46 = vmul.f32 %v810_v43, %v473_v28 }
 0x1ad   :  { %510 = vrot.lane.b32.xlu0 %v488_v45, %s812_s18  ;;  %v489_v49 = vmul.f32 %v481_v46, %v401_v60 }
 0x1af   :  { %512 = vrot.lane.b32.xlu1 %v489_v49, %s812_s18 }
 0x1b1   :  { %532 = vperm.xlu0 %757, %v474_v59  }
 0x1b3   :  { %537 = vperm.xlu1 %758, %v475_v27  }
 0x1b5   :  { %547 = vperm.xlu0 %757, %v477_v32  }
 0x1b7   :  { %542 = vperm.xlu1 %758, %v476_v22  }
 0x1b9   :  { %557 = vperm.xlu0 %757, %v479_v39  }
 0x1bb   :  { %552 = vperm.xlu1 %758, %v478_v36  }
 0x1bd   :  { %567 = vperm.xlu0 %757, %v481_v46  }
 0x1bf   :  { %562 = vperm.xlu1 %758, %v480_v42  }
 0x1c1   :  { %760 = vset.pattern.permute.xlu0 %v813_v48 }
 0x1c3   :  { %759 = vset.pattern.permute.xlu1 %v813_v48 }
 0x207   :  { %v499_v51 = vpop.permute.xlu0 %498 }
 0x208   :  { %v522_v52 = vsub.f32 %v983_v50, %v499_v51 }
 0x20a   :  { %580 = vperm.xlu1 %759, %v522_v52  }
 0x20f   :  { %v503_v53 = vpop.permute.xlu1 %502 }
 0x210   :  { %v524_v56 = vsub.f32 %v468_v13, %v503_v53 }
 0x212   :  { %590 = vperm.xlu1 %759, %v524_v56  }
 0x213   :  { %v501_v57 = vpop.permute.xlu1 %500 }
 0x214   :  { %v523_v58 = vsub.f32 %v467_v19, %v501_v57 }
 0x216   :  { %585 = vperm.xlu0 %760, %v523_v58  }
 0x217   :  { %v505_v59 = vpop.permute.xlu1 %504 }
 0x218   :  { %v525_v60 = vsub.f32 %v469_v30, %v505_v59 }
 0x21a   :  { %595 = vperm.xlu1 %759, %v525_v60  }
 0x21b   :  { %v507_v61 = vpop.permute.xlu0 %506 }
 0x21c   :  { %v526_v62 = vsub.f32 %v470_v33, %v507_v61 }
 0x21d   :  { %v509_v63 = vpop.permute.xlu1 %508 }
 0x21e   :  { %v527_v0 = vsub.f32 %v471_v35, %v509_v63  ;;  %600 = vperm.xlu0 %760, %v526_v62  }
 0x21f   :  { %v511_v1 = vpop.permute.xlu0 %510 }
 0x220   :  { %v528_v2 = vsub.f32 %v472_v26, %v511_v1  ;;  %605 = vperm.xlu1 %759, %v527_v0  }
 0x221   :  { %v513_v4 = vpop.permute.xlu1 %512 }
 0x222   :  { %v529_v50 = vsub.f32 %v473_v28, %v513_v4  ;;  %610 = vperm.xlu0 %760, %v528_v2  }
 0x224   :  { %615 = vperm.xlu1 %759, %v529_v50  }
 0x22c   :  { %v533_v10 = vpop.permute.xlu0 %532 }
 0x22d   :  { %v570_v14 = vmul.f32 %v533_v10, %v928_v44 }
 0x22e   :  { %v538_v6 = vpop.permute.xlu1 %537 }
 0x22f   :  { %v571_v23 = vmul.f32 %v538_v6, %v938_v55 }
 0x230   :  { %v548_v12 = vpop.permute.xlu0 %547 }
 0x231   :  { %v573_v29 = vmul.f32 %v548_v12, %v936_v54 }
 0x232   :  { %v543_v7 = vpop.permute.xlu1 %542 }
 0x233   :  { %v572_v19 = vmul.f32 %v543_v7, %v930_v47 }
 0x234   :  { %v558_v18 = vpop.permute.xlu0 %557 }
 0x235   :  { %v575_v24 = vmul.f32 %v558_v18, %v956_v9 }
 0x236   :  { %v553_v11 = vpop.permute.xlu1 %552 }
 0x237   :  { %v574_v32 = vmul.f32 %v553_v11, %v953_v8 }
 0x238   :  { %v568_v20 = vpop.permute.xlu0 %567 }
 0x239   :  { %v577_v38 = vmul.f32 %v568_v20, %v950_v5 }
 0x23a   :  { %v563_v13 = vpop.permute.xlu1 %562 }
 0x23b   :  { %v576_v54 = vmul.f32 %v563_v13, %v948_v3 }
 0x285   :  { %v581_v15 = vpop.permute.xlu1 %580 }
 0x286   :  { %v618_v17 = vadd.f32 %v581_v15, %v570_v14 }
 0x288   :  { %v626_v16 = vmax.f32 %v618_v17, 0.0 }
 0x28a   :  { %634 = vst [vmem:[%s1054_s3] sm:$0xff] %v626_v16 }
 0x28d   :  { %v591_v21 = vpop.permute.xlu1 %590 }
 0x28e   :  { %v620_v22 = vadd.f32 %v591_v21, %v572_v19 }
 0x290   :  { %v628_v25 = vmax.f32 %v620_v22, 0.0 }
 0x291   :  { %v586_v27 = vpop.permute.xlu0 %585 }
 0x292   :  { %636 = vst [vmem:[%s1054_s3 + $0x10] sm:$0xff] %v628_v25  ;;  %v619_v44 = vadd.f32 %v586_v27, %v571_v23 }
 0x294   :  { %v627_v30 = vmax.f32 %v619_v44, 0.0 }
 0x295   :  { %v596_v31 = vpop.permute.xlu1 %595 }
 0x296   :  { %635 = vst [vmem:[%s1054_s3 + $0x8] sm:$0xff] %v627_v30  ;;  %v621_v47 = vadd.f32 %v596_v31, %v573_v29 }
 0x298   :  { %v629_v33 = vmax.f32 %v621_v47, 0.0 }
 0x299   :  { %v601_v55 = vpop.permute.xlu0 %600 }
 0x29a   :  { %637 = vst [vmem:[%s1054_s3 + $0x18] sm:$0xff] %v629_v33  ;;  %v622_v34 = vadd.f32 %v601_v55, %v574_v32 }
 0x29b   :  { %v606_v35 = vpop.permute.xlu1 %605 }
 0x29c   :  { %v630_v36 = vmax.f32 %v622_v34, 0.0  ;;  %v623_v37 = vadd.f32 %v606_v35, %v575_v24 }
 0x29d   :  { %v611_v26 = vpop.permute.xlu0 %610 }
 0x29e   :  { %638 = vst [vmem:[%s1054_s3 + $0x20] sm:$0xff] %v630_v36  ;;  %v631_v8 = vmax.f32 %v623_v37, 0.0  ;;  %v624_v39 = vadd.f32 %v611_v26, %v576_v54 }
 0x29f   :  { %v616_v9 = vpop.permute.xlu1 %615 }
 0x2a0   :  { %639 = vst [vmem:[%s1054_s3 + $0x28] sm:$0xff] %v631_v8  ;;  %v632_v40 = vmax.f32 %v624_v39, 0.0  ;;  %v625_v28 = vadd.f32 %v616_v9, %v577_v38 }
 0x2a2   :  { %640 = vst [vmem:[%s1054_s3 + $0x30] sm:$0xff] %v632_v40  ;;  %v633_v3 = vmax.f32 %v625_v28, 0.0 }
 0x2a4   :  { %641 = vst [vmem:[%s1054_s3 + $0x38] sm:$0xff] %v633_v3 }

// kernel: _snn_c_apply.18
= control target key start
LH: loop header
LB: loop body
LE: loop exit
PB: predicated region body
PF: predicated region fallthrough
CT: control target
= control target key end

     0   :  { %vm551_vm0 = vcmask 523264   ;;  %s1787_s7 = smov 1   ;;  %s2506_s1 = inlined_call_operand.vmem [shape: bf16[576,128], index: 1, kind: input, shape index: {}]   ;;  %s2507_s0 = inlined_call_operand.vmem [shape: bf16[128,576], index: 0, kind: input, shape index: {}]   ;;  %s2508_s2 = inlined_call_operand.vmem [shape: f32[128,2], index: 2, kind: input, shape index: {}]   ;;  %s2509_s3 = inlined_call_operand.vmem [shape: f32[128,128], index: 3, kind: output, shape index: {}]  }
   0x1   :  { %v1662_v0 = vld [vmem:[%s2506_s1 + $0x78] sm:$0xff]   ;;  %v1666_v4 = vld [vmem:[%s2506_s1 + $0x70] sm:$0xff]   ;;  %v1670_v8 = vld [vmem:[%s2506_s1 + $0x68] sm:$0xff]  }
   0x2   :  { %v1663_v1 = vld [vmem:[%s2506_s1 + $0xf8] sm:$0xff]   ;;  %1483 = vmatprep.subr.bf16.mxu0 %v1662_v0  ;;  %v1667_v5 = vld [vmem:[%s2506_s1 + $0xf0] sm:$0xff]   ;;  %v1671_v9 = vld [vmem:[%s2506_s1 + $0xe8] sm:$0xff]  }
   0x3   :  { %v1664_v2 = vld [vmem:[%s2506_s1 + $0x38] sm:$0xff]   ;;  %1547 = vmatprep.subr.bf16.mxu1 %v1663_v1  ;;  %v1668_v6 = vld [vmem:[%s2506_s1 + $0x30] sm:$0xff]   ;;  %v1672_v10 = vld [vmem:[%s2506_s1 + $0x28] sm:$0xff]  }
   0x4   :  { %v1665_v3 = vld [vmem:[%s2506_s1 + $0xb8] sm:$0xff]   ;;  %1484 = vmatpush3.bf16.msra.mxu0 %v1664_v2  ;;  %v1669_v7 = vld [vmem:[%s2506_s1 + $0xb0] sm:$0xff]   ;;  %v1673_v11 = vld [vmem:[%s2506_s1 + $0xa8] sm:$0xff]  }
   0x5   :  { %1548 = vmatpush3.bf16.msra.mxu1 %v1665_v3  ;;  %1485 = vmatprep.subr.bf16.mxu0 %v1666_v4  ;;  %v1674_v12 = vld [vmem:[%s2506_s1 + $0x60] sm:$0xff]   ;;  %v1678_v16 = vld [vmem:[%s2506_s1 + $0x58] sm:$0xff]   ;;  %v1682_v20 = vld [vmem:[%s2506_s1 + $0x50] sm:$0xff]  }
   0x6   :  { %1549 = vmatprep.subr.bf16.mxu1 %v1667_v5  ;;  %v1675_v13 = vld [vmem:[%s2506_s1 + $0xe0] sm:$0xff]   ;;  %v1679_v17 = vld [vmem:[%s2506_s1 + $0xd8] sm:$0xff]   ;;  %v1683_v21 = vld [vmem:[%s2506_s1 + $0xd0] sm:$0xff]  }
   0x7   :  { %v1676_v14 = vld [vmem:[%s2506_s1 + $0x20] sm:$0xff]   ;;  %v1680_v18 = vld [vmem:[%s2506_s1 + $0x18] sm:$0xff]   ;;  %v1684_v22 = vld [vmem:[%s2506_s1 + $0x10] sm:$0xff]  }
   0x8   :  { %1486 = vmatpush3.bf16.msra.mxu0 %v1668_v6  ;;  %v1677_v15 = vld [vmem:[%s2506_s1 + $0xa0] sm:$0xff]   ;;  %v1681_v19 = vld [vmem:[%s2506_s1 + $0x98] sm:$0xff]   ;;  %v1685_v23 = vld [vmem:[%s2506_s1 + $0x90] sm:$0xff]  }
   0x9   :  { %1550 = vmatpush3.bf16.msra.mxu1 %v1669_v7  ;;  %1487 = vmatprep.subr.bf16.mxu0 %v1670_v8  ;;  %v1686_v24 = vld [vmem:[%s2506_s1 + $0x48] sm:$0xff]   ;;  %v1690_v28 = vld [vmem:[%s2506_s1 + $0x40] sm:$0xff]   ;;  %v1700_v36 = vld [vmem:[%s2506_s1 + $0x118] sm:$0xff]  }
   0xa   :  { %1551 = vmatprep.subr.bf16.mxu1 %v1671_v9  ;;  %v1687_v25 = vld [vmem:[%s2506_s1 + $0xc8] sm:$0xff]   ;;  %v1691_v29 = vld [vmem:[%s2506_s1 + $0xc0] sm:$0xff]   ;;  %v1713_v42 = vld [vmem:[%s2506_s1 + $0x110] sm:$0xff]  }
   0xb   :  { %v1688_v26 = vld [vmem:[%s2506_s1 + $0x8] sm:$0xff]   ;;  %v1692_v30 = vld [vmem:[%s2506_s1] sm:$0xff]   ;;  %v1709_v43 = vld [vmem:[%s2507_s0 + $0x5c] ss:$20 sps:$4 sm:$0xff]  }
   0xc   :  { %1488 = vmatpush3.bf16.msra.mxu0 %v1672_v10  ;;  %v1689_v27 = vld [vmem:[%s2506_s1 + $0x88] sm:$0xff]   ;;  %v1693_v31 = vld [vmem:[%s2506_s1 + $0x80] sm:$0xff]   ;;  %v1714_v47 = vld [vmem:[%s2507_s0 + $0x7c] ss:$20 sps:$4 sm:$0xff]  }
   0xd   :  { %1552 = vmatpush3.bf16.msra.mxu1 %v1673_v11  ;;  %1489 = vmatprep.subr.bf16.mxu0 %v1674_v12  ;;  %v1694_v32 = vld [vmem:[%s2507_s0] ss:$20 sps:$4 sm:$0xff]   ;;  %v1696_v33 = vld [vmem:[%s2507_s0 + $0x4] ss:$20 sps:$4 sm:$0xff]   ;;  %v1697_v34 = vld [vmem:[%s2507_s0 + $0x8] ss:$20 sps:$4 sm:$0xff]  }
   0xe   :  { %1553 = vmatprep.subr.bf16.mxu1 %v1675_v13  ;;  %v1699_v35 = vld [vmem:[%s2507_s0 + $0xc] ss:$20 sps:$4 sm:$0xff]   ;;  %608 = vmatprep.mubr.bf16.mxu0 %v1696_v33  ;;  %v1703_v38 = vld [vmem:[%s2507_s0 + $0x34] ss:$20 sps:$4 sm:$0xff]   ;;  %v1706_v40 = vld [vmem:[%s2507_s0 + $0x30] ss:$20 sps:$4 sm:$0xff]  }
   0xf   :  { %705 = vmatprep.mubr.bf16.mxu1 %v1699_v35  ;;  %v1701_v37 = vld [vmem:[%s2507_s0 + $0x2c] ss:$20 sps:$4 sm:$0xff]   ;;  %v1705_v39 = vld [vmem:[%s2507_s0 + $0x28] ss:$20 sps:$4 sm:$0xff]   ;;  %v1711_v44 = vld [vmem:[%s2507_s0 + $0x50] ss:$20 sps:$4 sm:$0xff]  }
  0x10   :  { %1490 = vmatpush3.bf16.msra.mxu0 %v1676_v14  ;;  %v1707_v41 = vld [vmem:[%s2507_s0 + $0x54] ss:$20 sps:$4 sm:$0xff]   ;;  %v1712_v45 = vld [vmem:[%s2507_s0 + $0x58] ss:$20 sps:$4 sm:$0xff]   ;;  %v1739_v49 = vld [vmem:[%s2506_s1 + $0x100] sm:$0xff]  }
  0x11   :  { %1554 = vmatpush3.bf16.msra.mxu1 %v1677_v15  ;;  %1491 = vmatprep.subr.bf16.mxu0 %v1678_v16  ;;  %v1726_v46 = vld [vmem:[%s2506_s1 + $0x108] sm:$0xff]   ;;  %v1716_v48 = vld [vmem:[%s2507_s0 + $0x84] ss:$20 sps:$4 sm:$0xff]   ;;  %v1719_v51 = vld [vmem:[%s2507_s0 + $0x80] ss:$20 sps:$4 sm:$0xff]  }
  0x12   :  { %1555 = vmatprep.subr.bf16.mxu1 %v1679_v17  ;;  %v1718_v50 = vld [vmem:[%s2507_s0 + $0x78] ss:$20 sps:$4 sm:$0xff]   ;;  %v1724_v54 = vld [vmem:[%s2507_s0 + $0xa0] ss:$20 sps:$4 sm:$0xff]   ;;  %v1725_v55 = vld [vmem:[%s2507_s0 + $0xa8] ss:$20 sps:$4 sm:$0xff]  }
  0x13   :  { %v1720_v52 = vld [vmem:[%s2507_s0 + $0xa4] ss:$20 sps:$4 sm:$0xff]   ;;  %v1722_v53 = vld [vmem:[%s2507_s0 + $0xac] ss:$20 sps:$4 sm:$0xff]   ;;  %v1729_v57 = vld [vmem:[%s2507_s0 + $0xd4] ss:$20 sps:$4 sm:$0xff]  }
  0x14   :  { %1492 = vmatpush3.bf16.msra.mxu0 %v1680_v18  ;;  %v1727_v56 = vld [vmem:[%s2507_s0 + $0xcc] ss:$20 sps:$4 sm:$0xff]   ;;  %v1731_v58 = vld [vmem:[%s2507_s0 + $0xc8] ss:$20 sps:$4 sm:$0xff]   ;;  %v1732_v59 = vld [vmem:[%s2507_s0 + $0xd0] ss:$20 sps:$4 sm:$0xff]  }
  0x15   :  { %1556 = vmatpush3.bf16.msra.mxu1 %v1681_v19  ;;  %1493 = vmatprep.subr.bf16.mxu0 %v1682_v20  ;;  %v1733_v60 = vld [vmem:[%s2507_s0 + $0xf4] ss:$20 sps:$4 sm:$0xff]   ;;  %v1735_v61 = vld [vmem:[%s2507_s0 + $0xfc] ss:$20 sps:$4 sm:$0xff]   ;;  %v1738_v63 = vld [vmem:[%s2507_s0 + $0xf8] ss:$20 sps:$4 sm:$0xff]  }
  0x16   :  { %1557 = vmatprep.subr.bf16.mxu1 %v1683_v21  ;;  %v1737_v62 = vld [vmem:[%s2507_s0 + $0xf0] ss:$20 sps:$4 sm:$0xff]   ;;  %v1744_v2 = vld [vmem:[%s2507_s0 + $0x118] ss:$20 sps:$4 sm:$0xff]   ;;  %v1745_v3 = vld [vmem:[%s2507_s0 + $0x120] ss:$20 sps:$4 sm:$0xff]  }
  0x17   :  { %v1740_v0 = vld [vmem:[%s2507_s0 + $0x11c] ss:$20 sps:$4 sm:$0xff]   ;;  %v1742_v1 = vld [vmem:[%s2507_s0 + $0x124] ss:$20 sps:$4 sm:$0xff]   ;;  %v1750_v8 = vld [vmem:[%s2507_s0 + $0x60] ss:$20 sps:$4 sm:$0xff]  }
  0x18   :  { %1494 = vmatpush3.bf16.msra.mxu0 %v1684_v22  ;;  %v1746_v4 = vld [vmem:[%s2507_s0 + $0x10] ss:$20 sps:$4 sm:$0xff]   ;;  %v1748_v6 = vld [vmem:[%s2507_s0 + $0x38] ss:$20 sps:$4 sm:$0xff]   ;;  %v1751_v9 = vld [vmem:[%s2507_s0 + $0x100] ss:$20 sps:$4 sm:$0xff]  }
  0x19   :  { %1558 = vmatpush3.bf16.msra.mxu1 %v1685_v23  ;;  %1495 = vmatprep.subr.bf16.mxu0 %v1686_v24  ;;  %v1747_v5 = vld [vmem:[%s2507_s0 + $0xb0] ss:$20 sps:$4 sm:$0xff]   ;;  %v1749_v7 = vld [vmem:[%s2507_s0 + $0xd8] ss:$20 sps:$4 sm:$0xff]   ;;  %v1752_v10 = vld [vmem:[%s2507_s0 + $0x88] ss:$20 sps:$4 sm:$0xff]  }
  0x1a   :  { %1559 = vmatprep.subr.bf16.mxu1 %v1687_v25  ;;  %v1753_v11 = vld [vmem:[%s2507_s0 + $0x128] ss:$20 sps:$4 sm:$0xff]  }
  0x1c   :  { %1496 = vmatpush3.bf16.msra.mxu0 %v1688_v26 }
  0x1d   :  { %1560 = vmatpush3.bf16.msra.mxu1 %v1689_v27  ;;  %1497 = vmatprep.subr.bf16.mxu0 %v1690_v28 }
  0x1e   :  { %1561 = vmatprep.subr.bf16.mxu1 %v1691_v29 }
  0x20   :  { %1498 = vmatpush3.bf16.msra.mxu0 %v1692_v30 }
  0x21   :  { %1562 = vmatpush3.bf16.msra.mxu1 %v1693_v31  ;;  %1623 = vmatprep.subr.bf16.mxu0 %v1700_v36 }
  0x22   :  { %1647 = vmatprep.subr.bf16.mxu1 %v1700_v36 }
  0x23   :  { %609 = vmatmul.mubr.bf16.vlgmr.msra.gmra.mxu0 %v1694_v32 }
  0x24   :  { %706 = vmatmul.mubr.bf16.vlgmr.msra.gmra.mxu1 %v1697_v34  ;;  %1624 = vmatpush3.bf16.msra.mxu0 %v1700_v36 }
  0x25   :  { %1651 = vmatpush3.bf16.msra.mxu1 %v1700_v36  ;;  %616 = vmatprep.mubr.bf16.mxu0 %v1701_v37 }
  0x26   :  { %713 = vmatprep.mubr.bf16.mxu1 %v1703_v38  ;;  %1625 = vmatprep.subr.bf16.mxu0 %v1713_v42 }
  0x27   :  { %1648 = vmatprep.subr.bf16.mxu1 %v1713_v42 }
  0x28   :  { %1626 = vmatpush3.bf16.msra.mxu0 %v1713_v42 }
  0x29   :  { %1652 = vmatpush3.bf16.msra.mxu1 %v1713_v42  ;;  %1627 = vmatprep.subr.bf16.mxu0 %v1726_v46 }
  0x2a   :  { %1649 = vmatprep.subr.bf16.mxu1 %v1726_v46 }
  0x2b   :  { %617 = vmatmul.mubr.bf16.gmra.mxu0 %v1705_v39 }
  0x2c   :  { %714 = vmatmul.mubr.bf16.gmra.mxu1 %v1706_v40  ;;  %624 = vmatprep.mubr.bf16.mxu0 %v1707_v41 }
  0x2d   :  { %721 = vmatprep.mubr.bf16.mxu1 %v1709_v43  ;;  %1628 = vmatpush3.bf16.msra.mxu0 %v1726_v46 }
  0x2e   :  { %1653 = vmatpush3.bf16.msra.mxu1 %v1726_v46  ;;  %1629 = vmatprep.subr.bf16.mxu0 %v1739_v49 }
  0x2f   :  { %1650 = vmatprep.subr.bf16.mxu1 %v1739_v49 }
  0x31   :  { %1630 = vmatpush3.bf16.msra.mxu0 %v1739_v49 }
  0x32   :  { %1654 = vmatpush3.bf16.msra.mxu1 %v1739_v49 }
  0x33   :  { %625 = vmatmul.mubr.bf16.gmra.mxu0 %v1711_v44 }
  0x34   :  { %722 = vmatmul.mubr.bf16.gmra.mxu1 %v1712_v45  ;;  %632 = vmatprep.mubr.bf16.mxu0 %v1714_v47 }
  0x35   :  { %729 = vmatprep.mubr.bf16.mxu1 %v1716_v48 }
  0x3b   :  { %633 = vmatmul.mubr.bf16.gmra.mxu0 %v1718_v50 }
  0x3c   :  { %730 = vmatmul.mubr.bf16.gmra.mxu1 %v1719_v51  ;;  %640 = vmatprep.mubr.bf16.mxu0 %v1720_v52 }
  0x3d   :  { %737 = vmatprep.mubr.bf16.mxu1 %v1722_v53 }
  0x43   :  { %641 = vmatmul.mubr.bf16.gmra.mxu0 %v1724_v54 }
  0x44   :  { %738 = vmatmul.mubr.bf16.gmra.mxu1 %v1725_v55  ;;  %648 = vmatprep.mubr.bf16.mxu0 %v1727_v56 }
  0x45   :  { %745 = vmatprep.mubr.bf16.mxu1 %v1729_v57 }
  0x4b   :  { %649 = vmatmul.mubr.bf16.gmra.mxu0 %v1731_v58 }
  0x4c   :  { %746 = vmatmul.mubr.bf16.gmra.mxu1 %v1732_v59  ;;  %656 = vmatprep.mubr.bf16.mxu0 %v1733_v60 }
  0x4d   :  { %753 = vmatprep.mubr.bf16.mxu1 %v1735_v61 }
  0x53   :  { %657 = vmatmul.mubr.bf16.gmra.mxu0 %v1737_v62 }
  0x54   :  { %754 = vmatmul.mubr.bf16.gmra.mxu1 %v1738_v63  ;;  %664 = vmatprep.mubr.bf16.mxu0 %v1740_v0 }
  0x55   :  { %761 = vmatprep.mubr.bf16.mxu1 %v1742_v1 }
  0x5b   :  { %665 = vmatmul.mubr.bf16.gmra.mxu0 %v1744_v2 }
  0x5c   :  { %762 = vmatmul.mubr.bf16.gmra.mxu1 %v1745_v3  ;;  %1631 = vmatprep.mubr.msk.bf16.mxu0 %vm551_vm0, %v1746_v4 }
  0x5d   :  { %1639 = vmatprep.mubr.msk.bf16.mxu1 %vm551_vm0, %v1747_v5 }
  0x63   :  { %1632 = vmatmul.mubr.msk.bf16.vlgmr.msra.gmra.mxu0 %vm551_vm0, %v1748_v6 }
  0x64   :  { %1640 = vmatmul.mubr.msk.bf16.vlgmr.msra.gmra.mxu1 %vm551_vm0, %v1749_v7  ;;  %1635 = vmatprep.mubr.msk.bf16.mxu0 %vm551_vm0, %v1750_v8 }
  0x65   :  { %1643 = vmatprep.mubr.msk.bf16.mxu1 %vm551_vm0, %v1751_v9 }
  0x6b   :  { %1636 = vmatmul.mubr.msk.bf16.gmra.mxu0 %vm551_vm0, %v1752_v10 }
  0x6c   :  { %1644 = vmatmul.mubr.msk.bf16.gmra.mxu1 %vm551_vm0, %v1753_v11 }
  0xe3   :  { %v1499_v12 = vpop.f32.mrf.mxu0 }
  0xe4   :  { %v1563_v13 = vpop.f32.mrf.mxu1 }
  0xe5   :  { %v1500_v14 = vpop.f32.mrf.mxu0 }
  0xe6   :  { %v1501_v15 = vadd.f32 %v1500_v14, %v1499_v12  ;;  %v1564_v16 = vpop.f32.mrf.mxu1 }
  0xe7   :  { %v1565_v17 = vadd.f32 %v1564_v16, %v1563_v13  ;;  %v1502_v18 = vpop.f32.mrf.mxu0 }
  0xe8   :  { %v1566_v19 = vpop.f32.mrf.mxu1 }
  0xe9   :  { %v1503_v20 = vpop.f32.mrf.mxu0  ;;  %v2045_v21 = vadd.f32 %v1565_v17, %v1501_v15 }
  0xea   :  { %v1504_v22 = vadd.f32 %v1503_v20, %v1502_v18  ;;  %v1567_v23 = vpop.f32.mrf.mxu1 }
  0xeb   :  { %v1568_v24 = vadd.f32 %v1567_v23, %v1566_v19  ;;  %v1505_v25 = vpop.f32.mrf.mxu0 }
  0xec   :  { %v1569_v26 = vpop.f32.mrf.mxu1 }
  0xed   :  { %v1506_v27 = vpop.f32.mrf.mxu0  ;;  %v2047_v28 = vadd.f32 %v1568_v24, %v1504_v22 }
  0xee   :  { %v1570_v29 = vpop.f32.mrf.mxu1  ;;  %v1507_v23 = vadd.f32 %v1506_v27, %v1505_v25 }
  0xef   :  { %v2049_v30 = vpop.f32.mrf.mxu0  ;;  %v1571_v24 = vadd.f32 %v1570_v29, %v1569_v26 }
  0xf0   :  { %v2051_v31 = vpop.f32.mrf.mxu1 }
  0xf1   :  { %v1509_v32 = vpop.f32.mrf.mxu0 }
  0xf2   :  { %v1573_v33 = vpop.f32.mrf.mxu1 }
  0xf3   :  { %v1511_v34 = vpop.f32.mrf.mxu0 }
  0xf4   :  { %v1575_v35 = vpop.f32.mrf.mxu1 }
  0xf5   :  { %v1512_v36 = vpop.f32.mrf.mxu0 }
  0xf6   :  { %v1513_v37 = vadd.f32 %v1512_v36, %v1511_v34  ;;  %v1576_v38 = vpop.f32.mrf.mxu1 }
  0xf7   :  { %v1577_v39 = vadd.f32 %v1576_v38, %v1575_v35  ;;  %v1514_v40 = vpop.f32.mrf.mxu0 }
  0xf8   :  { %v1578_v41 = vpop.f32.mrf.mxu1 }
  0xf9   :  { %v1515_v42 = vpop.f32.mrf.mxu0  ;;  %v2053_v43 = vadd.f32 %v1577_v39, %v1513_v37 }
  0xfa   :  { %v1516_v44 = vadd.f32 %v1515_v42, %v1514_v40  ;;  %v1579_v45 = vpop.f32.mrf.mxu1  ;;  %v1510_v40 = vadd.f32 %v1509_v32, %v2049_v30 }
  0xfb   :  { %v1580_v46 = vadd.f32 %v1579_v45, %v1578_v41  ;;  %v1517_v47 = vpop.f32.mrf.mxu0  ;;  %v1574_v41 = vadd.f32 %v1573_v33, %v2051_v31 }
  0xfc   :  { %v1581_v48 = vpop.f32.mrf.mxu1 }
  0xfd   :  { %v1518_v49 = vpop.f32.mrf.mxu0  ;;  %v2055_v50 = vadd.f32 %v1580_v46, %v1516_v44  ;;  %v716_v44 = vadd.f32 %v1571_v24, %v1507_v23 }
  0xfe   :  { %v1519_v51 = vadd.f32 %v1518_v49, %v1517_v47  ;;  %v1582_v52 = vpop.f32.mrf.mxu1 }
  0xff   :  { %v1583_v53 = vadd.f32 %v1582_v52, %v1581_v48  ;;  %v2057_v54 = vpop.f32.mrf.mxu0 }
 0x100   :  { %v2059_v55 = vpop.f32.mrf.mxu1 }
 0x101   :  { %v2061_v56 = vpop.f32.mrf.mxu0  ;;  %v2063_v57 = vadd.f32 %v1583_v53, %v1519_v51  ;;  %v719_v51 = vadd.f32 %v1574_v41, %v1510_v40 }
 0x102   :  { %v2065_v58 = vpop.f32.mrf.mxu1 }
 0x103   :  { %v1523_v59 = vpop.f32.mrf.mxu0  ;;  %v1586_v40 = vadd.f32 %v2065_v58, %v2059_v55 }
 0x104   :  { %v1587_v60 = vpop.f32.mrf.mxu1 }
 0x105   :  { %v1524_v61 = vpop.f32.mrf.mxu0 }
 0x106   :  { %v1588_v62 = vpop.f32.mrf.mxu1  ;;  %v1525_v52 = vadd.f32 %v1524_v61, %v1523_v59 }
 0x107   :  { %v1526_v63 = vpop.f32.mrf.mxu0  ;;  %v1589_v30 = vadd.f32 %v1588_v62, %v1587_v60 }
 0x108   :  { %v1590_v0 = vpop.f32.mrf.mxu1 }
 0x109   :  { %v1527_v1 = vpop.f32.mrf.mxu0 }
 0x10a   :  { %v1591_v2 = vpop.f32.mrf.mxu1 }
 0x10b   :  { %v1529_v3 = vpop.f32.mrf.mxu0 }
 0x10c   :  { %v1593_v4 = vpop.f32.mrf.mxu1 }
 0x10d   :  { %v1530_v5 = vpop.f32.mrf.mxu0 }
 0x10e   :  { %v1594_v6 = vpop.f32.mrf.mxu1  ;;  %v1531_v35 = vadd.f32 %v1530_v5, %v1529_v3  ;;  %v1528_v3 = vadd.f32 %v1527_v1, %v1526_v63 }
 0x10f   :  { %v1532_v7 = vpop.f32.mrf.mxu0  ;;  %v1595_v36 = vadd.f32 %v1594_v6, %v1593_v4  ;;  %v1592_v4 = vadd.f32 %v1591_v2, %v1590_v0  ;;  %v740_v6 = vadd.f32 %v1589_v30, %v1525_v52 }
 0x110   :  { %v1596_v8 = vpop.f32.mrf.mxu1 }
 0x111   :  { %v1533_v9 = vpop.f32.mrf.mxu0  ;;  %v748_v46 = vadd.f32 %v1595_v36, %v1531_v35  ;;  %v743_v61 = vadd.f32 %v1592_v4, %v1528_v3 }
 0x112   :  { %v1597_v10 = vpop.f32.mrf.mxu1  ;;  %v1534_v29 = vadd.f32 %v1533_v9, %v1532_v7 }
 0x113   :  { %v2067_v11 = vpop.f32.mrf.mxu0  ;;  %v1598_v48 = vadd.f32 %v1597_v10, %v1596_v8 }
 0x114   :  { %v2069_v12 = vpop.f32.mrf.mxu1 }
 0x115   :  { %v2071_v13 = vpop.f32.mrf.mxu0  ;;  %v751_v5 = vadd.f32 %v1598_v48, %v1534_v29 }
 0x116   :  { %v2073_v14 = vpop.f32.mrf.mxu1 }
 0x117   :  { %v2075_v15 = vpop.f32.mrf.mxu0 }
 0x118   :  { %v2077_v16 = vpop.f32.mrf.mxu1 }
 0x119   :  { %v2079_v17 = vpop.f32.mrf.mxu0 }
 0x11a   :  { %v2081_v18 = vpop.f32.mrf.mxu1 }
 0x11b   :  { %v2083_v19 = vpop.f32.mrf.mxu0 }
 0x11c   :  { %v2085_v20 = vpop.f32.mrf.mxu1 }
 0x11d   :  { %v2087_v22 = vpop.f32.mrf.mxu0 }
 0x11e   :  { %v2089_v34 = vpop.f32.mrf.mxu1  ;;  %v1543_v29 = vadd.f32 %v2087_v22, %v2083_v19 }
 0x11f   :  { %v2091_v37 = vpop.f32.mrf.mxu0 }
 0x120   :  { %v2093_v38 = vpop.f32.mrf.mxu1 }
 0x121   :  { %v1545_v39 = vpop.f32.mrf.mxu0 }
 0x122   :  { %v1609_v42 = vpop.f32.mrf.mxu1 }
 0x123   :  { %v1633_v45 = vpop.f32.mrf.mxu0 }
 0x124   :  { %v2097_v47 = vadd.f32 %v1633_v45, %v716_v44  ;;  %v1641_v25 = vpop.f32.mrf.mxu1 }
 0x125   :  { %v2099_v26 = vadd.f32 %v1641_v25, %v748_v46  ;;  %v804_v27 = vpop.f32.mrf.mxu0  ;;  %v1546_v46 = vadd.f32 %v1545_v39, %v2091_v37  ;;  %v1610_v25 = vadd.f32 %v1609_v42, %v2093_v38  ;;  %v1601_v39 = vadd.f32 %v2073_v14, %v2069_v12 }
 0x126   :  { %v836_v49 = vpop.f32.mrf.mxu1  ;;  %871 = vadd.xlane.f32.xlu1 %v2097_v47  ;;  %v2106_v33 = vadd.f32 %v804_v27, %v2045_v21  ;;  %v917_v62 = vmul.f32 %v2097_v47, %v2097_v47  ;;  %v1786_v12 = vmov 0  }
 0x127   :  { %887 = vadd.xlane.f32.xlu0 %v2099_v26  ;;  %v1634_v31 = vpop.f32.mrf.mxu0  ;;  %v2112_v59 = vadd.f32 %v836_v49, %v740_v6  ;;  %v925_v1 = vmul.f32 %v2099_v26, %v2099_v26  ;;  %v767_v48 = vadd.f32 %v1610_v25, %v1546_v46  ;;  %1658 = vset.pattern.permute.xlu1 %v1786_v12 }
 0x128   :  { %v2103_v32 = vadd.f32 %v1634_v31, %v719_v51  ;;  %v1642_v53 = vpop.f32.mrf.mxu1  ;;  %v915_v10 = vmul.f32 %v2106_v33, %v2106_v33  ;;  %1659 = vset.pattern.permute.xlu0 %v1786_v12 }
 0x129   :  { %v2110_v7 = vadd.f32 %v1642_v53, %v751_v5  ;;  %v807_v0 = vpop.f32.mrf.mxu0  ;;  %v923_v36 = vmul.f32 %v2112_v59, %v2112_v59 }
 0x12a   :  { %873 = vadd.xlane.f32.xlu1 %v2103_v32  ;;  %v839_v60 = vpop.f32.mrf.mxu1  ;;  %v918_v63 = vmul.f32 %v2103_v32, %v2103_v32  ;;  %v2126_v2 = vadd.f32 %v807_v0, %v2047_v28  ;;  %v1522_v28 = vadd.f32 %v2061_v56, %v2057_v54  ;;  %v1607_v54 = vadd.f32 %v2089_v34, %v2085_v20 }
 0x12b   :  { %867 = vadd.xlane.f32.xlu0 %v2106_v33  ;;  %v2116_v21 = vadd.f32 %v839_v60, %v743_v61  ;;  %v926_v8 = vmul.f32 %v2110_v7, %v2110_v7  ;;  %v1637_v9 = vpop.f32.mrf.mxu0  ;;  %v1540_v20 = vadd.f32 %v2079_v17, %v2075_v15  ;;  %v1604_v34 = vadd.f32 %v2081_v18, %v2077_v16 }
 0x12c   :  { %v916_v23 = vmul.f32 %v2126_v2, %v2126_v2  ;;  %v1645_v24 = vpop.f32.mrf.mxu1  ;;  %v735_v27 = vadd.f32 %v1586_v40, %v1522_v28  ;;  %v2152_v56 = vadd.f32 %v1637_v9, %v2063_v57  ;;  %v764_v37 = vadd.f32 %v1607_v54, %v1543_v29 }
 0x12d   :  { %v820_v35 = vpop.f32.mrf.mxu0  ;;  %v924_v41 = vmul.f32 %v2116_v21, %v2116_v21  ;;  %v1537_v57 = vadd.f32 %v2071_v13, %v2067_v11  ;;  %v759_v17 = vadd.f32 %v1604_v34, %v1540_v20 }
 0x12e   :  { %889 = vadd.xlane.f32.xlu1 %v2110_v7  ;;  %v852_v44 = vpop.f32.mrf.mxu1  ;;  %v2158_v19 = vadd.f32 %v1645_v24, %v764_v37  ;;  %v2174_v49 = vadd.f32 %v820_v35, %v2053_v43 }
 0x12f   :  { %883 = vadd.xlane.f32.xlu0 %v2112_v59  ;;  %v1638_v45 = vpop.f32.mrf.mxu0  ;;  %v756_v16 = vadd.f32 %v1601_v39, %v1537_v57 }
 0x130   :  { %v2149_v55 = vadd.f32 %v1638_v45, %v735_v27  ;;  %v1646_v58 = vpop.f32.mrf.mxu1  ;;  %v919_v14 = vmul.f32 %v2174_v49, %v2174_v49  ;;  %v929_v31 = vmul.f32 %v2158_v19, %v2158_v19 }
 0x131   :  { %v2156_v38 = vadd.f32 %v1646_v58, %v767_v48  ;;  %v823_v22 = vpop.f32.mrf.mxu0  ;;  %v2180_v11 = vadd.f32 %v852_v44, %v756_v16 }
 0x132   :  { %885 = vadd.xlane.f32.xlu1 %v2116_v21  ;;  %v2171_v42 = vadd.f32 %v823_v22, %v2055_v50  ;;  %v855_v15 = vpop.f32.mrf.mxu1  ;;  %v922_v43 = vmul.f32 %v2149_v55, %v2149_v55  ;;  %v921_v50 = vmul.f32 %v2152_v56, %v2152_v56 }
 0x133   :  { %935 = vadd.xlane.f32.xlu0 %v917_v62  ;;  %v2178_v18 = vadd.f32 %v855_v15, %v759_v17  ;;  %v927_v52 = vmul.f32 %v2180_v11, %v2180_v11  ;;  %v930_v30 = vmul.f32 %v2156_v38, %v2156_v38 }
 0x134   :  { %v920_v13 = vmul.f32 %v2171_v42, %v2171_v42 }
 0x135   :  { %v928_v51 = vmul.f32 %v2178_v18, %v2178_v18 }
 0x136   :  { %937 = vadd.xlane.f32.xlu1 %v918_v63 }
 0x137   :  { %951 = vadd.xlane.f32.xlu0 %v925_v1 }
 0x13a   :  { %953 = vadd.xlane.f32.xlu1 %v926_v8 }
 0x13b   :  { %931 = vadd.xlane.f32.xlu0 %v915_v10 }
 0x13e   :  { %933 = vadd.xlane.f32.xlu1 %v916_v23 }
 0x13f   :  { %947 = vadd.xlane.f32.xlu0 %v923_v36 }
 0x142   :  { %949 = vadd.xlane.f32.xlu1 %v924_v41 }
 0x143   :  { %869 = vadd.xlane.f32.xlu0 %v2126_v2 }
 0x146   :  { %881 = vadd.xlane.f32.xlu1 %v2149_v55 }
 0x147   :  { %879 = vadd.xlane.f32.xlu0 %v2152_v56 }
 0x14a   :  { %897 = vadd.xlane.f32.xlu1 %v2156_v38 }
 0x14b   :  { %895 = vadd.xlane.f32.xlu0 %v2158_v19 }
 0x14e   :  { %877 = vadd.xlane.f32.xlu1 %v2171_v42 }
 0x14f   :  { %875 = vadd.xlane.f32.xlu0 %v2174_v49 }
 0x152   :  { %893 = vadd.xlane.f32.xlu1 %v2178_v18 }
 0x153   :  { %891 = vadd.xlane.f32.xlu0 %v2180_v11 }
 0x156   :  { %945 = vadd.xlane.f32.xlu1 %v922_v43 }
 0x157   :  { %943 = vadd.xlane.f32.xlu0 %v921_v50 }
 0x15a   :  { %941 = vadd.xlane.f32.xlu1 %v920_v13 }
 0x15b   :  { %939 = vadd.xlane.f32.xlu0 %v919_v14 }
 0x15e   :  { %957 = vadd.xlane.f32.xlu1 %v928_v51 }
 0x15f   :  { %955 = vadd.xlane.f32.xlu0 %v927_v52 }
 0x162   :  { %961 = vadd.xlane.f32.xlu1 %v930_v30 }
 0x163   :  { %959 = vadd.xlane.f32.xlu0 %v929_v31 }
 0x1af   :  { %v872_v53 = vpop.xlane.xlu1 %871 }
 0x1b0   :  { %v888_v3 = vpop.xlane.xlu0 %887  ;;  %v2200_v61 = vmul.f32 0.5, %v872_v53 }
 0x1b1   :  { %v2204_v1 = vmul.f32 0.5, %v888_v3 }
 0x1b2   :  { %v981_v8 = vmul.f32 %v2200_v61, %v2200_v61 }
 0x1b3   :  { %v874_v4 = vpop.xlane.xlu1 %873  ;;  %v989_v40 = vmul.f32 %v2204_v1, %v2204_v1 }
 0x1b4   :  { %v868_v5 = vpop.xlane.xlu0 %867  ;;  %v2202_v63 = vmul.f32 0.5, %v874_v4  ;;  %v2233_v4 = vld [vmem:[%s2508_s2 + $0x10] sm:$0xff] }
 0x1b5   :  { %v2214_v41 = vmul.f32 0.5, %v868_v5 }
 0x1b6   :  { %v982_v24 = vmul.f32 %v2202_v63, %v2202_v63 }
 0x1b7   :  { %v890_v6 = vpop.xlane.xlu1 %889  ;;  %v979_v37 = vmul.f32 %v2214_v41, %v2214_v41 }
 0x1b8   :  { %v884_v60 = vpop.xlane.xlu0 %883  ;;  %v2210_v35 = vmul.f32 0.5, %v890_v6 }
 0x1b9   :  { %v2220_v22 = vmul.f32 0.5, %v884_v60 }
 0x1ba   :  { %v990_v29 = vmul.f32 %v2210_v35, %v2210_v35 }
 0x1bb   :  { %v886_v62 = vpop.xlane.xlu1 %885  ;;  %v987_v12 = vmul.f32 %v2220_v22, %v2220_v22 }
 0x1bc   :  { %v936_v0 = vpop.xlane.xlu0 %935  ;;  %v2224_v43 = vmul.f32 0.5, %v886_v62 }
 0x1bd   :  { %v965_v9 = vmul.f32 0.5, %v936_v0 }
 0x1be   :  { %v988_v31 = vmul.f32 %v2224_v43, %v2224_v43 }
 0x1bf   :  { %v997_v10 = vsub.f32 %v965_v9, %v981_v8  ;;  %v938_v23 = vpop.xlane.xlu1 %937 }
 0x1c0   :  { %v966_v36 = vmul.f32 0.5, %v938_v23  ;;  %v952_v28 = vpop.xlane.xlu0 %951  ;;  %v2241_v23 = vld [vmem:[%s2508_s2 + $0x50] sm:$0xff] }
 0x1c1   :  { %v1013_v44 = vadd.f32 1e-05, %v997_v10  ;;  %v973_v45 = vmul.f32 0.5, %v952_v28 }
 0x1c2   :  { %v998_v46 = vsub.f32 %v966_v36, %v982_v24  ;;  %v2246_v24 = vld [vmem:[%s2508_s2 + $0x18] sm:$0xff] }
 0x1c3   :  { %1754 = vrsqrt.f32 %v1013_v44  ;;  %v1005_v25 = vsub.f32 %v973_v45, %v989_v40  ;;  %v954_v27 = vpop.xlane.xlu1 %953 }
 0x1c4   :  { %v1014_v54 = vadd.f32 1e-05, %v998_v46  ;;  %v974_v58 = vmul.f32 0.5, %v954_v27  ;;  %v932_v48 = vpop.xlane.xlu0 %931 }
 0x1c5   :  { %v1021_v20 = vadd.f32 1e-05, %v1005_v25  ;;  %v963_v34 = vmul.f32 0.5, %v932_v48 }
 0x1c6   :  { %1756 = vrsqrt.f32 %v1014_v54  ;;  %v1006_v57 = vsub.f32 %v974_v58, %v990_v29  ;;  %v2262_v54 = vld [vmem:[%s2508_s2 + $0x58] sm:$0xff] }
 0x1c7   :  { %1758 = vrsqrt.f32 %v1021_v20  ;;  %v995_v39 = vsub.f32 %v963_v34, %v979_v37  ;;  %v934_v15 = vpop.xlane.xlu1 %933  ;;  %v2270_v34 = vld [vmem:[%s2508_s2] sm:$0xff] }
 0x1c8   :  { %v1022_v17 = vadd.f32 1e-05, %v1006_v57  ;;  %v948_v16 = vpop.xlane.xlu0 %947  ;;  %v964_v5 = vmul.f32 0.5, %v934_v15 }
 0x1c9   :  { %v1011_v50 = vadd.f32 1e-05, %v995_v39  ;;  %v971_v13 = vmul.f32 0.5, %v948_v16 }
 0x1ca   :  { %1760 = vrsqrt.f32 %v1022_v17 }
 0x1cb   :  { %1762 = vrsqrt.f32 %v1011_v50  ;;  %v1003_v14 = vsub.f32 %v971_v13, %v987_v12  ;;  %v950_v51 = vpop.xlane.xlu1 %949  ;;  %v2285_v50 = vld [vmem:[%s2508_s2 + $0x40] sm:$0xff] }
 0x1cc   :  { %v972_v52 = vmul.f32 0.5, %v950_v51  ;;  %v870_v30 = vpop.xlane.xlu0 %869 }
 0x1cd   :  { %v1019_v53 = vadd.f32 1e-05, %v1003_v14  ;;  %v2228_v3 = vmul.f32 0.5, %v870_v30  ;;  %v2299_v30 = vld [vmem:[%s2508_s2 + $0x8] sm:$0xff] }
 0x1ce   :  { %v1004_v6 = vsub.f32 %v972_v52, %v988_v31 }
 0x1cf   :  { %1764 = vrsqrt.f32 %v1019_v53  ;;  %v980_v60 = vmul.f32 %v2228_v3, %v2228_v3  ;;  %v882_v62 = vpop.xlane.xlu1 %881 }
 0x1d0   :  { %v1755_v0 = vpop.eup %1754  ;;  %v880_v8 = vpop.xlane.xlu0 %879  ;;  %v1020_v28 = vadd.f32 1e-05, %v1004_v6  ;;  %v2280_v16 = vmul.f32 0.5, %v882_v62 }
 0x1d1   :  { %v996_v9 = vsub.f32 %v964_v5, %v980_v60  ;;  %v1061_v10 = vmul.f32 %v1755_v0, %v2233_v4  ;;  %v2287_v13 = vmul.f32 0.5, %v880_v8 }
 0x1d2   :  { %v986_v31 = vmul.f32 %v2280_v16, %v2280_v16 }
 0x1d3   :  { %v1757_v36 = vpop.eup %1756  ;;  %v1012_v40 = vadd.f32 1e-05, %v996_v9  ;;  %1183 = vperm.xlu1 %1658, %v1061_v10   ;;  %v2248_v44 = vpop.xlane.xlu1 %897  ;;  %v1077_v25 = vmul.f32 %v1061_v10, %v2200_v61 }
 0x1d4   :  { %v1759_v45 = vpop.eup %1758  ;;  %v2250_v46 = vpop.xlane.xlu0 %895  ;;  %v2257_v29 = vmul.f32 %v1757_v36, %v2246_v24 }
 0x1d5   :  { %1766 = vrsqrt.f32 %v1012_v40  ;;  %v2254_v27 = vmul.f32 %v1759_v45, %v2241_v23 }
 0x1d6   :  { %1768 = vrsqrt.f32 %v1020_v28  ;;  %v1078_v57 = vmul.f32 %v2257_v29, %v2202_v63 }
 0x1d7   :  { %v1761_v58 = vpop.eup %1760  ;;  %1111 = vrot.lane.b32.xlu1 %v1077_v25, %s1787_s7  ;;  %v878_v48 = vpop.xlane.xlu1 %877  ;;  %v1085_v61 = vmul.f32 %v2254_v27, %v2204_v1 }
 0x1d8   :  { %v1763_v37 = vpop.eup %1762  ;;  %v876_v20 = vpop.xlane.xlu0 %875  ;;  %v2276_v39 = vmul.f32 %v1761_v58, %v2262_v54  ;;  %v2306_v60 = vmul.f32 0.5, %v878_v48  ;;  %v2316_v58 = vld [vmem:[%s2508_s2 + $0x48] sm:$0xff] }
 0x1d9   :  { %1127 = vrot.lane.b32.xlu0 %v1085_v61, %s1787_s7  ;;  %v1059_v1 = vmul.f32 %v1763_v37, %v2270_v34  ;;  %v2309_v8 = vmul.f32 0.5, %v876_v20 }
 0x1da   :  { %v1086_v63 = vmul.f32 %v2276_v39, %v2210_v35  ;;  %v985_v35 = vmul.f32 %v2287_v13, %v2287_v13  ;;  %v984_v37 = vmul.f32 %v2306_v60, %v2306_v60 }
 0x1db   :  { %1113 = vrot.lane.b32.xlu1 %v1078_v57, %s1787_s7  ;;  %v894_v15 = vpop.xlane.xlu1 %893  ;;  %v1075_v51 = vmul.f32 %v1059_v1, %v2214_v41  ;;  %v983_v20 = vmul.f32 %v2309_v8, %v2309_v8 }
 0x1dc   :  { %v1765_v17 = vpop.eup %1764  ;;  %v892_v12 = vpop.xlane.xlu0 %891 }
 0x1dd   :  { %1173 = vperm.xlu0 %1659, %v1059_v1   ;;  %v2294_v52 = vmul.f32 %v1765_v17, %v2285_v50  ;;  %v914_v17 = vmul.f32 0.5, %v2248_v44 }
 0x1df   :  { %1129 = vrot.lane.b32.xlu1 %v1086_v63, %s1787_s7  ;;  %v946_v14 = vpop.xlane.xlu1 %945  ;;  %v1083_v36 = vmul.f32 %v2294_v52, %v2220_v22  ;;  %v2328_v63 = vmul.f32 0.5, %v894_v15 }
 0x1e0   :  { %v970_v53 = vmul.f32 0.5, %v946_v14  ;;  %v944_v5 = vpop.xlane.xlu0 %943 }
 0x1e1   :  { %v969_v6 = vmul.f32 0.5, %v944_v5  ;;  %1107 = vrot.lane.b32.xlu0 %v1075_v51, %s1787_s7  ;;  %v992_v44 = vmul.f32 %v2328_v63, %v2328_v63 }
 0x1e2   :  { %v1767_v41 = vpop.eup %1766  ;;  %v1002_v62 = vsub.f32 %v970_v53, %v986_v31  ;;  %v913_v31 = vmul.f32 0.5, %v2250_v46  ;;  %v2331_v53 = vmul.f32 0.5, %v892_v12 }
 0x1e3   :  { %v1060_v0 = vmul.f32 %v1767_v41, %v2299_v30  ;;  %v1001_v9 = vsub.f32 %v969_v6, %v985_v35  ;;  %v942_v10 = vpop.xlane.xlu1 %941  ;;  %v1769_v28 = vpop.eup %1768 }
 0x1e4   :  { %v1018_v40 = vadd.f32 1e-05, %v1002_v62  ;;  %v968_v45 = vmul.f32 0.5, %v942_v10  ;;  %v940_v25 = vpop.xlane.xlu0 %939  ;;  %v2325_v1 = vmul.f32 %v1769_v28, %v2316_v58  ;;  %v994_v62 = vmul.f32 %v914_v17, %v914_v17 }
 0x1e5   :  { %v1017_v48 = vadd.f32 1e-05, %v1001_v9  ;;  %v967_v61 = vmul.f32 0.5, %v940_v25  ;;  %1123 = vrot.lane.b32.xlu0 %v1083_v36, %s1787_s7  ;;  %1178 = vperm.xlu1 %1658, %v1060_v0   ;;  %v1076_v22 = vmul.f32 %v1060_v0, %v2228_v3  ;;  %v993_v10 = vmul.f32 %v913_v31, %v913_v31 }
 0x1e6   :  { %1770 = vrsqrt.f32 %v1018_v40  ;;  %v1000_v14 = vsub.f32 %v968_v45, %v984_v37  ;;  %v1084_v41 = vmul.f32 %v2325_v1, %v2224_v43  ;;  %v991_v46 = vmul.f32 %v2331_v53, %v2331_v53 }
 0x1e7   :  { %1772 = vrsqrt.f32 %v1017_v48  ;;  %v958_v57 = vpop.xlane.xlu1 %957  ;;  %v999_v5 = vsub.f32 %v967_v61, %v983_v20  ;;  %v2344_v61 = vld [vmem:[%s2508_s2 + $0x38] sm:$0xff] }
 0x1e8   :  { %v956_v51 = vpop.xlane.xlu0 %955  ;;  %v976_v3 = vmul.f32 0.5, %v958_v57  ;;  %v1016_v15 = vadd.f32 1e-05, %v1000_v14 }
 0x1e9   :  { %1109 = vrot.lane.b32.xlu1 %v1076_v22, %s1787_s7  ;;  %v975_v35 = vmul.f32 0.5, %v956_v51  ;;  %v1015_v12 = vadd.f32 1e-05, %v999_v5  ;;  %v2349_v22 = vld [vmem:[%s2508_s2 + $0x30] sm:$0xff] }
 0x1ea   :  { %v1008_v28 = vsub.f32 %v976_v3, %v992_v44  ;;  %1774 = vrsqrt.f32 %v1016_v15  ;;  %v2365_v44 = vld [vmem:[%s2508_s2 + $0x70] sm:$0xff] }
 0x1eb   :  { %v962_v6 = vpop.xlane.xlu1 %961  ;;  %v1007_v45 = vsub.f32 %v975_v35, %v991_v46  ;;  %1776 = vrsqrt.f32 %v1015_v12 }
 0x1ec   :  { %v978_v0 = vmul.f32 0.5, %v962_v6  ;;  %v960_v9 = vpop.xlane.xlu0 %959  ;;  %v1024_v37 = vadd.f32 1e-05, %v1008_v28 }
 0x1ed   :  { %v977_v36 = vmul.f32 0.5, %v960_v9  ;;  %1125 = vrot.lane.b32.xlu1 %v1084_v41, %s1787_s7  ;;  %v1023_v57 = vadd.f32 1e-05, %v1007_v45  ;;  %v2360_v41 = vld [vmem:[%s2508_s2 + $0x78] sm:$0xff]  ;;  %v2376_v9 = vld [vmem:[%s2508_s2 + $0x20] sm:$0xff]  ;;  %v2384_v45 = vld [vmem:[%s2508_s2 + $0x68] sm:$0xff] }
 0x1ee   :  { %v1010_v40 = vsub.f32 %v978_v0, %v994_v62 }
 0x1ef   :  { %v1009_v25 = vsub.f32 %v977_v36, %v993_v10 }
 0x1f0   :  { %v1026_v43 = vadd.f32 1e-05, %v1010_v40 }
 0x1f1   :  { %v1025_v48 = vadd.f32 1e-05, %v1009_v25 }
 0x1f2   :  { %1778 = vrsqrt.f32 %v1026_v43  ;;  %v2390_v43 = vld [vmem:[%s2508_s2 + $0x60] sm:$0xff] }
 0x1f3   :  { %v1771_v20 = vpop.eup %1770  ;;  %1780 = vrsqrt.f32 %v1025_v48 }
 0x1f4   :  { %v1773_v14 = vpop.eup %1772  ;;  %v1066_v51 = vmul.f32 %v1771_v20, %v2344_v61  ;;  %1782 = vrsqrt.f32 %v1024_v37 }
 0x1f5   :  { %v1065_v5 = vmul.f32 %v1773_v14, %v2349_v22  ;;  %1784 = vrsqrt.f32 %v1023_v57 }
 0x1f6   :  { %v1082_v3 = vmul.f32 %v1066_v51, %v2280_v16 }
 0x1f7   :  { %v1081_v35 = vmul.f32 %v1065_v5, %v2287_v13  ;;  %v1775_v6 = vpop.eup %1774  ;;  %v2370_v13 = vld [vmem:[%s2508_s2 + $0x28] sm:$0xff] }
 0x1f8   :  { %1121 = vrot.lane.b32.xlu1 %v1082_v3, %s1787_s7  ;;  %v1777_v62 = vpop.eup %1776  ;;  %v1064_v12 = vmul.f32 %v1775_v6, %v2370_v13 }
 0x1f9   :  { %1119 = vrot.lane.b32.xlu0 %v1081_v35, %s1787_s7  ;;  %v1063_v40 = vmul.f32 %v1777_v62, %v2376_v9 }
 0x1fb   :  { %v1079_v48 = vmul.f32 %v1063_v40, %v2309_v8 }
 0x1ff   :  { %v1779_v16 = vpop.eup %1778 }
 0x200   :  { %v1781_v15 = vpop.eup %1780  ;;  %v1074_v0 = vmul.f32 %v1779_v16, %v2360_v41 }
 0x201   :  { %v1073_v10 = vmul.f32 %v1781_v15, %v2365_v44  ;;  %v1783_v36 = vpop.eup %1782 }
 0x202   :  { %v1090_v46 = vmul.f32 %v1074_v0, %v914_v17  ;;  %v1785_v25 = vpop.eup %1784  ;;  %v1080_v17 = vmul.f32 %v1064_v12, %v2306_v60  ;;  %v1788_v60 = vmov 1  }
 0x203   :  { %v1089_v28 = vmul.f32 %v1073_v10, %v913_v31  ;;  %v1072_v31 = vmul.f32 %v1783_v36, %v2384_v45  ;;  %v1071_v37 = vmul.f32 %v1785_v25, %v2390_v43 }
 0x204   :  { %1137 = vrot.lane.b32.xlu1 %v1090_v46, %s1787_s7 }
 0x205   :  { %1135 = vrot.lane.b32.xlu0 %v1089_v28, %s1787_s7  ;;  %v1088_v20 = vmul.f32 %v1072_v31, %v2328_v63  ;;  %v1087_v57 = vmul.f32 %v1071_v37, %v2331_v53 }
 0x208   :  { %1117 = vrot.lane.b32.xlu1 %v1080_v17, %s1787_s7 }
 0x209   :  { %1115 = vrot.lane.b32.xlu0 %v1079_v48, %s1787_s7 }
 0x20c   :  { %1133 = vrot.lane.b32.xlu1 %v1088_v20, %s1787_s7 }
 0x20d   :  { %1131 = vrot.lane.b32.xlu0 %v1087_v57, %s1787_s7 }
 0x210   :  { %1193 = vperm.xlu1 %1658, %v1063_v40  }
 0x211   :  { %1188 = vperm.xlu0 %1659, %v2257_v29  }
 0x214   :  { %1203 = vperm.xlu1 %1658, %v1065_v5  }
 0x215   :  { %1198 = vperm.xlu0 %1659, %v1064_v12  }
 0x218   :  { %1213 = vperm.xlu1 %1658, %v2294_v52  }
 0x219   :  { %1208 = vperm.xlu0 %1659, %v1066_v51  }
 0x21c   :  { %1223 = vperm.xlu1 %1658, %v2254_v27  }
 0x21d   :  { %1218 = vperm.xlu0 %1659, %v2325_v1  }
 0x220   :  { %1233 = vperm.xlu1 %1658, %v1071_v37  }
 0x221   :  { %1228 = vperm.xlu0 %1659, %v2276_v39  }
 0x224   :  { %1243 = vperm.xlu1 %1658, %v1073_v10  }
 0x225   :  { %1238 = vperm.xlu0 %1659, %v1072_v31  }
 0x228   :  { %1660 = vset.pattern.permute.xlu1 %v1788_v60 }
 0x229   :  { %1248 = vperm.xlu0 %1659, %v1074_v0  }
 0x22d   :  { %1661 = vset.pattern.permute.xlu0 %v1788_v60 }
 0x24b   :  { %v1128_v8 = vpop.permute.xlu0 %1127 }
 0x24c   :  { %v1165_v29 = vsub.f32 %v2241_v23, %v1128_v8 }
 0x24e   :  { %v2409_v63 = vpop.permute.xlu1 %1183  ;;  %1319 = vperm.xlu0 %1661, %v1165_v29  }
 0x252   :  { %v1112_v52 = vpop.permute.xlu1 %1111 }
 0x253   :  { %v1157_v27 = vsub.f32 %v2233_v4, %v1112_v52 }
 0x255   :  { %1279 = vperm.xlu1 %1660, %v1157_v27  }
 0x256   :  { %v1114_v1 = vpop.permute.xlu1 %1113 }
 0x257   :  { %v1158_v23 = vsub.f32 %v2246_v24, %v1114_v1  ;;  %v1253_v1 = vmul.f32 %v2409_v63, %v2097_v47 }
 0x258   :  { %v2412_v53 = vpop.permute.xlu0 %1173 }
 0x25a   :  { %v1130_v39 = vpop.permute.xlu1 %1129 }
 0x25b   :  { %v1166_v4 = vsub.f32 %v2262_v54, %v1130_v39 }
 0x25c   :  { %v1108_v14 = vpop.permute.xlu0 %1107 }
 0x25d   :  { %v1155_v51 = vsub.f32 %v2270_v34, %v1108_v14 }
 0x25f   :  { %1269 = vperm.xlu1 %1660, %v1155_v51  }
 0x260   :  { %v2415_v5 = vpop.permute.xlu1 %1178  ;;  %v1124_v3 = vpop.permute.xlu0 %1123 }
 0x261   :  { %v1163_v35 = vsub.f32 %v2285_v50, %v1124_v3 }
 0x263   :  { %1284 = vperm.xlu1 %1660, %v1158_v23   ;;  %1309 = vperm.xlu0 %1661, %v1163_v35  }
 0x264   :  { %v1110_v6 = vpop.permute.xlu1 %1109 }
 0x265   :  { %v1156_v62 = vsub.f32 %v2299_v30, %v1110_v6 }
 0x267   :  { %1324 = vperm.xlu1 %1660, %v1166_v4   ;;  %1274 = vperm.xlu0 %1661, %v1156_v62  }
 0x268   :  { %v1126_v16 = vpop.permute.xlu1 %1125 }
 0x269   :  { %v1164_v34 = vsub.f32 %v2316_v58, %v1126_v16 }
 0x26b   :  { %1314 = vperm.xlu1 %1660, %v1164_v34   ;;  %v1120_v15 = vpop.permute.xlu0 %1119  ;;  %v1252_v34 = vmul.f32 %v2415_v5, %v2126_v2 }
 0x26c   :  { %v1161_v0 = vsub.f32 %v2349_v22, %v1120_v15  ;;  %v1122_v10 = vpop.permute.xlu1 %1121 }
 0x26d   :  { %v1162_v24 = vsub.f32 %v2344_v61, %v1122_v10 }
 0x26e   :  { %1299 = vperm.xlu0 %1661, %v1161_v0  }
 0x26f   :  { %1304 = vperm.xlu1 %1660, %v1162_v24  }
 0x276   :  { %v1138_v50 = vpop.permute.xlu1 %1137 }
 0x277   :  { %v1136_v46 = vpop.permute.xlu0 %1135  ;;  %v1170_v61 = vsub.f32 %v2360_v41, %v1138_v50 }
 0x278   :  { %v1169_v25 = vsub.f32 %v2365_v44, %v1136_v46 }
 0x27a   :  { %v1118_v12 = vpop.permute.xlu1 %1117 }
 0x27b   :  { %v1160_v54 = vsub.f32 %v2370_v13, %v1118_v12  ;;  %v1116_v30 = vpop.permute.xlu0 %1115 }
 0x27c   :  { %v1159_v36 = vsub.f32 %v2376_v9, %v1116_v30 }
 0x27d   :  { %1294 = vperm.xlu1 %1660, %v1160_v54  }
 0x27e   :  { %1289 = vperm.xlu0 %1661, %v1159_v36   ;;  %v1134_v58 = vpop.permute.xlu1 %1133 }
 0x27f   :  { %v1168_v28 = vsub.f32 %v2384_v45, %v1134_v58  ;;  %v1132_v40 = vpop.permute.xlu0 %1131 }
 0x280   :  { %v1167_v22 = vsub.f32 %v2390_v43, %v1132_v40 }
 0x281   :  { %1334 = vperm.xlu1 %1660, %v1168_v28  }
 0x282   :  { %1329 = vperm.xlu0 %1661, %v1167_v22  }
 0x285   :  { %1344 = vperm.xlu1 %1660, %v1170_v61  }
 0x286   :  { %1339 = vperm.xlu0 %1661, %v1169_v25  }
 0x28b   :  { %v1194_v31 = vpop.permute.xlu1 %1193 }
 0x28c   :  { %v1189_v13 = vpop.permute.xlu0 %1188 }
 0x28d   :  { %v1254_v35 = vmul.f32 %v1189_v13, %v2103_v32 }
 0x28f   :  { %v1204_v37 = vpop.permute.xlu1 %1203 }
 0x290   :  { %v2430_v17 = vpop.permute.xlu0 %1198  ;;  %v1257_v46 = vmul.f32 %v1204_v37, %v2152_v56  ;;  %v1255_v56 = vmul.f32 %v1194_v31, %v2174_v49 }
 0x293   :  { %v1214_v45 = vpop.permute.xlu1 %1213 }
 0x294   :  { %v1209_v9 = vpop.permute.xlu0 %1208  ;;  %v1259_v6 = vmul.f32 %v1214_v45, %v2112_v59 }
 0x295   :  { %v1258_v12 = vmul.f32 %v1209_v9, %v2149_v55  ;;  %v1256_v55 = vmul.f32 %v2430_v17, %v2171_v42 }
 0x297   :  { %v1224_v60 = vpop.permute.xlu1 %1223 }
 0x298   :  { %v1219_v48 = vpop.permute.xlu0 %1218  ;;  %v1261_v41 = vmul.f32 %v1224_v60, %v2099_v26  ;;  %v1251_v26 = vmul.f32 %v2412_v53, %v2106_v33 }
 0x299   :  { %v1260_v24 = vmul.f32 %v1219_v48, %v2116_v21 }
 0x29b   :  { %v1234_v8 = vpop.permute.xlu1 %1233 }
 0x29c   :  { %v1229_v20 = vpop.permute.xlu0 %1228  ;;  %v1263_v37 = vmul.f32 %v1234_v8, %v2180_v11 }
 0x29d   :  { %v1262_v33 = vmul.f32 %v1229_v20, %v2110_v7 }
 0x29f   :  { %v2435_v52 = vpop.permute.xlu1 %1243 }
 0x2a0   :  { %v1239_v57 = vpop.permute.xlu0 %1238  ;;  %v1265_v11 = vmul.f32 %v2435_v52, %v2158_v19 }
 0x2a1   :  { %v1264_v9 = vmul.f32 %v1239_v57, %v2178_v18 }
 0x2a4   :  { %v2432_v43 = vpop.permute.xlu0 %1248 }
 0x2a5   :  { %v1266_v49 = vmul.f32 %v2432_v43, %v2156_v38 }
 0x2c9   :  { %v1320_v29 = vpop.permute.xlu0 %1319 }
 0x2ca   :  { %v1357_v44 = vadd.f32 %v1320_v29, %v1261_v41 }
 0x2cc   :  { %v1373_v27 = vmax.f32 %v1357_v44, 0.0 }
 0x2ce   :  { %1389 = vst [vmem:[%s2509_s3 + $0x50] sm:$0xff] %v1373_v27 }
 0x2d0   :  { %v1280_v39 = vpop.permute.xlu1 %1279 }
 0x2d1   :  { %v1349_v14 = vadd.f32 %v1280_v39, %v1253_v1 }
 0x2d3   :  { %v1365_v51 = vmax.f32 %v1349_v14, 0.0 }
 0x2d5   :  { %1381 = vst [vmem:[%s2509_s3 + $0x10] sm:$0xff] %v1365_v51 }
 0x2da   :  { %v1270_v3 = vpop.permute.xlu1 %1269 }
 0x2db   :  { %v1347_v23 = vadd.f32 %v1270_v3, %v1251_v26 }
 0x2dd   :  { %v1363_v4 = vmax.f32 %v1347_v23, 0.0 }
 0x2de   :  { %v1285_v62 = vpop.permute.xlu1 %1284  ;;  %v1310_v16 = vpop.permute.xlu0 %1309 }
 0x2df   :  { %1379 = vst [vmem:[%s2509_s3] sm:$0xff] %v1363_v4  ;;  %v1350_v47 = vadd.f32 %v1285_v62, %v1254_v35  ;;  %v1355_v63 = vadd.f32 %v1310_v16, %v1259_v6 }
 0x2e1   :  { %v1366_v53 = vmax.f32 %v1350_v47, 0.0  ;;  %v1371_v15 = vmax.f32 %v1355_v63, 0.0 }
 0x2e2   :  { %v1325_v0 = vpop.permute.xlu1 %1324  ;;  %v1275_v32 = vpop.permute.xlu0 %1274 }
 0x2e3   :  { %1382 = vst [vmem:[%s2509_s3 + $0x18] sm:$0xff] %v1366_v53  ;;  %1387 = vst [vmem:[%s2509_s3 + $0x40] sm:$0xff] %v1371_v15  ;;  %v1358_v59 = vadd.f32 %v1325_v0, %v1262_v33  ;;  %v1348_v10 = vadd.f32 %v1275_v32, %v1252_v34 }
 0x2e5   :  { %v1374_v50 = vmax.f32 %v1358_v59, 0.0  ;;  %v1364_v2 = vmax.f32 %v1348_v10, 0.0 }
 0x2e6   :  { %v1315_v5 = vpop.permute.xlu1 %1314 }
 0x2e7   :  { %1390 = vst [vmem:[%s2509_s3 + $0x58] sm:$0xff] %v1374_v50  ;;  %1380 = vst [vmem:[%s2509_s3 + $0x8] sm:$0xff] %v1364_v2  ;;  %v1356_v7 = vadd.f32 %v1315_v5, %v1260_v24 }
 0x2e9   :  { %v1372_v54 = vmax.f32 %v1356_v7, 0.0  ;;  %v1300_v30 = vpop.permute.xlu0 %1299 }
 0x2ea   :  { %v1353_v36 = vadd.f32 %v1300_v30, %v1257_v46  ;;  %v1305_v21 = vpop.permute.xlu1 %1304 }
 0x2eb   :  { %1388 = vst [vmem:[%s2509_s3 + $0x48] sm:$0xff] %v1372_v54  ;;  %v1354_v58 = vadd.f32 %v1305_v21, %v1258_v12 }
 0x2ec   :  { %v1369_v28 = vmax.f32 %v1353_v36, 0.0 }
 0x2ed   :  { %v1370_v40 = vmax.f32 %v1354_v58, 0.0 }
 0x2ee   :  { %1385 = vst [vmem:[%s2509_s3 + $0x30] sm:$0xff] %v1369_v28 }
 0x2ef   :  { %1386 = vst [vmem:[%s2509_s3 + $0x38] sm:$0xff] %v1370_v40 }
 0x2f8   :  { %v1295_v22 = vpop.permute.xlu1 %1294 }
 0x2f9   :  { %v1352_v61 = vadd.f32 %v1295_v22, %v1256_v55  ;;  %v1290_v25 = vpop.permute.xlu0 %1289 }
 0x2fa   :  { %v1351_v13 = vadd.f32 %v1290_v25, %v1255_v56 }
 0x2fb   :  { %v1368_v48 = vmax.f32 %v1352_v61, 0.0 }
 0x2fc   :  { %v1367_v20 = vmax.f32 %v1351_v13, 0.0  ;;  %v1335_v45 = vpop.permute.xlu1 %1334 }
 0x2fd   :  { %1384 = vst [vmem:[%s2509_s3 + $0x28] sm:$0xff] %v1368_v48  ;;  %v1360_v60 = vadd.f32 %v1335_v45, %v1264_v9  ;;  %v1330_v41 = vpop.permute.xlu0 %1329 }
 0x2fe   :  { %1383 = vst [vmem:[%s2509_s3 + $0x20] sm:$0xff] %v1367_v20  ;;  %v1359_v42 = vadd.f32 %v1330_v41, %v1263_v37 }
 0x2ff   :  { %v1376_v18 = vmax.f32 %v1360_v60, 0.0 }
 0x300   :  { %v1375_v17 = vmax.f32 %v1359_v42, 0.0  ;;  %v1345_v31 = vpop.permute.xlu1 %1344 }
 0x301   :  { %1392 = vst [vmem:[%s2509_s3 + $0x68] sm:$0xff] %v1376_v18  ;;  %v1362_v57 = vadd.f32 %v1345_v31, %v1266_v49  ;;  %v1340_v8 = vpop.permute.xlu0 %1339 }
 0x302   :  { %1391 = vst [vmem:[%s2509_s3 + $0x60] sm:$0xff] %v1375_v17  ;;  %v1361_v29 = vadd.f32 %v1340_v8, %v1265_v11 }
 0x303   :  { %v1378_v44 = vmax.f32 %v1362_v57, 0.0 }
 0x304   :  { %v1377_v27 = vmax.f32 %v1361_v29, 0.0 }
 0x305   :  { %1394 = vst [vmem:[%s2509_s3 + $0x78] sm:$0xff] %v1378_v44 }
 0x306   :  { %1393 = vst [vmem:[%s2509_s3 + $0x70] sm:$0xff] %v1377_v27 }

// kernel: _snn_c_apply.19
= control target key start
LH: loop header
LB: loop body
LE: loop exit
PB: predicated region body
PF: predicated region fallthrough
CT: control target
= control target key end

     0   :  { %s1322_s23 = smov 1   ;;  %s1717_s1 = inlined_call_operand.vmem [shape: bf16[768,128], index: 1, kind: input, shape index: {}]   ;;  %s1718_s0 = inlined_call_operand.vmem [shape: bf16[64,768], index: 0, kind: input, shape index: {}]   ;;  %s1719_s2 = inlined_call_operand.vmem [shape: f32[64,2], index: 2, kind: input, shape index: {}]   ;;  %s1720_s3 = inlined_call_operand.vmem [shape: f32[64,128], index: 3, kind: output, shape index: {}]  }
   0x1   :  { %v1221_v0 = vld [vmem:[%s1717_s1 + $0x78] sm:$0xff]   ;;  %v1225_v4 = vld [vmem:[%s1717_s1 + $0x70] sm:$0xff]   ;;  %v1229_v8 = vld [vmem:[%s1717_s1 + $0x68] sm:$0xff]  }
   0x2   :  { %v1222_v1 = vld [vmem:[%s1717_s1 + $0xf8] sm:$0xff]   ;;  %1078 = vmatprep.subr.bf16.mxu0 %v1221_v0  ;;  %v1226_v5 = vld [vmem:[%s1717_s1 + $0xf0] sm:$0xff]   ;;  %v1230_v9 = vld [vmem:[%s1717_s1 + $0xe8] sm:$0xff]  }
   0x3   :  { %v1223_v2 = vld [vmem:[%s1717_s1 + $0x38] sm:$0xff]   ;;  %1118 = vmatprep.subr.bf16.mxu1 %v1222_v1  ;;  %v1227_v6 = vld [vmem:[%s1717_s1 + $0x30] sm:$0xff]   ;;  %v1231_v10 = vld [vmem:[%s1717_s1 + $0x28] sm:$0xff]  }
   0x4   :  { %v1224_v3 = vld [vmem:[%s1717_s1 + $0xb8] sm:$0xff]   ;;  %1079 = vmatpush3.bf16.msra.mxu0 %v1223_v2  ;;  %v1228_v7 = vld [vmem:[%s1717_s1 + $0xb0] sm:$0xff]   ;;  %v1232_v11 = vld [vmem:[%s1717_s1 + $0xa8] sm:$0xff]  }
   0x5   :  { %1119 = vmatpush3.bf16.msra.mxu1 %v1224_v3  ;;  %1080 = vmatprep.subr.bf16.mxu0 %v1225_v4  ;;  %v1233_v12 = vld [vmem:[%s1717_s1 + $0x60] sm:$0xff]   ;;  %v1237_v16 = vld [vmem:[%s1717_s1 + $0x58] sm:$0xff]   ;;  %v1241_v20 = vld [vmem:[%s1717_s1 + $0x50] sm:$0xff]  }
   0x6   :  { %1120 = vmatprep.subr.bf16.mxu1 %v1226_v5  ;;  %v1234_v13 = vld [vmem:[%s1717_s1 + $0xe0] sm:$0xff]   ;;  %v1238_v17 = vld [vmem:[%s1717_s1 + $0xd8] sm:$0xff]   ;;  %v1242_v21 = vld [vmem:[%s1717_s1 + $0xd0] sm:$0xff]  }
   0x7   :  { %v1235_v14 = vld [vmem:[%s1717_s1 + $0x20] sm:$0xff]   ;;  %v1239_v18 = vld [vmem:[%s1717_s1 + $0x18] sm:$0xff]   ;;  %v1243_v22 = vld [vmem:[%s1717_s1 + $0x10] sm:$0xff]  }
   0x8   :  { %1081 = vmatpush3.bf16.msra.mxu0 %v1227_v6  ;;  %v1236_v15 = vld [vmem:[%s1717_s1 + $0xa0] sm:$0xff]   ;;  %v1240_v19 = vld [vmem:[%s1717_s1 + $0x98] sm:$0xff]   ;;  %v1244_v23 = vld [vmem:[%s1717_s1 + $0x90] sm:$0xff]  }
   0x9   :  { %1121 = vmatpush3.bf16.msra.mxu1 %v1228_v7  ;;  %1082 = vmatprep.subr.bf16.mxu0 %v1229_v8  ;;  %v1245_v24 = vld [vmem:[%s1717_s1 + $0x48] sm:$0xff]   ;;  %v1249_v28 = vld [vmem:[%s1717_s1 + $0x40] sm:$0xff]   ;;  %v1259_v36 = vld [vmem:[%s1717_s1 + $0x178] sm:$0xff]  }
   0xa   :  { %1122 = vmatprep.subr.bf16.mxu1 %v1230_v9  ;;  %v1246_v25 = vld [vmem:[%s1717_s1 + $0xc8] sm:$0xff]   ;;  %v1250_v29 = vld [vmem:[%s1717_s1 + $0xc0] sm:$0xff]   ;;  %v1260_v37 = vld [vmem:[%s1717_s1 + $0x138] sm:$0xff]  }
   0xb   :  { %v1247_v26 = vld [vmem:[%s1717_s1 + $0x8] sm:$0xff]   ;;  %v1251_v30 = vld [vmem:[%s1717_s1] sm:$0xff]   ;;  %v1261_v38 = vld [vmem:[%s1717_s1 + $0x170] sm:$0xff]  }
   0xc   :  { %1083 = vmatpush3.bf16.msra.mxu0 %v1231_v10  ;;  %v1248_v27 = vld [vmem:[%s1717_s1 + $0x88] sm:$0xff]   ;;  %v1252_v31 = vld [vmem:[%s1717_s1 + $0x80] sm:$0xff]   ;;  %v1262_v39 = vld [vmem:[%s1717_s1 + $0x130] sm:$0xff]  }
   0xd   :  { %1123 = vmatpush3.bf16.msra.mxu1 %v1232_v11  ;;  %1084 = vmatprep.subr.bf16.mxu0 %v1233_v12  ;;  %v1253_v32 = vld [vmem:[%s1718_s0] ss:$24 sps:$4 sm:$0xff]   ;;  %v1255_v33 = vld [vmem:[%s1718_s0 + $0x4] ss:$24 sps:$4 sm:$0xff]   ;;  %v1263_v40 = vld [vmem:[%s1718_s0 + $0x34] ss:$24 sps:$4 sm:$0xff]  }
   0xe   :  { %1124 = vmatprep.subr.bf16.mxu1 %v1234_v13  ;;  %v1256_v34 = vld [vmem:[%s1718_s0 + $0x8] ss:$24 sps:$4 sm:$0xff]   ;;  %v1258_v35 = vld [vmem:[%s1718_s0 + $0xc] ss:$24 sps:$4 sm:$0xff]   ;;  %575 = vmatprep.mubr.bf16.mxu0 %v1255_v33  ;;  %v1265_v41 = vld [vmem:[%s1718_s0 + $0x3c] ss:$24 sps:$4 sm:$0xff]  }
   0xf   :  { %640 = vmatprep.mubr.bf16.mxu1 %v1258_v35  ;;  %v1267_v42 = vld [vmem:[%s1718_s0 + $0x30] ss:$24 sps:$4 sm:$0xff]   ;;  %v1271_v46 = vld [vmem:[%s1717_s1 + $0x160] sm:$0xff]   ;;  %v1279_v51 = vld [vmem:[%s1717_s1 + $0x158] sm:$0xff]  }
  0x10   :  { %1085 = vmatpush3.bf16.msra.mxu0 %v1235_v14  ;;  %v1268_v43 = vld [vmem:[%s1718_s0 + $0x38] ss:$24 sps:$4 sm:$0xff]   ;;  %v1269_v44 = vld [vmem:[%s1717_s1 + $0x168] sm:$0xff]   ;;  %v1272_v47 = vld [vmem:[%s1717_s1 + $0x120] sm:$0xff]  }
  0x11   :  { %1125 = vmatpush3.bf16.msra.mxu1 %v1236_v15  ;;  %1086 = vmatprep.subr.bf16.mxu0 %v1237_v16  ;;  %v1270_v45 = vld [vmem:[%s1717_s1 + $0x128] sm:$0xff]   ;;  %v1273_v48 = vld [vmem:[%s1718_s0 + $0x64] ss:$24 sps:$4 sm:$0xff]   ;;  %v1277_v50 = vld [vmem:[%s1718_s0 + $0x60] ss:$24 sps:$4 sm:$0xff]  }
  0x12   :  { %1126 = vmatprep.subr.bf16.mxu1 %v1238_v17  ;;  %v1275_v49 = vld [vmem:[%s1718_s0 + $0x6c] ss:$24 sps:$4 sm:$0xff]   ;;  %v1278_v52 = vld [vmem:[%s1718_s0 + $0x68] ss:$24 sps:$4 sm:$0xff]   ;;  %v1280_v53 = vld [vmem:[%s1717_s1 + $0x118] sm:$0xff]  }
  0x13   :  { %v1281_v54 = vld [vmem:[%s1717_s1 + $0x150] sm:$0xff]   ;;  %v1289_v58 = vld [vmem:[%s1717_s1 + $0x148] sm:$0xff]   ;;  %v1291_v62 = vld [vmem:[%s1717_s1 + $0x140] sm:$0xff]  }
  0x14   :  { %1087 = vmatpush3.bf16.msra.mxu0 %v1239_v18  ;;  %v1283_v55 = vld [vmem:[%s1718_s0 + $0x94] ss:$24 sps:$4 sm:$0xff]   ;;  %v1287_v59 = vld [vmem:[%s1718_s0 + $0x90] ss:$24 sps:$4 sm:$0xff]   ;;  %v1292_v1 = vld [vmem:[%s1717_s1 + $0x100] sm:$0xff]  }
  0x15   :  { %1127 = vmatpush3.bf16.msra.mxu1 %v1240_v19  ;;  %1088 = vmatprep.subr.bf16.mxu0 %v1241_v20  ;;  %v1285_v56 = vld [vmem:[%s1718_s0 + $0x9c] ss:$24 sps:$4 sm:$0xff]   ;;  %v1288_v60 = vld [vmem:[%s1718_s0 + $0x98] ss:$24 sps:$4 sm:$0xff]   ;;  %v1290_v61 = vld [vmem:[%s1717_s1 + $0x108] sm:$0xff]  }
  0x16   :  { %1128 = vmatprep.subr.bf16.mxu1 %v1242_v21  ;;  %v1282_v57 = vld [vmem:[%s1717_s1 + $0x110] sm:$0xff]   ;;  %v1299_v4 = vld [vmem:[%s1718_s0 + $0x44] ss:$24 sps:$4 sm:$0xff]   ;;  %v1303_v6 = vld [vmem:[%s1718_s0 + $0x40] ss:$24 sps:$4 sm:$0xff]  }
  0x17   :  { %v1295_v63 = vld [vmem:[%s1718_s0 + $0x14] ss:$24 sps:$4 sm:$0xff]   ;;  %v1293_v2 = vld [vmem:[%s1718_s0 + $0x10] ss:$24 sps:$4 sm:$0xff]   ;;  %v1301_v5 = vld [vmem:[%s1718_s0 + $0xa4] ss:$24 sps:$4 sm:$0xff]  }
  0x18   :  { %1089 = vmatpush3.bf16.msra.mxu0 %v1243_v22  ;;  %v1298_v0 = vld [vmem:[%s1718_s0 + $0x74] ss:$24 sps:$4 sm:$0xff]   ;;  %v1296_v3 = vld [vmem:[%s1718_s0 + $0x70] ss:$24 sps:$4 sm:$0xff]   ;;  %v1304_v7 = vld [vmem:[%s1718_s0 + $0xa0] ss:$24 sps:$4 sm:$0xff]  }
  0x19   :  { %1129 = vmatpush3.bf16.msra.mxu1 %v1244_v23  ;;  %1090 = vmatprep.subr.bf16.mxu0 %v1245_v24 }
  0x1a   :  { %1130 = vmatprep.subr.bf16.mxu1 %v1246_v25 }
  0x1c   :  { %1091 = vmatpush3.bf16.msra.mxu0 %v1247_v26 }
  0x1d   :  { %1131 = vmatpush3.bf16.msra.mxu1 %v1248_v27  ;;  %1092 = vmatprep.subr.bf16.mxu0 %v1249_v28 }
  0x1e   :  { %1132 = vmatprep.subr.bf16.mxu1 %v1250_v29 }
  0x20   :  { %1093 = vmatpush3.bf16.msra.mxu0 %v1251_v30 }
  0x21   :  { %1133 = vmatpush3.bf16.msra.mxu1 %v1252_v31  ;;  %1158 = vmatprep.subr.bf16.mxu0 %v1259_v36 }
  0x22   :  { %1198 = vmatprep.subr.bf16.mxu1 %v1259_v36 }
  0x23   :  { %576 = vmatmul.mubr.bf16.vlgmr.msra.gmra.mxu0 %v1253_v32 }
  0x24   :  { %641 = vmatmul.mubr.bf16.vlgmr.msra.gmra.mxu1 %v1256_v34  ;;  %1159 = vmatpush3.bf16.msra.mxu0 %v1260_v37 }
  0x25   :  { %1206 = vmatpush3.bf16.msra.mxu1 %v1260_v37  ;;  %1160 = vmatprep.subr.bf16.mxu0 %v1261_v38 }
  0x26   :  { %1199 = vmatprep.subr.bf16.mxu1 %v1261_v38  ;;  %583 = vmatprep.mubr.bf16.mxu0 %v1263_v40 }
  0x27   :  { %648 = vmatprep.mubr.bf16.mxu1 %v1265_v41 }
  0x28   :  { %1161 = vmatpush3.bf16.msra.mxu0 %v1262_v39 }
  0x29   :  { %1207 = vmatpush3.bf16.msra.mxu1 %v1262_v39  ;;  %1162 = vmatprep.subr.bf16.mxu0 %v1269_v44 }
  0x2a   :  { %1200 = vmatprep.subr.bf16.mxu1 %v1269_v44 }
  0x2b   :  { %584 = vmatmul.mubr.bf16.gmra.mxu0 %v1267_v42 }
  0x2c   :  { %649 = vmatmul.mubr.bf16.gmra.mxu1 %v1268_v43  ;;  %1163 = vmatpush3.bf16.msra.mxu0 %v1270_v45 }
  0x2d   :  { %1208 = vmatpush3.bf16.msra.mxu1 %v1270_v45  ;;  %1164 = vmatprep.subr.bf16.mxu0 %v1271_v46 }
  0x2e   :  { %1201 = vmatprep.subr.bf16.mxu1 %v1271_v46  ;;  %591 = vmatprep.mubr.bf16.mxu0 %v1273_v48 }
  0x2f   :  { %656 = vmatprep.mubr.bf16.mxu1 %v1275_v49 }
  0x30   :  { %1165 = vmatpush3.bf16.msra.mxu0 %v1272_v47 }
  0x31   :  { %1209 = vmatpush3.bf16.msra.mxu1 %v1272_v47  ;;  %1166 = vmatprep.subr.bf16.mxu0 %v1279_v51 }
  0x32   :  { %1202 = vmatprep.subr.bf16.mxu1 %v1279_v51 }
  0x33   :  { %592 = vmatmul.mubr.bf16.gmra.mxu0 %v1277_v50 }
  0x34   :  { %657 = vmatmul.mubr.bf16.gmra.mxu1 %v1278_v52  ;;  %1167 = vmatpush3.bf16.msra.mxu0 %v1280_v53 }
  0x35   :  { %599 = vmatprep.mubr.bf16.mxu0 %v1283_v55  ;;  %1210 = vmatpush3.bf16.msra.mxu1 %v1280_v53 }
  0x36   :  { %1168 = vmatprep.subr.bf16.mxu0 %v1281_v54  ;;  %1203 = vmatprep.subr.bf16.mxu1 %v1281_v54 }
  0x37   :  { %664 = vmatprep.mubr.bf16.mxu1 %v1285_v56 }
  0x38   :  { %1169 = vmatpush3.bf16.msra.mxu0 %v1282_v57 }
  0x39   :  { %1211 = vmatpush3.bf16.msra.mxu1 %v1282_v57  ;;  %1170 = vmatprep.subr.bf16.mxu0 %v1289_v58 }
  0x3a   :  { %1204 = vmatprep.subr.bf16.mxu1 %v1289_v58 }
  0x3b   :  { %600 = vmatmul.mubr.bf16.gmra.mxu0 %v1287_v59 }
  0x3c   :  { %665 = vmatmul.mubr.bf16.gmra.mxu1 %v1288_v60  ;;  %705 = vmatprep.mubr.bf16.mxu0 %v1295_v63 }
  0x3d   :  { %1171 = vmatpush3.bf16.msra.mxu0 %v1290_v61  ;;  %1212 = vmatpush3.bf16.msra.mxu1 %v1290_v61 }
  0x3e   :  { %1172 = vmatprep.subr.bf16.mxu0 %v1291_v62  ;;  %1205 = vmatprep.subr.bf16.mxu1 %v1291_v62 }
  0x3f   :  { %721 = vmatprep.mubr.bf16.mxu1 %v1298_v0 }
  0x41   :  { %1173 = vmatpush3.bf16.msra.mxu0 %v1292_v1  ;;  %1213 = vmatpush3.bf16.msra.mxu1 %v1292_v1 }
  0x44   :  { %706 = vmatmul.mubr.bf16.vlgmr.msra.gmra.mxu0 %v1293_v2  ;;  %722 = vmatmul.mubr.bf16.vlgmr.msra.gmra.mxu1 %v1296_v3 }
  0x45   :  { %713 = vmatprep.mubr.bf16.mxu0 %v1299_v4  ;;  %729 = vmatprep.mubr.bf16.mxu1 %v1301_v5 }
  0x4c   :  { %714 = vmatmul.mubr.bf16.gmra.mxu0 %v1303_v6  ;;  %730 = vmatmul.mubr.bf16.gmra.mxu1 %v1304_v7 }
  0xe3   :  { %v1094_v8 = vpop.f32.mrf.mxu0 }
  0xe4   :  { %v1134_v9 = vpop.f32.mrf.mxu1 }
  0xe5   :  { %v1095_v10 = vpop.f32.mrf.mxu0 }
  0xe6   :  { %v1135_v11 = vpop.f32.mrf.mxu1  ;;  %v1096_v40 = vadd.f32 %v1095_v10, %v1094_v8 }
  0xe7   :  { %v1097_v12 = vpop.f32.mrf.mxu0  ;;  %v1136_v41 = vadd.f32 %v1135_v11, %v1134_v9 }
  0xe8   :  { %v1137_v13 = vpop.f32.mrf.mxu1 }
  0xe9   :  { %v1098_v14 = vpop.f32.mrf.mxu0  ;;  %v643_v45 = vadd.f32 %v1136_v41, %v1096_v40 }
  0xea   :  { %v1138_v15 = vpop.f32.mrf.mxu1  ;;  %v1099_v50 = vadd.f32 %v1098_v14, %v1097_v12 }
  0xeb   :  { %v1560_v16 = vpop.f32.mrf.mxu0  ;;  %v1139_v51 = vadd.f32 %v1138_v15, %v1137_v13 }
  0xec   :  { %v1562_v17 = vpop.f32.mrf.mxu1 }
  0xed   :  { %v1101_v18 = vpop.f32.mrf.mxu0  ;;  %v646_v62 = vadd.f32 %v1139_v51, %v1099_v50 }
  0xee   :  { %v1141_v19 = vpop.f32.mrf.mxu1  ;;  %v1102_v11 = vadd.f32 %v1101_v18, %v1560_v16 }
  0xef   :  { %v1564_v20 = vpop.f32.mrf.mxu0  ;;  %v1142_v12 = vadd.f32 %v1141_v19, %v1562_v17 }
  0xf0   :  { %v1566_v21 = vpop.f32.mrf.mxu1 }
  0xf1   :  { %v1568_v22 = vpop.f32.mrf.mxu0 }
  0xf2   :  { %v1570_v23 = vpop.f32.mrf.mxu1 }
  0xf3   :  { %v1106_v24 = vpop.f32.mrf.mxu0  ;;  %v1145_v16 = vadd.f32 %v1570_v23, %v1566_v21 }
  0xf4   :  { %v1146_v25 = vpop.f32.mrf.mxu1 }
  0xf5   :  { %v1107_v26 = vpop.f32.mrf.mxu0 }
  0xf6   :  { %v1147_v27 = vpop.f32.mrf.mxu1  ;;  %v1108_v46 = vadd.f32 %v1107_v26, %v1106_v24 }
  0xf7   :  { %v1109_v28 = vpop.f32.mrf.mxu0  ;;  %v1148_v47 = vadd.f32 %v1147_v27, %v1146_v25 }
  0xf8   :  { %v1149_v29 = vpop.f32.mrf.mxu1 }
  0xf9   :  { %v1110_v30 = vpop.f32.mrf.mxu0  ;;  %v659_v59 = vadd.f32 %v1148_v47, %v1108_v46 }
  0xfa   :  { %v1150_v31 = vpop.f32.mrf.mxu1  ;;  %v1111_v52 = vadd.f32 %v1110_v30, %v1109_v28  ;;  %v651_v28 = vadd.f32 %v1142_v12, %v1102_v11 }
  0xfb   :  { %v1112_v32 = vpop.f32.mrf.mxu0  ;;  %v1151_v53 = vadd.f32 %v1150_v31, %v1149_v29  ;;  %v1105_v29 = vadd.f32 %v1568_v22, %v1564_v20 }
  0xfc   :  { %v1152_v33 = vpop.f32.mrf.mxu1 }
  0xfd   :  { %v1113_v34 = vpop.f32.mrf.mxu0  ;;  %v662_v63 = vadd.f32 %v1151_v53, %v1111_v52 }
  0xfe   :  { %v1153_v35 = vpop.f32.mrf.mxu1  ;;  %v1114_v24 = vadd.f32 %v1113_v34, %v1112_v32  ;;  %v654_v32 = vadd.f32 %v1145_v16, %v1105_v29 }
  0xff   :  { %v1572_v36 = vpop.f32.mrf.mxu0  ;;  %v1154_v25 = vadd.f32 %v1153_v35, %v1152_v33 }
 0x100   :  { %v1574_v37 = vpop.f32.mrf.mxu1 }
 0x101   :  { %v1576_v38 = vpop.f32.mrf.mxu0  ;;  %v667_v30 = vadd.f32 %v1154_v25, %v1114_v24 }
 0x102   :  { %v1578_v39 = vpop.f32.mrf.mxu1  ;;  %v1117_v33 = vadd.f32 %v1576_v38, %v1572_v36 }
 0x103   :  { %v1157_v34 = vadd.f32 %v1578_v39, %v1574_v37  ;;  %v1321_v39 = vmov 0  }
 0x104   :  { %v1174_v42 = vpop.f32.mrf.mxu0  ;;  %v1186_v43 = vpop.f32.mrf.mxu1  ;;  %1217 = vset.pattern.permute.xlu0 %v1321_v39  ;;  %1218 = vset.pattern.permute.xlu1 %v1321_v39 }
 0x105   :  { %v670_v23 = vadd.f32 %v1157_v34, %v1117_v33 }
 0x106   :  { %v1175_v44 = vpop.f32.mrf.mxu0  ;;  %v1187_v49 = vpop.f32.mrf.mxu1 }
 0x107   :  { %v1176_v48 = vadd.f32 %v1175_v44, %v1174_v42  ;;  %v1188_v56 = vadd.f32 %v1187_v49, %v1186_v43 }
 0x108   :  { %v1177_v54 = vpop.f32.mrf.mxu0  ;;  %v1189_v57 = vpop.f32.mrf.mxu1 }
 0x109   :  { %v1580_v55 = vadd.f32 %v1176_v48, %v643_v45  ;;  %v1583_v2 = vadd.f32 %v1188_v56, %v659_v59 }
 0x10a   :  { %v1178_v58 = vpop.f32.mrf.mxu0  ;;  %v1190_v61 = vpop.f32.mrf.mxu1 }
 0x10b   :  { %v1179_v60 = vadd.f32 %v1178_v58, %v1177_v54  ;;  %738 = vadd.xlane.f32.xlu0 %v1580_v55  ;;  %v1191_v0 = vadd.f32 %v1190_v61, %v1189_v57  ;;  %v762_v7 = vmul.f32 %v1580_v55, %v1580_v55  ;;  %v766_v13 = vmul.f32 %v1583_v2, %v1583_v2 }
 0x10c   :  { %v1180_v1 = vpop.f32.mrf.mxu0  ;;  %v1192_v5 = vpop.f32.mrf.mxu1 }
 0x10d   :  { %v1585_v3 = vadd.f32 %v1179_v60, %v646_v62  ;;  %v1587_v4 = vadd.f32 %v1191_v0, %v662_v63 }
 0x10e   :  { %v1181_v6 = vpop.f32.mrf.mxu0  ;;  %v1193_v9 = vpop.f32.mrf.mxu1 }
 0x10f   :  { %746 = vadd.xlane.f32.xlu0 %v1583_v2  ;;  %748 = vadd.xlane.f32.xlu1 %v1587_v4  ;;  %v763_v8 = vmul.f32 %v1585_v3, %v1585_v3  ;;  %v1182_v14 = vadd.f32 %v1181_v6, %v1180_v1  ;;  %v767_v15 = vmul.f32 %v1587_v4, %v1587_v4 }
 0x110   :  { %v1183_v10 = vpop.f32.mrf.mxu0  ;;  %v1195_v26 = vpop.f32.mrf.mxu1  ;;  %v1194_v17 = vadd.f32 %v1193_v9, %v1192_v5 }
 0x111   :  { %v1605_v18 = vadd.f32 %v1182_v14, %v651_v28 }
 0x112   :  { %v1184_v27 = vpop.f32.mrf.mxu0  ;;  %v1196_v31 = vpop.f32.mrf.mxu1  ;;  %v1613_v20 = vadd.f32 %v1194_v17, %v667_v30 }
 0x113   :  { %770 = vadd.xlane.f32.xlu0 %v762_v7  ;;  %772 = vadd.xlane.f32.xlu1 %v763_v8  ;;  %v1185_v19 = vadd.f32 %v1184_v27, %v1183_v10  ;;  %v1197_v22 = vadd.f32 %v1196_v31, %v1195_v26  ;;  %v764_v35 = vmul.f32 %v1605_v18, %v1605_v18  ;;  %v1645_v27 = vld [vmem:[%s1719_s2] sm:$0xff] }
 0x114   :  { %v768_v36 = vmul.f32 %v1613_v20, %v1613_v20 }
 0x115   :  { %v1615_v21 = vadd.f32 %v1185_v19, %v654_v32  ;;  %v1621_v40 = vadd.f32 %v1197_v22, %v670_v23  ;;  %v1651_v23 = vld [vmem:[%s1719_s2 + $0x20] sm:$0xff] }
 0x117   :  { %778 = vadd.xlane.f32.xlu0 %v766_v13  ;;  %780 = vadd.xlane.f32.xlu1 %v767_v15  ;;  %v765_v37 = vmul.f32 %v1615_v21, %v1615_v21  ;;  %v769_v38 = vmul.f32 %v1621_v40, %v1621_v40 }
 0x11b   :  { %740 = vadd.xlane.f32.xlu0 %v1585_v3  ;;  %742 = vadd.xlane.f32.xlu1 %v1605_v18 }
 0x11f   :  { %750 = vadd.xlane.f32.xlu0 %v1613_v20  ;;  %744 = vadd.xlane.f32.xlu1 %v1615_v21 }
 0x123   :  { %774 = vadd.xlane.f32.xlu0 %v764_v35  ;;  %752 = vadd.xlane.f32.xlu1 %v1621_v40 }
 0x127   :  { %782 = vadd.xlane.f32.xlu0 %v768_v36  ;;  %776 = vadd.xlane.f32.xlu1 %v765_v37 }
 0x12b   :  { %784 = vadd.xlane.f32.xlu1 %v769_v38 }
 0x194   :  { %v739_v41 = vpop.xlane.xlu0 %738 }
 0x195   :  { %v754_v43 = vmul.f32 0.083333336, %v739_v41 }
 0x197   :  { %v794_v46 = vmul.f32 %v754_v43, %v754_v43 }
 0x198   :  { %v747_v42 = vpop.xlane.xlu0 %746  ;;  %v749_v44 = vpop.xlane.xlu1 %748 }
 0x199   :  { %v1630_v47 = vmul.f32 0.083333336, %v747_v42  ;;  %v1632_v50 = vmul.f32 0.083333336, %v749_v44 }
 0x19b   :  { %v798_v53 = vmul.f32 %v1630_v47, %v1630_v47  ;;  %v799_v58 = vmul.f32 %v1632_v50, %v1632_v50 }
 0x19c   :  { %v771_v45 = vpop.xlane.xlu0 %770  ;;  %v773_v48 = vpop.xlane.xlu1 %772 }
 0x19d   :  { %v786_v49 = vmul.f32 0.083333336, %v771_v45  ;;  %v787_v5 = vmul.f32 0.083333336, %v773_v48 }
 0x19f   :  { %v802_v51 = vsub.f32 %v786_v49, %v794_v46  ;;  %v827_v49 = vld [vmem:[%s1719_s2 + $0x8] sm:$0xff] }
 0x1a0   :  { %v779_v52 = vpop.xlane.xlu0 %778  ;;  %v781_v56 = vpop.xlane.xlu1 %780 }
 0x1a1   :  { %v810_v54 = vadd.f32 1e-05, %v802_v51  ;;  %v790_v57 = vmul.f32 0.083333336, %v779_v52  ;;  %v791_v59 = vmul.f32 0.083333336, %v781_v56 }
 0x1a3   :  { %1305 = vrsqrt.f32 %v810_v54  ;;  %v806_v60 = vsub.f32 %v790_v57, %v798_v53  ;;  %v807_v61 = vsub.f32 %v791_v59, %v799_v58  ;;  %v831_v54 = vld [vmem:[%s1719_s2 + $0x28] sm:$0xff] }
 0x1a4   :  { %v741_v62 = vpop.xlane.xlu0 %740  ;;  %v743_v0 = vpop.xlane.xlu1 %742 }
 0x1a5   :  { %v814_v63 = vadd.f32 1e-05, %v806_v60  ;;  %v755_v1 = vmul.f32 0.083333336, %v741_v62  ;;  %v815_v7 = vadd.f32 1e-05, %v807_v61 }
 0x1a6   :  { %v1638_v9 = vmul.f32 0.083333336, %v743_v0  ;;  %v832_v62 = vld [vmem:[%s1719_s2 + $0x30] sm:$0xff] }
 0x1a7   :  { %1307 = vrsqrt.f32 %v814_v63  ;;  %v795_v6 = vmul.f32 %v755_v1, %v755_v1  ;;  %v829_v63 = vld [vmem:[%s1719_s2 + $0x18] sm:$0xff] }
 0x1a8   :  { %v751_v8 = vpop.xlane.xlu0 %750  ;;  %v745_v11 = vpop.xlane.xlu1 %744  ;;  %1309 = vrsqrt.f32 %v815_v7  ;;  %v796_v14 = vmul.f32 %v1638_v9, %v1638_v9 }
 0x1a9   :  { %v803_v10 = vsub.f32 %v787_v5, %v795_v6  ;;  %v760_v15 = vmul.f32 0.083333336, %v751_v8  ;;  %v757_v26 = vmul.f32 0.083333336, %v745_v11  ;;  %v833_v8 = vld [vmem:[%s1719_s2 + $0x38] sm:$0xff] }
 0x1ab   :  { %v811_v12 = vadd.f32 1e-05, %v803_v10  ;;  %v800_v17 = vmul.f32 %v760_v15, %v760_v15  ;;  %v797_v33 = vmul.f32 %v757_v26, %v757_v26 }
 0x1ac   :  { %v775_v13 = vpop.xlane.xlu0 %774  ;;  %v753_v24 = vpop.xlane.xlu1 %752 }
 0x1ad   :  { %1311 = vrsqrt.f32 %v811_v12  ;;  %v788_v25 = vmul.f32 0.083333336, %v775_v13  ;;  %v761_v34 = vmul.f32 0.083333336, %v753_v24 }
 0x1af   :  { %v804_v28 = vsub.f32 %v788_v25, %v796_v14  ;;  %v801_v44 = vmul.f32 %v761_v34, %v761_v34 }
 0x1b0   :  { %v1306_v29 = vpop.eup %1305  ;;  %v783_v16 = vpop.xlane.xlu0 %782 }
 0x1b1   :  { %v812_v19 = vadd.f32 1e-05, %v804_v28  ;;  %v777_v30 = vpop.xlane.xlu1 %776  ;;  %v792_v31 = vmul.f32 0.083333336, %v783_v16  ;;  %v834_v32 = vmul.f32 %v1306_v29, %v1645_v27 }
 0x1b2   :  { %v789_v22 = vmul.f32 0.083333336, %v777_v30 }
 0x1b3   :  { %1313 = vrsqrt.f32 %v812_v19  ;;  %v808_v35 = vsub.f32 %v792_v31, %v800_v17  ;;  %v842_v36 = vmul.f32 %v834_v32, %v754_v43 }
 0x1b4   :  { %v1308_v37 = vpop.eup %1307  ;;  %v805_v38 = vsub.f32 %v789_v22, %v797_v33 }
 0x1b5   :  { %v816_v39 = vadd.f32 1e-05, %v808_v35  ;;  %v785_v41 = vpop.xlane.xlu1 %784  ;;  %858 = vrot.lane.b32.xlu0 %v842_v36, %s1322_s23  ;;  %v838_v42 = vmul.f32 %v1308_v37, %v1651_v23  ;;  %v1310_v51 = vpop.eup %1309 }
 0x1b6   :  { %v813_v45 = vadd.f32 1e-05, %v805_v38  ;;  %v793_v46 = vmul.f32 0.083333336, %v785_v41  ;;  %v839_v58 = vmul.f32 %v1310_v51, %v831_v54 }
 0x1b7   :  { %1315 = vrsqrt.f32 %v816_v39  ;;  %v846_v48 = vmul.f32 %v838_v42, %v1630_v47  ;;  %v828_v47 = vld [vmem:[%s1719_s2 + $0x10] sm:$0xff] }
 0x1b8   :  { %1317 = vrsqrt.f32 %v813_v45  ;;  %v809_v43 = vsub.f32 %v793_v46, %v801_v44  ;;  %v847_v60 = vmul.f32 %v839_v58, %v1632_v50 }
 0x1b9   :  { %866 = vrot.lane.b32.xlu0 %v846_v48, %s1322_s23 }
 0x1ba   :  { %v1312_v52 = vpop.eup %1311  ;;  %v817_v53 = vadd.f32 1e-05, %v809_v43 }
 0x1bb   :  { %v835_v56 = vmul.f32 %v1312_v52, %v827_v49 }
 0x1bc   :  { %1319 = vrsqrt.f32 %v817_v53 }
 0x1bd   :  { %v843_v57 = vmul.f32 %v835_v56, %v755_v1 }
 0x1bf   :  { %860 = vrot.lane.b32.xlu1 %v843_v57, %s1322_s23 }
 0x1c0   :  { %v1314_v59 = vpop.eup %1313 }
 0x1c1   :  { %v836_v61 = vmul.f32 %v1314_v59, %v828_v47 }
 0x1c3   :  { %868 = vrot.lane.b32.xlu1 %v847_v60, %s1322_s23  ;;  %v844_v5 = vmul.f32 %v836_v61, %v1638_v9  ;;  %v1323_v9 = vmov 1  }
 0x1c4   :  { %v1316_v0 = vpop.eup %1315 }
 0x1c5   :  { %v1318_v1 = vpop.eup %1317  ;;  %v840_v6 = vmul.f32 %v1316_v0, %v832_v62 }
 0x1c6   :  { %v837_v7 = vmul.f32 %v1318_v1, %v829_v63 }
 0x1c7   :  { %862 = vrot.lane.b32.xlu1 %v844_v5, %s1322_s23  ;;  %v848_v50 = vmul.f32 %v840_v6, %v760_v15 }
 0x1c8   :  { %v845_v11 = vmul.f32 %v837_v7, %v757_v26 }
 0x1c9   :  { %v1320_v10 = vpop.eup %1319  ;;  %870 = vrot.lane.b32.xlu0 %v848_v50, %s1322_s23 }
 0x1ca   :  { %v841_v12 = vmul.f32 %v1320_v10, %v833_v8 }
 0x1cb   :  { %864 = vrot.lane.b32.xlu1 %v845_v11, %s1322_s23 }
 0x1cc   :  { %v849_v13 = vmul.f32 %v841_v12, %v761_v34 }
 0x1cd   :  { %892 = vperm.xlu0 %1217, %v834_v32  }
 0x1cf   :  { %872 = vrot.lane.b32.xlu1 %v849_v13, %s1322_s23 }
 0x1d1   :  { %907 = vperm.xlu0 %1217, %v837_v7  }
 0x1d3   :  { %897 = vperm.xlu1 %1218, %v835_v56  }
 0x1d5   :  { %917 = vperm.xlu0 %1217, %v839_v58  }
 0x1d7   :  { %902 = vperm.xlu1 %1218, %v836_v61  }
 0x1d9   :  { %927 = vperm.xlu0 %1217, %v841_v12  }
 0x1db   :  { %912 = vperm.xlu1 %1218, %v838_v42  }
 0x1dd   :  { %1220 = vset.pattern.permute.xlu0 %v1323_v9 }
 0x1df   :  { %922 = vperm.xlu1 %1218, %v840_v6  }
 0x1e3   :  { %1219 = vset.pattern.permute.xlu1 %v1323_v9 }
 0x227   :  { %v859_v14 = vpop.permute.xlu0 %858 }
 0x228   :  { %v882_v15 = vsub.f32 %v1645_v27, %v859_v14 }
 0x22a   :  { %940 = vperm.xlu1 %1219, %v882_v15  }
 0x22b   :  { %v867_v24 = vpop.permute.xlu0 %866 }
 0x22c   :  { %v886_v25 = vsub.f32 %v1651_v23, %v867_v24 }
 0x22e   :  { %960 = vperm.xlu0 %1220, %v886_v25  }
 0x231   :  { %v861_v26 = vpop.permute.xlu1 %860 }
 0x232   :  { %v883_v28 = vsub.f32 %v827_v49, %v861_v26 }
 0x234   :  { %945 = vperm.xlu0 %1220, %v883_v28  }
 0x235   :  { %v869_v29 = vpop.permute.xlu1 %868 }
 0x236   :  { %v887_v16 = vsub.f32 %v831_v54, %v869_v29 }
 0x238   :  { %965 = vperm.xlu1 %1219, %v887_v16  }
 0x239   :  { %v863_v17 = vpop.permute.xlu1 %862 }
 0x23a   :  { %v884_v19 = vsub.f32 %v828_v47, %v863_v17 }
 0x23b   :  { %v871_v30 = vpop.permute.xlu0 %870 }
 0x23c   :  { %v888_v31 = vsub.f32 %v832_v62, %v871_v30  ;;  %950 = vperm.xlu1 %1219, %v884_v19  }
 0x23d   :  { %v865_v32 = vpop.permute.xlu1 %864 }
 0x23e   :  { %v885_v33 = vsub.f32 %v829_v63, %v865_v32  ;;  %970 = vperm.xlu0 %1220, %v888_v31  }
 0x240   :  { %955 = vperm.xlu1 %1219, %v885_v33  }
 0x241   :  { %v873_v27 = vpop.permute.xlu1 %872 }
 0x242   :  { %v889_v34 = vsub.f32 %v833_v8, %v873_v27 }
 0x244   :  { %975 = vperm.xlu1 %1219, %v889_v34  }
 0x248   :  { %v893_v23 = vpop.permute.xlu0 %892 }
 0x249   :  { %v930_v41 = vmul.f32 %v893_v23, %v1580_v55 }
 0x24c   :  { %v908_v36 = vpop.permute.xlu0 %907 }
 0x24e   :  { %v898_v22 = vpop.permute.xlu1 %897 }
 0x24f   :  { %v931_v52 = vmul.f32 %v898_v22, %v1585_v3 }
 0x250   :  { %v918_v38 = vpop.permute.xlu0 %917 }
 0x251   :  { %v935_v54 = vmul.f32 %v918_v38, %v1587_v4  ;;  %v933_v4 = vmul.f32 %v908_v36, %v1615_v21 }
 0x252   :  { %v903_v35 = vpop.permute.xlu1 %902 }
 0x253   :  { %v932_v58 = vmul.f32 %v903_v35, %v1605_v18 }
 0x254   :  { %v928_v42 = vpop.permute.xlu0 %927 }
 0x255   :  { %v937_v5 = vmul.f32 %v928_v42, %v1621_v40 }
 0x256   :  { %v913_v37 = vpop.permute.xlu1 %912 }
 0x257   :  { %v934_v46 = vmul.f32 %v913_v37, %v1583_v2 }
 0x25a   :  { %v923_v39 = vpop.permute.xlu1 %922 }
 0x25b   :  { %v936_v3 = vmul.f32 %v923_v39, %v1613_v20 }
 0x2a5   :  { %v941_v44 = vpop.permute.xlu1 %940 }
 0x2a6   :  { %v978_v45 = vadd.f32 %v941_v44, %v930_v41 }
 0x2a8   :  { %v986_v48 = vmax.f32 %v978_v45, 0.0 }
 0x2a9   :  { %v961_v49 = vpop.permute.xlu0 %960 }
 0x2aa   :  { %994 = vst [vmem:[%s1720_s3] sm:$0xff] %v986_v48  ;;  %v982_v43 = vadd.f32 %v961_v49, %v934_v46 }
 0x2ac   :  { %v990_v51 = vmax.f32 %v982_v43, 0.0 }
 0x2ae   :  { %998 = vst [vmem:[%s1720_s3 + $0x20] sm:$0xff] %v990_v51 }
 0x2af   :  { %v946_v55 = vpop.permute.xlu0 %945 }
 0x2b0   :  { %v979_v53 = vadd.f32 %v946_v55, %v931_v52 }
 0x2b2   :  { %v987_v56 = vmax.f32 %v979_v53, 0.0 }
 0x2b3   :  { %v966_v2 = vpop.permute.xlu1 %965 }
 0x2b4   :  { %995 = vst [vmem:[%s1720_s3 + $0x8] sm:$0xff] %v987_v56  ;;  %v983_v57 = vadd.f32 %v966_v2, %v935_v54 }
 0x2b6   :  { %v991_v47 = vmax.f32 %v983_v57, 0.0 }
 0x2b7   :  { %v951_v59 = vpop.permute.xlu1 %950 }
 0x2b8   :  { %999 = vst [vmem:[%s1720_s3 + $0x28] sm:$0xff] %v991_v47  ;;  %v980_v60 = vadd.f32 %v951_v59, %v932_v58 }
 0x2b9   :  { %v971_v61 = vpop.permute.xlu0 %970 }
 0x2ba   :  { %v988_v62 = vmax.f32 %v980_v60, 0.0  ;;  %v984_v63 = vadd.f32 %v971_v61, %v936_v3 }
 0x2bb   :  { %v956_v0 = vpop.permute.xlu1 %955 }
 0x2bc   :  { %996 = vst [vmem:[%s1720_s3 + $0x10] sm:$0xff] %v988_v62  ;;  %v992_v18 = vmax.f32 %v984_v63, 0.0  ;;  %v981_v1 = vadd.f32 %v956_v0, %v933_v4 }
 0x2be   :  { %1000 = vst [vmem:[%s1720_s3 + $0x30] sm:$0xff] %v992_v18  ;;  %v989_v20 = vmax.f32 %v981_v1, 0.0 }
 0x2bf   :  { %v976_v6 = vpop.permute.xlu1 %975 }
 0x2c0   :  { %997 = vst [vmem:[%s1720_s3 + $0x18] sm:$0xff] %v989_v20  ;;  %v985_v21 = vadd.f32 %v976_v6, %v937_v5 }
 0x2c2   :  { %v993_v7 = vmax.f32 %v985_v21, 0.0 }
 0x2c4   :  { %1001 = vst [vmem:[%s1720_s3 + $0x38] sm:$0xff] %v993_v7 }

// kernel: _snn_c_apply.20
= control target key start
LH: loop header
LB: loop body
LE: loop exit
PB: predicated region body
PF: predicated region fallthrough
CT: control target
= control target key end

     0   :  { %s1876_s16 = smov 1   ;;  %s2425_s1 = inlined_call_operand.vmem [shape: bf16[1152,128], index: 1, kind: input, shape index: {}]   ;;  %s2426_s0 = inlined_call_operand.vmem [shape: bf16[64,1152], index: 0, kind: input, shape index: {}]   ;;  %s2427_s2 = inlined_call_operand.vmem [shape: f32[64,2], index: 2, kind: input, shape index: {}]   ;;  %s2428_s3 = inlined_call_operand.vmem [shape: f32[64,128], index: 3, kind: output, shape index: {}]  }
   0x1   :  { %v1735_v0 = vld [vmem:[%s2425_s1 + $0x78] sm:$0xff]   ;;  %v1739_v4 = vld [vmem:[%s2425_s1 + $0x70] sm:$0xff]   ;;  %v1743_v8 = vld [vmem:[%s2425_s1 + $0x68] sm:$0xff]  }
   0x2   :  { %v1736_v1 = vld [vmem:[%s2425_s1 + $0xf8] sm:$0xff]   ;;  %1516 = vmatprep.subr.bf16.mxu0 %v1735_v0  ;;  %v1740_v5 = vld [vmem:[%s2425_s1 + $0xf0] sm:$0xff]   ;;  %v1744_v9 = vld [vmem:[%s2425_s1 + $0xe8] sm:$0xff]  }
   0x3   :  { %v1737_v2 = vld [vmem:[%s2425_s1 + $0x38] sm:$0xff]   ;;  %1556 = vmatprep.subr.bf16.mxu1 %v1736_v1  ;;  %v1741_v6 = vld [vmem:[%s2425_s1 + $0x30] sm:$0xff]   ;;  %v1745_v10 = vld [vmem:[%s2425_s1 + $0x28] sm:$0xff]  }
   0x4   :  { %v1738_v3 = vld [vmem:[%s2425_s1 + $0xb8] sm:$0xff]   ;;  %1517 = vmatpush3.bf16.msra.mxu0 %v1737_v2  ;;  %v1742_v7 = vld [vmem:[%s2425_s1 + $0xb0] sm:$0xff]   ;;  %v1746_v11 = vld [vmem:[%s2425_s1 + $0xa8] sm:$0xff]  }
   0x5   :  { %1557 = vmatpush3.bf16.msra.mxu1 %v1738_v3  ;;  %1518 = vmatprep.subr.bf16.mxu0 %v1739_v4  ;;  %v1747_v12 = vld [vmem:[%s2425_s1 + $0x60] sm:$0xff]   ;;  %v1751_v16 = vld [vmem:[%s2425_s1 + $0x58] sm:$0xff]   ;;  %v1755_v20 = vld [vmem:[%s2425_s1 + $0x50] sm:$0xff]  }
   0x6   :  { %1558 = vmatprep.subr.bf16.mxu1 %v1740_v5  ;;  %v1748_v13 = vld [vmem:[%s2425_s1 + $0xe0] sm:$0xff]   ;;  %v1752_v17 = vld [vmem:[%s2425_s1 + $0xd8] sm:$0xff]   ;;  %v1756_v21 = vld [vmem:[%s2425_s1 + $0xd0] sm:$0xff]  }
   0x7   :  { %v1749_v14 = vld [vmem:[%s2425_s1 + $0x20] sm:$0xff]   ;;  %v1753_v18 = vld [vmem:[%s2425_s1 + $0x18] sm:$0xff]   ;;  %v1757_v22 = vld [vmem:[%s2425_s1 + $0x10] sm:$0xff]  }
   0x8   :  { %1519 = vmatpush3.bf16.msra.mxu0 %v1741_v6  ;;  %v1750_v15 = vld [vmem:[%s2425_s1 + $0xa0] sm:$0xff]   ;;  %v1754_v19 = vld [vmem:[%s2425_s1 + $0x98] sm:$0xff]   ;;  %v1758_v23 = vld [vmem:[%s2425_s1 + $0x90] sm:$0xff]  }
   0x9   :  { %1559 = vmatpush3.bf16.msra.mxu1 %v1742_v7  ;;  %1520 = vmatprep.subr.bf16.mxu0 %v1743_v8  ;;  %v1759_v24 = vld [vmem:[%s2425_s1 + $0x48] sm:$0xff]   ;;  %v1763_v28 = vld [vmem:[%s2425_s1 + $0x40] sm:$0xff]   ;;  %v1773_v36 = vld [vmem:[%s2425_s1 + $0x178] sm:$0xff]  }
   0xa   :  { %1560 = vmatprep.subr.bf16.mxu1 %v1744_v9  ;;  %v1760_v25 = vld [vmem:[%s2425_s1 + $0xc8] sm:$0xff]   ;;  %v1764_v29 = vld [vmem:[%s2425_s1 + $0xc0] sm:$0xff]   ;;  %v1774_v37 = vld [vmem:[%s2425_s1 + $0x1f8] sm:$0xff]  }
   0xb   :  { %v1761_v26 = vld [vmem:[%s2425_s1 + $0x8] sm:$0xff]   ;;  %v1765_v30 = vld [vmem:[%s2425_s1] sm:$0xff]   ;;  %v1775_v38 = vld [vmem:[%s2425_s1 + $0x138] sm:$0xff]  }
   0xc   :  { %1521 = vmatpush3.bf16.msra.mxu0 %v1745_v10  ;;  %v1762_v27 = vld [vmem:[%s2425_s1 + $0x88] sm:$0xff]   ;;  %v1766_v31 = vld [vmem:[%s2425_s1 + $0x80] sm:$0xff]   ;;  %v1776_v39 = vld [vmem:[%s2425_s1 + $0x1b8] sm:$0xff]  }
   0xd   :  { %1561 = vmatpush3.bf16.msra.mxu1 %v1746_v11  ;;  %1522 = vmatprep.subr.bf16.mxu0 %v1747_v12  ;;  %v1767_v32 = vld [vmem:[%s2426_s0] ss:$36 sps:$4 sm:$0xff]   ;;  %v1770_v34 = vld [vmem:[%s2426_s0 + $0x8] ss:$36 sps:$4 sm:$0xff]   ;;  %v1777_v40 = vld [vmem:[%s2425_s1 + $0x170] sm:$0xff]  }
   0xe   :  { %1562 = vmatprep.subr.bf16.mxu1 %v1748_v13  ;;  %v1769_v33 = vld [vmem:[%s2426_s0 + $0x4] ss:$36 sps:$4 sm:$0xff]   ;;  %v1772_v35 = vld [vmem:[%s2426_s0 + $0xc] ss:$36 sps:$4 sm:$0xff]   ;;  %v1783_v45 = vld [vmem:[%s2426_s0 + $0x54] ss:$36 sps:$4 sm:$0xff]  }
   0xf   :  { %847 = vmatprep.mubr.bf16.mxu0 %v1769_v33  ;;  %912 = vmatprep.mubr.bf16.mxu1 %v1772_v35  ;;  %v1778_v41 = vld [vmem:[%s2425_s1 + $0x1f0] sm:$0xff]   ;;  %v1785_v46 = vld [vmem:[%s2426_s0 + $0x48] ss:$36 sps:$4 sm:$0xff]   ;;  %v1791_v52 = vld [vmem:[%s2425_s1 + $0x160] sm:$0xff]  }
  0x10   :  { %1523 = vmatpush3.bf16.msra.mxu0 %v1749_v14  ;;  %v1779_v42 = vld [vmem:[%s2425_s1 + $0x130] sm:$0xff]   ;;  %v1787_v48 = vld [vmem:[%s2425_s1 + $0x168] sm:$0xff]   ;;  %v1792_v53 = vld [vmem:[%s2425_s1 + $0x1e0] sm:$0xff]  }
  0x11   :  { %1563 = vmatpush3.bf16.msra.mxu1 %v1750_v15  ;;  %1524 = vmatprep.subr.bf16.mxu0 %v1751_v16  ;;  %v1780_v43 = vld [vmem:[%s2425_s1 + $0x1b0] sm:$0xff]   ;;  %v1788_v49 = vld [vmem:[%s2425_s1 + $0x1e8] sm:$0xff]   ;;  %v1793_v54 = vld [vmem:[%s2425_s1 + $0x120] sm:$0xff]  }
  0x12   :  { %1564 = vmatprep.subr.bf16.mxu1 %v1752_v17  ;;  %v1781_v44 = vld [vmem:[%s2426_s0 + $0x4c] ss:$36 sps:$4 sm:$0xff]   ;;  %v1794_v55 = vld [vmem:[%s2425_s1 + $0x1a0] sm:$0xff]   ;;  %v1795_v56 = vld [vmem:[%s2426_s0 + $0x94] ss:$36 sps:$4 sm:$0xff]  }
  0x13   :  { %v1786_v47 = vld [vmem:[%s2426_s0 + $0x50] ss:$36 sps:$4 sm:$0xff]   ;;  %v1789_v50 = vld [vmem:[%s2425_s1 + $0x128] sm:$0xff]   ;;  %v1797_v57 = vld [vmem:[%s2426_s0 + $0x9c] ss:$36 sps:$4 sm:$0xff]  }
  0x14   :  { %1525 = vmatpush3.bf16.msra.mxu0 %v1753_v18  ;;  %v1790_v51 = vld [vmem:[%s2425_s1 + $0x1a8] sm:$0xff]   ;;  %v1799_v58 = vld [vmem:[%s2426_s0 + $0x90] ss:$36 sps:$4 sm:$0xff]   ;;  %v1800_v59 = vld [vmem:[%s2426_s0 + $0x98] ss:$36 sps:$4 sm:$0xff]  }
  0x15   :  { %1565 = vmatpush3.bf16.msra.mxu1 %v1754_v19  ;;  %1526 = vmatprep.subr.bf16.mxu0 %v1755_v20  ;;  %v1801_v60 = vld [vmem:[%s2425_s1 + $0x158] sm:$0xff]   ;;  %v1805_v0 = vld [vmem:[%s2425_s1 + $0x150] sm:$0xff]   ;;  %v1811_v5 = vld [vmem:[%s2426_s0 + $0xe4] ss:$36 sps:$4 sm:$0xff]  }
  0x16   :  { %1566 = vmatprep.subr.bf16.mxu1 %v1756_v21  ;;  %v1802_v61 = vld [vmem:[%s2425_s1 + $0x1d8] sm:$0xff]   ;;  %v1806_v1 = vld [vmem:[%s2425_s1 + $0x1d0] sm:$0xff]   ;;  %v1814_v7 = vld [vmem:[%s2426_s0 + $0xe0] ss:$36 sps:$4 sm:$0xff]  }
  0x17   :  { %v1803_v62 = vld [vmem:[%s2425_s1 + $0x118] sm:$0xff]   ;;  %v1807_v2 = vld [vmem:[%s2425_s1 + $0x110] sm:$0xff]   ;;  %v1815_v8 = vld [vmem:[%s2425_s1 + $0x148] sm:$0xff]  }
  0x18   :  { %1527 = vmatpush3.bf16.msra.mxu0 %v1757_v22  ;;  %v1804_v63 = vld [vmem:[%s2425_s1 + $0x198] sm:$0xff]   ;;  %v1808_v3 = vld [vmem:[%s2425_s1 + $0x190] sm:$0xff]   ;;  %v1816_v9 = vld [vmem:[%s2425_s1 + $0x1c8] sm:$0xff]  }
  0x19   :  { %1567 = vmatpush3.bf16.msra.mxu1 %v1758_v23  ;;  %1528 = vmatprep.subr.bf16.mxu0 %v1759_v24  ;;  %v1809_v4 = vld [vmem:[%s2426_s0 + $0xdc] ss:$36 sps:$4 sm:$0xff]   ;;  %v1817_v10 = vld [vmem:[%s2425_s1 + $0x108] sm:$0xff]   ;;  %v1823_v16 = vld [vmem:[%s2426_s0 + $0x10] ss:$36 sps:$4 sm:$0xff]  }
  0x1a   :  { %1568 = vmatprep.subr.bf16.mxu1 %v1760_v25  ;;  %v1813_v6 = vld [vmem:[%s2426_s0 + $0xd8] ss:$36 sps:$4 sm:$0xff]   ;;  %v1818_v11 = vld [vmem:[%s2425_s1 + $0x188] sm:$0xff]   ;;  %v1819_v12 = vld [vmem:[%s2425_s1 + $0x140] sm:$0xff]  }
  0x1b   :  { %v1820_v13 = vld [vmem:[%s2425_s1 + $0x1c0] sm:$0xff]   ;;  %v1825_v17 = vld [vmem:[%s2426_s0 + $0x14] ss:$36 sps:$4 sm:$0xff]   ;;  %v1847_v33 = vld [vmem:[%s2426_s0 + $0xec] ss:$36 sps:$4 sm:$0xff]  }
  0x1c   :  { %1529 = vmatpush3.bf16.msra.mxu0 %v1761_v26  ;;  %v1821_v14 = vld [vmem:[%s2425_s1 + $0x100] sm:$0xff]   ;;  %v1826_v18 = vld [vmem:[%s2426_s0 + $0x18] ss:$36 sps:$4 sm:$0xff]   ;;  %v1830_v21 = vld [vmem:[%s2425_s1 + $0x230] sm:$0xff]  }
  0x1d   :  { %1569 = vmatpush3.bf16.msra.mxu1 %v1762_v27  ;;  %1530 = vmatprep.subr.bf16.mxu0 %v1763_v28  ;;  %v1822_v15 = vld [vmem:[%s2425_s1 + $0x180] sm:$0xff]   ;;  %v1829_v20 = vld [vmem:[%s2425_s1 + $0x238] sm:$0xff]   ;;  %v1837_v26 = vld [vmem:[%s2425_s1 + $0x228] sm:$0xff]  }
  0x1e   :  { %1570 = vmatprep.subr.bf16.mxu1 %v1764_v29  ;;  %v1828_v19 = vld [vmem:[%s2426_s0 + $0x1c] ss:$36 sps:$4 sm:$0xff]   ;;  %v1833_v23 = vld [vmem:[%s2426_s0 + $0x64] ss:$36 sps:$4 sm:$0xff]   ;;  %v1841_v28 = vld [vmem:[%s2426_s0 + $0xac] ss:$36 sps:$4 sm:$0xff]  }
  0x1f   :  { %v1831_v22 = vld [vmem:[%s2426_s0 + $0x5c] ss:$36 sps:$4 sm:$0xff]   ;;  %v1839_v27 = vld [vmem:[%s2426_s0 + $0xa4] ss:$36 sps:$4 sm:$0xff]   ;;  %v1846_v35 = vld [vmem:[%s2425_s1 + $0x210] sm:$0xff]  }
  0x20   :  { %1531 = vmatpush3.bf16.msra.mxu0 %v1765_v30  ;;  %v1835_v24 = vld [vmem:[%s2426_s0 + $0x58] ss:$36 sps:$4 sm:$0xff]   ;;  %v1836_v25 = vld [vmem:[%s2426_s0 + $0x60] ss:$36 sps:$4 sm:$0xff]  }
  0x21   :  { %1571 = vmatpush3.bf16.msra.mxu1 %v1766_v31  ;;  %1596 = vmatprep.subr.bf16.mxu0 %v1773_v36  ;;  %v1838_v29 = vld [vmem:[%s2425_s1 + $0x220] sm:$0xff]   ;;  %v1844_v31 = vld [vmem:[%s2426_s0 + $0xa8] ss:$36 sps:$4 sm:$0xff]  }
  0x22   :  { %1636 = vmatprep.subr.bf16.mxu1 %v1774_v37  ;;  %v1843_v30 = vld [vmem:[%s2426_s0 + $0xa0] ss:$36 sps:$4 sm:$0xff]   ;;  %v1851_v36 = vld [vmem:[%s2426_s0 + $0xe8] ss:$36 sps:$4 sm:$0xff]  }
  0x23   :  { %848 = vmatmul.mubr.bf16.vlgmr.msra.gmra.mxu0 %v1767_v32  ;;  %v1845_v32 = vld [vmem:[%s2425_s1 + $0x218] sm:$0xff]   ;;  %v1853_v37 = vld [vmem:[%s2425_s1 + $0x208] sm:$0xff]  }
  0x24   :  { %913 = vmatmul.mubr.bf16.vlgmr.msra.gmra.mxu1 %v1770_v34  ;;  %1597 = vmatpush3.bf16.msra.mxu0 %v1775_v38  ;;  %v1849_v34 = vld [vmem:[%s2426_s0 + $0xf4] ss:$36 sps:$4 sm:$0xff]  }
  0x25   :  { %1637 = vmatpush3.bf16.msra.mxu1 %v1776_v39  ;;  %1598 = vmatprep.subr.bf16.mxu0 %v1777_v40  ;;  %v1852_v38 = vld [vmem:[%s2426_s0 + $0xf0] ss:$36 sps:$4 sm:$0xff]   ;;  %v1855_v39 = vld [vmem:[%s2426_s0 + $0x20] ss:$36 sps:$4 sm:$0xff]  }
  0x26   :  { %1638 = vmatprep.subr.bf16.mxu1 %v1778_v41  ;;  %855 = vmatprep.mubr.bf16.mxu0 %v1781_v44  ;;  %v1856_v40 = vld [vmem:[%s2426_s0 + $0xb0] ss:$36 sps:$4 sm:$0xff]   ;;  %v1854_v41 = vld [vmem:[%s2425_s1 + $0x200] sm:$0xff]  }
  0x27   :  { %920 = vmatprep.mubr.bf16.mxu1 %v1783_v45 }
  0x28   :  { %1599 = vmatpush3.bf16.msra.mxu0 %v1779_v42  ;;  %v1857_v42 = vld [vmem:[%s2426_s0 + $0x68] ss:$36 sps:$4 sm:$0xff]  }
  0x29   :  { %1639 = vmatpush3.bf16.msra.mxu1 %v1780_v43  ;;  %1600 = vmatprep.subr.bf16.mxu0 %v1787_v48  ;;  %v1858_v43 = vld [vmem:[%s2426_s0 + $0xf8] ss:$36 sps:$4 sm:$0xff]  }
  0x2a   :  { %1640 = vmatprep.subr.bf16.mxu1 %v1788_v49 }
  0x2b   :  { %856 = vmatmul.mubr.bf16.gmra.mxu0 %v1785_v46 }
  0x2c   :  { %921 = vmatmul.mubr.bf16.gmra.mxu1 %v1786_v47  ;;  %1601 = vmatpush3.bf16.msra.mxu0 %v1789_v50 }
  0x2d   :  { %1641 = vmatpush3.bf16.msra.mxu1 %v1790_v51  ;;  %1602 = vmatprep.subr.bf16.mxu0 %v1791_v52 }
  0x2e   :  { %1642 = vmatprep.subr.bf16.mxu1 %v1792_v53  ;;  %863 = vmatprep.mubr.bf16.mxu0 %v1795_v56 }
  0x2f   :  { %928 = vmatprep.mubr.bf16.mxu1 %v1797_v57 }
  0x30   :  { %1603 = vmatpush3.bf16.msra.mxu0 %v1793_v54 }
  0x31   :  { %1643 = vmatpush3.bf16.msra.mxu1 %v1794_v55  ;;  %1604 = vmatprep.subr.bf16.mxu0 %v1801_v60 }
  0x32   :  { %1644 = vmatprep.subr.bf16.mxu1 %v1802_v61 }
  0x33   :  { %864 = vmatmul.mubr.bf16.gmra.mxu0 %v1799_v58 }
  0x34   :  { %929 = vmatmul.mubr.bf16.gmra.mxu1 %v1800_v59  ;;  %1605 = vmatpush3.bf16.msra.mxu0 %v1803_v62 }
  0x35   :  { %1645 = vmatpush3.bf16.msra.mxu1 %v1804_v63  ;;  %1606 = vmatprep.subr.bf16.mxu0 %v1805_v0 }
  0x36   :  { %1646 = vmatprep.subr.bf16.mxu1 %v1806_v1  ;;  %871 = vmatprep.mubr.bf16.mxu0 %v1809_v4 }
  0x37   :  { %936 = vmatprep.mubr.bf16.mxu1 %v1811_v5 }
  0x38   :  { %1607 = vmatpush3.bf16.msra.mxu0 %v1807_v2 }
  0x39   :  { %1647 = vmatpush3.bf16.msra.mxu1 %v1808_v3  ;;  %1608 = vmatprep.subr.bf16.mxu0 %v1815_v8 }
  0x3a   :  { %1648 = vmatprep.subr.bf16.mxu1 %v1816_v9 }
  0x3b   :  { %872 = vmatmul.mubr.bf16.gmra.mxu0 %v1813_v6 }
  0x3c   :  { %937 = vmatmul.mubr.bf16.gmra.mxu1 %v1814_v7  ;;  %1609 = vmatpush3.bf16.msra.mxu0 %v1817_v10 }
  0x3d   :  { %1649 = vmatpush3.bf16.msra.mxu1 %v1818_v11  ;;  %1610 = vmatprep.subr.bf16.mxu0 %v1819_v12 }
  0x3e   :  { %1650 = vmatprep.subr.bf16.mxu1 %v1820_v13  ;;  %977 = vmatprep.mubr.bf16.mxu0 %v1825_v17 }
  0x3f   :  { %1042 = vmatprep.mubr.bf16.mxu1 %v1828_v19 }
  0x40   :  { %1611 = vmatpush3.bf16.msra.mxu0 %v1821_v14 }
  0x41   :  { %1651 = vmatpush3.bf16.msra.mxu1 %v1822_v15  ;;  %1688 = vmatprep.subr.bf16.mxu0 %v1829_v20 }
  0x42   :  { %1712 = vmatprep.subr.bf16.mxu1 %v1829_v20 }
  0x43   :  { %978 = vmatmul.mubr.bf16.vlgmr.msra.gmra.mxu0 %v1823_v16 }
  0x44   :  { %1043 = vmatmul.mubr.bf16.vlgmr.msra.gmra.mxu1 %v1826_v18  ;;  %1689 = vmatpush3.bf16.msra.mxu0 %v1829_v20 }
  0x45   :  { %1720 = vmatpush3.bf16.msra.mxu1 %v1829_v20  ;;  %1690 = vmatprep.subr.bf16.mxu0 %v1830_v21 }
  0x46   :  { %1713 = vmatprep.subr.bf16.mxu1 %v1830_v21  ;;  %985 = vmatprep.mubr.bf16.mxu0 %v1831_v22 }
  0x47   :  { %1050 = vmatprep.mubr.bf16.mxu1 %v1833_v23 }
  0x48   :  { %1691 = vmatpush3.bf16.msra.mxu0 %v1830_v21 }
  0x49   :  { %1721 = vmatpush3.bf16.msra.mxu1 %v1830_v21  ;;  %1692 = vmatprep.subr.bf16.mxu0 %v1837_v26 }
  0x4a   :  { %1714 = vmatprep.subr.bf16.mxu1 %v1837_v26 }
  0x4b   :  { %986 = vmatmul.mubr.bf16.gmra.mxu0 %v1835_v24 }
  0x4c   :  { %1051 = vmatmul.mubr.bf16.gmra.mxu1 %v1836_v25  ;;  %993 = vmatprep.mubr.bf16.mxu0 %v1839_v27 }
  0x4d   :  { %1693 = vmatpush3.bf16.msra.mxu0 %v1837_v26  ;;  %1058 = vmatprep.mubr.bf16.mxu1 %v1841_v28 }
  0x4e   :  { %1722 = vmatpush3.bf16.msra.mxu1 %v1837_v26  ;;  %1694 = vmatprep.subr.bf16.mxu0 %v1838_v29 }
  0x4f   :  { %1715 = vmatprep.subr.bf16.mxu1 %v1838_v29 }
  0x51   :  { %1695 = vmatpush3.bf16.msra.mxu0 %v1838_v29 }
  0x52   :  { %1723 = vmatpush3.bf16.msra.mxu1 %v1838_v29  ;;  %1696 = vmatprep.subr.bf16.mxu0 %v1845_v32 }
  0x53   :  { %994 = vmatmul.mubr.bf16.gmra.mxu0 %v1843_v30  ;;  %1716 = vmatprep.subr.bf16.mxu1 %v1845_v32 }
  0x54   :  { %1059 = vmatmul.mubr.bf16.gmra.mxu1 %v1844_v31  ;;  %1001 = vmatprep.mubr.bf16.mxu0 %v1847_v33 }
  0x55   :  { %1697 = vmatpush3.bf16.msra.mxu0 %v1845_v32  ;;  %1066 = vmatprep.mubr.bf16.mxu1 %v1849_v34 }
  0x56   :  { %1724 = vmatpush3.bf16.msra.mxu1 %v1845_v32  ;;  %1698 = vmatprep.subr.bf16.mxu0 %v1846_v35 }
  0x57   :  { %1717 = vmatprep.subr.bf16.mxu1 %v1846_v35 }
  0x59   :  { %1699 = vmatpush3.bf16.msra.mxu0 %v1846_v35 }
  0x5a   :  { %1725 = vmatpush3.bf16.msra.mxu1 %v1846_v35  ;;  %1700 = vmatprep.subr.bf16.mxu0 %v1853_v37 }
  0x5b   :  { %1002 = vmatmul.mubr.bf16.gmra.mxu0 %v1851_v36  ;;  %1718 = vmatprep.subr.bf16.mxu1 %v1853_v37 }
  0x5c   :  { %1067 = vmatmul.mubr.bf16.gmra.mxu1 %v1852_v38  ;;  %1704 = vmatprep.mubr.bf16.mxu0 %v1855_v39 }
  0x5d   :  { %1701 = vmatpush3.bf16.msra.mxu0 %v1853_v37  ;;  %1708 = vmatprep.mubr.bf16.mxu1 %v1856_v40 }
  0x5e   :  { %1726 = vmatpush3.bf16.msra.mxu1 %v1853_v37  ;;  %1702 = vmatprep.subr.bf16.mxu0 %v1854_v41 }
  0x5f   :  { %1719 = vmatprep.subr.bf16.mxu1 %v1854_v41 }
  0x61   :  { %1703 = vmatpush3.bf16.msra.mxu0 %v1854_v41 }
  0x62   :  { %1727 = vmatpush3.bf16.msra.mxu1 %v1854_v41 }
  0x64   :  { %1705 = vmatmul.mubr.bf16.vlgmr.msra.gmra.mxu0 %v1857_v42 }
  0x65   :  { %1709 = vmatmul.mubr.bf16.vlgmr.msra.gmra.mxu1 %v1858_v43 }
  0xe3   :  { %v2222_v44 = vpop.f32.mrf.mxu0 }
  0xe4   :  { %v2224_v45 = vpop.f32.mrf.mxu1 }
  0xe5   :  { %v2226_v46 = vpop.f32.mrf.mxu0 }
  0xe6   :  { %v2228_v47 = vpop.f32.mrf.mxu1 }
  0xe7   :  { %v1535_v48 = vpop.f32.mrf.mxu0 }
  0xe8   :  { %v1575_v49 = vpop.f32.mrf.mxu1 }
  0xe9   :  { %v1536_v50 = vpop.f32.mrf.mxu0 }
  0xea   :  { %v1537_v51 = vadd.f32 %v1536_v50, %v1535_v48  ;;  %v1576_v52 = vpop.f32.mrf.mxu1 }
  0xeb   :  { %v1577_v53 = vadd.f32 %v1576_v52, %v1575_v49  ;;  %v1538_v55 = vpop.f32.mrf.mxu0 }
  0xec   :  { %v1578_v56 = vpop.f32.mrf.mxu1 }
  0xed   :  { %v2230_v54 = vadd.f32 %v1577_v53, %v1537_v51  ;;  %v1539_v57 = vpop.f32.mrf.mxu0 }
  0xee   :  { %v1579_v58 = vpop.f32.mrf.mxu1  ;;  %v1540_v36 = vadd.f32 %v1539_v57, %v1538_v55  ;;  %v1534_v55 = vadd.f32 %v2226_v46, %v2222_v44 }
  0xef   :  { %v1541_v59 = vpop.f32.mrf.mxu0  ;;  %v1580_v37 = vadd.f32 %v1579_v58, %v1578_v56  ;;  %v1574_v56 = vadd.f32 %v2228_v47, %v2224_v45 }
  0xf0   :  { %v1581_v60 = vpop.f32.mrf.mxu1 }
  0xf1   :  { %v1542_v61 = vpop.f32.mrf.mxu0  ;;  %v923_v49 = vadd.f32 %v1580_v37, %v1540_v36 }
  0xf2   :  { %v1582_v62 = vpop.f32.mrf.mxu1  ;;  %v1543_v52 = vadd.f32 %v1542_v61, %v1541_v59 }
  0xf3   :  { %v2232_v63 = vpop.f32.mrf.mxu0  ;;  %v1583_v53 = vadd.f32 %v1582_v62, %v1581_v60 }
  0xf4   :  { %v2234_v0 = vpop.f32.mrf.mxu1 }
  0xf5   :  { %v2236_v1 = vpop.f32.mrf.mxu0  ;;  %v926_v60 = vadd.f32 %v1583_v53, %v1543_v52 }
  0xf6   :  { %v2238_v2 = vpop.f32.mrf.mxu1  ;;  %v1546_v44 = vadd.f32 %v2236_v1, %v2232_v63 }
  0xf7   :  { %v2240_v3 = vpop.f32.mrf.mxu0  ;;  %v1586_v45 = vadd.f32 %v2238_v2, %v2234_v0 }
  0xf8   :  { %v2242_v4 = vpop.f32.mrf.mxu1 }
  0xf9   :  { %v2244_v5 = vpop.f32.mrf.mxu0  ;;  %v931_v0 = vadd.f32 %v1586_v45, %v1546_v44 }
  0xfa   :  { %v2246_v6 = vpop.f32.mrf.mxu1 }
  0xfb   :  { %v1550_v7 = vpop.f32.mrf.mxu0 }
  0xfc   :  { %v1590_v8 = vpop.f32.mrf.mxu1 }
  0xfd   :  { %v1551_v9 = vpop.f32.mrf.mxu0 }
  0xfe   :  { %v1591_v10 = vpop.f32.mrf.mxu1  ;;  %v1552_v40 = vadd.f32 %v1551_v9, %v1550_v7 }
  0xff   :  { %v1553_v11 = vpop.f32.mrf.mxu0  ;;  %v1592_v41 = vadd.f32 %v1591_v10, %v1590_v8 }
 0x100   :  { %v1593_v12 = vpop.f32.mrf.mxu1 }
 0x101   :  { %v1554_v13 = vpop.f32.mrf.mxu0 }
 0x102   :  { %v1594_v14 = vpop.f32.mrf.mxu1  ;;  %v1555_v57 = vadd.f32 %v1554_v13, %v1553_v11 }
 0x103   :  { %v1612_v15 = vpop.f32.mrf.mxu0  ;;  %v1595_v8 = vadd.f32 %v1594_v14, %v1593_v12  ;;  %v1549_v14 = vadd.f32 %v2244_v5, %v2240_v3 }
 0x104   :  { %v2248_v16 = vpop.f32.mrf.mxu1 }
 0x105   :  { %v1613_v17 = vpop.f32.mrf.mxu0  ;;  %v942_v11 = vadd.f32 %v1595_v8, %v1555_v57 }
 0x106   :  { %v2250_v18 = vpop.f32.mrf.mxu1 }
 0x107   :  { %v2252_v19 = vpop.f32.mrf.mxu0  ;;  %v1654_v2 = vadd.f32 %v2250_v18, %v2248_v16 }
 0x108   :  { %v2254_v20 = vpop.f32.mrf.mxu1 }
 0x109   :  { %2429 = vst [vmem:[#allocation2_spill] sm:$0xff] %v2254_v20  ;;  %v2256_v21 = vpop.f32.mrf.mxu0 }
 0x10a   :  { %v2258_v22 = vpop.f32.mrf.mxu1 }
 0x10b   :  { %2430 = vst [vmem:[#allocation3_spill] sm:$0xff] %v2258_v22  ;;  %v1618_v23 = vpop.f32.mrf.mxu0  ;;  %v939_v22 = vadd.f32 %v1592_v41, %v1552_v40  ;;  %v915_v40 = vadd.f32 %v1574_v56, %v1534_v55 }
 0x10c   :  { %v1658_v24 = vpop.f32.mrf.mxu1 }
 0x10d   :  { %v1619_v25 = vpop.f32.mrf.mxu0 }
 0x10e   :  { %v1659_v26 = vpop.f32.mrf.mxu1  ;;  %v1620_v48 = vadd.f32 %v1619_v25, %v1618_v23  ;;  %v1614_v25 = vadd.f32 %v1613_v17, %v1612_v15 }
 0x10f   :  { %v1621_v27 = vpop.f32.mrf.mxu0  ;;  %v1660_v61 = vadd.f32 %v1659_v26, %v1658_v24 }
 0x110   :  { %v1661_v28 = vpop.f32.mrf.mxu1  ;;  %v988_v9 = vadd.f32 %v1620_v48, %v923_v49  ;;  %v980_v15 = vadd.f32 %v1614_v25, %v915_v40 }
 0x111   :  { %v1622_v29 = vpop.f32.mrf.mxu0 }
 0x112   :  { %v1662_v30 = vpop.f32.mrf.mxu1  ;;  %v1623_v10 = vadd.f32 %v1622_v29, %v1621_v27  ;;  %v1053_v13 = vadd.f32 %v1660_v61, %v988_v9 }
 0x113   :  { %v1624_v31 = vpop.f32.mrf.mxu0  ;;  %v1663_v24 = vadd.f32 %v1662_v30, %v1661_v28 }
 0x114   :  { %v2260_v32 = vpop.f32.mrf.mxu1  ;;  %v991_v12 = vadd.f32 %v1623_v10, %v926_v60 }
 0x115   :  { %v1625_v33 = vpop.f32.mrf.mxu0 }
 0x116   :  { %v2262_v34 = vpop.f32.mrf.mxu1  ;;  %v1626_v17 = vadd.f32 %v1625_v33, %v1624_v31  ;;  %v1056_v31 = vadd.f32 %v1663_v24, %v991_v12 }
 0x117   :  { %v1627_v35 = vpop.f32.mrf.mxu0  ;;  %v1666_v16 = vadd.f32 %v2262_v34, %v2260_v32 }
 0x118   :  { %v2264_v38 = vpop.f32.mrf.mxu1  ;;  %v996_v33 = vadd.f32 %v1626_v17, %v931_v0 }
 0x119   :  { %v1628_v39 = vpop.f32.mrf.mxu0 }
 0x11a   :  { %v2266_v42 = vpop.f32.mrf.mxu1  ;;  %v1629_v41 = vadd.f32 %v1628_v39, %v1627_v35  ;;  %v1617_v39 = vadd.f32 %v2256_v21, %v2252_v19  ;;  %v1061_v49 = vadd.f32 %v1666_v16, %v996_v33  ;;  %v2431_v19 = vld [vmem:[#allocation2_spill] sm:$0xff]  ;;  %v2432_v21 = vld [vmem:[#allocation3_spill] sm:$0xff] }
 0x11b   :  { %v1630_v43 = vpop.f32.mrf.mxu0  ;;  %v1657_v55 = vadd.f32 %v2432_v21, %v2431_v19 }
 0x11c   :  { %v1670_v50 = vpop.f32.mrf.mxu1  ;;  %v983_v34 = vadd.f32 %v1617_v39, %v2230_v54 }
 0x11d   :  { %v1631_v51 = vpop.f32.mrf.mxu0 }
 0x11e   :  { %v1632_v20 = vadd.f32 %v1631_v51, %v1630_v43  ;;  %v1671_v58 = vpop.f32.mrf.mxu1 }
 0x11f   :  { %v1633_v7 = vpop.f32.mrf.mxu0  ;;  %v1672_v36 = vadd.f32 %v1671_v58, %v1670_v50  ;;  %v1669_v50 = vadd.f32 %v2266_v42, %v2264_v38  ;;  %v1048_v42 = vadd.f32 %v1657_v55, %v983_v34 }
 0x120   :  { %v1004_v23 = vadd.f32 %v1632_v20, %v939_v22  ;;  %v1673_v37 = vpop.f32.mrf.mxu1  ;;  %v1589_v22 = vadd.f32 %v2246_v6, %v2242_v4  ;;  %v1045_v4 = vadd.f32 %v1654_v2, %v980_v15 }
 0x121   :  { %v1634_v59 = vpop.f32.mrf.mxu0 }
 0x122   :  { %v1635_v62 = vadd.f32 %v1634_v59, %v1633_v7  ;;  %v1674_v46 = vpop.f32.mrf.mxu1  ;;  %v1069_v47 = vadd.f32 %v1672_v36, %v1004_v23  ;;  %v934_v28 = vadd.f32 %v1589_v22, %v1549_v14  ;;  %v1875_v36 = vmov 0  }
 0x123   :  { %v1675_v3 = vadd.f32 %v1674_v46, %v1673_v37  ;;  %1731 = vset.pattern.permute.xlu0 %v1875_v36  ;;  %1732 = vset.pattern.permute.xlu1 %v1875_v36 }
 0x124   :  { %v1706_v20 = vpop.f32.mrf.mxu0  ;;  %v1007_v26 = vadd.f32 %v1635_v62, %v942_v11  ;;  %v999_v48 = vadd.f32 %v1629_v41, %v934_v28 }
 0x125   :  { %v2280_v63 = vadd.f32 %v1706_v20, %v1053_v13  ;;  %v1710_v1 = vpop.f32.mrf.mxu1 }
 0x126   :  { %v2284_v27 = vadd.f32 %v1710_v1, %v1069_v47  ;;  %v1109_v29 = vpop.f32.mrf.mxu0  ;;  %v1072_v43 = vadd.f32 %v1675_v3, %v1007_v26  ;;  %v1064_v53 = vadd.f32 %v1669_v50, %v999_v48 }
 0x127   :  { %v1125_v5 = vpop.f32.mrf.mxu1  ;;  %1144 = vadd.xlane.f32.xlu1 %v2280_v63  ;;  %v2292_v18 = vadd.f32 %v1109_v29, %v1045_v4  ;;  %v1166_v38 = vmul.f32 %v2280_v63, %v2280_v63 }
 0x128   :  { %1152 = vadd.xlane.f32.xlu0 %v2284_v27  ;;  %v1707_v6 = vpop.f32.mrf.mxu0  ;;  %v2302_v52 = vadd.f32 %v1125_v5, %v1061_v49  ;;  %v1170_v25 = vmul.f32 %v2284_v27, %v2284_v27 }
 0x129   :  { %v2288_v30 = vadd.f32 %v1707_v6, %v1056_v31  ;;  %v1711_v35 = vpop.f32.mrf.mxu1  ;;  %v1164_v7 = vmul.f32 %v2292_v18, %v2292_v18 }
 0x12a   :  { %v2300_v51 = vadd.f32 %v1711_v35, %v1072_v43  ;;  %v1112_v57 = vpop.f32.mrf.mxu0  ;;  %v1168_v9 = vmul.f32 %v2302_v52, %v2302_v52 }
 0x12b   :  { %1146 = vadd.xlane.f32.xlu1 %v2288_v30  ;;  %v1128_v32 = vpop.f32.mrf.mxu1  ;;  %v2314_v58 = vadd.f32 %v1112_v57, %v1048_v42  ;;  %v1167_v54 = vmul.f32 %v2288_v30, %v2288_v30 }
 0x12c   :  { %1140 = vadd.xlane.f32.xlu0 %v2292_v18  ;;  %v2309_v56 = vadd.f32 %v1128_v32, %v1064_v53  ;;  %v1171_v23 = vmul.f32 %v2300_v51, %v2300_v51 }
 0x12d   :  { %v1165_v8 = vmul.f32 %v2314_v58, %v2314_v58 }
 0x12e   :  { %v1169_v10 = vmul.f32 %v2309_v56, %v2309_v56 }
 0x12f   :  { %1154 = vadd.xlane.f32.xlu1 %v2300_v51 }
 0x130   :  { %1148 = vadd.xlane.f32.xlu0 %v2302_v52 }
 0x133   :  { %1150 = vadd.xlane.f32.xlu1 %v2309_v56 }
 0x134   :  { %1176 = vadd.xlane.f32.xlu0 %v1166_v38 }
 0x137   :  { %1178 = vadd.xlane.f32.xlu1 %v1167_v54 }
 0x138   :  { %1172 = vadd.xlane.f32.xlu0 %v1164_v7 }
 0x13b   :  { %1174 = vadd.xlane.f32.xlu1 %v1165_v8 }
 0x13c   :  { %1180 = vadd.xlane.f32.xlu0 %v1168_v9 }
 0x13f   :  { %1182 = vadd.xlane.f32.xlu1 %v1169_v10  ;;  %v1230_v10 = vld [vmem:[%s2427_s2 + $0x10] sm:$0xff] }
 0x140   :  { %1142 = vadd.xlane.f32.xlu0 %v2314_v58 }
 0x143   :  { %1186 = vadd.xlane.f32.xlu1 %v1171_v23 }
 0x144   :  { %1184 = vadd.xlane.f32.xlu0 %v1170_v25 }
 0x1b0   :  { %v1145_v37 = vpop.xlane.xlu1 %1144 }
 0x1b1   :  { %v1153_v59 = vpop.xlane.xlu0 %1152  ;;  %v2331_v44 = vmul.f32 0.083333336, %v1145_v37 }
 0x1b2   :  { %v1162_v49 = vmul.f32 0.083333336, %v1153_v59 }
 0x1b3   :  { %v1198_v11 = vmul.f32 %v2331_v44, %v2331_v44 }
 0x1b4   :  { %v1147_v60 = vpop.xlane.xlu1 %1146  ;;  %v1202_v54 = vmul.f32 %v1162_v49, %v1162_v49 }
 0x1b5   :  { %v1141_v61 = vpop.xlane.xlu0 %1140  ;;  %v2333_v46 = vmul.f32 0.083333336, %v1147_v60 }
 0x1b6   :  { %v2337_v12 = vmul.f32 0.083333336, %v1141_v61  ;;  %v1231_v61 = vld [vmem:[%s2427_s2 + $0x18] sm:$0xff] }
 0x1b7   :  { %v1199_v17 = vmul.f32 %v2333_v46, %v2333_v46 }
 0x1b8   :  { %v1155_v62 = vpop.xlane.xlu1 %1154  ;;  %v1196_v24 = vmul.f32 %v2337_v12, %v2337_v12 }
 0x1b9   :  { %v1149_v40 = vpop.xlane.xlu0 %1148  ;;  %v2349_v16 = vmul.f32 0.083333336, %v1155_v62  ;;  %v1228_v62 = vld [vmem:[%s2427_s2] sm:$0xff] }
 0x1ba   :  { %v2343_v26 = vmul.f32 0.083333336, %v1149_v40 }
 0x1bb   :  { %v1203_v55 = vmul.f32 %v2349_v16, %v2349_v16 }
 0x1bc   :  { %v1151_v45 = vpop.xlane.xlu1 %1150  ;;  %v1200_v33 = vmul.f32 %v2343_v26, %v2343_v26 }
 0x1bd   :  { %v1177_v47 = vpop.xlane.xlu0 %1176  ;;  %v2345_v3 = vmul.f32 0.083333336, %v1151_v45 }
 0x1be   :  { %v1190_v13 = vmul.f32 0.083333336, %v1177_v47 }
 0x1bf   :  { %v1201_v35 = vmul.f32 %v2345_v3, %v2345_v3 }
 0x1c0   :  { %v1206_v14 = vsub.f32 %v1190_v13, %v1198_v11  ;;  %v1179_v15 = vpop.xlane.xlu1 %1178 }
 0x1c1   :  { %v1191_v20 = vmul.f32 0.083333336, %v1179_v15  ;;  %v1173_v22 = vpop.xlane.xlu0 %1172  ;;  %v1232_v15 = vld [vmem:[%s2427_s2 + $0x20] sm:$0xff] }
 0x1c2   :  { %v1214_v1 = vadd.f32 1e-05, %v1206_v14  ;;  %v1188_v0 = vmul.f32 0.083333336, %v1173_v22 }
 0x1c3   :  { %v1207_v2 = vsub.f32 %v1191_v20, %v1199_v17 }
 0x1c4   :  { %1859 = vrsqrt.f32 %v1214_v1  ;;  %v1204_v29 = vsub.f32 %v1188_v0, %v1196_v24  ;;  %v1175_v41 = vpop.xlane.xlu1 %1174  ;;  %v1229_v24 = vld [vmem:[%s2427_s2 + $0x8] sm:$0xff] }
 0x1c5   :  { %v1215_v5 = vadd.f32 1e-05, %v1207_v2  ;;  %v1181_v31 = vpop.xlane.xlu0 %1180  ;;  %v1189_v53 = vmul.f32 0.083333336, %v1175_v41  ;;  %v1233_v0 = vld [vmem:[%s2427_s2 + $0x28] sm:$0xff] }
 0x1c6   :  { %v1212_v4 = vadd.f32 1e-05, %v1204_v29  ;;  %v1192_v6 = vmul.f32 0.083333336, %v1181_v31 }
 0x1c7   :  { %1861 = vrsqrt.f32 %v1215_v5 }
 0x1c8   :  { %1863 = vrsqrt.f32 %v1212_v4  ;;  %v1208_v28 = vsub.f32 %v1192_v6, %v1200_v33  ;;  %v1183_v43 = vpop.xlane.xlu1 %1182  ;;  %v1235_v33 = vld [vmem:[%s2427_s2 + $0x38] sm:$0xff] }
 0x1c9   :  { %v1193_v39 = vmul.f32 0.083333336, %v1183_v43  ;;  %v1143_v48 = vpop.xlane.xlu0 %1142 }
 0x1ca   :  { %v1216_v50 = vadd.f32 1e-05, %v1208_v28  ;;  %v1157_v32 = vmul.f32 0.083333336, %v1143_v48 }
 0x1cb   :  { %v1209_v34 = vsub.f32 %v1193_v39, %v1201_v35  ;;  %v1877_v35 = vmov 1  }
 0x1cc   :  { %1865 = vrsqrt.f32 %v1216_v50  ;;  %v1197_v19 = vmul.f32 %v1157_v32, %v1157_v32  ;;  %v1187_v21 = vpop.xlane.xlu1 %1186 }
 0x1cd   :  { %v1217_v57 = vadd.f32 1e-05, %v1209_v34  ;;  %v1195_v38 = vmul.f32 0.083333336, %v1187_v21  ;;  %v1185_v42 = vpop.xlane.xlu0 %1184 }
 0x1ce   :  { %v1205_v7 = vsub.f32 %v1189_v53, %v1197_v19  ;;  %v1194_v8 = vmul.f32 0.083333336, %v1185_v42 }
 0x1cf   :  { %v1211_v9 = vsub.f32 %v1195_v38, %v1203_v55  ;;  %1867 = vrsqrt.f32 %v1217_v57 }
 0x1d0   :  { %v1213_v23 = vadd.f32 1e-05, %v1205_v7  ;;  %v1210_v25 = vsub.f32 %v1194_v8, %v1202_v54 }
 0x1d1   :  { %v1860_v36 = vpop.eup %1859  ;;  %v1219_v37 = vadd.f32 1e-05, %v1211_v9 }
 0x1d2   :  { %1869 = vrsqrt.f32 %v1213_v23  ;;  %v1218_v59 = vadd.f32 1e-05, %v1210_v25  ;;  %v1238_v60 = vmul.f32 %v1860_v36, %v1230_v10 }
 0x1d4   :  { %v1862_v40 = vpop.eup %1861  ;;  %1871 = vrsqrt.f32 %v1218_v59  ;;  %v1246_v45 = vmul.f32 %v1238_v60, %v2331_v44 }
 0x1d5   :  { %v1864_v47 = vpop.eup %1863  ;;  %v1239_v11 = vmul.f32 %v1862_v40, %v1231_v61  ;;  %1873 = vrsqrt.f32 %v1219_v37 }
 0x1d6   :  { %1264 = vrot.lane.b32.xlu1 %v1246_v45, %s1876_s16  ;;  %v1236_v13 = vmul.f32 %v1864_v47, %v1228_v62 }
 0x1d7   :  { %v1247_v14 = vmul.f32 %v1239_v11, %v2333_v46 }
 0x1d8   :  { %v1244_v17 = vmul.f32 %v1236_v13, %v2337_v12  ;;  %v1234_v12 = vld [vmem:[%s2427_s2 + $0x30] sm:$0xff] }
 0x1d9   :  { %v1866_v20 = vpop.eup %1865 }
 0x1da   :  { %1266 = vrot.lane.b32.xlu1 %v1247_v14, %s1876_s16  ;;  %1260 = vrot.lane.b32.xlu0 %v1244_v17, %s1876_s16  ;;  %v1240_v44 = vmul.f32 %v1866_v20, %v1232_v15 }
 0x1dc   :  { %v1248_v22 = vmul.f32 %v1240_v44, %v2343_v26  ;;  %v1868_v1 = vpop.eup %1867 }
 0x1dd   :  { %v1241_v5 = vmul.f32 %v1868_v1, %v1233_v0 }
 0x1de   :  { %1268 = vrot.lane.b32.xlu0 %v1248_v22, %s1876_s16 }
 0x1df   :  { %v1870_v46 = vpop.eup %1869  ;;  %v1249_v6 = vmul.f32 %v1241_v5, %v2345_v3 }
 0x1e0   :  { %v1237_v2 = vmul.f32 %v1870_v46, %v1229_v24 }
 0x1e1   :  { %v1872_v29 = vpop.eup %1871 }
 0x1e2   :  { %v1245_v41 = vmul.f32 %v1237_v2, %v1157_v32  ;;  %v1242_v26 = vmul.f32 %v1872_v29, %v1234_v12  ;;  %v1874_v31 = vpop.eup %1873 }
 0x1e3   :  { %v1243_v28 = vmul.f32 %v1874_v31, %v1235_v33 }
 0x1e4   :  { %1262 = vrot.lane.b32.xlu1 %v1245_v41, %s1876_s16  ;;  %v1250_v4 = vmul.f32 %v1242_v26, %v1162_v49 }
 0x1e5   :  { %v1251_v43 = vmul.f32 %v1243_v28, %v2349_v16 }
 0x1e6   :  { %1272 = vrot.lane.b32.xlu0 %v1250_v4, %s1876_s16 }
 0x1e8   :  { %1270 = vrot.lane.b32.xlu1 %v1249_v6, %s1876_s16 }
 0x1ea   :  { %1294 = vperm.xlu0 %1731, %v1236_v13  }
 0x1ec   :  { %1274 = vrot.lane.b32.xlu1 %v1251_v43, %s1876_s16 }
 0x1ee   :  { %1309 = vperm.xlu0 %1731, %v1239_v11  }
 0x1f0   :  { %1299 = vperm.xlu1 %1732, %v1237_v2  }
 0x1f2   :  { %1319 = vperm.xlu0 %1731, %v1241_v5  }
 0x1f4   :  { %1304 = vperm.xlu1 %1732, %v1238_v60  }
 0x1f6   :  { %1329 = vperm.xlu0 %1731, %v1243_v28  }
 0x1f8   :  { %1314 = vperm.xlu1 %1732, %v1240_v44  }
 0x1fa   :  { %1734 = vset.pattern.permute.xlu0 %v1877_v35 }
 0x1fc   :  { %1324 = vperm.xlu1 %1732, %v1242_v26  }
 0x200   :  { %1733 = vset.pattern.permute.xlu1 %v1877_v35 }
 0x248   :  { %v1265_v39 = vpop.permute.xlu1 %1264 }
 0x249   :  { %v1286_v3 = vsub.f32 %v1230_v10, %v1265_v39 }
 0x24b   :  { %1352 = vperm.xlu1 %1733, %v1286_v3  }
 0x24c   :  { %v1261_v48 = vpop.permute.xlu0 %1260  ;;  %v1267_v50 = vpop.permute.xlu1 %1266 }
 0x24d   :  { %v1284_v49 = vsub.f32 %v1228_v62, %v1261_v48  ;;  %v1287_v32 = vsub.f32 %v1231_v61, %v1267_v50 }
 0x24f   :  { %1342 = vperm.xlu1 %1733, %v1284_v49  }
 0x250   :  { %v1269_v16 = vpop.permute.xlu0 %1268 }
 0x251   :  { %v1288_v34 = vsub.f32 %v1232_v15, %v1269_v16 }
 0x253   :  { %1357 = vperm.xlu1 %1733, %v1287_v32   ;;  %1362 = vperm.xlu0 %1734, %v1288_v34  }
 0x256   :  { %v1263_v53 = vpop.permute.xlu1 %1262 }
 0x257   :  { %v1285_v19 = vsub.f32 %v1229_v24, %v1263_v53 }
 0x258   :  { %v1273_v21 = vpop.permute.xlu0 %1272 }
 0x259   :  { %1347 = vperm.xlu0 %1734, %v1285_v19   ;;  %v1290_v57 = vsub.f32 %v1234_v12, %v1273_v21 }
 0x25a   :  { %v1271_v55 = vpop.permute.xlu1 %1270 }
 0x25b   :  { %v1289_v38 = vsub.f32 %v1233_v0, %v1271_v55 }
 0x25d   :  { %1367 = vperm.xlu1 %1733, %v1289_v38   ;;  %1372 = vperm.xlu0 %1734, %v1290_v57  }
 0x25e   :  { %v1275_v42 = vpop.permute.xlu1 %1274 }
 0x25f   :  { %v1291_v54 = vsub.f32 %v1235_v33, %v1275_v42 }
 0x261   :  { %1377 = vperm.xlu1 %1733, %v1291_v54  }
 0x265   :  { %v1295_v9 = vpop.permute.xlu0 %1294 }
 0x266   :  { %v1332_v61 = vmul.f32 %v1295_v9, %v2292_v18 }
 0x269   :  { %v1310_v23 = vpop.permute.xlu0 %1309 }
 0x26a   :  { %v1335_v11 = vmul.f32 %v1310_v23, %v2288_v30 }
 0x26b   :  { %v1300_v7 = vpop.permute.xlu1 %1299 }
 0x26c   :  { %v1333_v22 = vmul.f32 %v1300_v7, %v2314_v58 }
 0x26d   :  { %v1320_v36 = vpop.permute.xlu0 %1319 }
 0x26e   :  { %v1337_v24 = vmul.f32 %v1320_v36, %v2309_v56 }
 0x26f   :  { %v1305_v8 = vpop.permute.xlu1 %1304 }
 0x270   :  { %v1334_v37 = vmul.f32 %v1305_v8, %v2280_v63 }
 0x271   :  { %v1330_v40 = vpop.permute.xlu0 %1329 }
 0x272   :  { %v1339_v29 = vmul.f32 %v1330_v40, %v2300_v51 }
 0x273   :  { %v1315_v10 = vpop.permute.xlu1 %1314 }
 0x274   :  { %v1336_v13 = vmul.f32 %v1315_v10, %v2302_v52 }
 0x277   :  { %v1325_v25 = vpop.permute.xlu1 %1324 }
 0x278   :  { %v1338_v1 = vmul.f32 %v1325_v25, %v2284_v27 }
 0x2c6   :  { %v1353_v59 = vpop.permute.xlu1 %1352 }
 0x2c7   :  { %v1382_v60 = vadd.f32 %v1353_v59, %v1334_v37 }
 0x2c9   :  { %v1390_v62 = vmax.f32 %v1382_v60, 0.0 }
 0x2ca   :  { %v1343_v45 = vpop.permute.xlu1 %1342 }
 0x2cb   :  { %1398 = vst [vmem:[%s2428_s3 + $0x10] sm:$0xff] %v1390_v62  ;;  %v1380_v47 = vadd.f32 %v1343_v45, %v1332_v61 }
 0x2cd   :  { %v1388_v14 = vmax.f32 %v1380_v47, 0.0 }
 0x2ce   :  { %v1358_v15 = vpop.permute.xlu1 %1357  ;;  %v1363_v17 = vpop.permute.xlu0 %1362 }
 0x2cf   :  { %1396 = vst [vmem:[%s2428_s3] sm:$0xff] %v1388_v14  ;;  %v1383_v63 = vadd.f32 %v1358_v15, %v1335_v11  ;;  %v1384_v18 = vadd.f32 %v1363_v17, %v1336_v13 }
 0x2d1   :  { %v1391_v20 = vmax.f32 %v1383_v63, 0.0  ;;  %v1392_v44 = vmax.f32 %v1384_v18, 0.0 }
 0x2d3   :  { %1399 = vst [vmem:[%s2428_s3 + $0x18] sm:$0xff] %v1391_v20  ;;  %1400 = vst [vmem:[%s2428_s3 + $0x20] sm:$0xff] %v1392_v44 }
 0x2d4   :  { %v1348_v30 = vpop.permute.xlu0 %1347 }
 0x2d5   :  { %v1381_v52 = vadd.f32 %v1348_v30, %v1333_v22 }
 0x2d7   :  { %v1389_v46 = vmax.f32 %v1381_v52, 0.0 }
 0x2d8   :  { %v1368_v12 = vpop.permute.xlu1 %1367  ;;  %v1373_v0 = vpop.permute.xlu0 %1372 }
 0x2d9   :  { %1397 = vst [vmem:[%s2428_s3 + $0x8] sm:$0xff] %v1389_v46  ;;  %v1385_v58 = vadd.f32 %v1368_v12, %v1337_v24  ;;  %v1386_v2 = vadd.f32 %v1373_v0, %v1338_v1 }
 0x2db   :  { %v1393_v41 = vmax.f32 %v1385_v58, 0.0  ;;  %v1394_v26 = vmax.f32 %v1386_v2, 0.0 }
 0x2dc   :  { %v1378_v5 = vpop.permute.xlu1 %1377 }
 0x2dd   :  { %1401 = vst [vmem:[%s2428_s3 + $0x28] sm:$0xff] %v1393_v41  ;;  %1402 = vst [vmem:[%s2428_s3 + $0x30] sm:$0xff] %v1394_v26  ;;  %v1387_v27 = vadd.f32 %v1378_v5, %v1339_v29 }
 0x2df   :  { %v1395_v56 = vmax.f32 %v1387_v27, 0.0 }
 0x2e1   :  { %1403 = vst [vmem:[%s2428_s3 + $0x38] sm:$0xff] %v1395_v56 }

// kernel: _snn_c_apply.21
= control target key start
LH: loop header
LB: loop body
LE: loop exit
PB: predicated region body
PF: predicated region fallthrough
CT: control target
= control target key end

     0   :  { %v453_v36 = vmov 0   ;;  %s454_s25 = smov 1   ;;  %s584_s1 = inlined_call_operand.vmem [shape: bf16[256,128], index: 1, kind: input, shape index: {}]   ;;  %s585_s0 = inlined_call_operand.vmem [shape: bf16[32,256], index: 0, kind: input, shape index: {}]   ;;  %s586_s2 = inlined_call_operand.vmem [shape: f32[32,2], index: 2, kind: input, shape index: {}]   ;;  %s587_s3 = inlined_call_operand.vmem [shape: f32[32,128], index: 3, kind: output, shape index: {}]  }
   0x1   :  { %v423_v0 = vld [vmem:[%s584_s1 + $0x78] sm:$0xff]   ;;  %v425_v2 = vld [vmem:[%s584_s1 + $0x70] sm:$0xff]   ;;  %v427_v4 = vld [vmem:[%s584_s1 + $0x68] sm:$0xff]   ;;  %419 = vset.pattern.permute.xlu0 %v453_v36  ;;  %420 = vset.pattern.permute.xlu1 %v453_v36 }
   0x2   :  { %v424_v1 = vld [vmem:[%s584_s1 + $0x38] sm:$0xff]   ;;  %372 = vmatprep.subr.bf16.mxu0 %v423_v0  ;;  %400 = vmatprep.subr.bf16.mxu1 %v423_v0  ;;  %v426_v3 = vld [vmem:[%s584_s1 + $0x30] sm:$0xff]   ;;  %v428_v5 = vld [vmem:[%s584_s1 + $0x28] sm:$0xff]  }
   0x3   :  { %373 = vmatpush3.bf16.msra.mxu0 %v424_v1  ;;  %408 = vmatpush3.bf16.msra.mxu1 %v424_v1  ;;  %v429_v6 = vld [vmem:[%s584_s1 + $0x60] sm:$0xff]   ;;  %v431_v8 = vld [vmem:[%s584_s1 + $0x58] sm:$0xff]   ;;  %v433_v10 = vld [vmem:[%s584_s1 + $0x50] sm:$0xff]  }
   0x4   :  { %374 = vmatprep.subr.bf16.mxu0 %v425_v2  ;;  %401 = vmatprep.subr.bf16.mxu1 %v425_v2  ;;  %v430_v7 = vld [vmem:[%s584_s1 + $0x20] sm:$0xff]   ;;  %v432_v9 = vld [vmem:[%s584_s1 + $0x18] sm:$0xff]   ;;  %v434_v13 = vld [vmem:[%s584_s1 + $0x10] sm:$0xff]  }
   0x5   :  { %v441_v11 = vld [vmem:[%s585_s0 + $0x4] ss:$8 sps:$4 sm:$0xff]   ;;  %v444_v12 = vld [vmem:[%s585_s0 + $0x14] ss:$8 sps:$4 sm:$0xff]   ;;  %v439_v18 = vld [vmem:[%s585_s0] ss:$8 sps:$4 sm:$0xff]  }
   0x6   :  { %v435_v14 = vld [vmem:[%s584_s1 + $0x48] sm:$0xff]   ;;  %199 = vmatprep.mubr.bf16.mxu0 %v441_v11  ;;  %207 = vmatprep.mubr.bf16.mxu1 %v444_v12  ;;  %v437_v16 = vld [vmem:[%s584_s1 + $0x40] sm:$0xff]   ;;  %v442_v19 = vld [vmem:[%s585_s0 + $0x10] ss:$8 sps:$4 sm:$0xff]  }
   0x7   :  { %375 = vmatpush3.bf16.msra.mxu0 %v426_v3  ;;  %409 = vmatpush3.bf16.msra.mxu1 %v426_v3  ;;  %v436_v15 = vld [vmem:[%s584_s1 + $0x8] sm:$0xff]   ;;  %v438_v17 = vld [vmem:[%s584_s1] sm:$0xff]  }
   0x8   :  { %376 = vmatprep.subr.bf16.mxu0 %v427_v4  ;;  %402 = vmatprep.subr.bf16.mxu1 %v427_v4  ;;  %v260_v1 = vld [vmem:[%s586_s2] sm:$0xff] }
   0xb   :  { %377 = vmatpush3.bf16.msra.mxu0 %v428_v5  ;;  %410 = vmatpush3.bf16.msra.mxu1 %v428_v5 }
   0xc   :  { %378 = vmatprep.subr.bf16.mxu0 %v429_v6  ;;  %403 = vmatprep.subr.bf16.mxu1 %v429_v6  ;;  %v262_v6 = vld [vmem:[%s586_s2 + $0x10] sm:$0xff] }
   0xf   :  { %379 = vmatpush3.bf16.msra.mxu0 %v430_v7  ;;  %411 = vmatpush3.bf16.msra.mxu1 %v430_v7 }
  0x10   :  { %380 = vmatprep.subr.bf16.mxu0 %v431_v8  ;;  %404 = vmatprep.subr.bf16.mxu1 %v431_v8  ;;  %v263_v8 = vld [vmem:[%s586_s2 + $0x18] sm:$0xff] }
  0x13   :  { %381 = vmatpush3.bf16.msra.mxu0 %v432_v9  ;;  %412 = vmatpush3.bf16.msra.mxu1 %v432_v9 }
  0x14   :  { %382 = vmatprep.subr.bf16.mxu0 %v433_v10  ;;  %405 = vmatprep.subr.bf16.mxu1 %v433_v10  ;;  %v261_v10 = vld [vmem:[%s586_s2 + $0x8] sm:$0xff] }
  0x17   :  { %383 = vmatpush3.bf16.msra.mxu0 %v434_v13  ;;  %413 = vmatpush3.bf16.msra.mxu1 %v434_v13 }
  0x18   :  { %384 = vmatprep.subr.bf16.mxu0 %v435_v14  ;;  %406 = vmatprep.subr.bf16.mxu1 %v435_v14 }
  0x1b   :  { %385 = vmatpush3.bf16.msra.mxu0 %v436_v15  ;;  %414 = vmatpush3.bf16.msra.mxu1 %v436_v15 }
  0x1c   :  { %386 = vmatprep.subr.bf16.mxu0 %v437_v16  ;;  %407 = vmatprep.subr.bf16.mxu1 %v437_v16  ;;  %v455_v16 = vmov 1  }
  0x1f   :  { %387 = vmatpush3.bf16.msra.mxu0 %v438_v17  ;;  %415 = vmatpush3.bf16.msra.mxu1 %v438_v17 }
  0x22   :  { %200 = vmatmul.mubr.bf16.vlgmr.msra.gmra.mxu0 %v439_v18  ;;  %208 = vmatmul.mubr.bf16.vlgmr.msra.gmra.mxu1 %v442_v19 }
  0xe2   :  { %v388_v20 = vpop.f32.mrf.mxu0  ;;  %v394_v21 = vpop.f32.mrf.mxu1 }
  0xe4   :  { %v389_v22 = vpop.f32.mrf.mxu0  ;;  %v395_v23 = vpop.f32.mrf.mxu1 }
  0xe5   :  { %v536_v24 = vadd.f32 %v389_v22, %v388_v20  ;;  %v538_v25 = vadd.f32 %v395_v23, %v394_v21 }
  0xe6   :  { %v391_v26 = vpop.f32.mrf.mxu0  ;;  %v397_v27 = vpop.f32.mrf.mxu1 }
  0xe7   :  { %220 = vadd.xlane.f32.xlu1 %v538_v25  ;;  %216 = vadd.xlane.f32.xlu0 %v536_v24  ;;  %v228_v32 = vmul.f32 %v536_v24, %v536_v24  ;;  %v230_v35 = vmul.f32 %v538_v25, %v538_v25 }
  0xe8   :  { %v392_v28 = vpop.f32.mrf.mxu0  ;;  %v398_v29 = vpop.f32.mrf.mxu1 }
  0xe9   :  { %v542_v30 = vadd.f32 %v392_v28, %v391_v26  ;;  %v544_v31 = vadd.f32 %v398_v29, %v397_v27 }
  0xeb   :  { %222 = vadd.xlane.f32.xlu1 %v544_v31  ;;  %232 = vadd.xlane.f32.xlu0 %v228_v32  ;;  %v229_v33 = vmul.f32 %v542_v30, %v542_v30  ;;  %v231_v34 = vmul.f32 %v544_v31, %v544_v31 }
  0xef   :  { %234 = vadd.xlane.f32.xlu1 %v229_v33  ;;  %218 = vadd.xlane.f32.xlu0 %v542_v30 }
  0xf3   :  { %238 = vadd.xlane.f32.xlu1 %v231_v34  ;;  %236 = vadd.xlane.f32.xlu0 %v230_v35 }
 0x170   :  { %v221_v37 = vpop.xlane.xlu1 %220  ;;  %v217_v38 = vpop.xlane.xlu0 %216 }
 0x171   :  { %v224_v39 = vmul.f32 0.020833334, %v217_v38  ;;  %v226_v45 = vmul.f32 0.020833334, %v221_v37 }
 0x173   :  { %v244_v42 = vmul.f32 %v224_v39, %v224_v39  ;;  %v246_v53 = vmul.f32 %v226_v45, %v226_v45 }
 0x174   :  { %v223_v40 = vpop.xlane.xlu1 %222  ;;  %v233_v41 = vpop.xlane.xlu0 %232 }
 0x175   :  { %v240_v43 = vmul.f32 0.020833334, %v233_v41  ;;  %v227_v48 = vmul.f32 0.020833334, %v223_v40 }
 0x177   :  { %v248_v44 = vsub.f32 %v240_v43, %v244_v42  ;;  %v247_v56 = vmul.f32 %v227_v48, %v227_v48 }
 0x178   :  { %v235_v46 = vpop.xlane.xlu1 %234  ;;  %v219_v47 = vpop.xlane.xlu0 %218 }
 0x179   :  { %v252_v49 = vadd.f32 1e-05, %v248_v44  ;;  %v225_v50 = vmul.f32 0.020833334, %v219_v47  ;;  %v241_v51 = vmul.f32 0.020833334, %v235_v46 }
 0x17b   :  { %445 = vrsqrt.f32 %v252_v49  ;;  %v245_v52 = vmul.f32 %v225_v50, %v225_v50 }
 0x17c   :  { %v239_v54 = vpop.xlane.xlu1 %238  ;;  %v237_v55 = vpop.xlane.xlu0 %236 }
 0x17d   :  { %v249_v57 = vsub.f32 %v241_v51, %v245_v52  ;;  %v243_v58 = vmul.f32 0.020833334, %v239_v54  ;;  %v242_v59 = vmul.f32 0.020833334, %v237_v55 }
 0x17f   :  { %v253_v60 = vadd.f32 1e-05, %v249_v57  ;;  %v251_v61 = vsub.f32 %v243_v58, %v247_v56  ;;  %v250_v62 = vsub.f32 %v242_v59, %v246_v53 }
 0x181   :  { %v255_v63 = vadd.f32 1e-05, %v251_v61  ;;  %v254_v0 = vadd.f32 1e-05, %v250_v62  ;;  %447 = vrsqrt.f32 %v253_v60 }
 0x183   :  { %449 = vrsqrt.f32 %v255_v63 }
 0x184   :  { %451 = vrsqrt.f32 %v254_v0 }
 0x188   :  { %v446_v2 = vpop.eup %445 }
 0x189   :  { %v264_v3 = vmul.f32 %v446_v2, %v260_v1 }
 0x18b   :  { %v268_v4 = vmul.f32 %v264_v3, %v224_v39 }
 0x18d   :  { %276 = vrot.lane.b32.xlu0 %v268_v4, %s454_s25 }
 0x18e   :  { %v448_v5 = vpop.eup %447 }
 0x18f   :  { %v265_v13 = vmul.f32 %v448_v5, %v261_v10 }
 0x190   :  { %v450_v7 = vpop.eup %449 }
 0x191   :  { %v452_v9 = vpop.eup %451  ;;  %294 = vperm.xlu0 %419, %v264_v3   ;;  %v267_v12 = vmul.f32 %v450_v7, %v263_v8  ;;  %v269_v15 = vmul.f32 %v265_v13, %v225_v50 }
 0x192   :  { %v266_v11 = vmul.f32 %v452_v9, %v262_v6 }
 0x193   :  { %v271_v17 = vmul.f32 %v267_v12, %v227_v48 }
 0x194   :  { %v270_v14 = vmul.f32 %v266_v11, %v226_v45 }
 0x195   :  { %309 = vperm.xlu0 %419, %v267_v12  }
 0x196   :  { %280 = vrot.lane.b32.xlu1 %v270_v14, %s454_s25 }
 0x199   :  { %422 = vset.pattern.permute.xlu0 %v455_v16 }
 0x19a   :  { %278 = vrot.lane.b32.xlu1 %v269_v15, %s454_s25 }
 0x19e   :  { %282 = vrot.lane.b32.xlu1 %v271_v17, %s454_s25 }
 0x1a2   :  { %299 = vperm.xlu1 %420, %v265_v13  }
 0x1a6   :  { %304 = vperm.xlu1 %420, %v266_v11  }
 0x1aa   :  { %421 = vset.pattern.permute.xlu1 %v455_v16 }
 0x1ff   :  { %v277_v18 = vpop.permute.xlu0 %276 }
 0x200   :  { %v288_v19 = vsub.f32 %v260_v1, %v277_v18 }
 0x202   :  { %318 = vperm.xlu1 %421, %v288_v19  }
 0x208   :  { %v281_v20 = vpop.permute.xlu1 %280 }
 0x209   :  { %v290_v21 = vsub.f32 %v262_v6, %v281_v20 }
 0x20b   :  { %328 = vperm.xlu1 %421, %v290_v21  }
 0x20c   :  { %v279_v22 = vpop.permute.xlu1 %278  ;;  %v295_v29 = vpop.permute.xlu0 %294 }
 0x20d   :  { %v289_v23 = vsub.f32 %v261_v10, %v279_v22  ;;  %v312_v33 = vmul.f32 %v536_v24, %v295_v29 }
 0x20f   :  { %323 = vperm.xlu0 %422, %v289_v23  }
 0x210   :  { %v283_v26 = vpop.permute.xlu1 %282  ;;  %v310_v38 = vpop.permute.xlu0 %309 }
 0x211   :  { %v291_v27 = vsub.f32 %v263_v8, %v283_v26  ;;  %v315_v44 = vmul.f32 %v544_v31, %v310_v38 }
 0x213   :  { %333 = vperm.xlu1 %421, %v291_v27  }
 0x21d   :  { %v300_v28 = vpop.permute.xlu1 %299 }
 0x21e   :  { %v313_v41 = vmul.f32 %v542_v30, %v300_v28 }
 0x221   :  { %v305_v32 = vpop.permute.xlu1 %304 }
 0x222   :  { %v314_v37 = vmul.f32 %v538_v25, %v305_v32 }
 0x27d   :  { %v319_v34 = vpop.permute.xlu1 %318 }
 0x27e   :  { %v336_v35 = vadd.f32 %v319_v34, %v312_v33 }
 0x280   :  { %v340_v36 = vmax.f32 %v336_v35, 0.0 }
 0x282   :  { %344 = vst [vmem:[%s587_s3] sm:$0xff] %v340_v36 }
 0x286   :  { %v329_v39 = vpop.permute.xlu1 %328 }
 0x287   :  { %v338_v40 = vadd.f32 %v329_v39, %v314_v37 }
 0x289   :  { %v342_v42 = vmax.f32 %v338_v40, 0.0 }
 0x28a   :  { %v324_v43 = vpop.permute.xlu0 %323 }
 0x28b   :  { %346 = vst [vmem:[%s587_s3 + $0x10] sm:$0xff] %v342_v42  ;;  %v337_v24 = vadd.f32 %v324_v43, %v313_v41 }
 0x28d   :  { %v341_v45 = vmax.f32 %v337_v24, 0.0 }
 0x28e   :  { %v334_v46 = vpop.permute.xlu1 %333 }
 0x28f   :  { %345 = vst [vmem:[%s587_s3 + $0x8] sm:$0xff] %v341_v45  ;;  %v339_v25 = vadd.f32 %v334_v46, %v315_v44 }
 0x291   :  { %v343_v47 = vmax.f32 %v339_v25, 0.0 }
 0x293   :  { %347 = vst [vmem:[%s587_s3 + $0x18] sm:$0xff] %v343_v47 }

// kernel: _snn_c_apply.22
= control target key start
LH: loop header
LB: loop body
LE: loop exit
PB: predicated region body
PF: predicated region fallthrough
CT: control target
= control target key end

     0   :  { %vm365_vm0 = vcmask 523264   ;;  %s843_s23 = smov 1   ;;  %s1051_s1 = inlined_call_operand.vmem [shape: bf16[576,128], index: 1, kind: input, shape index: {}]   ;;  %s1052_s0 = inlined_call_operand.vmem [shape: bf16[32,576], index: 0, kind: input, shape index: {}]   ;;  %s1053_s2 = inlined_call_operand.vmem [shape: f32[32,2], index: 2, kind: input, shape index: {}]   ;;  %s1054_s3 = inlined_call_operand.vmem [shape: f32[32,128], index: 3, kind: output, shape index: {}]  }
   0x1   :  { %v784_v0 = vld [vmem:[%s1051_s1 + $0x78] sm:$0xff]   ;;  %v788_v4 = vld [vmem:[%s1051_s1 + $0x70] sm:$0xff]   ;;  %v792_v8 = vld [vmem:[%s1051_s1 + $0x68] sm:$0xff]  }
   0x2   :  { %v785_v1 = vld [vmem:[%s1051_s1 + $0xf8] sm:$0xff]   ;;  %703 = vmatprep.subr.bf16.mxu0 %v784_v0  ;;  %v789_v5 = vld [vmem:[%s1051_s1 + $0xf0] sm:$0xff]   ;;  %v793_v9 = vld [vmem:[%s1051_s1 + $0xe8] sm:$0xff]  }
   0x3   :  { %v786_v2 = vld [vmem:[%s1051_s1 + $0x38] sm:$0xff]   ;;  %731 = vmatprep.subr.bf16.mxu1 %v785_v1  ;;  %v790_v6 = vld [vmem:[%s1051_s1 + $0x30] sm:$0xff]   ;;  %v794_v10 = vld [vmem:[%s1051_s1 + $0x28] sm:$0xff]  }
   0x4   :  { %v787_v3 = vld [vmem:[%s1051_s1 + $0xb8] sm:$0xff]   ;;  %704 = vmatpush3.bf16.msra.mxu0 %v786_v2  ;;  %v791_v7 = vld [vmem:[%s1051_s1 + $0xb0] sm:$0xff]   ;;  %v795_v11 = vld [vmem:[%s1051_s1 + $0xa8] sm:$0xff]  }
   0x5   :  { %732 = vmatpush3.bf16.msra.mxu1 %v787_v3  ;;  %705 = vmatprep.subr.bf16.mxu0 %v788_v4  ;;  %v796_v12 = vld [vmem:[%s1051_s1 + $0x60] sm:$0xff]   ;;  %v800_v16 = vld [vmem:[%s1051_s1 + $0x58] sm:$0xff]   ;;  %v804_v20 = vld [vmem:[%s1051_s1 + $0x50] sm:$0xff]  }
   0x6   :  { %733 = vmatprep.subr.bf16.mxu1 %v789_v5  ;;  %v797_v13 = vld [vmem:[%s1051_s1 + $0xe0] sm:$0xff]   ;;  %v801_v17 = vld [vmem:[%s1051_s1 + $0xd8] sm:$0xff]   ;;  %v805_v21 = vld [vmem:[%s1051_s1 + $0xd0] sm:$0xff]  }
   0x7   :  { %v798_v14 = vld [vmem:[%s1051_s1 + $0x20] sm:$0xff]   ;;  %v802_v18 = vld [vmem:[%s1051_s1 + $0x18] sm:$0xff]   ;;  %v806_v22 = vld [vmem:[%s1051_s1 + $0x10] sm:$0xff]  }
   0x8   :  { %706 = vmatpush3.bf16.msra.mxu0 %v790_v6  ;;  %v799_v15 = vld [vmem:[%s1051_s1 + $0xa0] sm:$0xff]   ;;  %v803_v19 = vld [vmem:[%s1051_s1 + $0x98] sm:$0xff]   ;;  %v807_v23 = vld [vmem:[%s1051_s1 + $0x90] sm:$0xff]  }
   0x9   :  { %734 = vmatpush3.bf16.msra.mxu1 %v791_v7  ;;  %707 = vmatprep.subr.bf16.mxu0 %v792_v8  ;;  %v808_v24 = vld [vmem:[%s1051_s1 + $0x48] sm:$0xff]   ;;  %v812_v28 = vld [vmem:[%s1051_s1 + $0x40] sm:$0xff]   ;;  %v822_v36 = vld [vmem:[%s1051_s1 + $0x118] sm:$0xff]  }
   0xa   :  { %735 = vmatprep.subr.bf16.mxu1 %v793_v9  ;;  %v809_v25 = vld [vmem:[%s1051_s1 + $0xc8] sm:$0xff]   ;;  %v813_v29 = vld [vmem:[%s1051_s1 + $0xc0] sm:$0xff]   ;;  %v823_v37 = vld [vmem:[%s1051_s1 + $0x110] sm:$0xff]  }
   0xb   :  { %v810_v26 = vld [vmem:[%s1051_s1 + $0x8] sm:$0xff]   ;;  %v814_v30 = vld [vmem:[%s1051_s1] sm:$0xff]  }
   0xc   :  { %708 = vmatpush3.bf16.msra.mxu0 %v794_v10  ;;  %v811_v27 = vld [vmem:[%s1051_s1 + $0x88] sm:$0xff]   ;;  %v815_v31 = vld [vmem:[%s1051_s1 + $0x80] sm:$0xff]  }
   0xd   :  { %736 = vmatpush3.bf16.msra.mxu1 %v795_v11  ;;  %709 = vmatprep.subr.bf16.mxu0 %v796_v12  ;;  %v816_v32 = vld [vmem:[%s1052_s0] ss:$20 sps:$4 sm:$0xff]   ;;  %v818_v33 = vld [vmem:[%s1052_s0 + $0x4] ss:$20 sps:$4 sm:$0xff]   ;;  %v819_v34 = vld [vmem:[%s1052_s0 + $0x8] ss:$20 sps:$4 sm:$0xff]  }
   0xe   :  { %737 = vmatprep.subr.bf16.mxu1 %v797_v13  ;;  %v821_v35 = vld [vmem:[%s1052_s0 + $0xc] ss:$20 sps:$4 sm:$0xff]   ;;  %404 = vmatprep.mubr.bf16.mxu0 %v818_v33  ;;  %v826_v39 = vld [vmem:[%s1052_s0 + $0x34] ss:$20 sps:$4 sm:$0xff]   ;;  %v829_v42 = vld [vmem:[%s1052_s0 + $0x30] ss:$20 sps:$4 sm:$0xff]  }
   0xf   :  { %453 = vmatprep.mubr.bf16.mxu1 %v821_v35  ;;  %v824_v38 = vld [vmem:[%s1052_s0 + $0x2c] ss:$20 sps:$4 sm:$0xff]   ;;  %v828_v40 = vld [vmem:[%s1052_s0 + $0x28] ss:$20 sps:$4 sm:$0xff]   ;;  %v832_v43 = vld [vmem:[%s1052_s0 + $0x10] ss:$20 sps:$4 sm:$0xff]  }
  0x10   :  { %710 = vmatpush3.bf16.msra.mxu0 %v798_v14  ;;  %v830_v41 = vld [vmem:[%s1051_s1 + $0x108] sm:$0xff]   ;;  %v831_v44 = vld [vmem:[%s1051_s1 + $0x100] sm:$0xff]  }
  0x11   :  { %738 = vmatpush3.bf16.msra.mxu1 %v799_v15  ;;  %711 = vmatprep.subr.bf16.mxu0 %v800_v16  ;;  %v833_v45 = vld [vmem:[%s1052_s0 + $0x38] ss:$20 sps:$4 sm:$0xff]  }
  0x12   :  { %739 = vmatprep.subr.bf16.mxu1 %v801_v17 }
  0x14   :  { %712 = vmatpush3.bf16.msra.mxu0 %v802_v18 }
  0x15   :  { %740 = vmatpush3.bf16.msra.mxu1 %v803_v19  ;;  %713 = vmatprep.subr.bf16.mxu0 %v804_v20 }
  0x16   :  { %741 = vmatprep.subr.bf16.mxu1 %v805_v21 }
  0x18   :  { %714 = vmatpush3.bf16.msra.mxu0 %v806_v22  ;;  %v842_v22 = vmov 0  }
  0x19   :  { %742 = vmatpush3.bf16.msra.mxu1 %v807_v23  ;;  %715 = vmatprep.subr.bf16.mxu0 %v808_v24 }
  0x1a   :  { %743 = vmatprep.subr.bf16.mxu1 %v809_v25  ;;  %780 = vset.pattern.permute.xlu0 %v842_v22 }
  0x1b   :  { %781 = vset.pattern.permute.xlu1 %v842_v22 }
  0x1c   :  { %716 = vmatpush3.bf16.msra.mxu0 %v810_v26 }
  0x1d   :  { %744 = vmatpush3.bf16.msra.mxu1 %v811_v27  ;;  %717 = vmatprep.subr.bf16.mxu0 %v812_v28 }
  0x1e   :  { %745 = vmatprep.subr.bf16.mxu1 %v813_v29 }
  0x20   :  { %718 = vmatpush3.bf16.msra.mxu0 %v814_v30 }
  0x21   :  { %746 = vmatpush3.bf16.msra.mxu1 %v815_v31  ;;  %765 = vmatprep.subr.bf16.mxu0 %v822_v36 }
  0x23   :  { %405 = vmatmul.mubr.bf16.vlgmr.msra.gmra.mxu0 %v816_v32 }
  0x24   :  { %454 = vmatmul.mubr.bf16.vlgmr.msra.gmra.mxu1 %v819_v34  ;;  %766 = vmatpush3.bf16.msra.mxu0 %v822_v36 }
  0x25   :  { %767 = vmatprep.subr.bf16.mxu0 %v823_v37  ;;  %412 = vmatprep.mubr.bf16.mxu0 %v824_v38 }
  0x26   :  { %461 = vmatprep.mubr.bf16.mxu1 %v826_v39 }
  0x28   :  { %768 = vmatpush3.bf16.msra.mxu0 %v823_v37 }
  0x29   :  { %769 = vmatprep.subr.bf16.mxu0 %v830_v41 }
  0x2b   :  { %413 = vmatmul.mubr.bf16.gmra.mxu0 %v828_v40 }
  0x2c   :  { %462 = vmatmul.mubr.bf16.gmra.mxu1 %v829_v42  ;;  %773 = vmatprep.mubr.msk.bf16.mxu0 %vm365_vm0, %v832_v43 }
  0x2d   :  { %770 = vmatpush3.bf16.msra.mxu0 %v830_v41 }
  0x2e   :  { %771 = vmatprep.subr.bf16.mxu0 %v831_v44 }
  0x31   :  { %772 = vmatpush3.bf16.msra.mxu0 %v831_v44 }
  0x34   :  { %774 = vmatmul.mubr.msk.bf16.vlgmr.msra.gmra.mxu0 %vm365_vm0, %v833_v45 }
  0xe3   :  { %v719_v46 = vpop.f32.mrf.mxu0 }
  0xe4   :  { %v747_v47 = vpop.f32.mrf.mxu1 }
  0xe5   :  { %v720_v48 = vpop.f32.mrf.mxu0 }
  0xe6   :  { %v748_v49 = vpop.f32.mrf.mxu1  ;;  %v721_v62 = vadd.f32 %v720_v48, %v719_v46 }
  0xe7   :  { %v722_v50 = vpop.f32.mrf.mxu0  ;;  %v749_v63 = vadd.f32 %v748_v49, %v747_v47 }
  0xe8   :  { %v750_v51 = vpop.f32.mrf.mxu1 }
  0xe9   :  { %v723_v52 = vpop.f32.mrf.mxu0  ;;  %v456_v9 = vadd.f32 %v749_v63, %v721_v62 }
  0xea   :  { %v751_v53 = vpop.f32.mrf.mxu1  ;;  %v724_v6 = vadd.f32 %v723_v52, %v722_v50 }
  0xeb   :  { %v725_v54 = vpop.f32.mrf.mxu0  ;;  %v752_v7 = vadd.f32 %v751_v53, %v750_v51  ;;  %v563_v51 = vld [vmem:[%s1053_s2] sm:$0xff] }
  0xec   :  { %v753_v55 = vpop.f32.mrf.mxu1 }
  0xed   :  { %v726_v56 = vpop.f32.mrf.mxu0  ;;  %v459_v15 = vadd.f32 %v752_v7, %v724_v6 }
  0xee   :  { %v754_v57 = vpop.f32.mrf.mxu1  ;;  %v727_v58 = vadd.f32 %v726_v56, %v725_v54  ;;  %v565_v56 = vld [vmem:[%s1053_s2 + $0x10] sm:$0xff] }
  0xef   :  { %v755_v59 = vadd.f32 %v754_v57, %v753_v55  ;;  %v728_v60 = vpop.f32.mrf.mxu0 }
  0xf0   :  { %v756_v61 = vpop.f32.mrf.mxu1 }
  0xf1   :  { %v729_v0 = vpop.f32.mrf.mxu0  ;;  %v464_v4 = vadd.f32 %v755_v59, %v727_v58  ;;  %v564_v59 = vld [vmem:[%s1053_s2 + $0x8] sm:$0xff] }
  0xf2   :  { %v757_v1 = vpop.f32.mrf.mxu1  ;;  %v730_v2 = vadd.f32 %v729_v0, %v728_v60  ;;  %v566_v60 = vld [vmem:[%s1053_s2 + $0x18] sm:$0xff] }
  0xf3   :  { %v758_v3 = vadd.f32 %v757_v1, %v756_v61 }
  0xf4   :  { %v775_v5 = vpop.f32.mrf.mxu0 }
  0xf5   :  { %v1003_v8 = vadd.f32 %v775_v5, %v464_v4  ;;  %v467_v12 = vadd.f32 %v758_v3, %v730_v2  ;;  %v844_v2 = vmov 1  }
  0xf6   :  { %v504_v10 = vpop.f32.mrf.mxu0 }
  0xf7   :  { %v1005_v11 = vadd.f32 %v504_v10, %v456_v9  ;;  %523 = vadd.xlane.f32.xlu1 %v1003_v8  ;;  %v533_v21 = vmul.f32 %v1003_v8, %v1003_v8 }
  0xf8   :  { %v776_v13 = vpop.f32.mrf.mxu0 }
  0xf9   :  { %v1008_v14 = vadd.f32 %v776_v13, %v467_v12  ;;  %519 = vadd.xlane.f32.xlu0 %v1005_v11  ;;  %v531_v18 = vmul.f32 %v1005_v11, %v1005_v11 }
  0xfa   :  { %v507_v16 = vpop.f32.mrf.mxu0 }
  0xfb   :  { %v1011_v17 = vadd.f32 %v507_v16, %v459_v15  ;;  %525 = vadd.xlane.f32.xlu1 %v1008_v14  ;;  %v534_v20 = vmul.f32 %v1008_v14, %v1008_v14 }
  0xfd   :  { %535 = vadd.xlane.f32.xlu0 %v531_v18  ;;  %v532_v19 = vmul.f32 %v1011_v17, %v1011_v17 }
  0xff   :  { %537 = vadd.xlane.f32.xlu1 %v532_v19 }
 0x101   :  { %521 = vadd.xlane.f32.xlu0 %v1011_v17 }
 0x103   :  { %541 = vadd.xlane.f32.xlu1 %v534_v20 }
 0x105   :  { %539 = vadd.xlane.f32.xlu0 %v533_v21 }
 0x180   :  { %v524_v23 = vpop.xlane.xlu1 %523 }
 0x181   :  { %v529_v34 = vmul.f32 0.020833334, %v524_v23 }
 0x182   :  { %v520_v24 = vpop.xlane.xlu0 %519 }
 0x183   :  { %v527_v25 = vmul.f32 0.020833334, %v520_v24  ;;  %v549_v43 = vmul.f32 %v529_v34, %v529_v34 }
 0x184   :  { %v526_v26 = vpop.xlane.xlu1 %525 }
 0x185   :  { %v547_v28 = vmul.f32 %v527_v25, %v527_v25  ;;  %v530_v30 = vmul.f32 0.020833334, %v526_v26 }
 0x186   :  { %v536_v27 = vpop.xlane.xlu0 %535 }
 0x187   :  { %v543_v29 = vmul.f32 0.020833334, %v536_v27  ;;  %v550_v37 = vmul.f32 %v530_v30, %v530_v30 }
 0x188   :  { %v538_v31 = vpop.xlane.xlu1 %537 }
 0x189   :  { %v551_v32 = vsub.f32 %v543_v29, %v547_v28  ;;  %v544_v39 = vmul.f32 0.020833334, %v538_v31 }
 0x18a   :  { %v522_v33 = vpop.xlane.xlu0 %521 }
 0x18b   :  { %v555_v35 = vadd.f32 1e-05, %v551_v32  ;;  %v528_v36 = vmul.f32 0.020833334, %v522_v33 }
 0x18c   :  { %v542_v38 = vpop.xlane.xlu1 %541 }
 0x18d   :  { %834 = vrsqrt.f32 %v555_v35  ;;  %v548_v40 = vmul.f32 %v528_v36, %v528_v36  ;;  %v546_v41 = vmul.f32 0.020833334, %v542_v38 }
 0x18e   :  { %v540_v42 = vpop.xlane.xlu0 %539 }
 0x18f   :  { %v552_v44 = vsub.f32 %v544_v39, %v548_v40  ;;  %v554_v45 = vsub.f32 %v546_v41, %v550_v37  ;;  %v545_v46 = vmul.f32 0.020833334, %v540_v42 }
 0x191   :  { %v556_v47 = vadd.f32 1e-05, %v552_v44  ;;  %v558_v48 = vadd.f32 1e-05, %v554_v45  ;;  %v553_v49 = vsub.f32 %v545_v46, %v549_v43 }
 0x193   :  { %836 = vrsqrt.f32 %v556_v47  ;;  %v557_v50 = vadd.f32 1e-05, %v553_v49 }
 0x194   :  { %838 = vrsqrt.f32 %v558_v48 }
 0x195   :  { %840 = vrsqrt.f32 %v557_v50 }
 0x19a   :  { %v835_v52 = vpop.eup %834 }
 0x19b   :  { %v567_v53 = vmul.f32 %v835_v52, %v563_v51 }
 0x19d   :  { %v571_v54 = vmul.f32 %v567_v53, %v527_v25 }
 0x19f   :  { %579 = vrot.lane.b32.xlu0 %v571_v54, %s843_s23 }
 0x1a0   :  { %v837_v55 = vpop.eup %836 }
 0x1a1   :  { %v839_v57 = vpop.eup %838  ;;  %v568_v62 = vmul.f32 %v837_v55, %v564_v59 }
 0x1a2   :  { %v841_v58 = vpop.eup %840  ;;  %v570_v63 = vmul.f32 %v839_v57, %v566_v60 }
 0x1a3   :  { %597 = vperm.xlu0 %780, %v567_v53   ;;  %v569_v61 = vmul.f32 %v841_v58, %v565_v56  ;;  %v572_v1 = vmul.f32 %v568_v62, %v528_v36 }
 0x1a4   :  { %v574_v3 = vmul.f32 %v570_v63, %v530_v30 }
 0x1a5   :  { %v573_v0 = vmul.f32 %v569_v61, %v529_v34 }
 0x1a7   :  { %612 = vperm.xlu0 %780, %v570_v63   ;;  %583 = vrot.lane.b32.xlu1 %v573_v0, %s843_s23 }
 0x1ab   :  { %581 = vrot.lane.b32.xlu1 %v572_v1, %s843_s23  ;;  %783 = vset.pattern.permute.xlu0 %v844_v2 }
 0x1af   :  { %585 = vrot.lane.b32.xlu1 %v574_v3, %s843_s23 }
 0x1b3   :  { %602 = vperm.xlu1 %781, %v568_v62  }
 0x1b7   :  { %607 = vperm.xlu1 %781, %v569_v61  }
 0x1bb   :  { %782 = vset.pattern.permute.xlu1 %v844_v2 }
 0x211   :  { %v580_v4 = vpop.permute.xlu0 %579 }
 0x212   :  { %v591_v5 = vsub.f32 %v563_v51, %v580_v4 }
 0x214   :  { %621 = vperm.xlu1 %782, %v591_v5  }
 0x219   :  { %v584_v6 = vpop.permute.xlu1 %583 }
 0x21a   :  { %v593_v7 = vsub.f32 %v565_v56, %v584_v6 }
 0x21c   :  { %631 = vperm.xlu1 %782, %v593_v7  }
 0x21d   :  { %v582_v9 = vpop.permute.xlu1 %581 }
 0x21e   :  { %v592_v10 = vsub.f32 %v564_v59, %v582_v9  ;;  %v598_v16 = vpop.permute.xlu0 %597 }
 0x21f   :  { %v615_v19 = vmul.f32 %v598_v16, %v1005_v11 }
 0x220   :  { %626 = vperm.xlu0 %783, %v592_v10  }
 0x221   :  { %v586_v12 = vpop.permute.xlu1 %585 }
 0x222   :  { %v594_v13 = vsub.f32 %v566_v60, %v586_v12  ;;  %v613_v24 = vpop.permute.xlu0 %612 }
 0x223   :  { %v618_v30 = vmul.f32 %v613_v24, %v1008_v14 }
 0x224   :  { %636 = vperm.xlu1 %782, %v594_v13  }
 0x22e   :  { %v603_v15 = vpop.permute.xlu1 %602 }
 0x22f   :  { %v616_v27 = vmul.f32 %v603_v15, %v1011_v17 }
 0x232   :  { %v608_v18 = vpop.permute.xlu1 %607 }
 0x233   :  { %v617_v23 = vmul.f32 %v608_v18, %v1003_v8 }
 0x28f   :  { %v622_v20 = vpop.permute.xlu1 %621 }
 0x290   :  { %v639_v21 = vadd.f32 %v622_v20, %v615_v19 }
 0x292   :  { %v643_v22 = vmax.f32 %v639_v21, 0.0 }
 0x294   :  { %647 = vst [vmem:[%s1054_s3] sm:$0xff] %v643_v22 }
 0x297   :  { %v632_v25 = vpop.permute.xlu1 %631 }
 0x298   :  { %v641_v26 = vadd.f32 %v632_v25, %v617_v23 }
 0x29a   :  { %v645_v28 = vmax.f32 %v641_v26, 0.0 }
 0x29b   :  { %v627_v29 = vpop.permute.xlu0 %626 }
 0x29c   :  { %649 = vst [vmem:[%s1054_s3 + $0x10] sm:$0xff] %v645_v28  ;;  %v640_v11 = vadd.f32 %v627_v29, %v616_v27 }
 0x29e   :  { %v644_v31 = vmax.f32 %v640_v11, 0.0 }
 0x29f   :  { %v637_v32 = vpop.permute.xlu1 %636 }
 0x2a0   :  { %648 = vst [vmem:[%s1054_s3 + $0x8] sm:$0xff] %v644_v31  ;;  %v642_v8 = vadd.f32 %v637_v32, %v618_v30 }
 0x2a2   :  { %v646_v33 = vmax.f32 %v642_v8, 0.0 }
 0x2a4   :  { %650 = vst [vmem:[%s1054_s3 + $0x18] sm:$0xff] %v646_v33 }

// kernel: _snn_c_apply.23
= control target key start
LH: loop header
LB: loop body
LE: loop exit
PB: predicated region body
PF: predicated region fallthrough
CT: control target
= control target key end

     0   :  { %vm170_vm0 = vcmask 523264   ;;  %v377_v38 = vmov 0   ;;  %v378_v53 = vmov 1   ;;  %s379_s12 = smov 1   ;;  %s496_s1 = inlined_call_operand.vmem [shape: bf16[192,256], index: 1, kind: input, shape index: {}]   ;;  %s497_s0 = inlined_call_operand.vmem [shape: bf16[16,192], index: 0, kind: input, shape index: {}]   ;;  %s498_s2 = inlined_call_operand.vmem [shape: f32[16,2], index: 2, kind: input, shape index: {}]   ;;  %s499_s3 = inlined_call_operand.vmem [shape: f32[16,256], index: 3, kind: output, shape index: {}]  }
   0x1   :  { %v334_v0 = vld [vmem:[%s496_s1 + $0x74] ss:$8 sps:$4 sm:$0xff]   ;;  %v336_v1 = vld [vmem:[%s496_s1 + $0x70] ss:$8 sps:$4 sm:$0xff]   ;;  %v337_v2 = vld [vmem:[%s496_s1 + $0x64] ss:$8 sps:$4 sm:$0xff]   ;;  %331 = vset.pattern.permute.xlu1 %v377_v38  ;;  %332 = vset.pattern.permute.xlu0 %v378_v53 }
   0x2   :  { %174 = vmatprep.subr.bf16.mxu0 %v334_v0  ;;  %v339_v3 = vld [vmem:[%s496_s1 + $0x60] ss:$8 sps:$4 sm:$0xff]   ;;  %v340_v4 = vld [vmem:[%s496_s1 + $0x54] ss:$8 sps:$4 sm:$0xff]   ;;  %v342_v5 = vld [vmem:[%s496_s1 + $0x50] ss:$8 sps:$4 sm:$0xff]  }
   0x3   :  { %175 = vmatpush1.bf16.msra.mxu0 %v336_v1  ;;  %v343_v6 = vld [vmem:[%s496_s1 + $0x44] ss:$8 sps:$4 sm:$0xff]   ;;  %v345_v7 = vld [vmem:[%s496_s1 + $0x40] ss:$8 sps:$4 sm:$0xff]   ;;  %v346_v8 = vld [vmem:[%s496_s1 + $0x34] ss:$8 sps:$4 sm:$0xff]  }
   0x4   :  { %176 = vmatprep.subr.bf16.mxu0 %v337_v2  ;;  %v348_v9 = vld [vmem:[%s496_s1 + $0x30] ss:$8 sps:$4 sm:$0xff]   ;;  %v349_v10 = vld [vmem:[%s496_s1 + $0x24] ss:$8 sps:$4 sm:$0xff]   ;;  %v351_v12 = vld [vmem:[%s496_s1 + $0x20] ss:$8 sps:$4 sm:$0xff]  }
   0x5   :  { %v372_v11 = vld [vmem:[%s497_s0 + $0x4] ss:$8 sps:$4 sm:$0xff]   ;;  %v352_v13 = vld [vmem:[%s496_s1 + $0x14] ss:$8 sps:$4 sm:$0xff]   ;;  %v354_v14 = vld [vmem:[%s496_s1 + $0x10] ss:$8 sps:$4 sm:$0xff]  }
   0x6   :  { %327 = vmatprep.mubr.msk.bf16.mxu0 %vm170_vm0, %v372_v11  ;;  %v355_v15 = vld [vmem:[%s496_s1 + $0x4] ss:$8 sps:$4 sm:$0xff]   ;;  %v357_v16 = vld [vmem:[%s496_s1] ss:$8 sps:$4 sm:$0xff]   ;;  %v358_v17 = vld [vmem:[%s496_s1 + $0xb4] ss:$8 sps:$4 sm:$0xff]  }
   0x7   :  { %177 = vmatpush1.bf16.msra.mxu0 %v339_v3  ;;  %v360_v18 = vld [vmem:[%s496_s1 + $0xb0] ss:$8 sps:$4 sm:$0xff]   ;;  %v361_v19 = vld [vmem:[%s496_s1 + $0xa4] ss:$8 sps:$4 sm:$0xff]   ;;  %v363_v20 = vld [vmem:[%s496_s1 + $0xa0] ss:$8 sps:$4 sm:$0xff]  }
   0x8   :  { %178 = vmatprep.subr.bf16.mxu0 %v340_v4  ;;  %v364_v21 = vld [vmem:[%s496_s1 + $0x94] ss:$8 sps:$4 sm:$0xff]   ;;  %v366_v22 = vld [vmem:[%s496_s1 + $0x90] ss:$8 sps:$4 sm:$0xff]   ;;  %v367_v23 = vld [vmem:[%s496_s1 + $0x84] ss:$8 sps:$4 sm:$0xff]  }
   0x9   :  { %v369_v24 = vld [vmem:[%s496_s1 + $0x80] ss:$8 sps:$4 sm:$0xff]  }
   0xa   :  { %v370_v25 = vld [vmem:[%s497_s0] ss:$8 sps:$4 sm:$0xff]  }
   0xb   :  { %179 = vmatpush1.bf16.msra.mxu0 %v342_v5  ;;  %v245_v54 = vld [vmem:[%s498_s2] sm:$0xff]  ;;  %v246_v57 = vld [vmem:[%s498_s2 + $0x8] sm:$0xff] }
   0xc   :  { %180 = vmatprep.subr.bf16.mxu0 %v343_v6 }
   0xf   :  { %181 = vmatpush1.bf16.msra.mxu0 %v345_v7 }
  0x10   :  { %182 = vmatprep.subr.bf16.mxu0 %v346_v8 }
  0x13   :  { %183 = vmatpush1.bf16.msra.mxu0 %v348_v9 }
  0x14   :  { %184 = vmatprep.subr.bf16.mxu0 %v349_v10 }
  0x17   :  { %185 = vmatpush1.bf16.msra.mxu0 %v351_v12 }
  0x18   :  { %186 = vmatprep.subr.bf16.mxu0 %v352_v13 }
  0x1b   :  { %187 = vmatpush1.bf16.msra.mxu0 %v354_v14 }
  0x1c   :  { %188 = vmatprep.subr.bf16.mxu0 %v355_v15 }
  0x1f   :  { %189 = vmatpush1.bf16.msra.mxu0 %v357_v16 }
  0x20   :  { %198 = vmatprep.subr.bf16.mxu0 %v358_v17 }
  0x23   :  { %199 = vmatpush2.bf16.msra.mxu0 %v360_v18 }
  0x24   :  { %200 = vmatprep.subr.bf16.mxu0 %v361_v19 }
  0x27   :  { %201 = vmatpush2.bf16.msra.mxu0 %v363_v20 }
  0x28   :  { %202 = vmatprep.subr.bf16.mxu0 %v364_v21 }
  0x2b   :  { %203 = vmatpush2.bf16.msra.mxu0 %v366_v22 }
  0x2c   :  { %204 = vmatprep.subr.bf16.mxu0 %v367_v23 }
  0x2f   :  { %205 = vmatpush2.bf16.msra.mxu0 %v369_v24 }
  0x32   :  { %207 = vmatmul.mubr.bf16.vlgmr.msra.gmra.mxu0 %v370_v25 }
  0xf2   :  { %v208_v26 = vpop.f32.mrf.mxu0 }
  0xf3   :  { %v225_v29 = vmul.f32 %v208_v26, %v208_v26 }
  0xf4   :  { %v210_v27 = vpop.f32.mrf.mxu0 }
  0xf5   :  { %v217_v28 = vadd.f32 %v210_v27, %v208_v26  ;;  %v226_v30 = vmul.f32 %v210_v27, %v210_v27 }
  0xf6   :  { %v212_v31 = vpop.f32.mrf.mxu0 }
  0xf7   :  { %218 = vadd.xlane.f32.xlu0 %v217_v28  ;;  %v229_v32 = vadd.f32 %v226_v30, %v225_v29  ;;  %v227_v36 = vmul.f32 %v212_v31, %v212_v31 }
  0xf8   :  { %v214_v33 = vpop.f32.mrf.mxu0 }
  0xf9   :  { %v228_v34 = vmul.f32 %v214_v33, %v214_v33  ;;  %230 = vadd.xlane.f32.xlu1 %v229_v32  ;;  %v220_v35 = vadd.f32 %v214_v33, %v212_v31 }
  0xfb   :  { %221 = vadd.xlane.f32.xlu0 %v220_v35  ;;  %v232_v37 = vadd.f32 %v228_v34, %v227_v36 }
  0xfd   :  { %233 = vadd.xlane.f32.xlu1 %v232_v37 }
 0x180   :  { %v219_v39 = vpop.xlane.xlu0 %218 }
 0x181   :  { %v223_v40 = vmul.f32 0.0048076925, %v219_v39 }
 0x182   :  { %v231_v41 = vpop.xlane.xlu1 %230 }
 0x183   :  { %v237_v42 = vmul.f32 %v223_v40, %v223_v40  ;;  %v235_v43 = vmul.f32 0.0048076925, %v231_v41 }
 0x184   :  { %v222_v44 = vpop.xlane.xlu0 %221 }
 0x185   :  { %v239_v45 = vsub.f32 %v235_v43, %v237_v42  ;;  %v224_v46 = vmul.f32 0.0048076925, %v222_v44 }
 0x186   :  { %v234_v47 = vpop.xlane.xlu1 %233 }
 0x187   :  { %v241_v48 = vadd.f32 1e-05, %v239_v45  ;;  %v238_v49 = vmul.f32 %v224_v46, %v224_v46  ;;  %v236_v50 = vmul.f32 0.0048076925, %v234_v47 }
 0x189   :  { %373 = vrsqrt.f32 %v241_v48  ;;  %v240_v51 = vsub.f32 %v236_v50, %v238_v49 }
 0x18b   :  { %v242_v52 = vadd.f32 1e-05, %v240_v51 }
 0x18d   :  { %375 = vrsqrt.f32 %v242_v52 }
 0x196   :  { %v374_v55 = vpop.eup %373 }
 0x197   :  { %v247_v56 = vmul.f32 %v374_v55, %v245_v54 }
 0x199   :  { %v249_v58 = vmul.f32 %v247_v56, %v223_v40 }
 0x19a   :  { %v376_v59 = vpop.eup %375 }
 0x19b   :  { %253 = vrot.lane.b32.xlu0 %v249_v58, %s379_s12  ;;  %v248_v60 = vmul.f32 %v376_v59, %v246_v57 }
 0x19d   :  { %v250_v61 = vmul.f32 %v248_v60, %v224_v46 }
 0x19f   :  { %255 = vrot.lane.b32.xlu1 %v250_v61, %s379_s12 }
 0x1a3   :  { %263 = vperm.xlu1 %331, %v247_v56  }
 0x1a7   :  { %268 = vperm.xlu1 %331, %v248_v60  }
 0x1ab   :  { %333 = vset.pattern.permute.xlu1 %v378_v53 }
 0x20d   :  { %v254_v62 = vpop.permute.xlu0 %253 }
 0x20e   :  { %v259_v63 = vsub.f32 %v245_v54, %v254_v62 }
 0x210   :  { %277 = vperm.xlu0 %332, %v259_v63  }
 0x211   :  { %v256_v0 = vpop.permute.xlu1 %255 }
 0x212   :  { %v260_v1 = vsub.f32 %v246_v57, %v256_v0 }
 0x214   :  { %282 = vperm.xlu1 %333, %v260_v1  }
 0x21e   :  { %v264_v2 = vpop.permute.xlu1 %263 }
 0x21f   :  { %v271_v3 = vmul.f32 %v264_v2, %v208_v26  ;;  %v272_v4 = vmul.f32 %v264_v2, %v210_v27 }
 0x222   :  { %v269_v5 = vpop.permute.xlu1 %268 }
 0x223   :  { %v273_v9 = vmul.f32 %v269_v5, %v212_v31  ;;  %v274_v10 = vmul.f32 %v269_v5, %v214_v33 }
 0x28b   :  { %v278_v6 = vpop.permute.xlu0 %277 }
 0x28c   :  { %v285_v7 = vadd.f32 %v278_v6, %v271_v3  ;;  %v286_v8 = vadd.f32 %v278_v6, %v272_v4 }
 0x28e   :  { %v289_v11 = vmax.f32 %v285_v7, 0.0  ;;  %v290_v12 = vmax.f32 %v286_v8, 0.0 }
 0x28f   :  { %v283_v13 = vpop.permute.xlu1 %282 }
 0x290   :  { %293 = vst [vmem:[%s499_s3] sm:$0xff] %v289_v11  ;;  %294 = vst [vmem:[%s499_s3 + $0x8] sm:$0xff] %v290_v12  ;;  %v287_v14 = vadd.f32 %v283_v13, %v273_v9  ;;  %v288_v15 = vadd.f32 %v283_v13, %v274_v10 }
 0x292   :  { %v291_v16 = vmax.f32 %v287_v14, 0.0  ;;  %v292_v17 = vmax.f32 %v288_v15, 0.0 }
 0x294   :  { %295 = vst [vmem:[%s499_s3 + $0x10] sm:$0xff] %v291_v16  ;;  %296 = vst [vmem:[%s499_s3 + $0x18] sm:$0xff] %v292_v17 }

// kernel: _snn_c_apply.24
= control target key start
LH: loop header
LB: loop body
LE: loop exit
PB: predicated region body
PF: predicated region fallthrough
CT: control target
= control target key end

     0   :  { %v532_v1 = vmov 0   ;;  %vm250_vm0 = vcmask 261120   ;;  %s534_s11 = smov 1   ;;  %s696_s1 = inlined_call_operand.vmem [shape: bf16[288,256], index: 1, kind: input, shape index: {}]   ;;  %s697_s0 = inlined_call_operand.vmem [shape: bf16[16,288], index: 0, kind: input, shape index: {}]   ;;  %s698_s2 = inlined_call_operand.vmem [shape: f32[16,2], index: 2, kind: input, shape index: {}]   ;;  %s699_s3 = inlined_call_operand.vmem [shape: f32[16,256], index: 3, kind: output, shape index: {}]  }
   0x1   :  { %v470_v0 = vld [vmem:[%s696_s1 + $0x74] ss:$8 sps:$4 sm:$0xff]   ;;  %329 = vmatprep.mubr.bf16.mxu1 %v532_v1  ;;  %467 = vset.pattern.permute.xlu1 %v532_v1  ;;  %v472_v2 = vld [vmem:[%s696_s1 + $0x70] ss:$8 sps:$4 sm:$0xff]   ;;  %v473_v3 = vld [vmem:[%s696_s1 + $0x64] ss:$8 sps:$4 sm:$0xff]  }
   0x2   :  { %254 = vmatprep.subr.bf16.mxu0 %v470_v0  ;;  %v475_v4 = vld [vmem:[%s696_s1 + $0x60] ss:$8 sps:$4 sm:$0xff]   ;;  %v476_v5 = vld [vmem:[%s696_s1 + $0x54] ss:$8 sps:$4 sm:$0xff]   ;;  %v478_v6 = vld [vmem:[%s696_s1 + $0x50] ss:$8 sps:$4 sm:$0xff]  }
   0x3   :  { %255 = vmatpush1.bf16.msra.mxu0 %v472_v2  ;;  %v479_v7 = vld [vmem:[%s696_s1 + $0x44] ss:$8 sps:$4 sm:$0xff]   ;;  %v481_v8 = vld [vmem:[%s696_s1 + $0x40] ss:$8 sps:$4 sm:$0xff]   ;;  %v482_v9 = vld [vmem:[%s696_s1 + $0x34] ss:$8 sps:$4 sm:$0xff]  }
   0x4   :  { %256 = vmatprep.subr.bf16.mxu0 %v473_v3  ;;  %v484_v10 = vld [vmem:[%s696_s1 + $0x30] ss:$8 sps:$4 sm:$0xff]   ;;  %v485_v11 = vld [vmem:[%s696_s1 + $0x24] ss:$8 sps:$4 sm:$0xff]   ;;  %v509_v12 = vld [vmem:[%s696_s1 + $0x114] ss:$8 sps:$4 sm:$0xff]  }
   0x5   :  { %v511_v13 = vld [vmem:[%s696_s1 + $0x110] ss:$8 sps:$4 sm:$0xff]   ;;  %v487_v14 = vld [vmem:[%s696_s1 + $0x20] ss:$8 sps:$4 sm:$0xff]   ;;  %v488_v15 = vld [vmem:[%s696_s1 + $0x14] ss:$8 sps:$4 sm:$0xff]   ;;  %309 = vmatprep.subr.bf16.mxu1 %v509_v12 }
   0x6   :  { %v515_v16 = vld [vmem:[%s696_s1 + $0x104] ss:$8 sps:$4 sm:$0xff]   ;;  %310 = vmatpush1.bf16.msra.mxu1 %v511_v13  ;;  %v517_v17 = vld [vmem:[%s696_s1 + $0x100] ss:$8 sps:$4 sm:$0xff]   ;;  %v490_v18 = vld [vmem:[%s696_s1 + $0x10] ss:$8 sps:$4 sm:$0xff]  }
   0x7   :  { %257 = vmatpush1.bf16.msra.mxu0 %v475_v4  ;;  %311 = vmatprep.subr.bf16.mxu1 %v515_v16  ;;  %v491_v19 = vld [vmem:[%s696_s1 + $0x4] ss:$8 sps:$4 sm:$0xff]   ;;  %v521_v20 = vld [vmem:[%s697_s0 + $0x8] ss:$12 sps:$4 sm:$0xff]   ;;  %v496_v24 = vld [vmem:[%s696_s1 + $0xf0] ss:$8 sps:$4 sm:$0xff]  }
   0x8   :  { %258 = vmatprep.subr.bf16.mxu0 %v476_v5  ;;  %v527_v21 = vld [vmem:[%s697_s0 + $0x4] ss:$12 sps:$4 sm:$0xff]   ;;  %v493_v22 = vld [vmem:[%s696_s1] ss:$8 sps:$4 sm:$0xff]   ;;  %v494_v23 = vld [vmem:[%s696_s1 + $0xf4] ss:$8 sps:$4 sm:$0xff]  }
   0x9   :  { %286 = vmatprep.mubr.bf16.mxu0 %v527_v21  ;;  %v497_v25 = vld [vmem:[%s696_s1 + $0xe4] ss:$8 sps:$4 sm:$0xff]   ;;  %v499_v26 = vld [vmem:[%s696_s1 + $0xe0] ss:$8 sps:$4 sm:$0xff]   ;;  %v500_v27 = vld [vmem:[%s696_s1 + $0xd4] ss:$8 sps:$4 sm:$0xff]  }
   0xa   :  { %312 = vmatpush1.bf16.msra.mxu1 %v517_v17  ;;  %v502_v28 = vld [vmem:[%s696_s1 + $0xd0] ss:$8 sps:$4 sm:$0xff]   ;;  %v503_v29 = vld [vmem:[%s696_s1 + $0xc4] ss:$8 sps:$4 sm:$0xff]   ;;  %v505_v30 = vld [vmem:[%s696_s1 + $0xc0] ss:$8 sps:$4 sm:$0xff]  }
   0xb   :  { %259 = vmatpush1.bf16.msra.mxu0 %v478_v6  ;;  %v506_v31 = vld [vmem:[%s696_s1 + $0xb4] ss:$8 sps:$4 sm:$0xff]   ;;  %v508_v32 = vld [vmem:[%s696_s1 + $0xb0] ss:$8 sps:$4 sm:$0xff]   ;;  %v512_v33 = vld [vmem:[%s696_s1 + $0xa4] ss:$8 sps:$4 sm:$0xff]  }
   0xc   :  { %260 = vmatprep.subr.bf16.mxu0 %v479_v7  ;;  %v514_v34 = vld [vmem:[%s696_s1 + $0xa0] ss:$8 sps:$4 sm:$0xff]   ;;  %v518_v35 = vld [vmem:[%s696_s1 + $0x94] ss:$8 sps:$4 sm:$0xff]   ;;  %v520_v36 = vld [vmem:[%s696_s1 + $0x90] ss:$8 sps:$4 sm:$0xff]  }
   0xd   :  { %463 = vmatmul.mubr.msk.bf16.vlgmr.msra.gmra.mxu1 %vm250_vm0, %v521_v20  ;;  %v522_v37 = vld [vmem:[%s696_s1 + $0x84] ss:$8 sps:$4 sm:$0xff]   ;;  %v524_v38 = vld [vmem:[%s696_s1 + $0x80] ss:$8 sps:$4 sm:$0xff]  }
   0xe   :  { %v525_v39 = vld [vmem:[%s697_s0] ss:$12 sps:$4 sm:$0xff]  }
   0xf   :  { %261 = vmatpush1.bf16.msra.mxu0 %v481_v8 }
  0x10   :  { %262 = vmatprep.subr.bf16.mxu0 %v482_v9 }
  0x13   :  { %263 = vmatpush1.bf16.msra.mxu0 %v484_v10  ;;  %v533_v10 = vmov 1  }
  0x14   :  { %264 = vmatprep.subr.bf16.mxu0 %v485_v11  ;;  %468 = vset.pattern.permute.xlu0 %v533_v10  ;;  %v368_v11 = vld [vmem:[%s698_s2] sm:$0xff] }
  0x17   :  { %265 = vmatpush1.bf16.msra.mxu0 %v487_v14  ;;  %v369_v14 = vld [vmem:[%s698_s2 + $0x8] sm:$0xff] }
  0x18   :  { %266 = vmatprep.subr.bf16.mxu0 %v488_v15 }
  0x1b   :  { %267 = vmatpush1.bf16.msra.mxu0 %v490_v18 }
  0x1c   :  { %268 = vmatprep.subr.bf16.mxu0 %v491_v19 }
  0x1f   :  { %269 = vmatpush1.bf16.msra.mxu0 %v493_v22 }
  0x20   :  { %270 = vmatprep.subr.bf16.mxu0 %v494_v23 }
  0x23   :  { %271 = vmatpush2.bf16.msra.mxu0 %v496_v24 }
  0x24   :  { %272 = vmatprep.subr.bf16.mxu0 %v497_v25 }
  0x27   :  { %273 = vmatpush2.bf16.msra.mxu0 %v499_v26 }
  0x28   :  { %274 = vmatprep.subr.bf16.mxu0 %v500_v27 }
  0x2b   :  { %275 = vmatpush2.bf16.msra.mxu0 %v502_v28 }
  0x2c   :  { %276 = vmatprep.subr.bf16.mxu0 %v503_v29 }
  0x2f   :  { %277 = vmatpush2.bf16.msra.mxu0 %v505_v30 }
  0x30   :  { %278 = vmatprep.subr.bf16.mxu0 %v506_v31 }
  0x33   :  { %279 = vmatpush2.bf16.msra.mxu0 %v508_v32 }
  0x34   :  { %280 = vmatprep.subr.bf16.mxu0 %v512_v33 }
  0x37   :  { %281 = vmatpush2.bf16.msra.mxu0 %v514_v34 }
  0x38   :  { %282 = vmatprep.subr.bf16.mxu0 %v518_v35 }
  0x3b   :  { %283 = vmatpush2.bf16.msra.mxu0 %v520_v36 }
  0x3c   :  { %284 = vmatprep.subr.bf16.mxu0 %v522_v37 }
  0x3f   :  { %285 = vmatpush2.bf16.msra.mxu0 %v524_v38 }
  0x42   :  { %287 = vmatmul.mubr.bf16.vlgmr.msra.gmra.mxu0 %v525_v39 }
  0xcd   :  { %v331_v40 = vpop.f32.mrf.mxu1 }
  0xcf   :  { %v333_v41 = vpop.f32.mrf.mxu1 }
  0xd1   :  { %v335_v44 = vpop.f32.mrf.mxu1 }
  0xd3   :  { %v337_v52 = vpop.f32.mrf.mxu1 }
 0x102   :  { %v288_v42 = vpop.f32.mrf.mxu0 }
 0x103   :  { %v332_v43 = vadd.f32 %v331_v40, %v288_v42 }
 0x104   :  { %v290_v45 = vpop.f32.mrf.mxu0 }
 0x105   :  { %v334_v46 = vadd.f32 %v333_v41, %v290_v45  ;;  %v348_v50 = vmul.f32 %v332_v43, %v332_v43 }
 0x106   :  { %v292_v47 = vpop.f32.mrf.mxu0 }
 0x107   :  { %v672_v48 = vadd.f32 %v335_v44, %v292_v47  ;;  %v340_v49 = vadd.f32 %v334_v46, %v332_v43  ;;  %v349_v51 = vmul.f32 %v334_v46, %v334_v46 }
 0x108   :  { %v294_v53 = vpop.f32.mrf.mxu0 }
 0x109   :  { %v338_v54 = vadd.f32 %v337_v52, %v294_v53  ;;  %341 = vadd.xlane.f32.xlu0 %v340_v49  ;;  %v352_v55 = vadd.f32 %v349_v51, %v348_v50  ;;  %v350_v57 = vmul.f32 %v672_v48, %v672_v48 }
 0x10b   :  { %353 = vadd.xlane.f32.xlu1 %v352_v55  ;;  %v343_v56 = vadd.f32 %v338_v54, %v672_v48  ;;  %v351_v58 = vmul.f32 %v338_v54, %v338_v54 }
 0x10d   :  { %344 = vadd.xlane.f32.xlu0 %v343_v56  ;;  %v355_v59 = vadd.f32 %v351_v58, %v350_v57 }
 0x10f   :  { %356 = vadd.xlane.f32.xlu1 %v355_v59 }
 0x192   :  { %v342_v60 = vpop.xlane.xlu0 %341 }
 0x193   :  { %v346_v61 = vmul.f32 0.0048076925, %v342_v60 }
 0x194   :  { %v354_v62 = vpop.xlane.xlu1 %353 }
 0x195   :  { %v360_v63 = vmul.f32 %v346_v61, %v346_v61  ;;  %v358_v0 = vmul.f32 0.0048076925, %v354_v62 }
 0x196   :  { %v345_v1 = vpop.xlane.xlu0 %344 }
 0x197   :  { %v362_v2 = vsub.f32 %v358_v0, %v360_v63  ;;  %v347_v3 = vmul.f32 0.0048076925, %v345_v1 }
 0x198   :  { %v357_v4 = vpop.xlane.xlu1 %356 }
 0x199   :  { %v364_v5 = vadd.f32 1e-05, %v362_v2  ;;  %v361_v6 = vmul.f32 %v347_v3, %v347_v3  ;;  %v359_v7 = vmul.f32 0.0048076925, %v357_v4 }
 0x19b   :  { %528 = vrsqrt.f32 %v364_v5  ;;  %v363_v8 = vsub.f32 %v359_v7, %v361_v6 }
 0x19d   :  { %v365_v9 = vadd.f32 1e-05, %v363_v8 }
 0x19f   :  { %530 = vrsqrt.f32 %v365_v9 }
 0x1a8   :  { %v529_v12 = vpop.eup %528 }
 0x1a9   :  { %v370_v13 = vmul.f32 %v529_v12, %v368_v11 }
 0x1ab   :  { %v372_v15 = vmul.f32 %v370_v13, %v346_v61 }
 0x1ac   :  { %v531_v16 = vpop.eup %530 }
 0x1ad   :  { %376 = vrot.lane.b32.xlu0 %v372_v15, %s534_s11  ;;  %v371_v17 = vmul.f32 %v531_v16, %v369_v14 }
 0x1af   :  { %v373_v18 = vmul.f32 %v371_v17, %v347_v3 }
 0x1b1   :  { %378 = vrot.lane.b32.xlu1 %v373_v18, %s534_s11 }
 0x1b5   :  { %386 = vperm.xlu1 %467, %v370_v13  }
 0x1b9   :  { %391 = vperm.xlu1 %467, %v371_v17  }
 0x1bd   :  { %469 = vset.pattern.permute.xlu1 %v533_v10 }
 0x21f   :  { %v377_v19 = vpop.permute.xlu0 %376 }
 0x220   :  { %v382_v20 = vsub.f32 %v368_v11, %v377_v19 }
 0x222   :  { %400 = vperm.xlu0 %468, %v382_v20  }
 0x223   :  { %v379_v21 = vpop.permute.xlu1 %378 }
 0x224   :  { %v383_v22 = vsub.f32 %v369_v14, %v379_v21 }
 0x226   :  { %405 = vperm.xlu1 %469, %v383_v22  }
 0x230   :  { %v387_v23 = vpop.permute.xlu1 %386 }
 0x231   :  { %v394_v24 = vmul.f32 %v387_v23, %v332_v43  ;;  %v395_v25 = vmul.f32 %v387_v23, %v334_v46 }
 0x234   :  { %v392_v26 = vpop.permute.xlu1 %391 }
 0x235   :  { %v396_v30 = vmul.f32 %v392_v26, %v672_v48  ;;  %v397_v31 = vmul.f32 %v392_v26, %v338_v54 }
 0x29d   :  { %v401_v27 = vpop.permute.xlu0 %400 }
 0x29e   :  { %v408_v28 = vadd.f32 %v401_v27, %v394_v24  ;;  %v409_v29 = vadd.f32 %v401_v27, %v395_v25 }
 0x2a0   :  { %v412_v32 = vmax.f32 %v408_v28, 0.0  ;;  %v413_v33 = vmax.f32 %v409_v29, 0.0 }
 0x2a1   :  { %v406_v34 = vpop.permute.xlu1 %405 }
 0x2a2   :  { %416 = vst [vmem:[%s699_s3] sm:$0xff] %v412_v32  ;;  %417 = vst [vmem:[%s699_s3 + $0x8] sm:$0xff] %v413_v33  ;;  %v410_v35 = vadd.f32 %v406_v34, %v396_v30  ;;  %v411_v36 = vadd.f32 %v406_v34, %v397_v31 }
 0x2a4   :  { %v414_v37 = vmax.f32 %v410_v35, 0.0  ;;  %v415_v38 = vmax.f32 %v411_v36, 0.0 }
 0x2a6   :  { %418 = vst [vmem:[%s699_s3 + $0x10] sm:$0xff] %v414_v37  ;;  %419 = vst [vmem:[%s699_s3 + $0x18] sm:$0xff] %v415_v38 }

// kernel: _snn_c_apply.25
= control target key start
LH: loop header
LB: loop body
LE: loop exit
PB: predicated region body
PF: predicated region fallthrough
CT: control target
= control target key end

     0   :  { %s865_s12 = smov 0   ;;  %s867_s13 = smov 0   ;;  %s1055_s0 = inlined_call_operand.vmem [shape: bf16[8,96], index: 0, kind: input, shape index: {}]   ;;  %s1056_s1 = inlined_call_operand.vmem [shape: bf16[96,1024], index: 1, kind: input, shape index: {}]   ;;  %s1057_s2 = inlined_call_operand.vmem [shape: f32[8,2], index: 2, kind: input, shape index: {}]   ;;  %s1058_s3 = inlined_call_operand.vmem [shape: f32[8,1024], index: 3, kind: output, shape index: {}]  }
   0x1   :  { %s869_s14 = smov 0   ;;  %s871_s15 = smov 0  }
   0x2   :  { %s873_s16 = smov 0   ;;  %s875_s17 = smov 0  }
   0x3   :  { %s877_s18 = smov 0  }
   0x4 LB: > { %s22_s19 = sadd.s32 1, %s830_s16  ;;  %s25_s20 = sadd.s32 1, %s834_s17  ;;  %s838_s18 = sphi %s877_s18, %s13_s18   ;;  %s834_s17 = sphi %s875_s17, %s1064_s17   ;;  %s830_s16 = sphi %s873_s16, %s1063_s16   ;;  %s826_s15 = sphi %s871_s15, %s1062_s15   ;;  %s822_s14 = sphi %s869_s14, %s1061_s14   ;;  %s818_s13 = sphi %s867_s13, %s1060_s13   ;;  %s814_s12 = sphi %s865_s12, %s1059_s12  }
   0x5   : > { %p23_p0 = scmp.ge.s32.totalorder %s22_s19, 2  ;;  %s53_s21 = sadd.s32 1, %s818_s13 }
   0x6   : > { %p60_p1 = scmp.ne.s32.totalorder %s818_s13, %s814_s12  ;;  %p61_p2 = scmp.eq.s32.totalorder %s838_s18, 0 }
   0x7   : > { %s1066_s19 = smov (%p23_p0, %s22_s19), 0  ;;  %s1068_s20 = smov (!%p23_p0, %s25_s20), %s834_s17 }
   0x8   : > { %s50_s22 = ssub.s32 %s830_s16, %s1066_s19  ;;  %p62_p3 = por %p61_p2, %p60_p1 }
   0x9   : > { %p27_p4 = scmp.ge.s32.totalorder %s1068_s20, 2  ;;  %p51_p5 = scmp.eq.s32.totalorder %s50_s22, 0 }
   0xa   : > { %p643_p6 = scmp.ge.s32.totalorder %s838_s18, 4 }
   0xb   : > { %s1070_s20 = smov (%p27_p4, %s1068_s20), 0 }
   0xc   : > { %s914_s23 = scalar_select %p51_p5, %s818_s13, %s53_s21  }
   0xd   : > { %139 = sbr.rel (%p643_p6) target bundleno = 34 (0x22), region = 24 }
  0x12   : > { %142 = sbr.rel (!%p62_p3) target bundleno = 34 (0x22), region = 28  ;;  %s144_s24 = sand.u32 (%p62_p3), 1, %s818_s13  }
  0x13   : > { %s679_s25 = sshll.u32 (%p62_p3), %s830_s16, 4  ;;  %s680_s26 = smul.u32 (%p62_p3), 192, %s144_s24 }
  0x14   : > { %s922_s29 = scalar_lea.vmem (%p62_p3), %s1056_s1, %s679_s25 }
  0x15   : > { %v162_v0 = vld [vmem:[%s922_s29] sm:$0xff] (%p62_p3)  ;;  %v164_v1 = vld [vmem:[%s922_s29 + $0x8] sm:$0xff] (%p62_p3)  ;;  %s930_s30 = scalar_lea.vmem (%p62_p3), [#allocation4], %s680_s26 }
  0x16   : > { %v166_v2 = vld [vmem:[%s922_s29 + $0x20] sm:$0xff] (%p62_p3)  ;;  %v168_v3 = vld [vmem:[%s922_s29 + $0x28] sm:$0xff] (%p62_p3)  ;;  %163 = vst [vmem:[%s930_s30] sm:$0xff] (%p62_p3), %v162_v0  ;;  %165 = vst [vmem:[%s930_s30 + $0x8] sm:$0xff] (%p62_p3), %v164_v1 }
  0x17   : > { %v170_v4 = vld [vmem:[%s922_s29 + $0x40] sm:$0xff]  ;;  %v172_v5 = vld [vmem:[%s922_s29 + $0x48] sm:$0xff]  ;;  %167 = vst [vmem:[%s930_s30 + $0x10] sm:$0xff] %v166_v2  ;;  %169 = vst [vmem:[%s930_s30 + $0x18] sm:$0xff] %v168_v3 }
  0x18   : > { %171 = vst [vmem:[%s930_s30 + $0x20] sm:$0xff] %v170_v4  ;;  %173 = vst [vmem:[%s930_s30 + $0x28] sm:$0xff] %v172_v5  ;;  %v174_v6 = vld [vmem:[%s922_s29 + $0x60] sm:$0xff]  ;;  %v176_v7 = vld [vmem:[%s922_s29 + $0x68] sm:$0xff] }
  0x19   : > { %v178_v8 = vld [vmem:[%s922_s29 + $0x80] sm:$0xff]  ;;  %175 = vst [vmem:[%s930_s30 + $0x30] sm:$0xff] %v174_v6  ;;  %177 = vst [vmem:[%s930_s30 + $0x38] sm:$0xff] %v176_v7  ;;  %v180_v9 = vld [vmem:[%s922_s29 + $0x88] sm:$0xff] }
  0x1a   : > { %179 = vst [vmem:[%s930_s30 + $0x40] sm:$0xff] %v178_v8  ;;  %v182_v10 = vld [vmem:[%s922_s29 + $0xa0] sm:$0xff]  ;;  %v184_v11 = vld [vmem:[%s922_s29 + $0xa8] sm:$0xff]  ;;  %181 = vst [vmem:[%s930_s30 + $0x48] sm:$0xff] %v180_v9 }
  0x1b   : > { %183 = vst [vmem:[%s930_s30 + $0x50] sm:$0xff] %v182_v10  ;;  %185 = vst [vmem:[%s930_s30 + $0x58] sm:$0xff] %v184_v11  ;;  %v186_v12 = vld [vmem:[%s922_s29 + $0xc0] sm:$0xff]  ;;  %v188_v13 = vld [vmem:[%s922_s29 + $0xc8] sm:$0xff] }
  0x1c   : > { %v190_v14 = vld [vmem:[%s922_s29 + $0xe0] sm:$0xff]  ;;  %187 = vst [vmem:[%s930_s30 + $0x60] sm:$0xff] %v186_v12  ;;  %189 = vst [vmem:[%s930_s30 + $0x68] sm:$0xff] %v188_v13  ;;  %v192_v15 = vld [vmem:[%s922_s29 + $0xe8] sm:$0xff] }
  0x1d   : > { %191 = vst [vmem:[%s930_s30 + $0x70] sm:$0xff] %v190_v14  ;;  %v194_v16 = vld [vmem:[%s922_s29 + $0x100] sm:$0xff]  ;;  %v196_v17 = vld [vmem:[%s922_s29 + $0x108] sm:$0xff]  ;;  %193 = vst [vmem:[%s930_s30 + $0x78] sm:$0xff] %v192_v15 }
  0x1e   : > { %195 = vst [vmem:[%s930_s30 + $0x80] sm:$0xff] %v194_v16  ;;  %197 = vst [vmem:[%s930_s30 + $0x88] sm:$0xff] %v196_v17  ;;  %v198_v18 = vld [vmem:[%s922_s29 + $0x120] sm:$0xff]  ;;  %v200_v19 = vld [vmem:[%s922_s29 + $0x128] sm:$0xff] }
  0x1f   : > { %v202_v20 = vld [vmem:[%s922_s29 + $0x140] sm:$0xff]  ;;  %199 = vst [vmem:[%s930_s30 + $0x90] sm:$0xff] %v198_v18  ;;  %201 = vst [vmem:[%s930_s30 + $0x98] sm:$0xff] %v200_v19  ;;  %v204_v21 = vld [vmem:[%s922_s29 + $0x148] sm:$0xff] }
  0x20   : > { %203 = vst [vmem:[%s930_s30 + $0xa0] sm:$0xff] %v202_v20  ;;  %v206_v22 = vld [vmem:[%s922_s29 + $0x160] sm:$0xff]  ;;  %v208_v23 = vld [vmem:[%s922_s29 + $0x168] sm:$0xff]  ;;  %205 = vst [vmem:[%s930_s30 + $0xa8] sm:$0xff] %v204_v21 }
  0x21   : > { %207 = vst [vmem:[%s930_s30 + $0xb0] sm:$0xff] %v206_v22  ;;  %209 = vst [vmem:[%s930_s30 + $0xb8] sm:$0xff] %v208_v23 }
  0x22 PF: > { %p646_p7 = scmp.ge.s32.totalorder %s838_s18, 1  ;;  %p214_p8 = scmp.lt.s32.totalorder %s838_s18, 5 }
  0x24   : > { %p215_p9 = pnand %p646_p7, %p214_p8 }
  0x25   : > { %s221_s4 = sand.u32 (!%p215_p9), 1, %s814_s12   ;;  %s647_s5 = sshll.u32 (!%p215_p9), %s822_s14, 2 }
  0x26   : > { %218 = sbr.rel (%p215_p9) target bundleno = 708 (0x2c4), region = 51  ;;  %p246_p10 = scmp.lt.s32.totalorder (!%p215_p9), %s647_s5, 7 }
  0x27   : > { %s681_s6 = smul.u32 (!%p215_p9), 192, %s221_s4  ;;  %p252_p11 = scmp.eq.s32.totalorder (!%p215_p9), %s826_s15, 0 }
  0x28   : > { %p253_p12 = scmp.eq.s32.totalorder (!%p215_p9), %s822_s14, 0 }
  0x29   : > { %s985_s11 = scalar_lea.vmem (!%p215_p9), [#allocation4], %s681_s6 }
  0x2a   : > { %p254_p13 = pnand (!%p215_p9), %p253_p12, %p252_p11 }
  0x2b   : > { %s1072_s5 = smov (!%p246_p10, %s647_s5), 7 }
  0x2c   : > { %s648_s7 = sshll.u32 %s1072_s5, 3  ;;  %257 = sbr.rel (%p254_p13) target bundleno = 51 (0x33), region = 59 }
  0x2d   : > { %s983_s10 = scalar_lea.vmem %s1058_s3, %s648_s7 }
  0x31   : > { %vm258_vm0 = vcmask 7168   ;;  %v840_v24 = vmov 0.0  }
  0x32   : > { %259 = vst.msk [vmem:[#allocation2] sm:$0xff] %vm258_vm0, %v840_v24  ;;  %260 = vst.msk [vmem:[#allocation3] sm:$0xff] %vm258_vm0, %v840_v24 }
  0x33 PF: > { %v743_v25 = vld [vmem:[%s985_s11 + $0xa4] ss:$16 sps:$4 sm:$0xff]   ;;  %v745_v26 = vld [vmem:[%s985_s11 + $0xac] ss:$16 sps:$4 sm:$0xff]   ;;  %v841_v27 = vmov 0   ;;  %vm406_vm1 = vcmask 785408  }
  0x34   : > { %442 = vmatprep.mubr.bf16.mxu0 %v841_v27  ;;  %483 = vmatprep.mubr.bf16.mxu1 %v841_v27  ;;  %v747_v28 = vld [vmem:[%s985_s11 + $0xa0] ss:$16 sps:$4 sm:$0xff]   ;;  %v748_v29 = vld [vmem:[%s985_s11 + $0xa8] ss:$16 sps:$4 sm:$0xff]   ;;  %v749_v30 = vld [vmem:[%s985_s11 + $0x84] ss:$16 sps:$4 sm:$0xff]  }
  0x35   : > { %414 = vmatprep.subr.bf16.mxu0 %v743_v25  ;;  %455 = vmatprep.subr.bf16.mxu1 %v745_v26  ;;  %v751_v31 = vld [vmem:[%s985_s11 + $0x8c] ss:$16 sps:$4 sm:$0xff]   ;;  %v753_v32 = vld [vmem:[%s985_s11 + $0x80] ss:$16 sps:$4 sm:$0xff]   ;;  %v754_v33 = vld [vmem:[%s985_s11 + $0x88] ss:$16 sps:$4 sm:$0xff]  }
  0x36   : > { %415 = vmatpush1.bf16.msra.mxu0 %v747_v28  ;;  %456 = vmatpush1.bf16.msra.mxu1 %v748_v29  ;;  %v755_v34 = vld [vmem:[%s985_s11 + $0x64] ss:$16 sps:$4 sm:$0xff]   ;;  %v757_v35 = vld [vmem:[%s985_s11 + $0x6c] ss:$16 sps:$4 sm:$0xff]   ;;  %v759_v36 = vld [vmem:[%s985_s11 + $0x60] ss:$16 sps:$4 sm:$0xff]  }
  0x37   : > { %416 = vmatprep.subr.bf16.mxu0 %v749_v30  ;;  %457 = vmatprep.subr.bf16.mxu1 %v751_v31  ;;  %v760_v37 = vld [vmem:[%s985_s11 + $0x68] ss:$16 sps:$4 sm:$0xff]   ;;  %v761_v38 = vld [vmem:[%s985_s11 + $0x44] ss:$16 sps:$4 sm:$0xff]   ;;  %v763_v39 = vld [vmem:[%s985_s11 + $0x4c] ss:$16 sps:$4 sm:$0xff]  }
  0x38   : > { %v765_v40 = vld [vmem:[%s985_s11 + $0x40] ss:$16 sps:$4 sm:$0xff]   ;;  %v766_v41 = vld [vmem:[%s985_s11 + $0x48] ss:$16 sps:$4 sm:$0xff]   ;;  %v767_v42 = vld [vmem:[%s985_s11 + $0x24] ss:$16 sps:$4 sm:$0xff]  }
  0x39   : > { %v769_v43 = vld [vmem:[%s985_s11 + $0x2c] ss:$16 sps:$4 sm:$0xff]   ;;  %v771_v44 = vld [vmem:[%s985_s11 + $0x20] ss:$16 sps:$4 sm:$0xff]   ;;  %v772_v45 = vld [vmem:[%s985_s11 + $0x28] ss:$16 sps:$4 sm:$0xff]  }
  0x3a   : > { %417 = vmatpush1.bf16.msra.mxu0 %v753_v32  ;;  %458 = vmatpush1.bf16.msra.mxu1 %v754_v33  ;;  %v773_v46 = vld [vmem:[%s985_s11 + $0x4] ss:$16 sps:$4 sm:$0xff]   ;;  %v775_v47 = vld [vmem:[%s985_s11 + $0xc] ss:$16 sps:$4 sm:$0xff]   ;;  %v777_v48 = vld [vmem:[%s985_s11] ss:$16 sps:$4 sm:$0xff]  }
  0x3b   : > { %418 = vmatprep.subr.bf16.mxu0 %v755_v34  ;;  %459 = vmatprep.subr.bf16.mxu1 %v757_v35  ;;  %v778_v49 = vld [vmem:[%s985_s11 + $0x8] ss:$16 sps:$4 sm:$0xff]   ;;  %v261_v50 = vld [vmem:[%s1055_s0] sm:$0xf]  ;;  %p675_p0 = scmp.ne.s32.totalorder %s826_s15, 0 }
  0x3e   : > { %419 = vmatpush1.bf16.msra.mxu0 %v759_v36  ;;  %460 = vmatpush1.bf16.msra.mxu1 %v760_v37 }
  0x3f   : > { %420 = vmatprep.subr.bf16.mxu0 %v761_v38  ;;  %461 = vmatprep.subr.bf16.mxu1 %v763_v39 }
  0x42   : > { %421 = vmatpush1.bf16.msra.mxu0 %v765_v40  ;;  %462 = vmatpush1.bf16.msra.mxu1 %v766_v41 }
  0x43   : > { %422 = vmatprep.subr.bf16.mxu0 %v767_v42  ;;  %463 = vmatprep.subr.bf16.mxu1 %v769_v43 }
  0x46   : > { %423 = vmatpush1.bf16.msra.mxu0 %v771_v44  ;;  %464 = vmatpush1.bf16.msra.mxu1 %v772_v45 }
  0x47   : > { %424 = vmatprep.subr.bf16.mxu0 %v773_v46  ;;  %465 = vmatprep.subr.bf16.mxu1 %v775_v47 }
  0x4a   : > { %425 = vmatpush1.bf16.msra.mxu0 %v777_v48  ;;  %466 = vmatpush1.bf16.msra.mxu1 %v778_v49 }
  0x4d   : > { %673 = vmatmul.mubr.msk.bf16.vlgmr.msra.gmra.mxu0 %vm406_vm1, %v261_v50  ;;  %674 = vmatmul.mubr.msk.bf16.vlgmr.msra.gmra.mxu1 %vm406_vm1, %v261_v50 }
 0x10d   : > { %v444_v51 = vpop.f32.mrf.mxu0  ;;  %v1014_v52 = vpop.f32.mrf.mxu1 }
 0x10f   : > { %v446_v53 = vpop.f32.mrf.mxu0  ;;  %v487_v54 = vpop.f32.mrf.mxu1  ;;  %494 = sbr.rel (%p675_p0) target bundleno = 427 (0x1ab), region = 63 }
 0x111   : > { %v448_v55 = vpop.f32.mrf.mxu0  ;;  %v489_v56 = vpop.f32.mrf.mxu1 }
 0x113   : > { %v449_v57 = vpop.f32.mrf.mxu0  ;;  %v490_v58 = vpop.f32.mrf.mxu1 }
 0x114   : > { %v496_v59 = vadd.f32 %v446_v53, %v444_v51  ;;  %v505_v60 = vmul.f32 %v444_v51, %v444_v51  ;;  %v506_v61 = vmul.f32 %v446_v53, %v446_v53  ;;  %v507_v62 = vmul.f32 %v1014_v52, %v1014_v52  ;;  %516 = vst [vmem:[%s983_s10] sm:$0xff] %v444_v51  ;;  %v495_v5 = vld [vmem:[#allocation2] sm:$0xff]  ;;  %v504_v8 = vld [vmem:[#allocation3] sm:$0xff] }
 0x115   : > { %517 = vst [vmem:[%s983_s10 + $0x8] sm:$0xff] %v446_v53  ;;  %v508_v0 = vmul.f32 %v487_v54, %v487_v54  ;;  %518 = vst [vmem:[%s983_s10 + $0x10] sm:$0xff] %v1014_v52  ;;  %vm502_vm2 = vcmask 7168  }
 0x116   : > { %v497_v63 = vadd.f32 %v496_v59, %v1014_v52  ;;  %v509_v1 = vadd.f32 %v506_v61, %v505_v60  ;;  %519 = vst [vmem:[%s983_s10 + $0x18] sm:$0xff] %v487_v54 }
 0x118   : > { %v498_v2 = vadd.f32 %v497_v63, %v487_v54  ;;  %v510_v3 = vadd.f32 %v509_v1, %v507_v62 }
 0x11a   : > { %499 = vadd.xlane.f32.xlu0 %v498_v2  ;;  %v511_v4 = vadd.f32 %v510_v3, %v508_v0 }
 0x11e   : > { %512 = vadd.xlane.f32.xlu0 %v511_v4 }
 0x1a3   : > { %v500_v6 = vpop.xlane.xlu0 %499 }
 0x1a4   : > { %v501_v7 = vadd.f32 %v500_v6, %v495_v5 }
 0x1a6   : > { %503 = vst.msk [vmem:[#allocation2] sm:$0xff] %vm502_vm2, %v501_v7 }
 0x1a7   : > { %v513_v9 = vpop.xlane.xlu0 %512 }
 0x1a8   : > { %v514_v10 = vadd.f32 %v513_v9, %v504_v8 }
 0x1aa   : > { %515 = vst.msk [vmem:[#allocation3] sm:$0xff] %vm502_vm2, %v514_v10 }
 0x1ab PF: > { %p676_p1 = scmp.ne.s32.totalorder %s826_s15, 1 }
 0x1ac   : > { %s844_s15 = smov (!%p676_p1), 1  }
 0x1ad   : > { %523 = sbr.rel (%p676_p1) target bundleno = 708 (0x2c4), region = 67 }
 0x1b2   : > { %v524_v11 = vld [vmem:[#allocation2] sm:$0xff]  ;;  %v526_v12 = vld [vmem:[#allocation3] sm:$0xff]  ;;  %v842_v15 = vmov 0   ;;  %v843_v19 = vmov 1  }
 0x1b3   : > { %v525_v13 = vmul.f32 0.0011574074, %v524_v11  ;;  %v527_v14 = vmul.f32 0.0011574074, %v526_v12  ;;  %779 = vset.pattern.permute.xlu0 %v842_v15  ;;  %780 = vset.pattern.permute.xlu1 %v843_v19  ;;  %v532_v20 = vld [vmem:[%s1057_s2] sm:$0xff] }
 0x1b5   : > { %v528_v16 = vmul.f32 %v525_v13, %v525_v13 }
 0x1b7   : > { %v529_v17 = vsub.f32 %v527_v14, %v528_v16 }
 0x1b9   : > { %v530_v18 = vadd.f32 1e-05, %v529_v17 }
 0x1bb   : > { %782 = vrsqrt.f32 %v530_v18 }
 0x1c8   : > { %v783_v21 = vpop.eup %782 }
 0x1c9   : > { %v533_v22 = vmul.f32 %v783_v21, %v532_v20 }
 0x1cb   : > { %v534_v23 = vmul.f32 %v533_v22, %v525_v13 }
 0x1cd   : > { %536 = vrot.lane.b32.xlu0 %v534_v23, %s844_s15 }
 0x1d1   : > { %542 = vperm.xlu0 %779, %v533_v22  }
 0x1d5   : > { %781 = vset.pattern.permute.xlu0 %v843_v19 }
 0x23f   : > { %v537_v24 = vpop.permute.xlu0 %536 }
 0x240   : > { %v539_v25 = vsub.f32 %v532_v20, %v537_v24 }
 0x242   : > { %551 = vperm.xlu1 %780, %v539_v25  }
 0x24c   : > { %v543_v26 = vpop.permute.xlu0 %542 }
 0x24d   : > { %v545_v27 = vmul.f32 %v543_v26, %v444_v51  ;;  %v546_v28 = vmul.f32 %v543_v26, %v446_v53  ;;  %v547_v29 = vmul.f32 %v543_v26, %v1014_v52  ;;  %v548_v30 = vmul.f32 %v543_v26, %v487_v54 }
 0x2bd   : > { %v552_v31 = vpop.permute.xlu1 %551 }
 0x2be   : > { %v554_v32 = vadd.f32 %v552_v31, %v545_v27  ;;  %v555_v33 = vadd.f32 %v552_v31, %v546_v28  ;;  %v556_v34 = vadd.f32 %v552_v31, %v547_v29  ;;  %v557_v35 = vadd.f32 %v552_v31, %v548_v30 }
 0x2c0   : > { %v558_v36 = vmax.f32 %v554_v32, 0.0  ;;  %v559_v37 = vmax.f32 %v555_v33, 0.0  ;;  %v560_v38 = vmax.f32 %v556_v34, 0.0  ;;  %v561_v39 = vmax.f32 %v557_v35, 0.0 }
 0x2c2   : > { %562 = vst [vmem:[%s983_s10] sm:$0xff] %v558_v36  ;;  %563 = vst [vmem:[%s983_s10 + $0x8] sm:$0xff] %v559_v37 }
 0x2c3   : > { %564 = vst [vmem:[%s983_s10 + $0x10] sm:$0xff] %v560_v38  ;;  %565 = vst [vmem:[%s983_s10 + $0x18] sm:$0xff] %v561_v39 }
 0x2c4 PF: > { %s13_s18 = sadd.s32 1, %s838_s18   ;;  %s1059_s12 = smov %s818_s13 }
 0x2c5   : > { %p10_p2 = scmp.ge.s32.totalorder %s13_s18, 6   ;;  %s1060_s13 = smov %s914_s23 }
 0x2c6   : > { %s1061_s14 = smov %s830_s16  ;;  %s1062_s15 = smov %s834_s17 }
 0x2c7   : > { %s1063_s16 = smov %s1066_s19  ;;  %s1064_s17 = smov %s1070_s20 }
 0x2c8   :  { %12 = sbr.rel (!%p10_p2) target bundleno = 4 (0x4), region = 102 }

// kernel: _snn_c_apply.26
= control target key start
LH: loop header
LB: loop body
LE: loop exit
PB: predicated region body
PF: predicated region fallthrough
CT: control target
= control target key end

     0   :  { %s999_s12 = smov 0   ;;  %s1001_s13 = smov 0   ;;  %s1225_s0 = inlined_call_operand.vmem [shape: bf16[8,144], index: 0, kind: input, shape index: {}]   ;;  %s1226_s1 = inlined_call_operand.vmem [shape: bf16[144,1024], index: 1, kind: input, shape index: {}]   ;;  %s1227_s2 = inlined_call_operand.vmem [shape: f32[8,2], index: 2, kind: input, shape index: {}]   ;;  %s1228_s3 = inlined_call_operand.vmem [shape: f32[8,1024], index: 3, kind: output, shape index: {}]  }
   0x1   :  { %s1003_s14 = smov 0   ;;  %s1005_s15 = smov 0  }
   0x2   :  { %s1007_s16 = smov 0   ;;  %s1009_s17 = smov 0  }
   0x3   :  { %s1011_s18 = smov 0  }
   0x4 LB: > { %s22_s19 = sadd.s32 1, %s965_s16  ;;  %s25_s20 = sadd.s32 1, %s969_s17  ;;  %s973_s18 = sphi %s1011_s18, %s13_s18   ;;  %s969_s17 = sphi %s1009_s17, %s1234_s17   ;;  %s965_s16 = sphi %s1007_s16, %s1233_s16   ;;  %s961_s15 = sphi %s1005_s15, %s1232_s15   ;;  %s957_s14 = sphi %s1003_s14, %s1231_s14   ;;  %s953_s13 = sphi %s1001_s13, %s1230_s13   ;;  %s949_s12 = sphi %s999_s12, %s1229_s12  }
   0x5   : > { %p23_p0 = scmp.ge.s32.totalorder %s22_s19, 2  ;;  %s53_s21 = sadd.s32 1, %s953_s13 }
   0x6   : > { %p60_p1 = scmp.ne.s32.totalorder %s953_s13, %s949_s12  ;;  %p61_p2 = scmp.eq.s32.totalorder %s973_s18, 0 }
   0x7   : > { %s1236_s19 = smov (%p23_p0, %s22_s19), 0  ;;  %s1238_s20 = smov (!%p23_p0, %s25_s20), %s969_s17 }
   0x8   : > { %s50_s22 = ssub.s32 %s965_s16, %s1236_s19  ;;  %p62_p3 = por %p61_p2, %p60_p1 }
   0x9   : > { %p27_p4 = scmp.ge.s32.totalorder %s1238_s20, 2  ;;  %p51_p5 = scmp.eq.s32.totalorder %s50_s22, 0 }
   0xa   : > { %p745_p6 = scmp.ge.s32.totalorder %s973_s18, 4 }
   0xb   : > { %s1240_s20 = smov (%p27_p4, %s1238_s20), 0 }
   0xc   : > { %s1048_s23 = scalar_select %p51_p5, %s953_s13, %s53_s21  }
   0xd   : > { %139 = sbr.rel (%p745_p6) target bundleno = 40 (0x28), region = 24 }
  0x12   : > { %142 = sbr.rel (!%p62_p3) target bundleno = 40 (0x28), region = 28  ;;  %s144_s24 = sand.u32 (%p62_p3), 1, %s953_s13  }
  0x13   : > { %s795_s25 = sshll.u32 (%p62_p3), %s965_s16, 4  ;;  %s796_s26 = smul.u32 (%p62_p3), 288, %s144_s24 }
  0x14   : > { %s1056_s29 = scalar_lea.vmem (%p62_p3), %s1226_s1, %s795_s25 }
  0x15   : > { %v162_v0 = vld [vmem:[%s1056_s29] sm:$0xff] (%p62_p3)  ;;  %v164_v1 = vld [vmem:[%s1056_s29 + $0x8] sm:$0xff] (%p62_p3)  ;;  %s1064_s30 = scalar_lea.vmem (%p62_p3), [#allocation4], %s796_s26 }
  0x16   : > { %v166_v2 = vld [vmem:[%s1056_s29 + $0x20] sm:$0xff] (%p62_p3)  ;;  %v168_v3 = vld [vmem:[%s1056_s29 + $0x28] sm:$0xff] (%p62_p3)  ;;  %163 = vst [vmem:[%s1064_s30] sm:$0xff] (%p62_p3), %v162_v0  ;;  %165 = vst [vmem:[%s1064_s30 + $0x8] sm:$0xff] (%p62_p3), %v164_v1 }
  0x17   : > { %v170_v4 = vld [vmem:[%s1056_s29 + $0x40] sm:$0xff]  ;;  %v172_v5 = vld [vmem:[%s1056_s29 + $0x48] sm:$0xff]  ;;  %167 = vst [vmem:[%s1064_s30 + $0x10] sm:$0xff] %v166_v2  ;;  %169 = vst [vmem:[%s1064_s30 + $0x18] sm:$0xff] %v168_v3 }
  0x18   : > { %171 = vst [vmem:[%s1064_s30 + $0x20] sm:$0xff] %v170_v4  ;;  %173 = vst [vmem:[%s1064_s30 + $0x28] sm:$0xff] %v172_v5  ;;  %v174_v6 = vld [vmem:[%s1056_s29 + $0x60] sm:$0xff]  ;;  %v176_v7 = vld [vmem:[%s1056_s29 + $0x68] sm:$0xff] }
  0x19   : > { %v178_v8 = vld [vmem:[%s1056_s29 + $0x80] sm:$0xff]  ;;  %175 = vst [vmem:[%s1064_s30 + $0x30] sm:$0xff] %v174_v6  ;;  %177 = vst [vmem:[%s1064_s30 + $0x38] sm:$0xff] %v176_v7  ;;  %v180_v9 = vld [vmem:[%s1056_s29 + $0x88] sm:$0xff] }
  0x1a   : > { %179 = vst [vmem:[%s1064_s30 + $0x40] sm:$0xff] %v178_v8  ;;  %v182_v10 = vld [vmem:[%s1056_s29 + $0xa0] sm:$0xff]  ;;  %v184_v11 = vld [vmem:[%s1056_s29 + $0xa8] sm:$0xff]  ;;  %181 = vst [vmem:[%s1064_s30 + $0x48] sm:$0xff] %v180_v9 }
  0x1b   : > { %183 = vst [vmem:[%s1064_s30 + $0x50] sm:$0xff] %v182_v10  ;;  %185 = vst [vmem:[%s1064_s30 + $0x58] sm:$0xff] %v184_v11  ;;  %v186_v12 = vld [vmem:[%s1056_s29 + $0xc0] sm:$0xff]  ;;  %v188_v13 = vld [vmem:[%s1056_s29 + $0xc8] sm:$0xff] }
  0x1c   : > { %v190_v14 = vld [vmem:[%s1056_s29 + $0xe0] sm:$0xff]  ;;  %187 = vst [vmem:[%s1064_s30 + $0x60] sm:$0xff] %v186_v12  ;;  %189 = vst [vmem:[%s1064_s30 + $0x68] sm:$0xff] %v188_v13  ;;  %v192_v15 = vld [vmem:[%s1056_s29 + $0xe8] sm:$0xff] }
  0x1d   : > { %191 = vst [vmem:[%s1064_s30 + $0x70] sm:$0xff] %v190_v14  ;;  %v194_v16 = vld [vmem:[%s1056_s29 + $0x100] sm:$0xff]  ;;  %v196_v17 = vld [vmem:[%s1056_s29 + $0x108] sm:$0xff]  ;;  %193 = vst [vmem:[%s1064_s30 + $0x78] sm:$0xff] %v192_v15 }
  0x1e   : > { %195 = vst [vmem:[%s1064_s30 + $0x80] sm:$0xff] %v194_v16  ;;  %197 = vst [vmem:[%s1064_s30 + $0x88] sm:$0xff] %v196_v17  ;;  %v198_v18 = vld [vmem:[%s1056_s29 + $0x120] sm:$0xff]  ;;  %v200_v19 = vld [vmem:[%s1056_s29 + $0x128] sm:$0xff] }
  0x1f   : > { %v202_v20 = vld [vmem:[%s1056_s29 + $0x140] sm:$0xff]  ;;  %199 = vst [vmem:[%s1064_s30 + $0x90] sm:$0xff] %v198_v18  ;;  %201 = vst [vmem:[%s1064_s30 + $0x98] sm:$0xff] %v200_v19  ;;  %v204_v21 = vld [vmem:[%s1056_s29 + $0x148] sm:$0xff] }
  0x20   : > { %203 = vst [vmem:[%s1064_s30 + $0xa0] sm:$0xff] %v202_v20  ;;  %v206_v22 = vld [vmem:[%s1056_s29 + $0x160] sm:$0xff]  ;;  %v208_v23 = vld [vmem:[%s1056_s29 + $0x168] sm:$0xff]  ;;  %205 = vst [vmem:[%s1064_s30 + $0xa8] sm:$0xff] %v204_v21 }
  0x21   : > { %207 = vst [vmem:[%s1064_s30 + $0xb0] sm:$0xff] %v206_v22  ;;  %209 = vst [vmem:[%s1064_s30 + $0xb8] sm:$0xff] %v208_v23  ;;  %v210_v24 = vld [vmem:[%s1056_s29 + $0x180] sm:$0xff]  ;;  %v212_v25 = vld [vmem:[%s1056_s29 + $0x188] sm:$0xff] }
  0x22   : > { %v214_v26 = vld [vmem:[%s1056_s29 + $0x1a0] sm:$0xff]  ;;  %211 = vst [vmem:[%s1064_s30 + $0xc0] sm:$0xff] %v210_v24  ;;  %213 = vst [vmem:[%s1064_s30 + $0xc8] sm:$0xff] %v212_v25  ;;  %v216_v27 = vld [vmem:[%s1056_s29 + $0x1a8] sm:$0xff] }
  0x23   : > { %215 = vst [vmem:[%s1064_s30 + $0xd0] sm:$0xff] %v214_v26  ;;  %v218_v28 = vld [vmem:[%s1056_s29 + $0x1c0] sm:$0xff]  ;;  %v220_v29 = vld [vmem:[%s1056_s29 + $0x1c8] sm:$0xff]  ;;  %217 = vst [vmem:[%s1064_s30 + $0xd8] sm:$0xff] %v216_v27 }
  0x24   : > { %219 = vst [vmem:[%s1064_s30 + $0xe0] sm:$0xff] %v218_v28  ;;  %221 = vst [vmem:[%s1064_s30 + $0xe8] sm:$0xff] %v220_v29  ;;  %v222_v30 = vld [vmem:[%s1056_s29 + $0x1e0] sm:$0xff]  ;;  %v224_v31 = vld [vmem:[%s1056_s29 + $0x1e8] sm:$0xff] }
  0x25   : > { %v226_v32 = vld [vmem:[%s1056_s29 + $0x200] sm:$0xff]  ;;  %223 = vst [vmem:[%s1064_s30 + $0xf0] sm:$0xff] %v222_v30  ;;  %225 = vst [vmem:[%s1064_s30 + $0xf8] sm:$0xff] %v224_v31  ;;  %v228_v33 = vld [vmem:[%s1056_s29 + $0x208] sm:$0xff] }
  0x26   : > { %227 = vst [vmem:[%s1064_s30 + $0x100] sm:$0xff] %v226_v32  ;;  %v230_v34 = vld [vmem:[%s1056_s29 + $0x220] sm:$0xff]  ;;  %v232_v35 = vld [vmem:[%s1056_s29 + $0x228] sm:$0xff]  ;;  %229 = vst [vmem:[%s1064_s30 + $0x108] sm:$0xff] %v228_v33 }
  0x27   : > { %231 = vst [vmem:[%s1064_s30 + $0x110] sm:$0xff] %v230_v34  ;;  %233 = vst [vmem:[%s1064_s30 + $0x118] sm:$0xff] %v232_v35 }
  0x28 PF: > { %p748_p7 = scmp.ge.s32.totalorder %s973_s18, 1  ;;  %p238_p8 = scmp.lt.s32.totalorder %s973_s18, 5 }
  0x2a   : > { %p239_p9 = pnand %p748_p7, %p238_p8 }
  0x2b   : > { %s245_s4 = sand.u32 (!%p239_p9), 1, %s949_s12   ;;  %s749_s5 = sshll.u32 (!%p239_p9), %s957_s14, 2 }
  0x2c   : > { %242 = sbr.rel (%p239_p9) target bundleno = 725 (0x2d5), region = 51  ;;  %p270_p10 = scmp.lt.s32.totalorder (!%p239_p9), %s749_s5, 7 }
  0x2d   : > { %s797_s6 = smul.u32 (!%p239_p9), 288, %s245_s4  ;;  %p276_p11 = scmp.eq.s32.totalorder (!%p239_p9), %s961_s15, 0 }
  0x2e   : > { %p277_p12 = scmp.eq.s32.totalorder (!%p239_p9), %s957_s14, 0 }
  0x2f   : > { %s1143_s11 = scalar_lea.vmem (!%p239_p9), [#allocation4], %s797_s6 }
  0x30   : > { %p278_p13 = pnand (!%p239_p9), %p277_p12, %p276_p11 }
  0x31   : > { %s1242_s5 = smov (!%p270_p10, %s749_s5), 7 }
  0x32   : > { %s750_s7 = sshll.u32 %s1242_s5, 3  ;;  %281 = sbr.rel (%p278_p13) target bundleno = 57 (0x39), region = 59 }
  0x33   : > { %s1141_s10 = scalar_lea.vmem %s1228_s3, %s750_s7 }
  0x37   : > { %vm282_vm0 = vcmask 7168   ;;  %v975_v36 = vmov 0.0  }
  0x38   : > { %283 = vst.msk [vmem:[#allocation2] sm:$0xff] %vm282_vm0, %v975_v36  ;;  %284 = vst.msk [vmem:[#allocation3] sm:$0xff] %vm282_vm0, %v975_v36 }
  0x39 PF: > { %v858_v37 = vld [vmem:[%s1143_s11 + $0xe4] ss:$16 sps:$4 sm:$0xff]   ;;  %v860_v38 = vld [vmem:[%s1143_s11 + $0xec] ss:$16 sps:$4 sm:$0xff]   ;;  %v862_v39 = vld [vmem:[%s1143_s11 + $0xe0] ss:$16 sps:$4 sm:$0xff]  }
  0x3a   : > { %512 = vmatprep.subr.bf16.mxu0 %v858_v37  ;;  %v863_v40 = vld [vmem:[%s1143_s11 + $0xe8] ss:$16 sps:$4 sm:$0xff]   ;;  %553 = vmatprep.subr.bf16.mxu1 %v860_v38  ;;  %v864_v41 = vld [vmem:[%s1143_s11 + $0xc4] ss:$16 sps:$4 sm:$0xff]   ;;  %v866_v42 = vld [vmem:[%s1143_s11 + $0xcc] ss:$16 sps:$4 sm:$0xff]  }
  0x3b   : > { %513 = vmatpush1.bf16.msra.mxu0 %v862_v39  ;;  %554 = vmatpush1.bf16.msra.mxu1 %v863_v40  ;;  %v868_v43 = vld [vmem:[%s1143_s11 + $0xc0] ss:$16 sps:$4 sm:$0xff]   ;;  %v869_v44 = vld [vmem:[%s1143_s11 + $0xc8] ss:$16 sps:$4 sm:$0xff]   ;;  %v870_v45 = vld [vmem:[%s1143_s11 + $0xa4] ss:$16 sps:$4 sm:$0xff]  }
  0x3c   : > { %514 = vmatprep.subr.bf16.mxu0 %v864_v41  ;;  %555 = vmatprep.subr.bf16.mxu1 %v866_v42  ;;  %v872_v46 = vld [vmem:[%s1143_s11 + $0xac] ss:$16 sps:$4 sm:$0xff]   ;;  %v874_v47 = vld [vmem:[%s1143_s11 + $0xa0] ss:$16 sps:$4 sm:$0xff]   ;;  %v875_v48 = vld [vmem:[%s1143_s11 + $0xa8] ss:$16 sps:$4 sm:$0xff]  }
  0x3d   : > { %v876_v49 = vld [vmem:[%s1143_s11 + $0x84] ss:$16 sps:$4 sm:$0xff]   ;;  %v878_v50 = vld [vmem:[%s1143_s11 + $0x8c] ss:$16 sps:$4 sm:$0xff]   ;;  %v880_v51 = vld [vmem:[%s1143_s11 + $0x80] ss:$16 sps:$4 sm:$0xff]  }
  0x3e   : > { %v881_v52 = vld [vmem:[%s1143_s11 + $0x88] ss:$16 sps:$4 sm:$0xff]   ;;  %v882_v53 = vld [vmem:[%s1143_s11 + $0x64] ss:$16 sps:$4 sm:$0xff]   ;;  %v884_v54 = vld [vmem:[%s1143_s11 + $0x6c] ss:$16 sps:$4 sm:$0xff]  }
  0x3f   : > { %515 = vmatpush1.bf16.msra.mxu0 %v868_v43  ;;  %556 = vmatpush1.bf16.msra.mxu1 %v869_v44  ;;  %v886_v55 = vld [vmem:[%s1143_s11 + $0x60] ss:$16 sps:$4 sm:$0xff]   ;;  %v887_v56 = vld [vmem:[%s1143_s11 + $0x68] ss:$16 sps:$4 sm:$0xff]   ;;  %v888_v57 = vld [vmem:[%s1143_s11 + $0x44] ss:$16 sps:$4 sm:$0xff]  }
  0x40   : > { %516 = vmatprep.subr.bf16.mxu0 %v870_v45  ;;  %557 = vmatprep.subr.bf16.mxu1 %v872_v46  ;;  %v890_v58 = vld [vmem:[%s1143_s11 + $0x4c] ss:$16 sps:$4 sm:$0xff]   ;;  %v892_v59 = vld [vmem:[%s1143_s11 + $0x40] ss:$16 sps:$4 sm:$0xff]   ;;  %v893_v60 = vld [vmem:[%s1143_s11 + $0x48] ss:$16 sps:$4 sm:$0xff]  }
  0x41   : > { %v894_v61 = vld [vmem:[%s1143_s11 + $0x24] ss:$16 sps:$4 sm:$0xff]   ;;  %v896_v62 = vld [vmem:[%s1143_s11 + $0x2c] ss:$16 sps:$4 sm:$0xff]   ;;  %v898_v63 = vld [vmem:[%s1143_s11 + $0x20] ss:$16 sps:$4 sm:$0xff]  }
  0x42   : > { %v899_v0 = vld [vmem:[%s1143_s11 + $0x28] ss:$16 sps:$4 sm:$0xff]   ;;  %v285_v1 = vld [vmem:[%s1225_s0] sm:$0xff]  ;;  %vm508_vm1 = vcmask 130048   ;;  %v902_v3 = vld [vmem:[%s1143_s11 + $0xc] ss:$16 sps:$4 sm:$0xff]  }
  0x43   : > { %517 = vmatpush1.bf16.msra.mxu0 %v874_v47  ;;  %558 = vmatpush1.bf16.msra.mxu1 %v875_v48  ;;  %v900_v2 = vld [vmem:[%s1143_s11 + $0x4] ss:$16 sps:$4 sm:$0xff]   ;;  %v752_v4 = vcombine.high %v285_v1, %v285_v1  ;;  %v904_v5 = vld [vmem:[%s1143_s11] ss:$16 sps:$4 sm:$0xff]   ;;  %v905_v6 = vld [vmem:[%s1143_s11 + $0x8] ss:$16 sps:$4 sm:$0xff]   ;;  %v751_v11 = vcombine.low %v285_v1, %v285_v1 }
  0x44   : > { %518 = vmatprep.subr.bf16.mxu0 %v876_v49  ;;  %559 = vmatprep.subr.bf16.mxu1 %v878_v50  ;;  %v906_v7 = vld [vmem:[%s1143_s11 + $0x104] ss:$16 sps:$4 sm:$0xff]   ;;  %v908_v8 = vld [vmem:[%s1143_s11 + $0x10c] ss:$16 sps:$4 sm:$0xff]   ;;  %v910_v9 = vld [vmem:[%s1143_s11 + $0x100] ss:$16 sps:$4 sm:$0xff]  }
  0x45   : > { %789 = vmatprep.mubr.msk.bf16.mxu0 %vm508_vm1, %v752_v4  ;;  %790 = vmatprep.mubr.msk.bf16.mxu1 %vm508_vm1, %v752_v4  ;;  %v911_v10 = vld [vmem:[%s1143_s11 + $0x108] ss:$16 sps:$4 sm:$0xff]   ;;  %p791_p0 = scmp.ne.s32.totalorder %s961_s15, 0 }
  0x47   : > { %519 = vmatpush1.bf16.msra.mxu0 %v880_v51  ;;  %560 = vmatpush1.bf16.msra.mxu1 %v881_v52 }
  0x48   : > { %520 = vmatprep.subr.bf16.mxu0 %v882_v53  ;;  %561 = vmatprep.subr.bf16.mxu1 %v884_v54 }
  0x4b   : > { %521 = vmatpush1.bf16.msra.mxu0 %v886_v55  ;;  %562 = vmatpush1.bf16.msra.mxu1 %v887_v56 }
  0x4c   : > { %522 = vmatprep.subr.bf16.mxu0 %v888_v57  ;;  %563 = vmatprep.subr.bf16.mxu1 %v890_v58 }
  0x4f   : > { %523 = vmatpush1.bf16.msra.mxu0 %v892_v59  ;;  %564 = vmatpush1.bf16.msra.mxu1 %v893_v60 }
  0x50   : > { %524 = vmatprep.subr.bf16.mxu0 %v894_v61  ;;  %565 = vmatprep.subr.bf16.mxu1 %v896_v62 }
  0x53   : > { %525 = vmatpush1.bf16.msra.mxu0 %v898_v63  ;;  %566 = vmatpush1.bf16.msra.mxu1 %v899_v0 }
  0x54   : > { %526 = vmatprep.subr.bf16.mxu0 %v900_v2  ;;  %567 = vmatprep.subr.bf16.mxu1 %v902_v3 }
  0x57   : > { %527 = vmatpush1.bf16.msra.mxu0 %v904_v5  ;;  %568 = vmatpush1.bf16.msra.mxu1 %v905_v6 }
  0x58   : > { %542 = vmatprep.subr.bf16.mxu0 %v906_v7  ;;  %583 = vmatprep.subr.bf16.mxu1 %v908_v8 }
  0x5b   : > { %543 = vmatpush2.bf16.msra.mxu0 %v910_v9  ;;  %584 = vmatpush2.bf16.msra.mxu1 %v911_v10 }
  0x5e   : > { %545 = vmatmul.mubr.bf16.vlgmr.msra.gmra.mxu0 %v751_v11  ;;  %586 = vmatmul.mubr.bf16.vlgmr.msra.gmra.mxu1 %v751_v11 }
 0x11e   : > { %v546_v12 = vpop.f32.mrf.mxu0  ;;  %v1184_v13 = vpop.f32.mrf.mxu1 }
 0x120   : > { %v548_v14 = vpop.f32.mrf.mxu0  ;;  %v589_v15 = vpop.f32.mrf.mxu1  ;;  %596 = sbr.rel (%p791_p0) target bundleno = 444 (0x1bc), region = 63 }
 0x122   : > { %v550_v16 = vpop.f32.mrf.mxu0  ;;  %v591_v17 = vpop.f32.mrf.mxu1 }
 0x124   : > { %v551_v18 = vpop.f32.mrf.mxu0  ;;  %v592_v19 = vpop.f32.mrf.mxu1 }
 0x125   : > { %v598_v20 = vadd.f32 %v548_v14, %v546_v12  ;;  %v607_v21 = vmul.f32 %v546_v12, %v546_v12  ;;  %v608_v22 = vmul.f32 %v548_v14, %v548_v14  ;;  %v609_v23 = vmul.f32 %v1184_v13, %v1184_v13  ;;  %618 = vst [vmem:[%s1141_s10] sm:$0xff] %v546_v12  ;;  %v597_v30 = vld [vmem:[#allocation2] sm:$0xff]  ;;  %v606_v33 = vld [vmem:[#allocation3] sm:$0xff] }
 0x126   : > { %619 = vst [vmem:[%s1141_s10 + $0x8] sm:$0xff] %v548_v14  ;;  %v610_v25 = vmul.f32 %v589_v15, %v589_v15  ;;  %620 = vst [vmem:[%s1141_s10 + $0x10] sm:$0xff] %v1184_v13  ;;  %vm604_vm2 = vcmask 7168  }
 0x127   : > { %v599_v24 = vadd.f32 %v598_v20, %v1184_v13  ;;  %v611_v26 = vadd.f32 %v608_v22, %v607_v21  ;;  %621 = vst [vmem:[%s1141_s10 + $0x18] sm:$0xff] %v589_v15 }
 0x129   : > { %v600_v27 = vadd.f32 %v599_v24, %v589_v15  ;;  %v612_v28 = vadd.f32 %v611_v26, %v609_v23 }
 0x12b   : > { %601 = vadd.xlane.f32.xlu0 %v600_v27  ;;  %v613_v29 = vadd.f32 %v612_v28, %v610_v25 }
 0x12f   : > { %614 = vadd.xlane.f32.xlu0 %v613_v29 }
 0x1b4   : > { %v602_v31 = vpop.xlane.xlu0 %601 }
 0x1b5   : > { %v603_v32 = vadd.f32 %v602_v31, %v597_v30 }
 0x1b7   : > { %605 = vst.msk [vmem:[#allocation2] sm:$0xff] %vm604_vm2, %v603_v32 }
 0x1b8   : > { %v615_v34 = vpop.xlane.xlu0 %614 }
 0x1b9   : > { %v616_v35 = vadd.f32 %v615_v34, %v606_v33 }
 0x1bb   : > { %617 = vst.msk [vmem:[#allocation3] sm:$0xff] %vm604_vm2, %v616_v35 }
 0x1bc PF: > { %p792_p1 = scmp.ne.s32.totalorder %s961_s15, 1 }
 0x1bd   : > { %s978_s15 = smov (!%p792_p1), 1  }
 0x1be   : > { %625 = sbr.rel (%p792_p1) target bundleno = 725 (0x2d5), region = 67 }
 0x1c3   : > { %v626_v36 = vld [vmem:[#allocation2] sm:$0xff]  ;;  %v628_v37 = vld [vmem:[#allocation3] sm:$0xff]  ;;  %v976_v40 = vmov 0   ;;  %v977_v44 = vmov 1  }
 0x1c4   : > { %v627_v38 = vmul.f32 0.0011574074, %v626_v36  ;;  %v629_v39 = vmul.f32 0.0011574074, %v628_v37  ;;  %914 = vset.pattern.permute.xlu0 %v976_v40  ;;  %915 = vset.pattern.permute.xlu1 %v977_v44  ;;  %v634_v45 = vld [vmem:[%s1227_s2] sm:$0xff] }
 0x1c6   : > { %v630_v41 = vmul.f32 %v627_v38, %v627_v38 }
 0x1c8   : > { %v631_v42 = vsub.f32 %v629_v39, %v630_v41 }
 0x1ca   : > { %v632_v43 = vadd.f32 1e-05, %v631_v42 }
 0x1cc   : > { %917 = vrsqrt.f32 %v632_v43 }
 0x1d9   : > { %v918_v46 = vpop.eup %917 }
 0x1da   : > { %v635_v47 = vmul.f32 %v918_v46, %v634_v45 }
 0x1dc   : > { %v636_v48 = vmul.f32 %v635_v47, %v627_v38 }
 0x1de   : > { %638 = vrot.lane.b32.xlu0 %v636_v48, %s978_s15 }
 0x1e2   : > { %644 = vperm.xlu0 %914, %v635_v47  }
 0x1e6   : > { %916 = vset.pattern.permute.xlu0 %v977_v44 }
 0x250   : > { %v639_v49 = vpop.permute.xlu0 %638 }
 0x251   : > { %v641_v50 = vsub.f32 %v634_v45, %v639_v49 }
 0x253   : > { %653 = vperm.xlu1 %915, %v641_v50  }
 0x25d   : > { %v645_v51 = vpop.permute.xlu0 %644 }
 0x25e   : > { %v647_v52 = vmul.f32 %v645_v51, %v546_v12  ;;  %v648_v53 = vmul.f32 %v645_v51, %v548_v14  ;;  %v649_v54 = vmul.f32 %v645_v51, %v1184_v13  ;;  %v650_v55 = vmul.f32 %v645_v51, %v589_v15 }
 0x2ce   : > { %v654_v56 = vpop.permute.xlu1 %653 }
 0x2cf   : > { %v656_v57 = vadd.f32 %v654_v56, %v647_v52  ;;  %v657_v58 = vadd.f32 %v654_v56, %v648_v53  ;;  %v658_v59 = vadd.f32 %v654_v56, %v649_v54  ;;  %v659_v60 = vadd.f32 %v654_v56, %v650_v55 }
 0x2d1   : > { %v660_v61 = vmax.f32 %v656_v57, 0.0  ;;  %v661_v62 = vmax.f32 %v657_v58, 0.0  ;;  %v662_v63 = vmax.f32 %v658_v59, 0.0  ;;  %v663_v0 = vmax.f32 %v659_v60, 0.0 }
 0x2d3   : > { %664 = vst [vmem:[%s1141_s10] sm:$0xff] %v660_v61  ;;  %665 = vst [vmem:[%s1141_s10 + $0x8] sm:$0xff] %v661_v62 }
 0x2d4   : > { %666 = vst [vmem:[%s1141_s10 + $0x10] sm:$0xff] %v662_v63  ;;  %667 = vst [vmem:[%s1141_s10 + $0x18] sm:$0xff] %v663_v0 }
 0x2d5 PF: > { %s13_s18 = sadd.s32 1, %s973_s18   ;;  %s1229_s12 = smov %s953_s13 }
 0x2d6   : > { %p10_p2 = scmp.ge.s32.totalorder %s13_s18, 6   ;;  %s1230_s13 = smov %s1048_s23 }
 0x2d7   : > { %s1231_s14 = smov %s965_s16  ;;  %s1232_s15 = smov %s969_s17 }
 0x2d8   : > { %s1233_s16 = smov %s1236_s19  ;;  %s1234_s17 = smov %s1240_s20 }
 0x2d9   :  { %12 = sbr.rel (!%p10_p2) target bundleno = 4 (0x4), region = 102 }

// kernel: _snn_c_apply.27
= control target key start
LH: loop header
LB: loop body
LE: loop exit
PB: predicated region body
PF: predicated region fallthrough
CT: control target
= control target key end

     0   :  { %s895_s12 = smov 0   ;;  %s897_s13 = smov 0   ;;  %s1096_s0 = inlined_call_operand.vmem [shape: bf16[1,80], index: 0, kind: input, shape index: {}]   ;;  %s1097_s1 = inlined_call_operand.vmem [shape: bf16[80,1024], index: 1, kind: input, shape index: {}]   ;;  %s1098_s2 = inlined_call_operand.vmem [shape: f32[1,2], index: 2, kind: input, shape index: {}]   ;;  %s1099_s3 = inlined_call_operand.vmem [shape: f32[1,1024], index: 3, kind: output, shape index: {}]  }
   0x1   :  { %s899_s14 = smov 0   ;;  %s901_s15 = smov 0  }
   0x2   :  { %s903_s16 = smov 0   ;;  %s905_s17 = smov 0  }
   0x3   :  { %s907_s18 = smov 0  }
   0x4 LB: > { %s22_s19 = sadd.s32 1, %s858_s16  ;;  %s25_s20 = sadd.s32 1, %s862_s17  ;;  %s866_s18 = sphi %s907_s18, %s13_s18   ;;  %s862_s17 = sphi %s905_s17, %s1105_s17   ;;  %s858_s16 = sphi %s903_s16, %s1104_s16   ;;  %s854_s15 = sphi %s901_s15, %s1103_s15   ;;  %s850_s14 = sphi %s899_s14, %s1102_s14   ;;  %s846_s13 = sphi %s897_s13, %s1101_s13   ;;  %s842_s12 = sphi %s895_s12, %s1100_s12  }
   0x5   : > { %p23_p0 = scmp.ge.s32.totalorder %s22_s19, 2  ;;  %s53_s21 = sadd.s32 1, %s846_s13 }
   0x6   : > { %p60_p1 = scmp.ne.s32.totalorder %s846_s13, %s842_s12  ;;  %p61_p2 = scmp.eq.s32.totalorder %s866_s18, 0 }
   0x7   : > { %s1107_s19 = smov (%p23_p0, %s22_s19), 0  ;;  %s1109_s20 = smov (!%p23_p0, %s25_s20), %s862_s17 }
   0x8   : > { %s50_s22 = ssub.s32 %s858_s16, %s1107_s19  ;;  %p62_p3 = por %p61_p2, %p60_p1 }
   0x9   : > { %p27_p4 = scmp.ge.s32.totalorder %s1109_s20, 2  ;;  %p51_p5 = scmp.eq.s32.totalorder %s50_s22, 0 }
   0xa   : > { %p680_p6 = scmp.ge.s32.totalorder %s866_s18, 4 }
   0xb   : > { %s1111_s20 = smov (%p27_p4, %s1109_s20), 0 }
   0xc   : > { %s944_s23 = scalar_select %p51_p5, %s846_s13, %s53_s21  }
   0xd   : > { %139 = sbr.rel (%p680_p6) target bundleno = 32 (0x20), region = 24 }
  0x12   : > { %142 = sbr.rel (!%p62_p3) target bundleno = 32 (0x20), region = 28  ;;  %s144_s24 = sand.u32 (%p62_p3), 1, %s846_s13  }
  0x13   : > { %s711_s25 = sshll.u32 (%p62_p3), %s858_s16, 4  ;;  %s712_s26 = smul.u32 (%p62_p3), 160, %s144_s24 }
  0x14   : > { %s952_s29 = scalar_lea.vmem (%p62_p3), %s1097_s1, %s711_s25 }
  0x15   : > { %v162_v0 = vld [vmem:[%s952_s29] sm:$0xff] (%p62_p3)  ;;  %v164_v1 = vld [vmem:[%s952_s29 + $0x8] sm:$0xff] (%p62_p3)  ;;  %s960_s30 = scalar_lea.vmem (%p62_p3), [#allocation4], %s712_s26 }
  0x16   : > { %v166_v2 = vld [vmem:[%s952_s29 + $0x20] sm:$0xff] (%p62_p3)  ;;  %v168_v3 = vld [vmem:[%s952_s29 + $0x28] sm:$0xff] (%p62_p3)  ;;  %163 = vst [vmem:[%s960_s30] sm:$0xff] (%p62_p3), %v162_v0  ;;  %165 = vst [vmem:[%s960_s30 + $0x8] sm:$0xff] (%p62_p3), %v164_v1 }
  0x17   : > { %v170_v4 = vld [vmem:[%s952_s29 + $0x40] sm:$0xff]  ;;  %v172_v5 = vld [vmem:[%s952_s29 + $0x48] sm:$0xff]  ;;  %167 = vst [vmem:[%s960_s30 + $0x10] sm:$0xff] %v166_v2  ;;  %169 = vst [vmem:[%s960_s30 + $0x18] sm:$0xff] %v168_v3 }
  0x18   : > { %171 = vst [vmem:[%s960_s30 + $0x20] sm:$0xff] %v170_v4  ;;  %173 = vst [vmem:[%s960_s30 + $0x28] sm:$0xff] %v172_v5  ;;  %v174_v6 = vld [vmem:[%s952_s29 + $0x60] sm:$0xff]  ;;  %v176_v7 = vld [vmem:[%s952_s29 + $0x68] sm:$0xff] }
  0x19   : > { %v178_v8 = vld [vmem:[%s952_s29 + $0x80] sm:$0xff]  ;;  %175 = vst [vmem:[%s960_s30 + $0x30] sm:$0xff] %v174_v6  ;;  %177 = vst [vmem:[%s960_s30 + $0x38] sm:$0xff] %v176_v7  ;;  %v180_v9 = vld [vmem:[%s952_s29 + $0x88] sm:$0xff] }
  0x1a   : > { %179 = vst [vmem:[%s960_s30 + $0x40] sm:$0xff] %v178_v8  ;;  %v182_v10 = vld [vmem:[%s952_s29 + $0xa0] sm:$0xff]  ;;  %v184_v11 = vld [vmem:[%s952_s29 + $0xa8] sm:$0xff]  ;;  %181 = vst [vmem:[%s960_s30 + $0x48] sm:$0xff] %v180_v9 }
  0x1b   : > { %183 = vst [vmem:[%s960_s30 + $0x50] sm:$0xff] %v182_v10  ;;  %185 = vst [vmem:[%s960_s30 + $0x58] sm:$0xff] %v184_v11  ;;  %v186_v12 = vld [vmem:[%s952_s29 + $0xc0] sm:$0xff]  ;;  %v188_v13 = vld [vmem:[%s952_s29 + $0xc8] sm:$0xff] }
  0x1c   : > { %v190_v14 = vld [vmem:[%s952_s29 + $0xe0] sm:$0xff]  ;;  %187 = vst [vmem:[%s960_s30 + $0x60] sm:$0xff] %v186_v12  ;;  %189 = vst [vmem:[%s960_s30 + $0x68] sm:$0xff] %v188_v13  ;;  %v192_v15 = vld [vmem:[%s952_s29 + $0xe8] sm:$0xff] }
  0x1d   : > { %191 = vst [vmem:[%s960_s30 + $0x70] sm:$0xff] %v190_v14  ;;  %v194_v16 = vld [vmem:[%s952_s29 + $0x100] sm:$0xff]  ;;  %v196_v17 = vld [vmem:[%s952_s29 + $0x108] sm:$0xff]  ;;  %193 = vst [vmem:[%s960_s30 + $0x78] sm:$0xff] %v192_v15 }
  0x1e   : > { %195 = vst [vmem:[%s960_s30 + $0x80] sm:$0xff] %v194_v16  ;;  %197 = vst [vmem:[%s960_s30 + $0x88] sm:$0xff] %v196_v17  ;;  %v198_v18 = vld [vmem:[%s952_s29 + $0x120] sm:$0xff]  ;;  %v200_v19 = vld [vmem:[%s952_s29 + $0x128] sm:$0xff] }
  0x1f   : > { %199 = vst [vmem:[%s960_s30 + $0x90] sm:$0xff] %v198_v18  ;;  %201 = vst [vmem:[%s960_s30 + $0x98] sm:$0xff] %v200_v19 }
  0x20 PF: > { %p683_p7 = scmp.ge.s32.totalorder %s866_s18, 1  ;;  %p206_p8 = scmp.lt.s32.totalorder %s866_s18, 5 }
  0x22   : > { %p207_p9 = pnand %p683_p7, %p206_p8 }
  0x23   : > { %s213_s4 = sand.u32 (!%p207_p9), 1, %s842_s12   ;;  %s684_s5 = sshll.u32 (!%p207_p9), %s850_s14, 2 }
  0x24   : > { %210 = sbr.rel (%p207_p9) target bundleno = 713 (0x2c9), region = 51  ;;  %p237_p10 = scmp.lt.s32.totalorder (!%p207_p9), %s684_s5, 7 }
  0x25   : > { %s713_s6 = smul.u32 (!%p207_p9), 160, %s213_s4  ;;  %p242_p11 = scmp.eq.s32.totalorder (!%p207_p9), %s854_s15, 0 }
  0x26   : > { %p243_p12 = scmp.eq.s32.totalorder (!%p207_p9), %s850_s14, 0 }
  0x27   : > { %s1007_s10 = scalar_lea.vmem (!%p207_p9), [#allocation4], %s713_s6 }
  0x28   : > { %p244_p13 = pnand (!%p207_p9), %p243_p12, %p242_p11 }
  0x29   : > { %s1113_s5 = smov (!%p237_p10, %s684_s5), 7 }
  0x2a   : > { %s1005_s9 = scalar_lea.vmem %s1099_s3, %s1113_s5  ;;  %247 = sbr.rel (%p244_p13) target bundleno = 49 (0x31), region = 59 }
  0x2f   : > { %vm248_vm0 = vcmask 0   ;;  %v868_v20 = vmov 0.0  }
  0x30   : > { %249 = vst.msk [vmem:[#allocation2] sm:$0x1] %vm248_vm0, %v868_v20  ;;  %250 = vst.msk [vmem:[#allocation3] sm:$0x1] %vm248_vm0, %v868_v20 }
  0x31 PF: > { %v777_v21 = vld [vmem:[%s1007_s10 + $0x84] ss:$16 sps:$4 sm:$0xff]   ;;  %v779_v22 = vld [vmem:[%s1007_s10 + $0x8c] ss:$16 sps:$4 sm:$0xff]   ;;  %v869_v23 = vmov 0   ;;  %vm372_vm1 = vcmask 654336  }
  0x32   : > { %408 = vmatprep.mubr.bf16.mxu0 %v869_v23  ;;  %449 = vmatprep.mubr.bf16.mxu1 %v869_v23  ;;  %v781_v24 = vld [vmem:[%s1007_s10 + $0x80] ss:$16 sps:$4 sm:$0xff]   ;;  %v782_v25 = vld [vmem:[%s1007_s10 + $0x88] ss:$16 sps:$4 sm:$0xff]   ;;  %v783_v26 = vld [vmem:[%s1007_s10 + $0x64] ss:$16 sps:$4 sm:$0xff]  }
  0x33   : > { %382 = vmatprep.subr.bf16.mxu0 %v777_v21  ;;  %423 = vmatprep.subr.bf16.mxu1 %v779_v22  ;;  %v785_v27 = vld [vmem:[%s1007_s10 + $0x6c] ss:$16 sps:$4 sm:$0xff]   ;;  %v787_v28 = vld [vmem:[%s1007_s10 + $0x60] ss:$16 sps:$4 sm:$0xff]   ;;  %v788_v29 = vld [vmem:[%s1007_s10 + $0x68] ss:$16 sps:$4 sm:$0xff]  }
  0x34   : > { %383 = vmatpush1.bf16.msra.mxu0 %v781_v24  ;;  %424 = vmatpush1.bf16.msra.mxu1 %v782_v25  ;;  %v789_v30 = vld [vmem:[%s1007_s10 + $0x44] ss:$16 sps:$4 sm:$0xff]   ;;  %v791_v31 = vld [vmem:[%s1007_s10 + $0x4c] ss:$16 sps:$4 sm:$0xff]   ;;  %v793_v32 = vld [vmem:[%s1007_s10 + $0x40] ss:$16 sps:$4 sm:$0xff]  }
  0x35   : > { %384 = vmatprep.subr.bf16.mxu0 %v783_v26  ;;  %425 = vmatprep.subr.bf16.mxu1 %v785_v27  ;;  %v794_v33 = vld [vmem:[%s1007_s10 + $0x48] ss:$16 sps:$4 sm:$0xff]   ;;  %v795_v34 = vld [vmem:[%s1007_s10 + $0x24] ss:$16 sps:$4 sm:$0xff]   ;;  %v797_v35 = vld [vmem:[%s1007_s10 + $0x2c] ss:$16 sps:$4 sm:$0xff]  }
  0x36   : > { %v799_v36 = vld [vmem:[%s1007_s10 + $0x20] ss:$16 sps:$4 sm:$0xff]   ;;  %v800_v37 = vld [vmem:[%s1007_s10 + $0x28] ss:$16 sps:$4 sm:$0xff]   ;;  %v801_v38 = vld [vmem:[%s1007_s10 + $0x4] ss:$16 sps:$4 sm:$0xff]  }
  0x37   : > { %v803_v39 = vld [vmem:[%s1007_s10 + $0xc] ss:$16 sps:$4 sm:$0xff]   ;;  %v805_v40 = vld [vmem:[%s1007_s10] ss:$16 sps:$4 sm:$0xff]   ;;  %v806_v41 = vld [vmem:[%s1007_s10 + $0x8] ss:$16 sps:$4 sm:$0xff]  }
  0x38   : > { %385 = vmatpush1.bf16.msra.mxu0 %v787_v28  ;;  %426 = vmatpush1.bf16.msra.mxu1 %v788_v29  ;;  %v251_v42 = vld [vmem:[%s1096_s0] sm:$0x1]  ;;  %p707_p0 = scmp.ne.s32.totalorder %s854_s15, 0 }
  0x39   : > { %386 = vmatprep.subr.bf16.mxu0 %v789_v30  ;;  %427 = vmatprep.subr.bf16.mxu1 %v791_v31 }
  0x3c   : > { %387 = vmatpush1.bf16.msra.mxu0 %v793_v32  ;;  %428 = vmatpush1.bf16.msra.mxu1 %v794_v33 }
  0x3d   : > { %388 = vmatprep.subr.bf16.mxu0 %v795_v34  ;;  %429 = vmatprep.subr.bf16.mxu1 %v797_v35 }
  0x40   : > { %389 = vmatpush1.bf16.msra.mxu0 %v799_v36  ;;  %430 = vmatpush1.bf16.msra.mxu1 %v800_v37 }
  0x41   : > { %390 = vmatprep.subr.bf16.mxu0 %v801_v38  ;;  %431 = vmatprep.subr.bf16.mxu1 %v803_v39 }
  0x44   : > { %391 = vmatpush1.bf16.msra.mxu0 %v805_v40  ;;  %432 = vmatpush1.bf16.msra.mxu1 %v806_v41 }
  0x47   : > { %705 = vmatmul.mubr.msk.bf16.vlgmr.msra.gmra.mxu0 %vm372_vm1, %v251_v42  ;;  %706 = vmatmul.mubr.msk.bf16.vlgmr.msra.gmra.mxu1 %vm372_vm1, %v251_v42 }
 0x107   : > { %v1032_v43 = vpop.f32.mrf.mxu0  ;;  %v1034_v44 = vpop.f32.mrf.mxu1 }
 0x109   : > { %v1036_v45 = vpop.f32.mrf.mxu0  ;;  %v1038_v46 = vpop.f32.mrf.mxu1  ;;  %460 = sbr.rel (%p707_p0) target bundleno = 423 (0x1a7), region = 63 }
 0x10b   : > { %v414_v47 = vpop.f32.mrf.mxu0  ;;  %v455_v48 = vpop.f32.mrf.mxu1 }
 0x10d   : > { %v415_v49 = vpop.f32.mrf.mxu0  ;;  %v456_v50 = vpop.f32.mrf.mxu1 }
 0x10e   : > { %vm462_vm2 = vcmask 1040384   ;;  %v476_v51 = vmul.f32 %v1032_v43, %v1032_v43  ;;  %v477_v52 = vmul.f32 %v1036_v45, %v1036_v45  ;;  %v478_v53 = vmul.f32 %v1034_v44, %v1034_v44  ;;  %v461_v17 = vld [vmem:[#allocation2] sm:$0x1]  ;;  %v475_v20 = vld [vmem:[#allocation3] sm:$0x1] }
 0x10f   : > { %v463_v54 = vsel %vm462_vm2, %v1032_v43, 0.0  ;;  %v464_v55 = vsel %vm462_vm2, %v1036_v45, 0.0  ;;  %v466_v56 = vsel %vm462_vm2, %v1034_v44, 0.0  ;;  %v479_v58 = vmul.f32 %v1038_v46, %v1038_v46 }
 0x110   : > { %v465_v57 = vadd.f32 %v464_v55, %v463_v54  ;;  %v480_v59 = vsel %vm462_vm2, %v476_v51, 0.0  ;;  %v481_v60 = vsel %vm462_vm2, %v477_v52, 0.0  ;;  %v468_v61 = vsel %vm462_vm2, %v1038_v46, 0.0 }
 0x111   : > { %v482_v62 = vadd.f32 %v481_v60, %v480_v59  ;;  %v483_v63 = vsel %vm462_vm2, %v478_v53, 0.0  ;;  %v485_v2 = vsel %vm462_vm2, %v479_v58, 0.0  ;;  %v870_v5 = vmov 1966171168  }
 0x112   : > { %v467_v0 = vadd.f32 %v466_v56, %v465_v57  ;;  %v498_v6 = vunpack.c.l.s4 %v870_v5  ;;  %v500_v7 = vlaneseq  ;;  %v495_v10 = vcombine.low %v1032_v43, %v1036_v45 }
 0x113   : > { %v484_v1 = vadd.f32 %v483_v63, %v482_v62  ;;  %v496_v11 = vcombine.low %v1034_v44, %v1038_v46  ;;  %vm473_vm4 = vcmask 0  }
 0x114   : > { %v469_v3 = vadd.f32 %v468_v61, %v467_v0  ;;  %v499_v8 = vunpack.c.0.s8 %v498_v6  ;;  %v501_v9 = vshrl.u32 %v500_v7, 7  ;;  %vm522_vm3 = vcmp.lt.s32.totalorder %v500_v7, 512 }
 0x115   : > { %v486_v4 = vadd.f32 %v485_v2, %v484_v1 }
 0x116   : > { %470 = vadd.xlane.f32.xlu0 %v469_v3  ;;  %v502_v12 = vsub.s32 %v499_v8, %v501_v9 }
 0x118   : > { %v503_v13 = vrot.slane %v495_v10, %v502_v12  ;;  %v510_v14 = vrot.slane %v496_v11, %v502_v12 }
 0x11a   : > { %487 = vadd.xlane.f32.xlu0 %v486_v4  ;;  %v511_v15 = vcombine.low %v503_v13, %v510_v14 }
 0x11c   : > { %v518_v16 = vrot.slane %v511_v15, %v502_v12 }
 0x11e   : > { %524 = vst.msk [vmem:[%s1005_s9] sm:$0xf] %vm522_vm3, %v518_v16 }
 0x19f   : > { %v471_v18 = vpop.xlane.xlu0 %470 }
 0x1a0   : > { %v472_v19 = vadd.f32 %v471_v18, %v461_v17 }
 0x1a2   : > { %474 = vst.msk [vmem:[#allocation2] sm:$0x1] %vm473_vm4, %v472_v19 }
 0x1a3   : > { %v488_v21 = vpop.xlane.xlu0 %487 }
 0x1a4   : > { %v489_v22 = vadd.f32 %v488_v21, %v475_v20 }
 0x1a6   : > { %490 = vst.msk [vmem:[#allocation3] sm:$0x1] %vm473_vm4, %v489_v22 }
 0x1a7 PF: > { %p708_p1 = scmp.ne.s32.totalorder %s854_s15, 1 }
 0x1a8   : > { %s873_s15 = smov (!%p708_p1), 1  }
 0x1a9   : > { %528 = sbr.rel (%p708_p1) target bundleno = 713 (0x2c9), region = 67 }
 0x1ae   : > { %v529_v23 = vld [vmem:[#allocation2] sm:$0x1]  ;;  %v531_v24 = vld [vmem:[#allocation3] sm:$0x1]  ;;  %v871_v27 = vmov 0   ;;  %v872_v31 = vmov 1   ;;  %v550_v38 = vlaneseq }
 0x1af   : > { %v530_v25 = vmul.f32 0.0011574074, %v529_v23  ;;  %v532_v26 = vmul.f32 0.0011574074, %v531_v24  ;;  %807 = vset.pattern.permute.xlu0 %v871_v27  ;;  %808 = vset.pattern.permute.xlu1 %v872_v31  ;;  %v537_v32 = vld [vmem:[%s1098_s2] sm:$0x1] }
 0x1b0   : > { %v551_v39 = vshrl.u32 %v550_v38, 7  ;;  %v874_v47 = vmov 1966171168   ;;  %vm606_vm5 = vcmp.lt.s32.totalorder %v550_v38, 512 }
 0x1b1   : > { %v533_v28 = vmul.f32 %v530_v25, %v530_v25  ;;  %v582_v48 = vunpack.c.l.s4 %v874_v47 }
 0x1b2   : > { %v552_v40 = vsub.s32 0, %v551_v39 }
 0x1b3   : > { %v534_v29 = vsub.f32 %v532_v26, %v533_v28  ;;  %v583_v53 = vunpack.c.0.s8 %v582_v48 }
 0x1b5   : > { %v535_v30 = vadd.f32 1e-05, %v534_v29  ;;  %v586_v60 = vsub.s32 %v583_v53, %v551_v39 }
 0x1b7   : > { %810 = vrsqrt.f32 %v535_v30 }
 0x1c4   : > { %v811_v33 = vpop.eup %810 }
 0x1c5   : > { %v538_v34 = vmul.f32 %v811_v33, %v537_v32 }
 0x1c7   : > { %v539_v35 = vmul.f32 %v538_v34, %v530_v25 }
 0x1c9   : > { %541 = vrot.lane.b32.xlu0 %v539_v35, %s873_s15 }
 0x1cd   : > { %547 = vperm.xlu0 %807, %v538_v34  }
 0x1d1   : > { %809 = vset.pattern.permute.xlu0 %v872_v31 }
 0x23b   : > { %v542_v36 = vpop.permute.xlu0 %541 }
 0x23c   : > { %v544_v37 = vsub.f32 %v537_v32, %v542_v36 }
 0x23e   : > { %560 = vperm.xlu1 %808, %v544_v37  }
 0x248   : > { %v548_v41 = vpop.permute.xlu0 %547 }
 0x249   : > { %v553_v42 = vrot.slane %v548_v41, %v552_v40 }
 0x24b   : > { %v554_v49 = vmul.f32 %v553_v42, %v1032_v43  ;;  %v555_v50 = vmul.f32 %v553_v42, %v1036_v45  ;;  %v556_v51 = vmul.f32 %v553_v42, %v1034_v44  ;;  %v557_v52 = vmul.f32 %v553_v42, %v1038_v46 }
 0x2b9   : > { %v561_v54 = vpop.permute.xlu1 %560 }
 0x2ba   : > { %v566_v55 = vrot.slane %v561_v54, %v552_v40 }
 0x2bc   : > { %v567_v56 = vadd.f32 %v566_v55, %v554_v49  ;;  %v568_v57 = vadd.f32 %v566_v55, %v555_v50  ;;  %v569_v58 = vadd.f32 %v566_v55, %v556_v51  ;;  %v570_v59 = vadd.f32 %v566_v55, %v557_v52 }
 0x2be   : > { %v571_v61 = vmax.f32 %v567_v56, 0.0  ;;  %v572_v62 = vmax.f32 %v568_v57, 0.0  ;;  %v573_v63 = vmax.f32 %v569_v58, 0.0  ;;  %v574_v0 = vmax.f32 %v570_v59, 0.0 }
 0x2c0   : > { %v579_v43 = vcombine.low %v571_v61, %v572_v62  ;;  %v580_v1 = vcombine.low %v573_v63, %v574_v0 }
 0x2c2   : > { %v587_v45 = vrot.slane %v579_v43, %v586_v60  ;;  %v594_v2 = vrot.slane %v580_v1, %v586_v60 }
 0x2c4   : > { %v595_v44 = vcombine.low %v587_v45, %v594_v2 }
 0x2c6   : > { %v602_v46 = vrot.slane %v595_v44, %v586_v60 }
 0x2c8   : > { %608 = vst.msk [vmem:[%s1005_s9] sm:$0xf] %vm606_vm5, %v602_v46 }
 0x2c9 PF: > { %s13_s18 = sadd.s32 1, %s866_s18   ;;  %s1100_s12 = smov %s846_s13 }
 0x2ca   : > { %p10_p2 = scmp.ge.s32.totalorder %s13_s18, 6   ;;  %s1101_s13 = smov %s944_s23 }
 0x2cb   : > { %s1102_s14 = smov %s858_s16  ;;  %s1103_s15 = smov %s862_s17 }
 0x2cc   : > { %s1104_s16 = smov %s1107_s19  ;;  %s1105_s17 = smov %s1111_s20 }
 0x2cd   :  { %12 = sbr.rel (!%p10_p2) target bundleno = 4 (0x4), region = 102 }

</bundles_post_ra>
